<compile_context>
chip_gen: v5e
topology: v5e:2x2
jax: 0.10.0
libtpu: 0.0.40
codegen_flags: <defaults>
</compile_context>

<pallas_src>
import functools

import jax
import jax.numpy as jnp
from jax import lax
from jax.experimental import pallas as pl
from jax.experimental.pallas import tpu as pltpu

EPS = 1e-5
CPAD = 128          # lane-dense channel padding
CH = 256            # conv matmul row chunk (M of each MXU matmul)

# Layer geometry (28x28 input is pinned by fc1 = 64*3*3).
H1 = W1 = 28
SLAB1 = 800         # conv1 per-image slab rows: 784 im2col rows + 16 zero slack
K1 = 16             # conv1 im2col K (9 taps zero-padded to 16 lanes)

H2 = W2 = 14
W2P = 16            # conv2 padded row width (>= W2+2, multiple of 8)
SLAB2 = 256         # conv2 per-image slab rows (16 padded rows x 16)

H3 = W3 = 7
W3P = 16
SLAB3 = 160         # conv3 per-image slab rows (10 padded rows x 16)

PAIR_ROWS = 448     # pooling bounce scratch rows (14 pooled rows x 32)


# ----------------------------------------------------------------------------
# In-kernel helpers
# ----------------------------------------------------------------------------
def _conv_chunks(in_ref, w_ref, sh_ref, out_scr, *, n_chunks, offsets, w_is_3d):
    """out[p] = relu(sum_t in[p + off_t] @ w_t + shift) for p in [0, n_chunks*CH)."""
    shift = sh_ref[...]                                     # (1, 128)
    w_flat = None if w_is_3d else w_ref[...]                # hoist small conv1 weight

    def body(ci, _):
        base = pl.multiple_of(ci * CH, CH)
        acc = None
        for t, off in enumerate(offsets):
            lhs = in_ref[pl.ds(base + off, CH), :]
            w = w_ref[t] if w_is_3d else w_flat
            d = jnp.dot(lhs, w, preferred_element_type=jnp.float32)
            acc = d if acc is None else acc + d
        out_scr[pl.ds(base, CH), :] = jnp.maximum(acc + shift, 0.0)
        return 0

    lax.fori_loop(0, n_chunks, body, 0)


def _pool_images(src_scr, pair_scr, emit, *, n_img, ho, wo, src_w, src_slab, brs):
    """2x2 max pool (floor), one image per loop step.

    Pass 1: vertical (row-pair) max for the whole image into the bounce
    scratch at static, 8-aligned offsets.  Pass 2: static-start stride-2
    horizontal max; each pooled row (wo, 128) is handed to `emit(i, r, row)`.
    """
    def body(i, _):
        base = i * src_slab
        for r in range(ho):
            top = src_scr[pl.ds(base + (2 * r) * src_w, 2 * wo), :]
            bot = src_scr[pl.ds(base + (2 * r + 1) * src_w, 2 * wo), :]
            pair_scr[pl.ds(r * brs, 2 * wo), :] = jnp.maximum(top, bot)
        for r in range(ho):
            ev = pair_scr[pl.ds(r * brs, wo, 2), :]
            od = pair_scr[pl.ds(r * brs + 1, wo, 2), :]
            emit(i, r, jnp.maximum(ev, od))
        return 0

    lax.fori_loop(0, n_img, body, 0)


# ----------------------------------------------------------------------------
# Fused kernel: conv1/2/3 (+BN+ReLU+pool) + fc1 (+BN+ReLU) + fc2
# ----------------------------------------------------------------------------
def _fused_cnn_kernel(x1_ref, w1_ref, sh1_ref, w2_ref, sh2_ref, w3_ref, sh3_ref,
                      wf1_ref, sh4_ref, wf2_ref, bf2_ref, o_ref,
                      c_scr, a2_scr, a3_scr, p3_scr, pair_scr, *, tb):
    # Zero only the small VMEM ring/slack buffers; the data rows are fully
    # overwritten by the pooling writes below.  No HBM block is zero-filled.
    a2_scr[...] = jnp.zeros(a2_scr.shape, a2_scr.dtype)
    a3_scr[...] = jnp.zeros(a3_scr.shape, a3_scr.dtype)

    taps2 = [ky * W2P + kx for ky in range(3) for kx in range(3)]
    taps3 = [ky * W3P + kx for ky in range(3) for kx in range(3)]

    # ---- layer 1: conv1 (im2col matmul, K=16) + BN + ReLU + pool ----
    _conv_chunks(x1_ref, w1_ref, sh1_ref, c_scr,
                 n_chunks=tb * SLAB1 // CH, offsets=[0], w_is_3d=False)

    def emit1(i, r, pooled):        # -> conv2 padded input (zero ring stays zero)
        a2_scr[pl.ds(i * SLAB2 + (r + 1) * W2P + 1, W2), :] = pooled

    _pool_images(c_scr, pair_scr, emit1, n_img=tb, ho=H2, wo=W2,
                 src_w=W1, src_slab=SLAB1, brs=32)

    # ---- layer 2: conv2 + BN + ReLU + pool ----
    _conv_chunks(a2_scr, w2_ref, sh2_ref, c_scr,
                 n_chunks=tb * SLAB2 // CH, offsets=taps2, w_is_3d=True)

    def emit2(i, r, pooled):
        a3_scr[pl.ds(i * SLAB3 + (r + 1) * W3P + 1, W3), :] = pooled

    _pool_images(c_scr, pair_scr, emit2, n_img=tb, ho=H3, wo=W3,
                 src_w=W2P, src_slab=SLAB2, brs=16)

    # ---- layer 3: conv3 + BN + ReLU + pool ----
    _conv_chunks(a3_scr, w3_ref, sh3_ref, c_scr,
                 n_chunks=tb * SLAB3 // CH, offsets=taps3, w_is_3d=True)

    def emit3(i, r, pooled):        # 3x3 pooled map: row i*16 + (3*r + c)
        p3_scr[pl.ds(i * 16 + 3 * r, 3), :] = pooled

    _pool_images(c_scr, pair_scr, emit3, n_img=tb, ho=3, wo=3,
                 src_w=W3P, src_slab=SLAB3, brs=8)

    # ---- FC head: fc1 (+ folded BN1d) + ReLU + fc2 (dropout = id at eval) ----
    h = jnp.zeros((tb, CPAD), jnp.float32)
    for s in range(9):
        lhs = p3_scr[pl.ds(s, tb, 16), :]                   # (tb, 128) spatial pos s
        h = h + jnp.dot(lhs, wf1_ref[s], preferred_element_type=jnp.float32)
    h = jnp.maximum(h + sh4_ref[...], 0.0)
    o_ref[...] = (jnp.dot(h, wf2_ref[...], preferred_element_type=jnp.float32)
                  + bf2_ref[...])


# ----------------------------------------------------------------------------
# pallas_call wrapper
# ----------------------------------------------------------------------------
def improved_cnn_forward(x_nchw, params, *, block_b=8):
    assert block_b % 8 == 0, "batch tile must be a multiple of 8 sublanes"
    B = x_nchw.shape[0]
    bp = ((B + block_b - 1) // block_b) * block_b
    grid_b = bp // block_b

    # conv1 input prep (layout plumbing only): pad=1 ring + channels-last
    # 9-tap pack, so conv1 is a plain MXU matmul inside the kernel.
    x = x_nchw[:, 0]
    if bp != B:
        x = jnp.concatenate([x, jnp.zeros((bp - B, H1, W1), x.dtype)], axis=0)
    xp = jnp.pad(x, ((0, 0), (1, 1), (1, 1)))                       # (bp, 30, 30)
    taps = jnp.stack([xp[:, ky:ky + H1, kx:kx + W1]
                      for ky in range(3) for kx in range(3)], axis=-1)
    x1 = taps.reshape(bp, H1 * W1, 9)
    x1 = jnp.pad(x1, ((0, 0), (0, SLAB1 - H1 * W1), (0, K1 - 9)))
    x1 = x1.reshape(bp * SLAB1, K1)

    kernel = functools.partial(_fused_cnn_kernel, tb=block_b)
    out = pl.pallas_call(
        kernel,
        out_shape=jax.ShapeDtypeStruct((bp, CPAD), jnp.float32),
        grid_spec=pltpu.PrefetchScalarGridSpec(
            num_scalar_prefetch=0,
            grid=(grid_b,),
            in_specs=[
                pl.BlockSpec((block_b * SLAB1, K1), lambda b: (b, 0)),
                pl.BlockSpec((K1, CPAD), lambda b: (0, 0)),
                pl.BlockSpec((1, CPAD), lambda b: (0, 0)),
                pl.BlockSpec((9, CPAD, CPAD), lambda b: (0, 0, 0)),
                pl.BlockSpec((1, CPAD), lambda b: (0, 0)),
                pl.BlockSpec((9, CPAD, CPAD), lambda b: (0, 0, 0)),
                pl.BlockSpec((1, CPAD), lambda b: (0, 0)),
                pl.BlockSpec((9, CPAD, CPAD), lambda b: (0, 0, 0)),
                pl.BlockSpec((1, CPAD), lambda b: (0, 0)),
                pl.BlockSpec((CPAD, CPAD), lambda b: (0, 0)),
                pl.BlockSpec((1, CPAD), lambda b: (0, 0)),
            ],
            out_specs=pl.BlockSpec((block_b, CPAD), lambda b: (b, 0)),
            scratch_shapes=[
                pltpu.VMEM((block_b * SLAB1, CPAD), jnp.float32),       # conv out
                pltpu.VMEM((block_b * SLAB2 + 40, CPAD), jnp.float32),  # conv2 in
                pltpu.VMEM((block_b * SLAB3 + 40, CPAD), jnp.float32),  # conv3 in
                pltpu.VMEM((block_b * 16, CPAD), jnp.float32),          # pool3 map
                pltpu.VMEM((PAIR_ROWS, CPAD), jnp.float32),             # pool bounce
            ],
        ),
        compiler_params=pltpu.CompilerParams(
            dimension_semantics=("parallel",),
            vmem_limit_bytes=48 * 1024 * 1024),
    )(x1, params["w1"], params["sh1"], params["w2"], params["sh2"],
      params["w3"], params["sh3"], params["wf1"], params["sh4"],
      params["wf2"], params["bf2"])
    return out[:B, :10]


# ----------------------------------------------------------------------------
# Parameters: raw (PyTorch-equivalent) + one-time kernel-ready prep
# ----------------------------------------------------------------------------
def make_raw_params(key):
    ks = jax.random.split(key, 14)

    def bn_stats(k, c):
        k1, k2, k3, k4 = jax.random.split(k, 4)
        gamma = 1.0 + 0.1 * jax.random.normal(k1, (c,), jnp.float32)
        beta = 0.1 * jax.random.normal(k2, (c,), jnp.float32)
        mean = 0.1 * jax.random.normal(k3, (c,), jnp.float32)
        var = 0.5 + jnp.abs(jax.random.normal(k4, (c,), jnp.float32))
        return gamma, beta, mean, var

    raw = dict(
        # conv weights HWIO (PyTorch is OIHW); fc weights stored (in, out)
        w_conv1=0.1 * jax.random.normal(ks[0], (3, 3, 1, 32), jnp.float32),
        b_conv1=0.1 * jax.random.normal(ks[1], (32,), jnp.float32),
        w_conv2=0.05 * jax.random.normal(ks[2], (3, 3, 32, 64), jnp.float32),
        b_conv2=0.1 * jax.random.normal(ks[3], (64,), jnp.float32),
        w_conv3=0.05 * jax.random.normal(ks[4], (3, 3, 64, 64), jnp.float32),
        b_conv3=0.1 * jax.random.normal(ks[5], (64,), jnp.float32),
        w_fc1=0.05 * jax.random.normal(ks[9], (576, 128), jnp.float32),
        b_fc1=0.1 * jax.random.normal(ks[10], (128,), jnp.float32),
        w_fc2=0.05 * jax.random.normal(ks[12], (128, 10), jnp.float32),
        b_fc2=0.1 * jax.random.normal(ks[13], (10,), jnp.float32),
    )
    raw["bn1"] = bn_stats(ks[6], 32)
    raw["bn2"] = bn_stats(ks[7], 64)
    raw["bn3"] = bn_stats(ks[8], 64)
    raw["bn4"] = bn_stats(ks[11], 128)
    return raw


def prepare_params(raw):
    def fold_conv(w_hwio, bias, bn):
        gamma, beta, mean, var = bn
        scale = gamma / jnp.sqrt(var + EPS)
        shift = beta + scale * (bias - mean)
        kh, kw, cin, cout = w_hwio.shape
        w = (w_hwio * scale).reshape(kh * kw, cin, cout)
        return w, jnp.pad(shift, (0, CPAD - cout)).reshape(1, CPAD)

    w1, sh1 = fold_conv(raw["w_conv1"], raw["b_conv1"], raw["bn1"])
    w1 = jnp.pad(w1.reshape(9, 32), ((0, K1 - 9), (0, CPAD - 32)))     # (16, 128)

    w2, sh2 = fold_conv(raw["w_conv2"], raw["b_conv2"], raw["bn2"])
    w2 = jnp.pad(w2, ((0, 0), (0, CPAD - 32), (0, CPAD - 64)))         # (9, 128, 128)

    w3, sh3 = fold_conv(raw["w_conv3"], raw["b_conv3"], raw["bn3"])
    w3 = jnp.pad(w3, ((0, 0), (0, CPAD - 64), (0, CPAD - 64)))         # (9, 128, 128)

    gamma4, beta4, mean4, var4 = raw["bn4"]
    scale4 = gamma4 / jnp.sqrt(var4 + EPS)
    sh4 = (beta4 + scale4 * (raw["b_fc1"] - mean4)).reshape(1, CPAD)
    # fc1 rows are in PyTorch (c, h, w) flatten order (f = c*9 + s); permute
    # once to the kernel's (spatial s, channel c) order and fold the BN1d scale.
    wf1 = (raw["w_fc1"] * scale4).reshape(64, 9, CPAD).transpose(1, 0, 2)
    wf1 = jnp.pad(wf1, ((0, 0), (0, CPAD - 64), (0, 0)))               # (9, 128, 128)

    wf2 = jnp.pad(raw["w_fc2"], ((0, 0), (0, CPAD - 10)))              # lane-dense
    bf2 = jnp.pad(raw["b_fc2"], (0, CPAD - 10)).reshape(1, CPAD)

    return dict(w1=w1, sh1=sh1, w2=w2, sh2=sh2, w3=w3, sh3=sh3,
                wf1=wf1, sh4=sh4, wf2=wf2, bf2=bf2)


# ----------------------------------------------------------------------------
# Plain-JAX reference (eval-mode BN, floor max-pool) for the numerical check
# ----------------------------------------------------------------------------
def reference_forward(x_nchw, raw):
    hp = lax.Precision.HIGHEST
    x = jnp.transpose(x_nchw, (0, 2, 3, 1))                            # NHWC

    def bn(y, stats):
        gamma, beta, mean, var = stats
        return (y - mean) / jnp.sqrt(var + EPS) * gamma + beta

    def block(y, w, b, stats):
        y = lax.conv_general_dilated(
            y, w, window_strides=(1, 1), padding="SAME",
            dimension_numbers=("NHWC", "HWIO", "NHWC"), precision=hp) + b
        y = jnp.maximum(bn(y, stats), 0.0)
        return lax.reduce_window(y, -jnp.inf, lax.max,
                                 (1, 2, 2, 1), (1, 2, 2, 1), "VALID")

    x = block(x, raw["w_conv1"], raw["b_conv1"], raw["bn1"])
    x = block(x, raw["w_conv2"], raw["b_conv2"], raw["bn2"])
    x = block(x, raw["w_conv3"], raw["b_conv3"], raw["bn3"])
    x = jnp.transpose(x, (0, 3, 1, 2)).reshape(x.shape[0], 64 * 3 * 3)  # torch view
    h = jnp.maximum(
        bn(jnp.dot(x, raw["w_fc1"], precision=hp) + raw["b_fc1"], raw["bn4"]), 0.0)
    return jnp.dot(h, raw["w_fc2"], precision=hp) + raw["b_fc2"]        # dropout=id


if __name__ == "__main__":
    # fc1 (64*3*3 inputs) pins the spatial size to 28x28; B=16 keeps two
    # parallel grid steps (TB=8 images per step).
    B = 16
    x = jax.random.normal(jax.random.PRNGKey(0), (B, 1, 28, 28), jnp.float32)
    raw = make_raw_params(jax.random.PRNGKey(42))
    params = prepare_params(raw)

    fwd = jax.jit(functools.partial(improved_cnn_forward, block_b=8))
    out = jax.block_until_ready(fwd(x, params))
    assert out.shape == (B, 10), out.shape
    assert bool(jnp.all(jnp.isfinite(out)))

    ref = reference_forward(x, raw)
    err = float(jnp.max(jnp.abs(out - ref)))
    assert err < 1e-2, f"mismatch vs JAX reference: max|err|={err}"
    # TODO(synk): BatchNorm is evaluated with running stats (inference mode);
    # training-mode batch statistics and active dropout are not implemented.
    print("KERNEL_OK")
</pallas_src>

<mosaic_0001>
module attributes {stable_mosaic.version = 11 : i64} {
  func.func @_fused_cnn_kernel(%arg0: i32, %arg1: memref<6400x16xf32, #tpu.memory_space<vmem>>, %arg2: memref<16x128xf32, #tpu.memory_space<vmem>>, %arg3: memref<1x128xf32, #tpu.memory_space<vmem>>, %arg4: memref<9x128x128xf32, #tpu.memory_space<vmem>>, %arg5: memref<1x128xf32, #tpu.memory_space<vmem>>, %arg6: memref<9x128x128xf32, #tpu.memory_space<vmem>>, %arg7: memref<1x128xf32, #tpu.memory_space<vmem>>, %arg8: memref<9x128x128xf32, #tpu.memory_space<vmem>>, %arg9: memref<1x128xf32, #tpu.memory_space<vmem>>, %arg10: memref<128x128xf32, #tpu.memory_space<vmem>>, %arg11: memref<1x128xf32, #tpu.memory_space<vmem>>, %arg12: memref<8x128xf32, #tpu.memory_space<vmem>>, %arg13: memref<6400x128xf32, #tpu.memory_space<vmem>>, %arg14: memref<2088x128xf32, #tpu.memory_space<vmem>>, %arg15: memref<1320x128xf32, #tpu.memory_space<vmem>>, %arg16: memref<128x128xf32, #tpu.memory_space<vmem>>, %arg17: memref<448x128xf32, #tpu.memory_space<vmem>>) attributes {dimension_semantics = [#tpu.dimension_semantics<parallel>], iteration_bounds = array<i64: 2>, scalar_prefetch = 0 : i64, scratch_operands = 5 : i64, tpu.core_type = #tpu.core_type<tc>, window_params = [{transform_indices = @transform_0, window_bounds = array<i64: 6400, 16>}, {pipeline_mode = #tpu.pipeline_mode<synchronous>, transform_indices = @transform_1, window_bounds = array<i64: 16, 128>}, {pipeline_mode = #tpu.pipeline_mode<synchronous>, transform_indices = @transform_2, window_bounds = array<i64: 1, 128>}, {pipeline_mode = #tpu.pipeline_mode<synchronous>, transform_indices = @transform_3, window_bounds = array<i64: 9, 128, 128>}, {pipeline_mode = #tpu.pipeline_mode<synchronous>, transform_indices = @transform_4, window_bounds = array<i64: 1, 128>}, {pipeline_mode = #tpu.pipeline_mode<synchronous>, transform_indices = @transform_5, window_bounds = array<i64: 9, 128, 128>}, {pipeline_mode = #tpu.pipeline_mode<synchronous>, transform_indices = @transform_6, window_bounds = array<i64: 1, 128>}, {pipeline_mode = #tpu.pipeline_mode<synchronous>, transform_indices = @transform_7, window_bounds = array<i64: 9, 128, 128>}, {pipeline_mode = #tpu.pipeline_mode<synchronous>, transform_indices = @transform_8, window_bounds = array<i64: 1, 128>}, {pipeline_mode = #tpu.pipeline_mode<synchronous>, transform_indices = @transform_9, window_bounds = array<i64: 128, 128>}, {pipeline_mode = #tpu.pipeline_mode<synchronous>, transform_indices = @transform_10, window_bounds = array<i64: 1, 128>}, {transform_indices = @transform_11, window_bounds = array<i64: 8, 128>}]} {
    %cst = arith.constant 0.000000e+00 : f32
    %0 = vector.broadcast %cst : f32 to vector<2088x128xf32>
    %c0 = arith.constant 0 : index
    %c0_0 = arith.constant 0 : index
    %1 = vector.load %arg14[%c0, %c0_0] : memref<2088x128xf32, #tpu.memory_space<vmem>>, vector<2088x128xf32>
    tpu.vector_store %arg14[%c0, %c0_0], %0 {strides = array<i32>} : memref<2088x128xf32, #tpu.memory_space<vmem>>, vector<2088x128xf32>,
    %cst_1 = arith.constant 0.000000e+00 : f32
    %2 = vector.broadcast %cst_1 : f32 to vector<1320x128xf32>
    %c0_2 = arith.constant 0 : index
    %c0_3 = arith.constant 0 : index
    %3 = vector.load %arg15[%c0_2, %c0_3] : memref<1320x128xf32, #tpu.memory_space<vmem>>, vector<1320x128xf32>
    tpu.vector_store %arg15[%c0_2, %c0_3], %2 {strides = array<i32>} : memref<1320x128xf32, #tpu.memory_space<vmem>>, vector<1320x128xf32>,
    %c0_4 = arith.constant 0 : index
    %c0_5 = arith.constant 0 : index
    %4 = vector.load %arg3[%c0_4, %c0_5] : memref<1x128xf32, #tpu.memory_space<vmem>>, vector<1x128xf32>
    %c0_6 = arith.constant 0 : index
    %c0_7 = arith.constant 0 : index
    %5 = vector.load %arg2[%c0_6, %c0_7] : memref<16x128xf32, #tpu.memory_space<vmem>>, vector<16x128xf32>
    %c0_i32 = arith.constant 0 : i32
    %c25_i32 = arith.constant 25 : i32
    %6 = arith.addi %c0_i32, %c25_i32 : i32
    %c1_i32 = arith.constant 1 : i32
    scf.for %arg18 = %c0_i32 to %6 step %c1_i32  : i32 {
      %c256_i32 = arith.constant 256 : i32
      %71 = arith.muli %arg18, %c256_i32 : i32
      %72 = tpu.assume_multiple %71, 256 : i32
      %c0_i32_88 = arith.constant 0 : i32
      %73 = arith.addi %72, %c0_i32_88 : i32
      %74 = arith.index_cast %73 : i32 to index
      %c0_89 = arith.constant 0 : index
      %75 = vector.load %arg1[%74, %c0_89] : memref<6400x16xf32, #tpu.memory_space<vmem>>, vector<256x16xf32>
      %cst_90 = arith.constant dense<0.000000e+00> : vector<256x128xf32>
      %76 = tpu.matmul %75, %5, %cst_90 {dimension_numbers = #tpu.dot_dimension_numbers<[1], [0], [0], [1], [0, 0, 1, 1], [], []>} : vector<256x16xf32>, vector<16x128xf32>, vector<256x128xf32> -> vector<256x128xf32>
      %77 = vector.broadcast %4 : vector<1x128xf32> to vector<256x128xf32>
      %78 = arith.addf %76, %77 : vector<256x128xf32>
      %cst_91 = arith.constant 0.000000e+00 : f32
      %79 = vector.broadcast %cst_91 : f32 to vector<256x128xf32>
      %80 = arith.maximumf %78, %79 : vector<256x128xf32>
      %81 = arith.index_cast %72 : i32 to index
      %c0_92 = arith.constant 0 : index
      %82 = vector.load %arg13[%81, %c0_92] : memref<6400x128xf32, #tpu.memory_space<vmem>>, vector<256x128xf32>
      tpu.vector_store %arg13[%81, %c0_92], %80 {strides = array<i32>} : memref<6400x128xf32, #tpu.memory_space<vmem>>, vector<256x128xf32>,
    }
    %c25_i32_8 = arith.constant 25 : i32
    %c0_i32_9 = arith.constant 0 : i32
    %c8_i32 = arith.constant 8 : i32
    %7 = arith.addi %c0_i32_9, %c8_i32 : i32
    %c1_i32_10 = arith.constant 1 : i32
    scf.for %arg18 = %c0_i32_9 to %7 step %c1_i32_10  : i32 {
      %c800_i32 = arith.constant 800 : i32
      %71 = arith.muli %arg18, %c800_i32 : i32
      %c0_i32_88 = arith.constant 0 : i32
      %72 = arith.addi %71, %c0_i32_88 : i32
      %73 = arith.index_cast %72 : i32 to index
      %c0_89 = arith.constant 0 : index
      %74 = vector.load %arg13[%73, %c0_89] : memref<6400x128xf32, #tpu.memory_space<vmem>>, vector<28x128xf32>
      %c28_i32 = arith.constant 28 : i32
      %75 = arith.addi %71, %c28_i32 : i32
      %76 = arith.index_cast %75 : i32 to index
      %c0_90 = arith.constant 0 : index
      %77 = vector.load %arg13[%76, %c0_90] : memref<6400x128xf32, #tpu.memory_space<vmem>>, vector<28x128xf32>
      %78 = arith.maximumf %74, %77 : vector<28x128xf32>
      %c0_91 = arith.constant 0 : index
      %c0_92 = arith.constant 0 : index
      %79 = vector.load %arg17[%c0_91, %c0_92] : memref<448x128xf32, #tpu.memory_space<vmem>>, vector<28x128xf32>
      tpu.vector_store %arg17[%c0_91, %c0_92], %78 {strides = array<i32>} : memref<448x128xf32, #tpu.memory_space<vmem>>, vector<28x128xf32>,
      %c56_i32 = arith.constant 56 : i32
      %80 = arith.addi %71, %c56_i32 : i32
      %81 = arith.index_cast %80 : i32 to index
      %c0_93 = arith.constant 0 : index
      %82 = vector.load %arg13[%81, %c0_93] : memref<6400x128xf32, #tpu.memory_space<vmem>>, vector<28x128xf32>
      %c84_i32 = arith.constant 84 : i32
      %83 = arith.addi %71, %c84_i32 : i32
      %84 = arith.index_cast %83 : i32 to index
      %c0_94 = arith.constant 0 : index
      %85 = vector.load %arg13[%84, %c0_94] : memref<6400x128xf32, #tpu.memory_space<vmem>>, vector<28x128xf32>
      %86 = arith.maximumf %82, %85 : vector<28x128xf32>
      %c32 = arith.constant 32 : index
      %c0_95 = arith.constant 0 : index
      %87 = vector.load %arg17[%c32, %c0_95] : memref<448x128xf32, #tpu.memory_space<vmem>>, vector<28x128xf32>
      tpu.vector_store %arg17[%c32, %c0_95], %86 {strides = array<i32>} : memref<448x128xf32, #tpu.memory_space<vmem>>, vector<28x128xf32>,
      %c112_i32 = arith.constant 112 : i32
      %88 = arith.addi %71, %c112_i32 : i32
      %89 = arith.index_cast %88 : i32 to index
      %c0_96 = arith.constant 0 : index
      %90 = vector.load %arg13[%89, %c0_96] : memref<6400x128xf32, #tpu.memory_space<vmem>>, vector<28x128xf32>
      %c140_i32 = arith.constant 140 : i32
      %91 = arith.addi %71, %c140_i32 : i32
      %92 = arith.index_cast %91 : i32 to index
      %c0_97 = arith.constant 0 : index
      %93 = vector.load %arg13[%92, %c0_97] : memref<6400x128xf32, #tpu.memory_space<vmem>>, vector<28x128xf32>
      %94 = arith.maximumf %90, %93 : vector<28x128xf32>
      %c64 = arith.constant 64 : index
      %c0_98 = arith.constant 0 : index
      %95 = vector.load %arg17[%c64, %c0_98] : memref<448x128xf32, #tpu.memory_space<vmem>>, vector<28x128xf32>
      tpu.vector_store %arg17[%c64, %c0_98], %94 {strides = array<i32>} : memref<448x128xf32, #tpu.memory_space<vmem>>, vector<28x128xf32>,
      %c168_i32 = arith.constant 168 : i32
      %96 = arith.addi %71, %c168_i32 : i32
      %97 = arith.index_cast %96 : i32 to index
      %c0_99 = arith.constant 0 : index
      %98 = vector.load %arg13[%97, %c0_99] : memref<6400x128xf32, #tpu.memory_space<vmem>>, vector<28x128xf32>
      %c196_i32 = arith.constant 196 : i32
      %99 = arith.addi %71, %c196_i32 : i32
      %100 = arith.index_cast %99 : i32 to index
      %c0_100 = arith.constant 0 : index
      %101 = vector.load %arg13[%100, %c0_100] : memref<6400x128xf32, #tpu.memory_space<vmem>>, vector<28x128xf32>
      %102 = arith.maximumf %98, %101 : vector<28x128xf32>
      %c96 = arith.constant 96 : index
      %c0_101 = arith.constant 0 : index
      %103 = vector.load %arg17[%c96, %c0_101] : memref<448x128xf32, #tpu.memory_space<vmem>>, vector<28x128xf32>
      tpu.vector_store %arg17[%c96, %c0_101], %102 {strides = array<i32>} : memref<448x128xf32, #tpu.memory_space<vmem>>, vector<28x128xf32>,
      %c224_i32 = arith.constant 224 : i32
      %104 = arith.addi %71, %c224_i32 : i32
      %105 = arith.index_cast %104 : i32 to index
      %c0_102 = arith.constant 0 : index
      %106 = vector.load %arg13[%105, %c0_102] : memref<6400x128xf32, #tpu.memory_space<vmem>>, vector<28x128xf32>
      %c252_i32 = arith.constant 252 : i32
      %107 = arith.addi %71, %c252_i32 : i32
      %108 = arith.index_cast %107 : i32 to index
      %c0_103 = arith.constant 0 : index
      %109 = vector.load %arg13[%108, %c0_103] : memref<6400x128xf32, #tpu.memory_space<vmem>>, vector<28x128xf32>
      %110 = arith.maximumf %106, %109 : vector<28x128xf32>
      %c128 = arith.constant 128 : index
      %c0_104 = arith.constant 0 : index
      %111 = vector.load %arg17[%c128, %c0_104] : memref<448x128xf32, #tpu.memory_space<vmem>>, vector<28x128xf32>
      tpu.vector_store %arg17[%c128, %c0_104], %110 {strides = array<i32>} : memref<448x128xf32, #tpu.memory_space<vmem>>, vector<28x128xf32>,
      %c280_i32 = arith.constant 280 : i32
      %112 = arith.addi %71, %c280_i32 : i32
      %113 = arith.index_cast %112 : i32 to index
      %c0_105 = arith.constant 0 : index
      %114 = vector.load %arg13[%113, %c0_105] : memref<6400x128xf32, #tpu.memory_space<vmem>>, vector<28x128xf32>
      %c308_i32 = arith.constant 308 : i32
      %115 = arith.addi %71, %c308_i32 : i32
      %116 = arith.index_cast %115 : i32 to index
      %c0_106 = arith.constant 0 : index
      %117 = vector.load %arg13[%116, %c0_106] : memref<6400x128xf32, #tpu.memory_space<vmem>>, vector<28x128xf32>
      %118 = arith.maximumf %114, %117 : vector<28x128xf32>
      %c160 = arith.constant 160 : index
      %c0_107 = arith.constant 0 : index
      %119 = vector.load %arg17[%c160, %c0_107] : memref<448x128xf32, #tpu.memory_space<vmem>>, vector<28x128xf32>
      tpu.vector_store %arg17[%c160, %c0_107], %118 {strides = array<i32>} : memref<448x128xf32, #tpu.memory_space<vmem>>, vector<28x128xf32>,
      %c336_i32 = arith.constant 336 : i32
      %120 = arith.addi %71, %c336_i32 : i32
      %121 = arith.index_cast %120 : i32 to index
      %c0_108 = arith.constant 0 : index
      %122 = vector.load %arg13[%121, %c0_108] : memref<6400x128xf32, #tpu.memory_space<vmem>>, vector<28x128xf32>
      %c364_i32 = arith.constant 364 : i32
      %123 = arith.addi %71, %c364_i32 : i32
      %124 = arith.index_cast %123 : i32 to index
      %c0_109 = arith.constant 0 : index
      %125 = vector.load %arg13[%124, %c0_109] : memref<6400x128xf32, #tpu.memory_space<vmem>>, vector<28x128xf32>
      %126 = arith.maximumf %122, %125 : vector<28x128xf32>
      %c192 = arith.constant 192 : index
      %c0_110 = arith.constant 0 : index
      %127 = vector.load %arg17[%c192, %c0_110] : memref<448x128xf32, #tpu.memory_space<vmem>>, vector<28x128xf32>
      tpu.vector_store %arg17[%c192, %c0_110], %126 {strides = array<i32>} : memref<448x128xf32, #tpu.memory_space<vmem>>, vector<28x128xf32>,
      %c392_i32 = arith.constant 392 : i32
      %128 = arith.addi %71, %c392_i32 : i32
      %129 = arith.index_cast %128 : i32 to index
      %c0_111 = arith.constant 0 : index
      %130 = vector.load %arg13[%129, %c0_111] : memref<6400x128xf32, #tpu.memory_space<vmem>>, vector<28x128xf32>
      %c420_i32 = arith.constant 420 : i32
      %131 = arith.addi %71, %c420_i32 : i32
      %132 = arith.index_cast %131 : i32 to index
      %c0_112 = arith.constant 0 : index
      %133 = vector.load %arg13[%132, %c0_112] : memref<6400x128xf32, #tpu.memory_space<vmem>>, vector<28x128xf32>
      %134 = arith.maximumf %130, %133 : vector<28x128xf32>
      %c224 = arith.constant 224 : index
      %c0_113 = arith.constant 0 : index
      %135 = vector.load %arg17[%c224, %c0_113] : memref<448x128xf32, #tpu.memory_space<vmem>>, vector<28x128xf32>
      tpu.vector_store %arg17[%c224, %c0_113], %134 {strides = array<i32>} : memref<448x128xf32, #tpu.memory_space<vmem>>, vector<28x128xf32>,
      %c448_i32 = arith.constant 448 : i32
      %136 = arith.addi %71, %c448_i32 : i32
      %137 = arith.index_cast %136 : i32 to index
      %c0_114 = arith.constant 0 : index
      %138 = vector.load %arg13[%137, %c0_114] : memref<6400x128xf32, #tpu.memory_space<vmem>>, vector<28x128xf32>
      %c476_i32 = arith.constant 476 : i32
      %139 = arith.addi %71, %c476_i32 : i32
      %140 = arith.index_cast %139 : i32 to index
      %c0_115 = arith.constant 0 : index
      %141 = vector.load %arg13[%140, %c0_115] : memref<6400x128xf32, #tpu.memory_space<vmem>>, vector<28x128xf32>
      %142 = arith.maximumf %138, %141 : vector<28x128xf32>
      %c256 = arith.constant 256 : index
      %c0_116 = arith.constant 0 : index
      %143 = vector.load %arg17[%c256, %c0_116] : memref<448x128xf32, #tpu.memory_space<vmem>>, vector<28x128xf32>
      tpu.vector_store %arg17[%c256, %c0_116], %142 {strides = array<i32>} : memref<448x128xf32, #tpu.memory_space<vmem>>, vector<28x128xf32>,
      %c504_i32 = arith.constant 504 : i32
      %144 = arith.addi %71, %c504_i32 : i32
      %145 = arith.index_cast %144 : i32 to index
      %c0_117 = arith.constant 0 : index
      %146 = vector.load %arg13[%145, %c0_117] : memref<6400x128xf32, #tpu.memory_space<vmem>>, vector<28x128xf32>
      %c532_i32 = arith.constant 532 : i32
      %147 = arith.addi %71, %c532_i32 : i32
      %148 = arith.index_cast %147 : i32 to index
      %c0_118 = arith.constant 0 : index
      %149 = vector.load %arg13[%148, %c0_118] : memref<6400x128xf32, #tpu.memory_space<vmem>>, vector<28x128xf32>
      %150 = arith.maximumf %146, %149 : vector<28x128xf32>
      %c288 = arith.constant 288 : index
      %c0_119 = arith.constant 0 : index
      %151 = vector.load %arg17[%c288, %c0_119] : memref<448x128xf32, #tpu.memory_space<vmem>>, vector<28x128xf32>
      tpu.vector_store %arg17[%c288, %c0_119], %150 {strides = array<i32>} : memref<448x128xf32, #tpu.memory_space<vmem>>, vector<28x128xf32>,
      %c560_i32 = arith.constant 560 : i32
      %152 = arith.addi %71, %c560_i32 : i32
      %153 = arith.index_cast %152 : i32 to index
      %c0_120 = arith.constant 0 : index
      %154 = vector.load %arg13[%153, %c0_120] : memref<6400x128xf32, #tpu.memory_space<vmem>>, vector<28x128xf32>
      %c588_i32 = arith.constant 588 : i32
      %155 = arith.addi %71, %c588_i32 : i32
      %156 = arith.index_cast %155 : i32 to index
      %c0_121 = arith.constant 0 : index
      %157 = vector.load %arg13[%156, %c0_121] : memref<6400x128xf32, #tpu.memory_space<vmem>>, vector<28x128xf32>
      %158 = arith.maximumf %154, %157 : vector<28x128xf32>
      %c320 = arith.constant 320 : index
      %c0_122 = arith.constant 0 : index
      %159 = vector.load %arg17[%c320, %c0_122] : memref<448x128xf32, #tpu.memory_space<vmem>>, vector<28x128xf32>
      tpu.vector_store %arg17[%c320, %c0_122], %158 {strides = array<i32>} : memref<448x128xf32, #tpu.memory_space<vmem>>, vector<28x128xf32>,
      %c616_i32 = arith.constant 616 : i32
      %160 = arith.addi %71, %c616_i32 : i32
      %161 = arith.index_cast %160 : i32 to index
      %c0_123 = arith.constant 0 : index
      %162 = vector.load %arg13[%161, %c0_123] : memref<6400x128xf32, #tpu.memory_space<vmem>>, vector<28x128xf32>
      %c644_i32 = arith.constant 644 : i32
      %163 = arith.addi %71, %c644_i32 : i32
      %164 = arith.index_cast %163 : i32 to index
      %c0_124 = arith.constant 0 : index
      %165 = vector.load %arg13[%164, %c0_124] : memref<6400x128xf32, #tpu.memory_space<vmem>>, vector<28x128xf32>
      %166 = arith.maximumf %162, %165 : vector<28x128xf32>
      %c352 = arith.constant 352 : index
      %c0_125 = arith.constant 0 : index
      %167 = vector.load %arg17[%c352, %c0_125] : memref<448x128xf32, #tpu.memory_space<vmem>>, vector<28x128xf32>
      tpu.vector_store %arg17[%c352, %c0_125], %166 {strides = array<i32>} : memref<448x128xf32, #tpu.memory_space<vmem>>, vector<28x128xf32>,
      %c672_i32 = arith.constant 672 : i32
      %168 = arith.addi %71, %c672_i32 : i32
      %169 = arith.index_cast %168 : i32 to index
      %c0_126 = arith.constant 0 : index
      %170 = vector.load %arg13[%169, %c0_126] : memref<6400x128xf32, #tpu.memory_space<vmem>>, vector<28x128xf32>
      %c700_i32 = arith.constant 700 : i32
      %171 = arith.addi %71, %c700_i32 : i32
      %172 = arith.index_cast %171 : i32 to index
      %c0_127 = arith.constant 0 : index
      %173 = vector.load %arg13[%172, %c0_127] : memref<6400x128xf32, #tpu.memory_space<vmem>>, vector<28x128xf32>
      %174 = arith.maximumf %170, %173 : vector<28x128xf32>
      %c384 = arith.constant 384 : index
      %c0_128 = arith.constant 0 : index
      %175 = vector.load %arg17[%c384, %c0_128] : memref<448x128xf32, #tpu.memory_space<vmem>>, vector<28x128xf32>
      tpu.vector_store %arg17[%c384, %c0_128], %174 {strides = array<i32>} : memref<448x128xf32, #tpu.memory_space<vmem>>, vector<28x128xf32>,
      %c728_i32 = arith.constant 728 : i32
      %176 = arith.addi %71, %c728_i32 : i32
      %177 = arith.index_cast %176 : i32 to index
      %c0_129 = arith.constant 0 : index
      %178 = vector.load %arg13[%177, %c0_129] : memref<6400x128xf32, #tpu.memory_space<vmem>>, vector<28x128xf32>
      %c756_i32 = arith.constant 756 : i32
      %179 = arith.addi %71, %c756_i32 : i32
      %180 = arith.index_cast %179 : i32 to index
      %c0_130 = arith.constant 0 : index
      %181 = vector.load %arg13[%180, %c0_130] : memref<6400x128xf32, #tpu.memory_space<vmem>>, vector<28x128xf32>
      %182 = arith.maximumf %178, %181 : vector<28x128xf32>
      %c416 = arith.constant 416 : index
      %c0_131 = arith.constant 0 : index
      %183 = vector.load %arg17[%c416, %c0_131] : memref<448x128xf32, #tpu.memory_space<vmem>>, vector<28x128xf32>
      tpu.vector_store %arg17[%c416, %c0_131], %182 {strides = array<i32>} : memref<448x128xf32, #tpu.memory_space<vmem>>, vector<28x128xf32>,
      %c0_132 = arith.constant 0 : index
      %c0_133 = arith.constant 0 : index
      %184 = tpu.strided_load %arg17[%c0_132, %c0_133] {strides = array<i32: 2, 1>} : memref<448x128xf32, #tpu.memory_space<vmem>>, vector<14x128xf32>
      %c1_134 = arith.constant 1 : index
      %c0_135 = arith.constant 0 : index
      %185 = tpu.strided_load %arg17[%c1_134, %c0_135] {strides = array<i32: 2, 1>} : memref<448x128xf32, #tpu.memory_space<vmem>>, vector<14x128xf32>
      %186 = arith.maximumf %184, %185 : vector<14x128xf32>
      %c256_i32 = arith.constant 256 : i32
      %187 = arith.muli %arg18, %c256_i32 : i32
      %c16_i32 = arith.constant 16 : i32
      %188 = arith.addi %187, %c16_i32 : i32
      %c1_i32_136 = arith.constant 1 : i32
      %189 = arith.addi %188, %c1_i32_136 : i32
      %190 = arith.index_cast %189 : i32 to index
      %c0_137 = arith.constant 0 : index
      %191 = vector.load %arg14[%190, %c0_137] : memref<2088x128xf32, #tpu.memory_space<vmem>>, vector<14x128xf32>
      tpu.vector_store %arg14[%190, %c0_137], %186 {strides = array<i32>} : memref<2088x128xf32, #tpu.memory_space<vmem>>, vector<14x128xf32>,
      %c32_138 = arith.constant 32 : index
      %c0_139 = arith.constant 0 : index
      %192 = tpu.strided_load %arg17[%c32_138, %c0_139] {strides = array<i32: 2, 1>} : memref<448x128xf32, #tpu.memory_space<vmem>>, vector<14x128xf32>
      %c33 = arith.constant 33 : index
      %c0_140 = arith.constant 0 : index
      %193 = tpu.strided_load %arg17[%c33, %c0_140] {strides = array<i32: 2, 1>} : memref<448x128xf32, #tpu.memory_space<vmem>>, vector<14x128xf32>
      %194 = arith.maximumf %192, %193 : vector<14x128xf32>
      %c256_i32_141 = arith.constant 256 : i32
      %195 = arith.muli %arg18, %c256_i32_141 : i32
      %c32_i32 = arith.constant 32 : i32
      %196 = arith.addi %195, %c32_i32 : i32
      %c1_i32_142 = arith.constant 1 : i32
      %197 = arith.addi %196, %c1_i32_142 : i32
      %198 = arith.index_cast %197 : i32 to index
      %c0_143 = arith.constant 0 : index
      %199 = vector.load %arg14[%198, %c0_143] : memref<2088x128xf32, #tpu.memory_space<vmem>>, vector<14x128xf32>
      tpu.vector_store %arg14[%198, %c0_143], %194 {strides = array<i32>} : memref<2088x128xf32, #tpu.memory_space<vmem>>, vector<14x128xf32>,
      %c64_144 = arith.constant 64 : index
      %c0_145 = arith.constant 0 : index
      %200 = tpu.strided_load %arg17[%c64_144, %c0_145] {strides = array<i32: 2, 1>} : memref<448x128xf32, #tpu.memory_space<vmem>>, vector<14x128xf32>
      %c65 = arith.constant 65 : index
      %c0_146 = arith.constant 0 : index
      %201 = tpu.strided_load %arg17[%c65, %c0_146] {strides = array<i32: 2, 1>} : memref<448x128xf32, #tpu.memory_space<vmem>>, vector<14x128xf32>
      %202 = arith.maximumf %200, %201 : vector<14x128xf32>
      %c256_i32_147 = arith.constant 256 : i32
      %203 = arith.muli %arg18, %c256_i32_147 : i32
      %c48_i32 = arith.constant 48 : i32
      %204 = arith.addi %203, %c48_i32 : i32
      %c1_i32_148 = arith.constant 1 : i32
      %205 = arith.addi %204, %c1_i32_148 : i32
      %206 = arith.index_cast %205 : i32 to index
      %c0_149 = arith.constant 0 : index
      %207 = vector.load %arg14[%206, %c0_149] : memref<2088x128xf32, #tpu.memory_space<vmem>>, vector<14x128xf32>
      tpu.vector_store %arg14[%206, %c0_149], %202 {strides = array<i32>} : memref<2088x128xf32, #tpu.memory_space<vmem>>, vector<14x128xf32>,
      %c96_150 = arith.constant 96 : index
      %c0_151 = arith.constant 0 : index
      %208 = tpu.strided_load %arg17[%c96_150, %c0_151] {strides = array<i32: 2, 1>} : memref<448x128xf32, #tpu.memory_space<vmem>>, vector<14x128xf32>
      %c97 = arith.constant 97 : index
      %c0_152 = arith.constant 0 : index
      %209 = tpu.strided_load %arg17[%c97, %c0_152] {strides = array<i32: 2, 1>} : memref<448x128xf32, #tpu.memory_space<vmem>>, vector<14x128xf32>
      %210 = arith.maximumf %208, %209 : vector<14x128xf32>
      %c256_i32_153 = arith.constant 256 : i32
      %211 = arith.muli %arg18, %c256_i32_153 : i32
      %c64_i32 = arith.constant 64 : i32
      %212 = arith.addi %211, %c64_i32 : i32
      %c1_i32_154 = arith.constant 1 : i32
      %213 = arith.addi %212, %c1_i32_154 : i32
      %214 = arith.index_cast %213 : i32 to index
      %c0_155 = arith.constant 0 : index
      %215 = vector.load %arg14[%214, %c0_155] : memref<2088x128xf32, #tpu.memory_space<vmem>>, vector<14x128xf32>
      tpu.vector_store %arg14[%214, %c0_155], %210 {strides = array<i32>} : memref<2088x128xf32, #tpu.memory_space<vmem>>, vector<14x128xf32>,
      %c128_156 = arith.constant 128 : index
      %c0_157 = arith.constant 0 : index
      %216 = tpu.strided_load %arg17[%c128_156, %c0_157] {strides = array<i32: 2, 1>} : memref<448x128xf32, #tpu.memory_space<vmem>>, vector<14x128xf32>
      %c129 = arith.constant 129 : index
      %c0_158 = arith.constant 0 : index
      %217 = tpu.strided_load %arg17[%c129, %c0_158] {strides = array<i32: 2, 1>} : memref<448x128xf32, #tpu.memory_space<vmem>>, vector<14x128xf32>
      %218 = arith.maximumf %216, %217 : vector<14x128xf32>
      %c256_i32_159 = arith.constant 256 : i32
      %219 = arith.muli %arg18, %c256_i32_159 : i32
      %c80_i32 = arith.constant 80 : i32
      %220 = arith.addi %219, %c80_i32 : i32
      %c1_i32_160 = arith.constant 1 : i32
      %221 = arith.addi %220, %c1_i32_160 : i32
      %222 = arith.index_cast %221 : i32 to index
      %c0_161 = arith.constant 0 : index
      %223 = vector.load %arg14[%222, %c0_161] : memref<2088x128xf32, #tpu.memory_space<vmem>>, vector<14x128xf32>
      tpu.vector_store %arg14[%222, %c0_161], %218 {strides = array<i32>} : memref<2088x128xf32, #tpu.memory_space<vmem>>, vector<14x128xf32>,
      %c160_162 = arith.constant 160 : index
      %c0_163 = arith.constant 0 : index
      %224 = tpu.strided_load %arg17[%c160_162, %c0_163] {strides = array<i32: 2, 1>} : memref<448x128xf32, #tpu.memory_space<vmem>>, vector<14x128xf32>
      %c161 = arith.constant 161 : index
      %c0_164 = arith.constant 0 : index
      %225 = tpu.strided_load %arg17[%c161, %c0_164] {strides = array<i32: 2, 1>} : memref<448x128xf32, #tpu.memory_space<vmem>>, vector<14x128xf32>
      %226 = arith.maximumf %224, %225 : vector<14x128xf32>
      %c256_i32_165 = arith.constant 256 : i32
      %227 = arith.muli %arg18, %c256_i32_165 : i32
      %c96_i32 = arith.constant 96 : i32
      %228 = arith.addi %227, %c96_i32 : i32
      %c1_i32_166 = arith.constant 1 : i32
      %229 = arith.addi %228, %c1_i32_166 : i32
      %230 = arith.index_cast %229 : i32 to index
      %c0_167 = arith.constant 0 : index
      %231 = vector.load %arg14[%230, %c0_167] : memref<2088x128xf32, #tpu.memory_space<vmem>>, vector<14x128xf32>
      tpu.vector_store %arg14[%230, %c0_167], %226 {strides = array<i32>} : memref<2088x128xf32, #tpu.memory_space<vmem>>, vector<14x128xf32>,
      %c192_168 = arith.constant 192 : index
      %c0_169 = arith.constant 0 : index
      %232 = tpu.strided_load %arg17[%c192_168, %c0_169] {strides = array<i32: 2, 1>} : memref<448x128xf32, #tpu.memory_space<vmem>>, vector<14x128xf32>
      %c193 = arith.constant 193 : index
      %c0_170 = arith.constant 0 : index
      %233 = tpu.strided_load %arg17[%c193, %c0_170] {strides = array<i32: 2, 1>} : memref<448x128xf32, #tpu.memory_space<vmem>>, vector<14x128xf32>
      %234 = arith.maximumf %232, %233 : vector<14x128xf32>
      %c256_i32_171 = arith.constant 256 : i32
      %235 = arith.muli %arg18, %c256_i32_171 : i32
      %c112_i32_172 = arith.constant 112 : i32
      %236 = arith.addi %235, %c112_i32_172 : i32
      %c1_i32_173 = arith.constant 1 : i32
      %237 = arith.addi %236, %c1_i32_173 : i32
      %238 = arith.index_cast %237 : i32 to index
      %c0_174 = arith.constant 0 : index
      %239 = vector.load %arg14[%238, %c0_174] : memref<2088x128xf32, #tpu.memory_space<vmem>>, vector<14x128xf32>
      tpu.vector_store %arg14[%238, %c0_174], %234 {strides = array<i32>} : memref<2088x128xf32, #tpu.memory_space<vmem>>, vector<14x128xf32>,
      %c224_175 = arith.constant 224 : index
      %c0_176 = arith.constant 0 : index
      %240 = tpu.strided_load %arg17[%c224_175, %c0_176] {strides = array<i32: 2, 1>} : memref<448x128xf32, #tpu.memory_space<vmem>>, vector<14x128xf32>
      %c225 = arith.constant 225 : index
      %c0_177 = arith.constant 0 : index
      %241 = tpu.strided_load %arg17[%c225, %c0_177] {strides = array<i32: 2, 1>} : memref<448x128xf32, #tpu.memory_space<vmem>>, vector<14x128xf32>
      %242 = arith.maximumf %240, %241 : vector<14x128xf32>
      %c256_i32_178 = arith.constant 256 : i32
      %243 = arith.muli %arg18, %c256_i32_178 : i32
      %c128_i32 = arith.constant 128 : i32
      %244 = arith.addi %243, %c128_i32 : i32
      %c1_i32_179 = arith.constant 1 : i32
      %245 = arith.addi %244, %c1_i32_179 : i32
      %246 = arith.index_cast %245 : i32 to index
      %c0_180 = arith.constant 0 : index
      %247 = vector.load %arg14[%246, %c0_180] : memref<2088x128xf32, #tpu.memory_space<vmem>>, vector<14x128xf32>
      tpu.vector_store %arg14[%246, %c0_180], %242 {strides = array<i32>} : memref<2088x128xf32, #tpu.memory_space<vmem>>, vector<14x128xf32>,
      %c256_181 = arith.constant 256 : index
      %c0_182 = arith.constant 0 : index
      %248 = tpu.strided_load %arg17[%c256_181, %c0_182] {strides = array<i32: 2, 1>} : memref<448x128xf32, #tpu.memory_space<vmem>>, vector<14x128xf32>
      %c257 = arith.constant 257 : index
      %c0_183 = arith.constant 0 : index
      %249 = tpu.strided_load %arg17[%c257, %c0_183] {strides = array<i32: 2, 1>} : memref<448x128xf32, #tpu.memory_space<vmem>>, vector<14x128xf32>
      %250 = arith.maximumf %248, %249 : vector<14x128xf32>
      %c256_i32_184 = arith.constant 256 : i32
      %251 = arith.muli %arg18, %c256_i32_184 : i32
      %c144_i32 = arith.constant 144 : i32
      %252 = arith.addi %251, %c144_i32 : i32
      %c1_i32_185 = arith.constant 1 : i32
      %253 = arith.addi %252, %c1_i32_185 : i32
      %254 = arith.index_cast %253 : i32 to index
      %c0_186 = arith.constant 0 : index
      %255 = vector.load %arg14[%254, %c0_186] : memref<2088x128xf32, #tpu.memory_space<vmem>>, vector<14x128xf32>
      tpu.vector_store %arg14[%254, %c0_186], %250 {strides = array<i32>} : memref<2088x128xf32, #tpu.memory_space<vmem>>, vector<14x128xf32>,
      %c288_187 = arith.constant 288 : index
      %c0_188 = arith.constant 0 : index
      %256 = tpu.strided_load %arg17[%c288_187, %c0_188] {strides = array<i32: 2, 1>} : memref<448x128xf32, #tpu.memory_space<vmem>>, vector<14x128xf32>
      %c289 = arith.constant 289 : index
      %c0_189 = arith.constant 0 : index
      %257 = tpu.strided_load %arg17[%c289, %c0_189] {strides = array<i32: 2, 1>} : memref<448x128xf32, #tpu.memory_space<vmem>>, vector<14x128xf32>
      %258 = arith.maximumf %256, %257 : vector<14x128xf32>
      %c256_i32_190 = arith.constant 256 : i32
      %259 = arith.muli %arg18, %c256_i32_190 : i32
      %c160_i32 = arith.constant 160 : i32
      %260 = arith.addi %259, %c160_i32 : i32
      %c1_i32_191 = arith.constant 1 : i32
      %261 = arith.addi %260, %c1_i32_191 : i32
      %262 = arith.index_cast %261 : i32 to index
      %c0_192 = arith.constant 0 : index
      %263 = vector.load %arg14[%262, %c0_192] : memref<2088x128xf32, #tpu.memory_space<vmem>>, vector<14x128xf32>
      tpu.vector_store %arg14[%262, %c0_192], %258 {strides = array<i32>} : memref<2088x128xf32, #tpu.memory_space<vmem>>, vector<14x128xf32>,
      %c320_193 = arith.constant 320 : index
      %c0_194 = arith.constant 0 : index
      %264 = tpu.strided_load %arg17[%c320_193, %c0_194] {strides = array<i32: 2, 1>} : memref<448x128xf32, #tpu.memory_space<vmem>>, vector<14x128xf32>
      %c321 = arith.constant 321 : index
      %c0_195 = arith.constant 0 : index
      %265 = tpu.strided_load %arg17[%c321, %c0_195] {strides = array<i32: 2, 1>} : memref<448x128xf32, #tpu.memory_space<vmem>>, vector<14x128xf32>
      %266 = arith.maximumf %264, %265 : vector<14x128xf32>
      %c256_i32_196 = arith.constant 256 : i32
      %267 = arith.muli %arg18, %c256_i32_196 : i32
      %c176_i32 = arith.constant 176 : i32
      %268 = arith.addi %267, %c176_i32 : i32
      %c1_i32_197 = arith.constant 1 : i32
      %269 = arith.addi %268, %c1_i32_197 : i32
      %270 = arith.index_cast %269 : i32 to index
      %c0_198 = arith.constant 0 : index
      %271 = vector.load %arg14[%270, %c0_198] : memref<2088x128xf32, #tpu.memory_space<vmem>>, vector<14x128xf32>
      tpu.vector_store %arg14[%270, %c0_198], %266 {strides = array<i32>} : memref<2088x128xf32, #tpu.memory_space<vmem>>, vector<14x128xf32>,
      %c352_199 = arith.constant 352 : index
      %c0_200 = arith.constant 0 : index
      %272 = tpu.strided_load %arg17[%c352_199, %c0_200] {strides = array<i32: 2, 1>} : memref<448x128xf32, #tpu.memory_space<vmem>>, vector<14x128xf32>
      %c353 = arith.constant 353 : index
      %c0_201 = arith.constant 0 : index
      %273 = tpu.strided_load %arg17[%c353, %c0_201] {strides = array<i32: 2, 1>} : memref<448x128xf32, #tpu.memory_space<vmem>>, vector<14x128xf32>
      %274 = arith.maximumf %272, %273 : vector<14x128xf32>
      %c256_i32_202 = arith.constant 256 : i32
      %275 = arith.muli %arg18, %c256_i32_202 : i32
      %c192_i32 = arith.constant 192 : i32
      %276 = arith.addi %275, %c192_i32 : i32
      %c1_i32_203 = arith.constant 1 : i32
      %277 = arith.addi %276, %c1_i32_203 : i32
      %278 = arith.index_cast %277 : i32 to index
      %c0_204 = arith.constant 0 : index
      %279 = vector.load %arg14[%278, %c0_204] : memref<2088x128xf32, #tpu.memory_space<vmem>>, vector<14x128xf32>
      tpu.vector_store %arg14[%278, %c0_204], %274 {strides = array<i32>} : memref<2088x128xf32, #tpu.memory_space<vmem>>, vector<14x128xf32>,
      %c384_205 = arith.constant 384 : index
      %c0_206 = arith.constant 0 : index
      %280 = tpu.strided_load %arg17[%c384_205, %c0_206] {strides = array<i32: 2, 1>} : memref<448x128xf32, #tpu.memory_space<vmem>>, vector<14x128xf32>
      %c385 = arith.constant 385 : index
      %c0_207 = arith.constant 0 : index
      %281 = tpu.strided_load %arg17[%c385, %c0_207] {strides = array<i32: 2, 1>} : memref<448x128xf32, #tpu.memory_space<vmem>>, vector<14x128xf32>
      %282 = arith.maximumf %280, %281 : vector<14x128xf32>
      %c256_i32_208 = arith.constant 256 : i32
      %283 = arith.muli %arg18, %c256_i32_208 : i32
      %c208_i32 = arith.constant 208 : i32
      %284 = arith.addi %283, %c208_i32 : i32
      %c1_i32_209 = arith.constant 1 : i32
      %285 = arith.addi %284, %c1_i32_209 : i32
      %286 = arith.index_cast %285 : i32 to index
      %c0_210 = arith.constant 0 : index
      %287 = vector.load %arg14[%286, %c0_210] : memref<2088x128xf32, #tpu.memory_space<vmem>>, vector<14x128xf32>
      tpu.vector_store %arg14[%286, %c0_210], %282 {strides = array<i32>} : memref<2088x128xf32, #tpu.memory_space<vmem>>, vector<14x128xf32>,
      %c416_211 = arith.constant 416 : index
      %c0_212 = arith.constant 0 : index
      %288 = tpu.strided_load %arg17[%c416_211, %c0_212] {strides = array<i32: 2, 1>} : memref<448x128xf32, #tpu.memory_space<vmem>>, vector<14x128xf32>
      %c417 = arith.constant 417 : index
      %c0_213 = arith.constant 0 : index
      %289 = tpu.strided_load %arg17[%c417, %c0_213] {strides = array<i32: 2, 1>} : memref<448x128xf32, #tpu.memory_space<vmem>>, vector<14x128xf32>
      %290 = arith.maximumf %288, %289 : vector<14x128xf32>
      %c256_i32_214 = arith.constant 256 : i32
      %291 = arith.muli %arg18, %c256_i32_214 : i32
      %c224_i32_215 = arith.constant 224 : i32
      %292 = arith.addi %291, %c224_i32_215 : i32
      %c1_i32_216 = arith.constant 1 : i32
      %293 = arith.addi %292, %c1_i32_216 : i32
      %294 = arith.index_cast %293 : i32 to index
      %c0_217 = arith.constant 0 : index
      %295 = vector.load %arg14[%294, %c0_217] : memref<2088x128xf32, #tpu.memory_space<vmem>>, vector<14x128xf32>
      tpu.vector_store %arg14[%294, %c0_217], %290 {strides = array<i32>} : memref<2088x128xf32, #tpu.memory_space<vmem>>, vector<14x128xf32>,
    }
    %c8_i32_11 = arith.constant 8 : i32
    %c0_12 = arith.constant 0 : index
    %c0_13 = arith.constant 0 : index
    %8 = vector.load %arg5[%c0_12, %c0_13] : memref<1x128xf32, #tpu.memory_space<vmem>>, vector<1x128xf32>
    %c0_i32_14 = arith.constant 0 : i32
    %c8_i32_15 = arith.constant 8 : i32
    %9 = arith.addi %c0_i32_14, %c8_i32_15 : i32
    %c1_i32_16 = arith.constant 1 : i32
    scf.for %arg18 = %c0_i32_14 to %9 step %c1_i32_16  : i32 {
      %c256_i32 = arith.constant 256 : i32
      %71 = arith.muli %arg18, %c256_i32 : i32
      %72 = tpu.assume_multiple %71, 256 : i32
      %c0_i32_88 = arith.constant 0 : i32
      %73 = arith.addi %72, %c0_i32_88 : i32
      %74 = arith.index_cast %73 : i32 to index
      %c0_89 = arith.constant 0 : index
      %75 = vector.load %arg14[%74, %c0_89] : memref<2088x128xf32, #tpu.memory_space<vmem>>, vector<256x128xf32>
      %c0_90 = arith.constant 0 : index
      %c0_91 = arith.constant 0 : index
      %c0_92 = arith.constant 0 : index
      %76 = vector.load %arg4[%c0_90, %c0_91, %c0_92] : memref<9x128x128xf32, #tpu.memory_space<vmem>>, vector<1x128x128xf32>
      %77 = vector.shape_cast %76 : vector<1x128x128xf32> to vector<128x128xf32>
      %cst_93 = arith.constant dense<0.000000e+00> : vector<256x128xf32>
      %78 = tpu.matmul %75, %77, %cst_93 {dimension_numbers = #tpu.dot_dimension_numbers<[1], [0], [0], [1], [0, 0, 1, 1], [], []>} : vector<256x128xf32>, vector<128x128xf32>, vector<256x128xf32> -> vector<256x128xf32>
      %c1_i32_94 = arith.constant 1 : i32
      %79 = arith.addi %72, %c1_i32_94 : i32
      %80 = arith.index_cast %79 : i32 to index
      %c0_95 = arith.constant 0 : index
      %81 = vector.load %arg14[%80, %c0_95] : memref<2088x128xf32, #tpu.memory_space<vmem>>, vector<256x128xf32>
      %c1_96 = arith.constant 1 : index
      %c0_97 = arith.constant 0 : index
      %c0_98 = arith.constant 0 : index
      %82 = vector.load %arg4[%c1_96, %c0_97, %c0_98] : memref<9x128x128xf32, #tpu.memory_space<vmem>>, vector<1x128x128xf32>
      %83 = vector.shape_cast %82 : vector<1x128x128xf32> to vector<128x128xf32>
      %cst_99 = arith.constant dense<0.000000e+00> : vector<256x128xf32>
      %84 = tpu.matmul %81, %83, %cst_99 {dimension_numbers = #tpu.dot_dimension_numbers<[1], [0], [0], [1], [0, 0, 1, 1], [], []>} : vector<256x128xf32>, vector<128x128xf32>, vector<256x128xf32> -> vector<256x128xf32>
      %85 = arith.addf %78, %84 : vector<256x128xf32>
      %c2_i32 = arith.constant 2 : i32
      %86 = arith.addi %72, %c2_i32 : i32
      %87 = arith.index_cast %86 : i32 to index
      %c0_100 = arith.constant 0 : index
      %88 = vector.load %arg14[%87, %c0_100] : memref<2088x128xf32, #tpu.memory_space<vmem>>, vector<256x128xf32>
      %c2_101 = arith.constant 2 : index
      %c0_102 = arith.constant 0 : index
      %c0_103 = arith.constant 0 : index
      %89 = vector.load %arg4[%c2_101, %c0_102, %c0_103] : memref<9x128x128xf32, #tpu.memory_space<vmem>>, vector<1x128x128xf32>
      %90 = vector.shape_cast %89 : vector<1x128x128xf32> to vector<128x128xf32>
      %cst_104 = arith.constant dense<0.000000e+00> : vector<256x128xf32>
      %91 = tpu.matmul %88, %90, %cst_104 {dimension_numbers = #tpu.dot_dimension_numbers<[1], [0], [0], [1], [0, 0, 1, 1], [], []>} : vector<256x128xf32>, vector<128x128xf32>, vector<256x128xf32> -> vector<256x128xf32>
      %92 = arith.addf %85, %91 : vector<256x128xf32>
      %c16_i32 = arith.constant 16 : i32
      %93 = arith.addi %72, %c16_i32 : i32
      %94 = arith.index_cast %93 : i32 to index
      %c0_105 = arith.constant 0 : index
      %95 = vector.load %arg14[%94, %c0_105] : memref<2088x128xf32, #tpu.memory_space<vmem>>, vector<256x128xf32>
      %c3_106 = arith.constant 3 : index
      %c0_107 = arith.constant 0 : index
      %c0_108 = arith.constant 0 : index
      %96 = vector.load %arg4[%c3_106, %c0_107, %c0_108] : memref<9x128x128xf32, #tpu.memory_space<vmem>>, vector<1x128x128xf32>
      %97 = vector.shape_cast %96 : vector<1x128x128xf32> to vector<128x128xf32>
      %cst_109 = arith.constant dense<0.000000e+00> : vector<256x128xf32>
      %98 = tpu.matmul %95, %97, %cst_109 {dimension_numbers = #tpu.dot_dimension_numbers<[1], [0], [0], [1], [0, 0, 1, 1], [], []>} : vector<256x128xf32>, vector<128x128xf32>, vector<256x128xf32> -> vector<256x128xf32>
      %99 = arith.addf %92, %98 : vector<256x128xf32>
      %c17_i32 = arith.constant 17 : i32
      %100 = arith.addi %72, %c17_i32 : i32
      %101 = arith.index_cast %100 : i32 to index
      %c0_110 = arith.constant 0 : index
      %102 = vector.load %arg14[%101, %c0_110] : memref<2088x128xf32, #tpu.memory_space<vmem>>, vector<256x128xf32>
      %c4_111 = arith.constant 4 : index
      %c0_112 = arith.constant 0 : index
      %c0_113 = arith.constant 0 : index
      %103 = vector.load %arg4[%c4_111, %c0_112, %c0_113] : memref<9x128x128xf32, #tpu.memory_space<vmem>>, vector<1x128x128xf32>
      %104 = vector.shape_cast %103 : vector<1x128x128xf32> to vector<128x128xf32>
      %cst_114 = arith.constant dense<0.000000e+00> : vector<256x128xf32>
      %105 = tpu.matmul %102, %104, %cst_114 {dimension_numbers = #tpu.dot_dimension_numbers<[1], [0], [0], [1], [0, 0, 1, 1], [], []>} : vector<256x128xf32>, vector<128x128xf32>, vector<256x128xf32> -> vector<256x128xf32>
      %106 = arith.addf %99, %105 : vector<256x128xf32>
      %c18_i32 = arith.constant 18 : i32
      %107 = arith.addi %72, %c18_i32 : i32
      %108 = arith.index_cast %107 : i32 to index
      %c0_115 = arith.constant 0 : index
      %109 = vector.load %arg14[%108, %c0_115] : memref<2088x128xf32, #tpu.memory_space<vmem>>, vector<256x128xf32>
      %c5_116 = arith.constant 5 : index
      %c0_117 = arith.constant 0 : index
      %c0_118 = arith.constant 0 : index
      %110 = vector.load %arg4[%c5_116, %c0_117, %c0_118] : memref<9x128x128xf32, #tpu.memory_space<vmem>>, vector<1x128x128xf32>
      %111 = vector.shape_cast %110 : vector<1x128x128xf32> to vector<128x128xf32>
      %cst_119 = arith.constant dense<0.000000e+00> : vector<256x128xf32>
      %112 = tpu.matmul %109, %111, %cst_119 {dimension_numbers = #tpu.dot_dimension_numbers<[1], [0], [0], [1], [0, 0, 1, 1], [], []>} : vector<256x128xf32>, vector<128x128xf32>, vector<256x128xf32> -> vector<256x128xf32>
      %113 = arith.addf %106, %112 : vector<256x128xf32>
      %c32_i32 = arith.constant 32 : i32
      %114 = arith.addi %72, %c32_i32 : i32
      %115 = arith.index_cast %114 : i32 to index
      %c0_120 = arith.constant 0 : index
      %116 = vector.load %arg14[%115, %c0_120] : memref<2088x128xf32, #tpu.memory_space<vmem>>, vector<256x128xf32>
      %c6_121 = arith.constant 6 : index
      %c0_122 = arith.constant 0 : index
      %c0_123 = arith.constant 0 : index
      %117 = vector.load %arg4[%c6_121, %c0_122, %c0_123] : memref<9x128x128xf32, #tpu.memory_space<vmem>>, vector<1x128x128xf32>
      %118 = vector.shape_cast %117 : vector<1x128x128xf32> to vector<128x128xf32>
      %cst_124 = arith.constant dense<0.000000e+00> : vector<256x128xf32>
      %119 = tpu.matmul %116, %118, %cst_124 {dimension_numbers = #tpu.dot_dimension_numbers<[1], [0], [0], [1], [0, 0, 1, 1], [], []>} : vector<256x128xf32>, vector<128x128xf32>, vector<256x128xf32> -> vector<256x128xf32>
      %120 = arith.addf %113, %119 : vector<256x128xf32>
      %c33_i32 = arith.constant 33 : i32
      %121 = arith.addi %72, %c33_i32 : i32
      %122 = arith.index_cast %121 : i32 to index
      %c0_125 = arith.constant 0 : index
      %123 = vector.load %arg14[%122, %c0_125] : memref<2088x128xf32, #tpu.memory_space<vmem>>, vector<256x128xf32>
      %c7_126 = arith.constant 7 : index
      %c0_127 = arith.constant 0 : index
      %c0_128 = arith.constant 0 : index
      %124 = vector.load %arg4[%c7_126, %c0_127, %c0_128] : memref<9x128x128xf32, #tpu.memory_space<vmem>>, vector<1x128x128xf32>
      %125 = vector.shape_cast %124 : vector<1x128x128xf32> to vector<128x128xf32>
      %cst_129 = arith.constant dense<0.000000e+00> : vector<256x128xf32>
      %126 = tpu.matmul %123, %125, %cst_129 {dimension_numbers = #tpu.dot_dimension_numbers<[1], [0], [0], [1], [0, 0, 1, 1], [], []>} : vector<256x128xf32>, vector<128x128xf32>, vector<256x128xf32> -> vector<256x128xf32>
      %127 = arith.addf %120, %126 : vector<256x128xf32>
      %c34_i32 = arith.constant 34 : i32
      %128 = arith.addi %72, %c34_i32 : i32
      %129 = arith.index_cast %128 : i32 to index
      %c0_130 = arith.constant 0 : index
      %130 = vector.load %arg14[%129, %c0_130] : memref<2088x128xf32, #tpu.memory_space<vmem>>, vector<256x128xf32>
      %c8_131 = arith.constant 8 : index
      %c0_132 = arith.constant 0 : index
      %c0_133 = arith.constant 0 : index
      %131 = vector.load %arg4[%c8_131, %c0_132, %c0_133] : memref<9x128x128xf32, #tpu.memory_space<vmem>>, vector<1x128x128xf32>
      %132 = vector.shape_cast %131 : vector<1x128x128xf32> to vector<128x128xf32>
      %cst_134 = arith.constant dense<0.000000e+00> : vector<256x128xf32>
      %133 = tpu.matmul %130, %132, %cst_134 {dimension_numbers = #tpu.dot_dimension_numbers<[1], [0], [0], [1], [0, 0, 1, 1], [], []>} : vector<256x128xf32>, vector<128x128xf32>, vector<256x128xf32> -> vector<256x128xf32>
      %134 = arith.addf %127, %133 : vector<256x128xf32>
      %135 = vector.broadcast %8 : vector<1x128xf32> to vector<256x128xf32>
      %136 = arith.addf %134, %135 : vector<256x128xf32>
      %cst_135 = arith.constant 0.000000e+00 : f32
      %137 = vector.broadcast %cst_135 : f32 to vector<256x128xf32>
      %138 = arith.maximumf %136, %137 : vector<256x128xf32>
      %139 = arith.index_cast %72 : i32 to index
      %c0_136 = arith.constant 0 : index
      %140 = vector.load %arg13[%139, %c0_136] : memref<6400x128xf32, #tpu.memory_space<vmem>>, vector<256x128xf32>
      tpu.vector_store %arg13[%139, %c0_136], %138 {strides = array<i32>} : memref<6400x128xf32, #tpu.memory_space<vmem>>, vector<256x128xf32>,
    }
    %c8_i32_17 = arith.constant 8 : i32
    %c0_i32_18 = arith.constant 0 : i32
    %c8_i32_19 = arith.constant 8 : i32
    %10 = arith.addi %c0_i32_18, %c8_i32_19 : i32
    %c1_i32_20 = arith.constant 1 : i32
    scf.for %arg18 = %c0_i32_18 to %10 step %c1_i32_20  : i32 {
      %c256_i32 = arith.constant 256 : i32
      %71 = arith.muli %arg18, %c256_i32 : i32
      %c0_i32_88 = arith.constant 0 : i32
      %72 = arith.addi %71, %c0_i32_88 : i32
      %73 = arith.index_cast %72 : i32 to index
      %c0_89 = arith.constant 0 : index
      %74 = vector.load %arg13[%73, %c0_89] : memref<6400x128xf32, #tpu.memory_space<vmem>>, vector<14x128xf32>
      %c16_i32 = arith.constant 16 : i32
      %75 = arith.addi %71, %c16_i32 : i32
      %76 = arith.index_cast %75 : i32 to index
      %c0_90 = arith.constant 0 : index
      %77 = vector.load %arg13[%76, %c0_90] : memref<6400x128xf32, #tpu.memory_space<vmem>>, vector<14x128xf32>
      %78 = arith.maximumf %74, %77 : vector<14x128xf32>
      %c0_91 = arith.constant 0 : index
      %c0_92 = arith.constant 0 : index
      %79 = vector.load %arg17[%c0_91, %c0_92] : memref<448x128xf32, #tpu.memory_space<vmem>>, vector<14x128xf32>
      tpu.vector_store %arg17[%c0_91, %c0_92], %78 {strides = array<i32>} : memref<448x128xf32, #tpu.memory_space<vmem>>, vector<14x128xf32>,
      %c32_i32 = arith.constant 32 : i32
      %80 = arith.addi %71, %c32_i32 : i32
      %81 = arith.index_cast %80 : i32 to index
      %c0_93 = arith.constant 0 : index
      %82 = vector.load %arg13[%81, %c0_93] : memref<6400x128xf32, #tpu.memory_space<vmem>>, vector<14x128xf32>
      %c48_i32 = arith.constant 48 : i32
      %83 = arith.addi %71, %c48_i32 : i32
      %84 = arith.index_cast %83 : i32 to index
      %c0_94 = arith.constant 0 : index
      %85 = vector.load %arg13[%84, %c0_94] : memref<6400x128xf32, #tpu.memory_space<vmem>>, vector<14x128xf32>
      %86 = arith.maximumf %82, %85 : vector<14x128xf32>
      %c16 = arith.constant 16 : index
      %c0_95 = arith.constant 0 : index
      %87 = vector.load %arg17[%c16, %c0_95] : memref<448x128xf32, #tpu.memory_space<vmem>>, vector<14x128xf32>
      tpu.vector_store %arg17[%c16, %c0_95], %86 {strides = array<i32>} : memref<448x128xf32, #tpu.memory_space<vmem>>, vector<14x128xf32>,
      %c64_i32 = arith.constant 64 : i32
      %88 = arith.addi %71, %c64_i32 : i32
      %89 = arith.index_cast %88 : i32 to index
      %c0_96 = arith.constant 0 : index
      %90 = vector.load %arg13[%89, %c0_96] : memref<6400x128xf32, #tpu.memory_space<vmem>>, vector<14x128xf32>
      %c80_i32 = arith.constant 80 : i32
      %91 = arith.addi %71, %c80_i32 : i32
      %92 = arith.index_cast %91 : i32 to index
      %c0_97 = arith.constant 0 : index
      %93 = vector.load %arg13[%92, %c0_97] : memref<6400x128xf32, #tpu.memory_space<vmem>>, vector<14x128xf32>
      %94 = arith.maximumf %90, %93 : vector<14x128xf32>
      %c32 = arith.constant 32 : index
      %c0_98 = arith.constant 0 : index
      %95 = vector.load %arg17[%c32, %c0_98] : memref<448x128xf32, #tpu.memory_space<vmem>>, vector<14x128xf32>
      tpu.vector_store %arg17[%c32, %c0_98], %94 {strides = array<i32>} : memref<448x128xf32, #tpu.memory_space<vmem>>, vector<14x128xf32>,
      %c96_i32 = arith.constant 96 : i32
      %96 = arith.addi %71, %c96_i32 : i32
      %97 = arith.index_cast %96 : i32 to index
      %c0_99 = arith.constant 0 : index
      %98 = vector.load %arg13[%97, %c0_99] : memref<6400x128xf32, #tpu.memory_space<vmem>>, vector<14x128xf32>
      %c112_i32 = arith.constant 112 : i32
      %99 = arith.addi %71, %c112_i32 : i32
      %100 = arith.index_cast %99 : i32 to index
      %c0_100 = arith.constant 0 : index
      %101 = vector.load %arg13[%100, %c0_100] : memref<6400x128xf32, #tpu.memory_space<vmem>>, vector<14x128xf32>
      %102 = arith.maximumf %98, %101 : vector<14x128xf32>
      %c48 = arith.constant 48 : index
      %c0_101 = arith.constant 0 : index
      %103 = vector.load %arg17[%c48, %c0_101] : memref<448x128xf32, #tpu.memory_space<vmem>>, vector<14x128xf32>
      tpu.vector_store %arg17[%c48, %c0_101], %102 {strides = array<i32>} : memref<448x128xf32, #tpu.memory_space<vmem>>, vector<14x128xf32>,
      %c128_i32 = arith.constant 128 : i32
      %104 = arith.addi %71, %c128_i32 : i32
      %105 = arith.index_cast %104 : i32 to index
      %c0_102 = arith.constant 0 : index
      %106 = vector.load %arg13[%105, %c0_102] : memref<6400x128xf32, #tpu.memory_space<vmem>>, vector<14x128xf32>
      %c144_i32 = arith.constant 144 : i32
      %107 = arith.addi %71, %c144_i32 : i32
      %108 = arith.index_cast %107 : i32 to index
      %c0_103 = arith.constant 0 : index
      %109 = vector.load %arg13[%108, %c0_103] : memref<6400x128xf32, #tpu.memory_space<vmem>>, vector<14x128xf32>
      %110 = arith.maximumf %106, %109 : vector<14x128xf32>
      %c64 = arith.constant 64 : index
      %c0_104 = arith.constant 0 : index
      %111 = vector.load %arg17[%c64, %c0_104] : memref<448x128xf32, #tpu.memory_space<vmem>>, vector<14x128xf32>
      tpu.vector_store %arg17[%c64, %c0_104], %110 {strides = array<i32>} : memref<448x128xf32, #tpu.memory_space<vmem>>, vector<14x128xf32>,
      %c160_i32 = arith.constant 160 : i32
      %112 = arith.addi %71, %c160_i32 : i32
      %113 = arith.index_cast %112 : i32 to index
      %c0_105 = arith.constant 0 : index
      %114 = vector.load %arg13[%113, %c0_105] : memref<6400x128xf32, #tpu.memory_space<vmem>>, vector<14x128xf32>
      %c176_i32 = arith.constant 176 : i32
      %115 = arith.addi %71, %c176_i32 : i32
      %116 = arith.index_cast %115 : i32 to index
      %c0_106 = arith.constant 0 : index
      %117 = vector.load %arg13[%116, %c0_106] : memref<6400x128xf32, #tpu.memory_space<vmem>>, vector<14x128xf32>
      %118 = arith.maximumf %114, %117 : vector<14x128xf32>
      %c80 = arith.constant 80 : index
      %c0_107 = arith.constant 0 : index
      %119 = vector.load %arg17[%c80, %c0_107] : memref<448x128xf32, #tpu.memory_space<vmem>>, vector<14x128xf32>
      tpu.vector_store %arg17[%c80, %c0_107], %118 {strides = array<i32>} : memref<448x128xf32, #tpu.memory_space<vmem>>, vector<14x128xf32>,
      %c192_i32 = arith.constant 192 : i32
      %120 = arith.addi %71, %c192_i32 : i32
      %121 = arith.index_cast %120 : i32 to index
      %c0_108 = arith.constant 0 : index
      %122 = vector.load %arg13[%121, %c0_108] : memref<6400x128xf32, #tpu.memory_space<vmem>>, vector<14x128xf32>
      %c208_i32 = arith.constant 208 : i32
      %123 = arith.addi %71, %c208_i32 : i32
      %124 = arith.index_cast %123 : i32 to index
      %c0_109 = arith.constant 0 : index
      %125 = vector.load %arg13[%124, %c0_109] : memref<6400x128xf32, #tpu.memory_space<vmem>>, vector<14x128xf32>
      %126 = arith.maximumf %122, %125 : vector<14x128xf32>
      %c96 = arith.constant 96 : index
      %c0_110 = arith.constant 0 : index
      %127 = vector.load %arg17[%c96, %c0_110] : memref<448x128xf32, #tpu.memory_space<vmem>>, vector<14x128xf32>
      tpu.vector_store %arg17[%c96, %c0_110], %126 {strides = array<i32>} : memref<448x128xf32, #tpu.memory_space<vmem>>, vector<14x128xf32>,
      %c0_111 = arith.constant 0 : index
      %c0_112 = arith.constant 0 : index
      %128 = tpu.strided_load %arg17[%c0_111, %c0_112] {strides = array<i32: 2, 1>} : memref<448x128xf32, #tpu.memory_space<vmem>>, vector<7x128xf32>
      %c1_113 = arith.constant 1 : index
      %c0_114 = arith.constant 0 : index
      %129 = tpu.strided_load %arg17[%c1_113, %c0_114] {strides = array<i32: 2, 1>} : memref<448x128xf32, #tpu.memory_space<vmem>>, vector<7x128xf32>
      %130 = arith.maximumf %128, %129 : vector<7x128xf32>
      %c160_i32_115 = arith.constant 160 : i32
      %131 = arith.muli %arg18, %c160_i32_115 : i32
      %c16_i32_116 = arith.constant 16 : i32
      %132 = arith.addi %131, %c16_i32_116 : i32
      %c1_i32_117 = arith.constant 1 : i32
      %133 = arith.addi %132, %c1_i32_117 : i32
      %134 = arith.index_cast %133 : i32 to index
      %c0_118 = arith.constant 0 : index
      %135 = vector.load %arg15[%134, %c0_118] : memref<1320x128xf32, #tpu.memory_space<vmem>>, vector<7x128xf32>
      tpu.vector_store %arg15[%134, %c0_118], %130 {strides = array<i32>} : memref<1320x128xf32, #tpu.memory_space<vmem>>, vector<7x128xf32>,
      %c16_119 = arith.constant 16 : index
      %c0_120 = arith.constant 0 : index
      %136 = tpu.strided_load %arg17[%c16_119, %c0_120] {strides = array<i32: 2, 1>} : memref<448x128xf32, #tpu.memory_space<vmem>>, vector<7x128xf32>
      %c17 = arith.constant 17 : index
      %c0_121 = arith.constant 0 : index
      %137 = tpu.strided_load %arg17[%c17, %c0_121] {strides = array<i32: 2, 1>} : memref<448x128xf32, #tpu.memory_space<vmem>>, vector<7x128xf32>
      %138 = arith.maximumf %136, %137 : vector<7x128xf32>
      %c160_i32_122 = arith.constant 160 : i32
      %139 = arith.muli %arg18, %c160_i32_122 : i32
      %c32_i32_123 = arith.constant 32 : i32
      %140 = arith.addi %139, %c32_i32_123 : i32
      %c1_i32_124 = arith.constant 1 : i32
      %141 = arith.addi %140, %c1_i32_124 : i32
      %142 = arith.index_cast %141 : i32 to index
      %c0_125 = arith.constant 0 : index
      %143 = vector.load %arg15[%142, %c0_125] : memref<1320x128xf32, #tpu.memory_space<vmem>>, vector<7x128xf32>
      tpu.vector_store %arg15[%142, %c0_125], %138 {strides = array<i32>} : memref<1320x128xf32, #tpu.memory_space<vmem>>, vector<7x128xf32>,
      %c32_126 = arith.constant 32 : index
      %c0_127 = arith.constant 0 : index
      %144 = tpu.strided_load %arg17[%c32_126, %c0_127] {strides = array<i32: 2, 1>} : memref<448x128xf32, #tpu.memory_space<vmem>>, vector<7x128xf32>
      %c33 = arith.constant 33 : index
      %c0_128 = arith.constant 0 : index
      %145 = tpu.strided_load %arg17[%c33, %c0_128] {strides = array<i32: 2, 1>} : memref<448x128xf32, #tpu.memory_space<vmem>>, vector<7x128xf32>
      %146 = arith.maximumf %144, %145 : vector<7x128xf32>
      %c160_i32_129 = arith.constant 160 : i32
      %147 = arith.muli %arg18, %c160_i32_129 : i32
      %c48_i32_130 = arith.constant 48 : i32
      %148 = arith.addi %147, %c48_i32_130 : i32
      %c1_i32_131 = arith.constant 1 : i32
      %149 = arith.addi %148, %c1_i32_131 : i32
      %150 = arith.index_cast %149 : i32 to index
      %c0_132 = arith.constant 0 : index
      %151 = vector.load %arg15[%150, %c0_132] : memref<1320x128xf32, #tpu.memory_space<vmem>>, vector<7x128xf32>
      tpu.vector_store %arg15[%150, %c0_132], %146 {strides = array<i32>} : memref<1320x128xf32, #tpu.memory_space<vmem>>, vector<7x128xf32>,
      %c48_133 = arith.constant 48 : index
      %c0_134 = arith.constant 0 : index
      %152 = tpu.strided_load %arg17[%c48_133, %c0_134] {strides = array<i32: 2, 1>} : memref<448x128xf32, #tpu.memory_space<vmem>>, vector<7x128xf32>
      %c49 = arith.constant 49 : index
      %c0_135 = arith.constant 0 : index
      %153 = tpu.strided_load %arg17[%c49, %c0_135] {strides = array<i32: 2, 1>} : memref<448x128xf32, #tpu.memory_space<vmem>>, vector<7x128xf32>
      %154 = arith.maximumf %152, %153 : vector<7x128xf32>
      %c160_i32_136 = arith.constant 160 : i32
      %155 = arith.muli %arg18, %c160_i32_136 : i32
      %c64_i32_137 = arith.constant 64 : i32
      %156 = arith.addi %155, %c64_i32_137 : i32
      %c1_i32_138 = arith.constant 1 : i32
      %157 = arith.addi %156, %c1_i32_138 : i32
      %158 = arith.index_cast %157 : i32 to index
      %c0_139 = arith.constant 0 : index
      %159 = vector.load %arg15[%158, %c0_139] : memref<1320x128xf32, #tpu.memory_space<vmem>>, vector<7x128xf32>
      tpu.vector_store %arg15[%158, %c0_139], %154 {strides = array<i32>} : memref<1320x128xf32, #tpu.memory_space<vmem>>, vector<7x128xf32>,
      %c64_140 = arith.constant 64 : index
      %c0_141 = arith.constant 0 : index
      %160 = tpu.strided_load %arg17[%c64_140, %c0_141] {strides = array<i32: 2, 1>} : memref<448x128xf32, #tpu.memory_space<vmem>>, vector<7x128xf32>
      %c65 = arith.constant 65 : index
      %c0_142 = arith.constant 0 : index
      %161 = tpu.strided_load %arg17[%c65, %c0_142] {strides = array<i32: 2, 1>} : memref<448x128xf32, #tpu.memory_space<vmem>>, vector<7x128xf32>
      %162 = arith.maximumf %160, %161 : vector<7x128xf32>
      %c160_i32_143 = arith.constant 160 : i32
      %163 = arith.muli %arg18, %c160_i32_143 : i32
      %c80_i32_144 = arith.constant 80 : i32
      %164 = arith.addi %163, %c80_i32_144 : i32
      %c1_i32_145 = arith.constant 1 : i32
      %165 = arith.addi %164, %c1_i32_145 : i32
      %166 = arith.index_cast %165 : i32 to index
      %c0_146 = arith.constant 0 : index
      %167 = vector.load %arg15[%166, %c0_146] : memref<1320x128xf32, #tpu.memory_space<vmem>>, vector<7x128xf32>
      tpu.vector_store %arg15[%166, %c0_146], %162 {strides = array<i32>} : memref<1320x128xf32, #tpu.memory_space<vmem>>, vector<7x128xf32>,
      %c80_147 = arith.constant 80 : index
      %c0_148 = arith.constant 0 : index
      %168 = tpu.strided_load %arg17[%c80_147, %c0_148] {strides = array<i32: 2, 1>} : memref<448x128xf32, #tpu.memory_space<vmem>>, vector<7x128xf32>
      %c81 = arith.constant 81 : index
      %c0_149 = arith.constant 0 : index
      %169 = tpu.strided_load %arg17[%c81, %c0_149] {strides = array<i32: 2, 1>} : memref<448x128xf32, #tpu.memory_space<vmem>>, vector<7x128xf32>
      %170 = arith.maximumf %168, %169 : vector<7x128xf32>
      %c160_i32_150 = arith.constant 160 : i32
      %171 = arith.muli %arg18, %c160_i32_150 : i32
      %c96_i32_151 = arith.constant 96 : i32
      %172 = arith.addi %171, %c96_i32_151 : i32
      %c1_i32_152 = arith.constant 1 : i32
      %173 = arith.addi %172, %c1_i32_152 : i32
      %174 = arith.index_cast %173 : i32 to index
      %c0_153 = arith.constant 0 : index
      %175 = vector.load %arg15[%174, %c0_153] : memref<1320x128xf32, #tpu.memory_space<vmem>>, vector<7x128xf32>
      tpu.vector_store %arg15[%174, %c0_153], %170 {strides = array<i32>} : memref<1320x128xf32, #tpu.memory_space<vmem>>, vector<7x128xf32>,
      %c96_154 = arith.constant 96 : index
      %c0_155 = arith.constant 0 : index
      %176 = tpu.strided_load %arg17[%c96_154, %c0_155] {strides = array<i32: 2, 1>} : memref<448x128xf32, #tpu.memory_space<vmem>>, vector<7x128xf32>
      %c97 = arith.constant 97 : index
      %c0_156 = arith.constant 0 : index
      %177 = tpu.strided_load %arg17[%c97, %c0_156] {strides = array<i32: 2, 1>} : memref<448x128xf32, #tpu.memory_space<vmem>>, vector<7x128xf32>
      %178 = arith.maximumf %176, %177 : vector<7x128xf32>
      %c160_i32_157 = arith.constant 160 : i32
      %179 = arith.muli %arg18, %c160_i32_157 : i32
      %c112_i32_158 = arith.constant 112 : i32
      %180 = arith.addi %179, %c112_i32_158 : i32
      %c1_i32_159 = arith.constant 1 : i32
      %181 = arith.addi %180, %c1_i32_159 : i32
      %182 = arith.index_cast %181 : i32 to index
      %c0_160 = arith.constant 0 : index
      %183 = vector.load %arg15[%182, %c0_160] : memref<1320x128xf32, #tpu.memory_space<vmem>>, vector<7x128xf32>
      tpu.vector_store %arg15[%182, %c0_160], %178 {strides = array<i32>} : memref<1320x128xf32, #tpu.memory_space<vmem>>, vector<7x128xf32>,
    }
    %c8_i32_21 = arith.constant 8 : i32
    %c0_22 = arith.constant 0 : index
    %c0_23 = arith.constant 0 : index
    %11 = vector.load %arg7[%c0_22, %c0_23] : memref<1x128xf32, #tpu.memory_space<vmem>>, vector<1x128xf32>
    %c0_i32_24 = arith.constant 0 : i32
    %c5_i32 = arith.constant 5 : i32
    %12 = arith.addi %c0_i32_24, %c5_i32 : i32
    %c1_i32_25 = arith.constant 1 : i32
    scf.for %arg18 = %c0_i32_24 to %12 step %c1_i32_25  : i32 {
      %c256_i32 = arith.constant 256 : i32
      %71 = arith.muli %arg18, %c256_i32 : i32
      %72 = tpu.assume_multiple %71, 256 : i32
      %c0_i32_88 = arith.constant 0 : i32
      %73 = arith.addi %72, %c0_i32_88 : i32
      %74 = arith.index_cast %73 : i32 to index
      %c0_89 = arith.constant 0 : index
      %75 = vector.load %arg15[%74, %c0_89] : memref<1320x128xf32, #tpu.memory_space<vmem>>, vector<256x128xf32>
      %c0_90 = arith.constant 0 : index
      %c0_91 = arith.constant 0 : index
      %c0_92 = arith.constant 0 : index
      %76 = vector.load %arg6[%c0_90, %c0_91, %c0_92] : memref<9x128x128xf32, #tpu.memory_space<vmem>>, vector<1x128x128xf32>
      %77 = vector.shape_cast %76 : vector<1x128x128xf32> to vector<128x128xf32>
      %cst_93 = arith.constant dense<0.000000e+00> : vector<256x128xf32>
      %78 = tpu.matmul %75, %77, %cst_93 {dimension_numbers = #tpu.dot_dimension_numbers<[1], [0], [0], [1], [0, 0, 1, 1], [], []>} : vector<256x128xf32>, vector<128x128xf32>, vector<256x128xf32> -> vector<256x128xf32>
      %c1_i32_94 = arith.constant 1 : i32
      %79 = arith.addi %72, %c1_i32_94 : i32
      %80 = arith.index_cast %79 : i32 to index
      %c0_95 = arith.constant 0 : index
      %81 = vector.load %arg15[%80, %c0_95] : memref<1320x128xf32, #tpu.memory_space<vmem>>, vector<256x128xf32>
      %c1_96 = arith.constant 1 : index
      %c0_97 = arith.constant 0 : index
      %c0_98 = arith.constant 0 : index
      %82 = vector.load %arg6[%c1_96, %c0_97, %c0_98] : memref<9x128x128xf32, #tpu.memory_space<vmem>>, vector<1x128x128xf32>
      %83 = vector.shape_cast %82 : vector<1x128x128xf32> to vector<128x128xf32>
      %cst_99 = arith.constant dense<0.000000e+00> : vector<256x128xf32>
      %84 = tpu.matmul %81, %83, %cst_99 {dimension_numbers = #tpu.dot_dimension_numbers<[1], [0], [0], [1], [0, 0, 1, 1], [], []>} : vector<256x128xf32>, vector<128x128xf32>, vector<256x128xf32> -> vector<256x128xf32>
      %85 = arith.addf %78, %84 : vector<256x128xf32>
      %c2_i32 = arith.constant 2 : i32
      %86 = arith.addi %72, %c2_i32 : i32
      %87 = arith.index_cast %86 : i32 to index
      %c0_100 = arith.constant 0 : index
      %88 = vector.load %arg15[%87, %c0_100] : memref<1320x128xf32, #tpu.memory_space<vmem>>, vector<256x128xf32>
      %c2_101 = arith.constant 2 : index
      %c0_102 = arith.constant 0 : index
      %c0_103 = arith.constant 0 : index
      %89 = vector.load %arg6[%c2_101, %c0_102, %c0_103] : memref<9x128x128xf32, #tpu.memory_space<vmem>>, vector<1x128x128xf32>
      %90 = vector.shape_cast %89 : vector<1x128x128xf32> to vector<128x128xf32>
      %cst_104 = arith.constant dense<0.000000e+00> : vector<256x128xf32>
      %91 = tpu.matmul %88, %90, %cst_104 {dimension_numbers = #tpu.dot_dimension_numbers<[1], [0], [0], [1], [0, 0, 1, 1], [], []>} : vector<256x128xf32>, vector<128x128xf32>, vector<256x128xf32> -> vector<256x128xf32>
      %92 = arith.addf %85, %91 : vector<256x128xf32>
      %c16_i32 = arith.constant 16 : i32
      %93 = arith.addi %72, %c16_i32 : i32
      %94 = arith.index_cast %93 : i32 to index
      %c0_105 = arith.constant 0 : index
      %95 = vector.load %arg15[%94, %c0_105] : memref<1320x128xf32, #tpu.memory_space<vmem>>, vector<256x128xf32>
      %c3_106 = arith.constant 3 : index
      %c0_107 = arith.constant 0 : index
      %c0_108 = arith.constant 0 : index
      %96 = vector.load %arg6[%c3_106, %c0_107, %c0_108] : memref<9x128x128xf32, #tpu.memory_space<vmem>>, vector<1x128x128xf32>
      %97 = vector.shape_cast %96 : vector<1x128x128xf32> to vector<128x128xf32>
      %cst_109 = arith.constant dense<0.000000e+00> : vector<256x128xf32>
      %98 = tpu.matmul %95, %97, %cst_109 {dimension_numbers = #tpu.dot_dimension_numbers<[1], [0], [0], [1], [0, 0, 1, 1], [], []>} : vector<256x128xf32>, vector<128x128xf32>, vector<256x128xf32> -> vector<256x128xf32>
      %99 = arith.addf %92, %98 : vector<256x128xf32>
      %c17_i32 = arith.constant 17 : i32
      %100 = arith.addi %72, %c17_i32 : i32
      %101 = arith.index_cast %100 : i32 to index
      %c0_110 = arith.constant 0 : index
      %102 = vector.load %arg15[%101, %c0_110] : memref<1320x128xf32, #tpu.memory_space<vmem>>, vector<256x128xf32>
      %c4_111 = arith.constant 4 : index
      %c0_112 = arith.constant 0 : index
      %c0_113 = arith.constant 0 : index
      %103 = vector.load %arg6[%c4_111, %c0_112, %c0_113] : memref<9x128x128xf32, #tpu.memory_space<vmem>>, vector<1x128x128xf32>
      %104 = vector.shape_cast %103 : vector<1x128x128xf32> to vector<128x128xf32>
      %cst_114 = arith.constant dense<0.000000e+00> : vector<256x128xf32>
      %105 = tpu.matmul %102, %104, %cst_114 {dimension_numbers = #tpu.dot_dimension_numbers<[1], [0], [0], [1], [0, 0, 1, 1], [], []>} : vector<256x128xf32>, vector<128x128xf32>, vector<256x128xf32> -> vector<256x128xf32>
      %106 = arith.addf %99, %105 : vector<256x128xf32>
      %c18_i32 = arith.constant 18 : i32
      %107 = arith.addi %72, %c18_i32 : i32
      %108 = arith.index_cast %107 : i32 to index
      %c0_115 = arith.constant 0 : index
      %109 = vector.load %arg15[%108, %c0_115] : memref<1320x128xf32, #tpu.memory_space<vmem>>, vector<256x128xf32>
      %c5_116 = arith.constant 5 : index
      %c0_117 = arith.constant 0 : index
      %c0_118 = arith.constant 0 : index
      %110 = vector.load %arg6[%c5_116, %c0_117, %c0_118] : memref<9x128x128xf32, #tpu.memory_space<vmem>>, vector<1x128x128xf32>
      %111 = vector.shape_cast %110 : vector<1x128x128xf32> to vector<128x128xf32>
      %cst_119 = arith.constant dense<0.000000e+00> : vector<256x128xf32>
      %112 = tpu.matmul %109, %111, %cst_119 {dimension_numbers = #tpu.dot_dimension_numbers<[1], [0], [0], [1], [0, 0, 1, 1], [], []>} : vector<256x128xf32>, vector<128x128xf32>, vector<256x128xf32> -> vector<256x128xf32>
      %113 = arith.addf %106, %112 : vector<256x128xf32>
      %c32_i32 = arith.constant 32 : i32
      %114 = arith.addi %72, %c32_i32 : i32
      %115 = arith.index_cast %114 : i32 to index
      %c0_120 = arith.constant 0 : index
      %116 = vector.load %arg15[%115, %c0_120] : memref<1320x128xf32, #tpu.memory_space<vmem>>, vector<256x128xf32>
      %c6_121 = arith.constant 6 : index
      %c0_122 = arith.constant 0 : index
      %c0_123 = arith.constant 0 : index
      %117 = vector.load %arg6[%c6_121, %c0_122, %c0_123] : memref<9x128x128xf32, #tpu.memory_space<vmem>>, vector<1x128x128xf32>
      %118 = vector.shape_cast %117 : vector<1x128x128xf32> to vector<128x128xf32>
      %cst_124 = arith.constant dense<0.000000e+00> : vector<256x128xf32>
      %119 = tpu.matmul %116, %118, %cst_124 {dimension_numbers = #tpu.dot_dimension_numbers<[1], [0], [0], [1], [0, 0, 1, 1], [], []>} : vector<256x128xf32>, vector<128x128xf32>, vector<256x128xf32> -> vector<256x128xf32>
      %120 = arith.addf %113, %119 : vector<256x128xf32>
      %c33_i32 = arith.constant 33 : i32
      %121 = arith.addi %72, %c33_i32 : i32
      %122 = arith.index_cast %121 : i32 to index
      %c0_125 = arith.constant 0 : index
      %123 = vector.load %arg15[%122, %c0_125] : memref<1320x128xf32, #tpu.memory_space<vmem>>, vector<256x128xf32>
      %c7_126 = arith.constant 7 : index
      %c0_127 = arith.constant 0 : index
      %c0_128 = arith.constant 0 : index
      %124 = vector.load %arg6[%c7_126, %c0_127, %c0_128] : memref<9x128x128xf32, #tpu.memory_space<vmem>>, vector<1x128x128xf32>
      %125 = vector.shape_cast %124 : vector<1x128x128xf32> to vector<128x128xf32>
      %cst_129 = arith.constant dense<0.000000e+00> : vector<256x128xf32>
      %126 = tpu.matmul %123, %125, %cst_129 {dimension_numbers = #tpu.dot_dimension_numbers<[1], [0], [0], [1], [0, 0, 1, 1], [], []>} : vector<256x128xf32>, vector<128x128xf32>, vector<256x128xf32> -> vector<256x128xf32>
      %127 = arith.addf %120, %126 : vector<256x128xf32>
      %c34_i32 = arith.constant 34 : i32
      %128 = arith.addi %72, %c34_i32 : i32
      %129 = arith.index_cast %128 : i32 to index
      %c0_130 = arith.constant 0 : index
      %130 = vector.load %arg15[%129, %c0_130] : memref<1320x128xf32, #tpu.memory_space<vmem>>, vector<256x128xf32>
      %c8_131 = arith.constant 8 : index
      %c0_132 = arith.constant 0 : index
      %c0_133 = arith.constant 0 : index
      %131 = vector.load %arg6[%c8_131, %c0_132, %c0_133] : memref<9x128x128xf32, #tpu.memory_space<vmem>>, vector<1x128x128xf32>
      %132 = vector.shape_cast %131 : vector<1x128x128xf32> to vector<128x128xf32>
      %cst_134 = arith.constant dense<0.000000e+00> : vector<256x128xf32>
      %133 = tpu.matmul %130, %132, %cst_134 {dimension_numbers = #tpu.dot_dimension_numbers<[1], [0], [0], [1], [0, 0, 1, 1], [], []>} : vector<256x128xf32>, vector<128x128xf32>, vector<256x128xf32> -> vector<256x128xf32>
      %134 = arith.addf %127, %133 : vector<256x128xf32>
      %135 = vector.broadcast %11 : vector<1x128xf32> to vector<256x128xf32>
      %136 = arith.addf %134, %135 : vector<256x128xf32>
      %cst_135 = arith.constant 0.000000e+00 : f32
      %137 = vector.broadcast %cst_135 : f32 to vector<256x128xf32>
      %138 = arith.maximumf %136, %137 : vector<256x128xf32>
      %139 = arith.index_cast %72 : i32 to index
      %c0_136 = arith.constant 0 : index
      %140 = vector.load %arg13[%139, %c0_136] : memref<6400x128xf32, #tpu.memory_space<vmem>>, vector<256x128xf32>
      tpu.vector_store %arg13[%139, %c0_136], %138 {strides = array<i32>} : memref<6400x128xf32, #tpu.memory_space<vmem>>, vector<256x128xf32>,
    }
    %c5_i32_26 = arith.constant 5 : i32
    %c0_i32_27 = arith.constant 0 : i32
    %c8_i32_28 = arith.constant 8 : i32
    %13 = arith.addi %c0_i32_27, %c8_i32_28 : i32
    %c1_i32_29 = arith.constant 1 : i32
    scf.for %arg18 = %c0_i32_27 to %13 step %c1_i32_29  : i32 {
      %c160_i32 = arith.constant 160 : i32
      %71 = arith.muli %arg18, %c160_i32 : i32
      %c0_i32_88 = arith.constant 0 : i32
      %72 = arith.addi %71, %c0_i32_88 : i32
      %73 = arith.index_cast %72 : i32 to index
      %c0_89 = arith.constant 0 : index
      %74 = vector.load %arg13[%73, %c0_89] : memref<6400x128xf32, #tpu.memory_space<vmem>>, vector<6x128xf32>
      %c16_i32 = arith.constant 16 : i32
      %75 = arith.addi %71, %c16_i32 : i32
      %76 = arith.index_cast %75 : i32 to index
      %c0_90 = arith.constant 0 : index
      %77 = vector.load %arg13[%76, %c0_90] : memref<6400x128xf32, #tpu.memory_space<vmem>>, vector<6x128xf32>
      %78 = arith.maximumf %74, %77 : vector<6x128xf32>
      %c0_91 = arith.constant 0 : index
      %c0_92 = arith.constant 0 : index
      %79 = vector.load %arg17[%c0_91, %c0_92] : memref<448x128xf32, #tpu.memory_space<vmem>>, vector<6x128xf32>
      tpu.vector_store %arg17[%c0_91, %c0_92], %78 {strides = array<i32>} : memref<448x128xf32, #tpu.memory_space<vmem>>, vector<6x128xf32>,
      %c32_i32 = arith.constant 32 : i32
      %80 = arith.addi %71, %c32_i32 : i32
      %81 = arith.index_cast %80 : i32 to index
      %c0_93 = arith.constant 0 : index
      %82 = vector.load %arg13[%81, %c0_93] : memref<6400x128xf32, #tpu.memory_space<vmem>>, vector<6x128xf32>
      %c48_i32 = arith.constant 48 : i32
      %83 = arith.addi %71, %c48_i32 : i32
      %84 = arith.index_cast %83 : i32 to index
      %c0_94 = arith.constant 0 : index
      %85 = vector.load %arg13[%84, %c0_94] : memref<6400x128xf32, #tpu.memory_space<vmem>>, vector<6x128xf32>
      %86 = arith.maximumf %82, %85 : vector<6x128xf32>
      %c8_95 = arith.constant 8 : index
      %c0_96 = arith.constant 0 : index
      %87 = vector.load %arg17[%c8_95, %c0_96] : memref<448x128xf32, #tpu.memory_space<vmem>>, vector<6x128xf32>
      tpu.vector_store %arg17[%c8_95, %c0_96], %86 {strides = array<i32>} : memref<448x128xf32, #tpu.memory_space<vmem>>, vector<6x128xf32>,
      %c64_i32 = arith.constant 64 : i32
      %88 = arith.addi %71, %c64_i32 : i32
      %89 = arith.index_cast %88 : i32 to index
      %c0_97 = arith.constant 0 : index
      %90 = vector.load %arg13[%89, %c0_97] : memref<6400x128xf32, #tpu.memory_space<vmem>>, vector<6x128xf32>
      %c80_i32 = arith.constant 80 : i32
      %91 = arith.addi %71, %c80_i32 : i32
      %92 = arith.index_cast %91 : i32 to index
      %c0_98 = arith.constant 0 : index
      %93 = vector.load %arg13[%92, %c0_98] : memref<6400x128xf32, #tpu.memory_space<vmem>>, vector<6x128xf32>
      %94 = arith.maximumf %90, %93 : vector<6x128xf32>
      %c16 = arith.constant 16 : index
      %c0_99 = arith.constant 0 : index
      %95 = vector.load %arg17[%c16, %c0_99] : memref<448x128xf32, #tpu.memory_space<vmem>>, vector<6x128xf32>
      tpu.vector_store %arg17[%c16, %c0_99], %94 {strides = array<i32>} : memref<448x128xf32, #tpu.memory_space<vmem>>, vector<6x128xf32>,
      %c0_100 = arith.constant 0 : index
      %c0_101 = arith.constant 0 : index
      %96 = tpu.strided_load %arg17[%c0_100, %c0_101] {strides = array<i32: 2, 1>} : memref<448x128xf32, #tpu.memory_space<vmem>>, vector<3x128xf32>
      %c1_102 = arith.constant 1 : index
      %c0_103 = arith.constant 0 : index
      %97 = tpu.strided_load %arg17[%c1_102, %c0_103] {strides = array<i32: 2, 1>} : memref<448x128xf32, #tpu.memory_space<vmem>>, vector<3x128xf32>
      %98 = arith.maximumf %96, %97 : vector<3x128xf32>
      %c16_i32_104 = arith.constant 16 : i32
      %99 = arith.muli %arg18, %c16_i32_104 : i32
      %c0_i32_105 = arith.constant 0 : i32
      %100 = arith.addi %99, %c0_i32_105 : i32
      %101 = arith.index_cast %100 : i32 to index
      %c0_106 = arith.constant 0 : index
      %102 = vector.load %arg16[%101, %c0_106] : memref<128x128xf32, #tpu.memory_space<vmem>>, vector<3x128xf32>
      tpu.vector_store %arg16[%101, %c0_106], %98 {strides = array<i32>} : memref<128x128xf32, #tpu.memory_space<vmem>>, vector<3x128xf32>,
      %c8_107 = arith.constant 8 : index
      %c0_108 = arith.constant 0 : index
      %103 = tpu.strided_load %arg17[%c8_107, %c0_108] {strides = array<i32: 2, 1>} : memref<448x128xf32, #tpu.memory_space<vmem>>, vector<3x128xf32>
      %c9 = arith.constant 9 : index
      %c0_109 = arith.constant 0 : index
      %104 = tpu.strided_load %arg17[%c9, %c0_109] {strides = array<i32: 2, 1>} : memref<448x128xf32, #tpu.memory_space<vmem>>, vector<3x128xf32>
      %105 = arith.maximumf %103, %104 : vector<3x128xf32>
      %c16_i32_110 = arith.constant 16 : i32
      %106 = arith.muli %arg18, %c16_i32_110 : i32
      %c3_i32 = arith.constant 3 : i32
      %107 = arith.addi %106, %c3_i32 : i32
      %108 = arith.index_cast %107 : i32 to index
      %c0_111 = arith.constant 0 : index
      %109 = vector.load %arg16[%108, %c0_111] : memref<128x128xf32, #tpu.memory_space<vmem>>, vector<3x128xf32>
      tpu.vector_store %arg16[%108, %c0_111], %105 {strides = array<i32>} : memref<128x128xf32, #tpu.memory_space<vmem>>, vector<3x128xf32>,
      %c16_112 = arith.constant 16 : index
      %c0_113 = arith.constant 0 : index
      %110 = tpu.strided_load %arg17[%c16_112, %c0_113] {strides = array<i32: 2, 1>} : memref<448x128xf32, #tpu.memory_space<vmem>>, vector<3x128xf32>
      %c17 = arith.constant 17 : index
      %c0_114 = arith.constant 0 : index
      %111 = tpu.strided_load %arg17[%c17, %c0_114] {strides = array<i32: 2, 1>} : memref<448x128xf32, #tpu.memory_space<vmem>>, vector<3x128xf32>
      %112 = arith.maximumf %110, %111 : vector<3x128xf32>
      %c16_i32_115 = arith.constant 16 : i32
      %113 = arith.muli %arg18, %c16_i32_115 : i32
      %c6_i32 = arith.constant 6 : i32
      %114 = arith.addi %113, %c6_i32 : i32
      %115 = arith.index_cast %114 : i32 to index
      %c0_116 = arith.constant 0 : index
      %116 = vector.load %arg16[%115, %c0_116] : memref<128x128xf32, #tpu.memory_space<vmem>>, vector<3x128xf32>
      tpu.vector_store %arg16[%115, %c0_116], %112 {strides = array<i32>} : memref<128x128xf32, #tpu.memory_space<vmem>>, vector<3x128xf32>,
    }
    %c8_i32_30 = arith.constant 8 : i32
    %cst_31 = arith.constant 0.000000e+00 : f32
    %14 = vector.broadcast %cst_31 : f32 to vector<8x128xf32>
    %c0_32 = arith.constant 0 : index
    %c0_33 = arith.constant 0 : index
    %15 = tpu.strided_load %arg16[%c0_32, %c0_33] {strides = array<i32: 16, 1>} : memref<128x128xf32, #tpu.memory_space<vmem>>, vector<8x128xf32>
    %c0_34 = arith.constant 0 : index
    %c0_35 = arith.constant 0 : index
    %c0_36 = arith.constant 0 : index
    %16 = vector.load %arg8[%c0_34, %c0_35, %c0_36] : memref<9x128x128xf32, #tpu.memory_space<vmem>>, vector<1x128x128xf32>
    %17 = vector.shape_cast %16 : vector<1x128x128xf32> to vector<128x128xf32>
    %cst_37 = arith.constant dense<0.000000e+00> : vector<8x128xf32>
    %18 = tpu.matmul %15, %17, %cst_37 {dimension_numbers = #tpu.dot_dimension_numbers<[1], [0], [0], [1], [0, 0, 1, 1], [], []>} : vector<8x128xf32>, vector<128x128xf32>, vector<8x128xf32> -> vector<8x128xf32>
    %19 = arith.addf %14, %18 : vector<8x128xf32>
    %c1 = arith.constant 1 : index
    %c0_38 = arith.constant 0 : index
    %20 = tpu.strided_load %arg16[%c1, %c0_38] {strides = array<i32: 16, 1>} : memref<128x128xf32, #tpu.memory_space<vmem>>, vector<8x128xf32>
    %c1_39 = arith.constant 1 : index
    %c0_40 = arith.constant 0 : index
    %c0_41 = arith.constant 0 : index
    %21 = vector.load %arg8[%c1_39, %c0_40, %c0_41] : memref<9x128x128xf32, #tpu.memory_space<vmem>>, vector<1x128x128xf32>
    %22 = vector.shape_cast %21 : vector<1x128x128xf32> to vector<128x128xf32>
    %cst_42 = arith.constant dense<0.000000e+00> : vector<8x128xf32>
    %23 = tpu.matmul %20, %22, %cst_42 {dimension_numbers = #tpu.dot_dimension_numbers<[1], [0], [0], [1], [0, 0, 1, 1], [], []>} : vector<8x128xf32>, vector<128x128xf32>, vector<8x128xf32> -> vector<8x128xf32>
    %24 = arith.addf %19, %23 : vector<8x128xf32>
    %c2 = arith.constant 2 : index
    %c0_43 = arith.constant 0 : index
    %25 = tpu.strided_load %arg16[%c2, %c0_43] {strides = array<i32: 16, 1>} : memref<128x128xf32, #tpu.memory_space<vmem>>, vector<8x128xf32>
    %c2_44 = arith.constant 2 : index
    %c0_45 = arith.constant 0 : index
    %c0_46 = arith.constant 0 : index
    %26 = vector.load %arg8[%c2_44, %c0_45, %c0_46] : memref<9x128x128xf32, #tpu.memory_space<vmem>>, vector<1x128x128xf32>
    %27 = vector.shape_cast %26 : vector<1x128x128xf32> to vector<128x128xf32>
    %cst_47 = arith.constant dense<0.000000e+00> : vector<8x128xf32>
    %28 = tpu.matmul %25, %27, %cst_47 {dimension_numbers = #tpu.dot_dimension_numbers<[1], [0], [0], [1], [0, 0, 1, 1], [], []>} : vector<8x128xf32>, vector<128x128xf32>, vector<8x128xf32> -> vector<8x128xf32>
    %29 = arith.addf %24, %28 : vector<8x128xf32>
    %c3 = arith.constant 3 : index
    %c0_48 = arith.constant 0 : index
    %30 = tpu.strided_load %arg16[%c3, %c0_48] {strides = array<i32: 16, 1>} : memref<128x128xf32, #tpu.memory_space<vmem>>, vector<8x128xf32>
    %c3_49 = arith.constant 3 : index
    %c0_50 = arith.constant 0 : index
    %c0_51 = arith.constant 0 : index
    %31 = vector.load %arg8[%c3_49, %c0_50, %c0_51] : memref<9x128x128xf32, #tpu.memory_space<vmem>>, vector<1x128x128xf32>
    %32 = vector.shape_cast %31 : vector<1x128x128xf32> to vector<128x128xf32>
    %cst_52 = arith.constant dense<0.000000e+00> : vector<8x128xf32>
    %33 = tpu.matmul %30, %32, %cst_52 {dimension_numbers = #tpu.dot_dimension_numbers<[1], [0], [0], [1], [0, 0, 1, 1], [], []>} : vector<8x128xf32>, vector<128x128xf32>, vector<8x128xf32> -> vector<8x128xf32>
    %34 = arith.addf %29, %33 : vector<8x128xf32>
    %c4 = arith.constant 4 : index
    %c0_53 = arith.constant 0 : index
    %35 = tpu.strided_load %arg16[%c4, %c0_53] {strides = array<i32: 16, 1>} : memref<128x128xf32, #tpu.memory_space<vmem>>, vector<8x128xf32>
    %c4_54 = arith.constant 4 : index
    %c0_55 = arith.constant 0 : index
    %c0_56 = arith.constant 0 : index
    %36 = vector.load %arg8[%c4_54, %c0_55, %c0_56] : memref<9x128x128xf32, #tpu.memory_space<vmem>>, vector<1x128x128xf32>
    %37 = vector.shape_cast %36 : vector<1x128x128xf32> to vector<128x128xf32>
    %cst_57 = arith.constant dense<0.000000e+00> : vector<8x128xf32>
    %38 = tpu.matmul %35, %37, %cst_57 {dimension_numbers = #tpu.dot_dimension_numbers<[1], [0], [0], [1], [0, 0, 1, 1], [], []>} : vector<8x128xf32>, vector<128x128xf32>, vector<8x128xf32> -> vector<8x128xf32>
    %39 = arith.addf %34, %38 : vector<8x128xf32>
    %c5 = arith.constant 5 : index
    %c0_58 = arith.constant 0 : index
    %40 = tpu.strided_load %arg16[%c5, %c0_58] {strides = array<i32: 16, 1>} : memref<128x128xf32, #tpu.memory_space<vmem>>, vector<8x128xf32>
    %c5_59 = arith.constant 5 : index
    %c0_60 = arith.constant 0 : index
    %c0_61 = arith.constant 0 : index
    %41 = vector.load %arg8[%c5_59, %c0_60, %c0_61] : memref<9x128x128xf32, #tpu.memory_space<vmem>>, vector<1x128x128xf32>
    %42 = vector.shape_cast %41 : vector<1x128x128xf32> to vector<128x128xf32>
    %cst_62 = arith.constant dense<0.000000e+00> : vector<8x128xf32>
    %43 = tpu.matmul %40, %42, %cst_62 {dimension_numbers = #tpu.dot_dimension_numbers<[1], [0], [0], [1], [0, 0, 1, 1], [], []>} : vector<8x128xf32>, vector<128x128xf32>, vector<8x128xf32> -> vector<8x128xf32>
    %44 = arith.addf %39, %43 : vector<8x128xf32>
    %c6 = arith.constant 6 : index
    %c0_63 = arith.constant 0 : index
    %45 = tpu.strided_load %arg16[%c6, %c0_63] {strides = array<i32: 16, 1>} : memref<128x128xf32, #tpu.memory_space<vmem>>, vector<8x128xf32>
    %c6_64 = arith.constant 6 : index
    %c0_65 = arith.constant 0 : index
    %c0_66 = arith.constant 0 : index
    %46 = vector.load %arg8[%c6_64, %c0_65, %c0_66] : memref<9x128x128xf32, #tpu.memory_space<vmem>>, vector<1x128x128xf32>
    %47 = vector.shape_cast %46 : vector<1x128x128xf32> to vector<128x128xf32>
    %cst_67 = arith.constant dense<0.000000e+00> : vector<8x128xf32>
    %48 = tpu.matmul %45, %47, %cst_67 {dimension_numbers = #tpu.dot_dimension_numbers<[1], [0], [0], [1], [0, 0, 1, 1], [], []>} : vector<8x128xf32>, vector<128x128xf32>, vector<8x128xf32> -> vector<8x128xf32>
    %49 = arith.addf %44, %48 : vector<8x128xf32>
    %c7 = arith.constant 7 : index
    %c0_68 = arith.constant 0 : index
    %50 = tpu.strided_load %arg16[%c7, %c0_68] {strides = array<i32: 16, 1>} : memref<128x128xf32, #tpu.memory_space<vmem>>, vector<8x128xf32>
    %c7_69 = arith.constant 7 : index
    %c0_70 = arith.constant 0 : index
    %c0_71 = arith.constant 0 : index
    %51 = vector.load %arg8[%c7_69, %c0_70, %c0_71] : memref<9x128x128xf32, #tpu.memory_space<vmem>>, vector<1x128x128xf32>
    %52 = vector.shape_cast %51 : vector<1x128x128xf32> to vector<128x128xf32>
    %cst_72 = arith.constant dense<0.000000e+00> : vector<8x128xf32>
    %53 = tpu.matmul %50, %52, %cst_72 {dimension_numbers = #tpu.dot_dimension_numbers<[1], [0], [0], [1], [0, 0, 1, 1], [], []>} : vector<8x128xf32>, vector<128x128xf32>, vector<8x128xf32> -> vector<8x128xf32>
    %54 = arith.addf %49, %53 : vector<8x128xf32>
    %c8 = arith.constant 8 : index
    %c0_73 = arith.constant 0 : index
    %55 = tpu.strided_load %arg16[%c8, %c0_73] {strides = array<i32: 16, 1>} : memref<128x128xf32, #tpu.memory_space<vmem>>, vector<8x128xf32>
    %c8_74 = arith.constant 8 : index
    %c0_75 = arith.constant 0 : index
    %c0_76 = arith.constant 0 : index
    %56 = vector.load %arg8[%c8_74, %c0_75, %c0_76] : memref<9x128x128xf32, #tpu.memory_space<vmem>>, vector<1x128x128xf32>
    %57 = vector.shape_cast %56 : vector<1x128x128xf32> to vector<128x128xf32>
    %cst_77 = arith.constant dense<0.000000e+00> : vector<8x128xf32>
    %58 = tpu.matmul %55, %57, %cst_77 {dimension_numbers = #tpu.dot_dimension_numbers<[1], [0], [0], [1], [0, 0, 1, 1], [], []>} : vector<8x128xf32>, vector<128x128xf32>, vector<8x128xf32> -> vector<8x128xf32>
    %59 = arith.addf %54, %58 : vector<8x128xf32>
    %c0_78 = arith.constant 0 : index
    %c0_79 = arith.constant 0 : index
    %60 = vector.load %arg9[%c0_78, %c0_79] : memref<1x128xf32, #tpu.memory_space<vmem>>, vector<1x128xf32>
    %61 = vector.broadcast %60 : vector<1x128xf32> to vector<8x128xf32>
    %62 = arith.addf %59, %61 : vector<8x128xf32>
    %cst_80 = arith.constant 0.000000e+00 : f32
    %63 = vector.broadcast %cst_80 : f32 to vector<8x128xf32>
    %64 = arith.maximumf %62, %63 : vector<8x128xf32>
    %c0_81 = arith.constant 0 : index
    %c0_82 = arith.constant 0 : index
    %65 = vector.load %arg10[%c0_81, %c0_82] : memref<128x128xf32, #tpu.memory_space<vmem>>, vector<128x128xf32>
    %cst_83 = arith.constant dense<0.000000e+00> : vector<8x128xf32>
    %66 = tpu.matmul %64, %65, %cst_83 {dimension_numbers = #tpu.dot_dimension_numbers<[1], [0], [0], [1], [0, 0, 1, 1], [], []>} : vector<8x128xf32>, vector<128x128xf32>, vector<8x128xf32> -> vector<8x128xf32>
    %c0_84 = arith.constant 0 : index
    %c0_85 = arith.constant 0 : index
    %67 = vector.load %arg11[%c0_84, %c0_85] : memref<1x128xf32, #tpu.memory_space<vmem>>, vector<1x128xf32>
    %68 = vector.broadcast %67 : vector<1x128xf32> to vector<8x128xf32>
    %69 = arith.addf %66, %68 : vector<8x128xf32>
    %c0_86 = arith.constant 0 : index
    %c0_87 = arith.constant 0 : index
    %70 = vector.load %arg12[%c0_86, %c0_87] : memref<8x128xf32, #tpu.memory_space<vmem>>, vector<8x128xf32>
    tpu.vector_store %arg12[%c0_86, %c0_87], %69 {strides = array<i32>} : memref<8x128xf32, #tpu.memory_space<vmem>>, vector<8x128xf32>,
    return
  }
  func.func @transform_0(%arg0: i32) -> (i32, i32) {
    %c0_i32 = arith.constant 0 : i32
    %c0_i32_0 = arith.constant 0 : i32
    return %arg0, %c0_i32 : i32, i32
  }
  func.func @transform_1(%arg0: i32) -> (i32, i32) {
    %c0_i32 = arith.constant 0 : i32
    %c0_i32_0 = arith.constant 0 : i32
    %c0_i32_1 = arith.constant 0 : i32
    return %c0_i32, %c0_i32_0 : i32, i32
  }
  func.func @transform_2(%arg0: i32) -> (i32, i32) {
    %c0_i32 = arith.constant 0 : i32
    %c0_i32_0 = arith.constant 0 : i32
    %c0_i32_1 = arith.constant 0 : i32
    return %c0_i32, %c0_i32_0 : i32, i32
  }
  func.func @transform_3(%arg0: i32) -> (i32, i32, i32) {
    %c0_i32 = arith.constant 0 : i32
    %c0_i32_0 = arith.constant 0 : i32
    %c0_i32_1 = arith.constant 0 : i32
    %c0_i32_2 = arith.constant 0 : i32
    return %c0_i32, %c0_i32_0, %c0_i32_1 : i32, i32, i32
  }
  func.func @transform_4(%arg0: i32) -> (i32, i32) {
    %c0_i32 = arith.constant 0 : i32
    %c0_i32_0 = arith.constant 0 : i32
    %c0_i32_1 = arith.constant 0 : i32
    return %c0_i32, %c0_i32_0 : i32, i32
  }
  func.func @transform_5(%arg0: i32) -> (i32, i32, i32) {
    %c0_i32 = arith.constant 0 : i32
    %c0_i32_0 = arith.constant 0 : i32
    %c0_i32_1 = arith.constant 0 : i32
    %c0_i32_2 = arith.constant 0 : i32
    return %c0_i32, %c0_i32_0, %c0_i32_1 : i32, i32, i32
  }
  func.func @transform_6(%arg0: i32) -> (i32, i32) {
    %c0_i32 = arith.constant 0 : i32
    %c0_i32_0 = arith.constant 0 : i32
    %c0_i32_1 = arith.constant 0 : i32
    return %c0_i32, %c0_i32_0 : i32, i32
  }
  func.func @transform_7(%arg0: i32) -> (i32, i32, i32) {
    %c0_i32 = arith.constant 0 : i32
    %c0_i32_0 = arith.constant 0 : i32
    %c0_i32_1 = arith.constant 0 : i32
    %c0_i32_2 = arith.constant 0 : i32
    return %c0_i32, %c0_i32_0, %c0_i32_1 : i32, i32, i32
  }
  func.func @transform_8(%arg0: i32) -> (i32, i32) {
    %c0_i32 = arith.constant 0 : i32
    %c0_i32_0 = arith.constant 0 : i32
    %c0_i32_1 = arith.constant 0 : i32
    return %c0_i32, %c0_i32_0 : i32, i32
  }
  func.func @transform_9(%arg0: i32) -> (i32, i32) {
    %c0_i32 = arith.constant 0 : i32
    %c0_i32_0 = arith.constant 0 : i32
    %c0_i32_1 = arith.constant 0 : i32
    return %c0_i32, %c0_i32_0 : i32, i32
  }
  func.func @transform_10(%arg0: i32) -> (i32, i32) {
    %c0_i32 = arith.constant 0 : i32
    %c0_i32_0 = arith.constant 0 : i32
    %c0_i32_1 = arith.constant 0 : i32
    return %c0_i32, %c0_i32_0 : i32, i32
  }
  func.func @transform_11(%arg0: i32) -> (i32, i32) {
    %c0_i32 = arith.constant 0 : i32
    %c0_i32_0 = arith.constant 0 : i32
    return %arg0, %c0_i32 : i32, i32
  }
}

</mosaic_0001>

<bundles_post_ra>
// kernel: improved_cnn_forward.1
= control target key start
LH: loop header
LB: loop body
LE: loop exit
PB: predicated region body
PF: predicated region fallthrough
CT: control target
= control target key end

     0   :  { %s11283_s0 = inlined_call_operand.vmem [shape: f32[12800,16], index: 0, kind: input, shape index: {}]   ;;  %s11284_s1 = inlined_call_operand.vmem [shape: f32[16,128], index: 1, kind: input, shape index: {}]   ;;  %s11285_s2 = inlined_call_operand.vmem [shape: f32[1,128], index: 2, kind: input, shape index: {}]   ;;  %s11286_s3 = inlined_call_operand.vmem [shape: f32[9,128,128], index: 3, kind: input, shape index: {}]   ;;  %s11287_s4 = inlined_call_operand.vmem [shape: f32[1,128], index: 4, kind: input, shape index: {}]   ;;  %s11288_s5 = inlined_call_operand.vmem [shape: f32[9,128,128], index: 5, kind: input, shape index: {}]   ;;  %s11289_s6 = inlined_call_operand.vmem [shape: f32[1,128], index: 6, kind: input, shape index: {}]   ;;  %s11290_s7 = inlined_call_operand.vmem [shape: f32[9,128,128], index: 7, kind: input, shape index: {}]   ;;  %s11291_s8 = inlined_call_operand.vmem [shape: f32[1,128], index: 8, kind: input, shape index: {}]   ;;  %s11292_s9 = inlined_call_operand.vmem [shape: f32[128,128], index: 9, kind: input, shape index: {}]   ;;  %s11293_s10 = inlined_call_operand.vmem [shape: f32[1,128], index: 10, kind: input, shape index: {}]   ;;  %s11294_s11 = inlined_call_operand.hbm [shape: f32[16,128], index: 11, kind: output, shape index: {}]  }
   0x1   :  { %11298 = sst [smem:[#allocation12_spill]] %s11283_s0 }
   0x2   :  { %11299 = sst [smem:[#allocation13_spill]] %s11284_s1 }
   0x3   :  { %11300 = sst [smem:[#allocation14_spill]] %s11285_s2 }
   0x4   :  { %11301 = sst [smem:[#allocation15_spill]] %s11286_s3 }
   0x5   :  { %16 = vsyncpa [#allocation8], 0 }
   0x6   :  { %18 = vsyncpa [#allocation8 + $0x1], 0  ;;  %s7790_s17 = smov 0   ;;  %s7792_s18 = smov 0  }
   0x7   :  { %s7794_s19 = smov 0   ;;  %s7796_s20 = smov 0  }
   0x8 LB: > { %s7811_s21 = sadd.s32 4294967295, %s7703_s20   ;;  %s6261_s22 = sadd.s32 4294967294, %s7703_s20   ;;  %s7703_s20 = sphi %s7796_s20, %s11320_s20   ;;  %s7699_s19 = sphi %s7794_s19, %s11319_s19   ;;  %s7695_s18 = sphi %s7792_s18, %s11318_s18   ;;  %s7691_s17 = sphi %s7790_s17, %s11317_s17  }
   0x9   : > { %s7815_s23 = sadd.s32 1, %s7703_s20   ;;  %s267_s24 = sadd.s32 1, %s7699_s19 }
   0xa   : > { %s264_s25 = ssub.s32 %s7703_s20, %s7815_s23  ;;  %p277_p0 = scmp.ne.s32.totalorder %s7699_s19, %s7695_s18 }
   0xb   : > { %p265_p1 = scmp.eq.s32.totalorder %s264_s25, 0  ;;  %p278_p2 = scmp.eq.s32.totalorder %s7811_s21, 1 }
   0xc   : > { %p283_p3 = scmp.ne.s32.totalorder %s7695_s18, %s7691_s17  ;;  %p284_p4 = scmp.eq.s32.totalorder %s6261_s22, 1 }
   0xd   : > { %s7826_s26 = scalar_select %p265_p1, %s7699_s19, %s267_s24  }
   0xe   : > { %p7828_p5 = por %p278_p2, %p277_p0  ;;  %p7832_p6 = por %p284_p4, %p283_p3 }
   0xf   : > { %p6264_p7 = scmp.ge.s32.totalorder %s7703_s20, 1  ;;  %p341_p8 = scmp.lt.s32.totalorder %s7703_s20, 3 }
  0x11   : > { %p342_p9 = pnand %p6264_p7, %p341_p8 }
  0x12   : > { %s11295_s29 = sand.u32 (!%p342_p9), 1, %s7695_s18   ;;  %s381_s30 = smul.u32 (!%p342_p9), 800, %s7811_s21 }
  0x13   : > { %345 = sbr.rel (%p342_p9) target bundleno = 2631 (0xa47), region = 64  ;;  %s7842_s12 = sshll.u32 (!%p342_p9), %s11295_s29, 3 }
  0x14   : > { %p382_p10 = scmp.lt.s32.totalorder (!%p342_p9), %s381_s30, 1599  ;;  %s11304_s0 = sld [smem:[#allocation12_spill]] (!%p342_p9) }
  0x15   : > { %s11305_s2 = sld [smem:[#allocation14_spill]] (!%p342_p9)  ;;  %s8291_s22 = smov (!%p342_p9), 0  }
  0x16   : > { %s11306_s1 = sld [smem:[#allocation13_spill]] (!%p342_p9) }
  0x18   : > { %v7729_v0 = vmov 0.0   ;;  %s11322_s30 = smov (!%p382_p10, %s381_s30), 1599 }
  0x19   : > { %387 = vst [vmem:[#allocation3] sm:$0xff] %v7729_v0  ;;  %s6266_s13 = sshll.u32 %s11322_s30, 3 }
  0x1a   : > { %388 = vst [vmem:[#allocation3 + $0x8] sm:$0xff] %v7729_v0  ;;  %s7853_s16 = scalar_lea.vmem %s11304_s0, %s6266_s13 }
  0x1b   : > { %389 = vst [vmem:[#allocation3 + $0x10] sm:$0xff] %v7729_v0  ;;  %v8246_v1 = vld [vmem:[%s11305_s2] sm:$0x1] }
  0x1c   : > { %390 = vst [vmem:[#allocation3 + $0x18] sm:$0xff] %v7729_v0  ;;  %v8251_v2 = vld [vmem:[%s11306_s1] sm:$0xff]  ;;  %v8256_v3 = vld [vmem:[%s11306_s1 + $0x8] sm:$0xff] }
  0x1d   : > { %391 = vst [vmem:[#allocation3 + $0x20] sm:$0xff] %v7729_v0 }
  0x1e   : > { %392 = vst [vmem:[#allocation3 + $0x28] sm:$0xff] %v7729_v0 }
  0x1f   : > { %393 = vst [vmem:[#allocation3 + $0x30] sm:$0xff] %v7729_v0 }
  0x20   : > { %394 = vst [vmem:[#allocation3 + $0x38] sm:$0xff] %v7729_v0 }
  0x21   : > { %395 = vst [vmem:[#allocation3 + $0x40] sm:$0xff] %v7729_v0 }
  0x22   : > { %396 = vst [vmem:[#allocation3 + $0x48] sm:$0xff] %v7729_v0 }
  0x23   : > { %397 = vst [vmem:[#allocation3 + $0x50] sm:$0xff] %v7729_v0 }
  0x24   : > { %398 = vst [vmem:[#allocation3 + $0x58] sm:$0xff] %v7729_v0 }
  0x25   : > { %399 = vst [vmem:[#allocation3 + $0x60] sm:$0xff] %v7729_v0 }
  0x26   : > { %400 = vst [vmem:[#allocation3 + $0x68] sm:$0xff] %v7729_v0 }
  0x27   : > { %401 = vst [vmem:[#allocation3 + $0x70] sm:$0xff] %v7729_v0 }
  0x28   : > { %402 = vst [vmem:[#allocation3 + $0x78] sm:$0xff] %v7729_v0 }
  0x29   : > { %403 = vst [vmem:[#allocation3 + $0x80] sm:$0xff] %v7729_v0 }
  0x2a   : > { %404 = vst [vmem:[#allocation3 + $0x88] sm:$0xff] %v7729_v0 }
  0x2b   : > { %405 = vst [vmem:[#allocation3 + $0x90] sm:$0xff] %v7729_v0 }
  0x2c   : > { %406 = vst [vmem:[#allocation3 + $0x98] sm:$0xff] %v7729_v0 }
  0x2d   : > { %407 = vst [vmem:[#allocation3 + $0xa0] sm:$0xff] %v7729_v0 }
  0x2e   : > { %408 = vst [vmem:[#allocation3 + $0xa8] sm:$0xff] %v7729_v0 }
  0x2f   : > { %409 = vst [vmem:[#allocation3 + $0xb0] sm:$0xff] %v7729_v0 }
  0x30   : > { %410 = vst [vmem:[#allocation3 + $0xb8] sm:$0xff] %v7729_v0 }
  0x31   : > { %411 = vst [vmem:[#allocation3 + $0xc0] sm:$0xff] %v7729_v0 }
  0x32   : > { %412 = vst [vmem:[#allocation3 + $0xc8] sm:$0xff] %v7729_v0 }
  0x33   : > { %413 = vst [vmem:[#allocation3 + $0xd0] sm:$0xff] %v7729_v0 }
  0x34   : > { %414 = vst [vmem:[#allocation3 + $0xd8] sm:$0xff] %v7729_v0 }
  0x35   : > { %415 = vst [vmem:[#allocation3 + $0xe0] sm:$0xff] %v7729_v0 }
  0x36   : > { %416 = vst [vmem:[#allocation3 + $0xe8] sm:$0xff] %v7729_v0 }
  0x37   : > { %417 = vst [vmem:[#allocation3 + $0xf0] sm:$0xff] %v7729_v0 }
  0x38   : > { %418 = vst [vmem:[#allocation3 + $0xf8] sm:$0xff] %v7729_v0 }
  0x39   : > { %419 = vst [vmem:[#allocation3 + $0x100] sm:$0xff] %v7729_v0 }
  0x3a   : > { %420 = vst [vmem:[#allocation3 + $0x108] sm:$0xff] %v7729_v0 }
  0x3b   : > { %421 = vst [vmem:[#allocation3 + $0x110] sm:$0xff] %v7729_v0 }
  0x3c   : > { %422 = vst [vmem:[#allocation3 + $0x118] sm:$0xff] %v7729_v0 }
  0x3d   : > { %423 = vst [vmem:[#allocation3 + $0x120] sm:$0xff] %v7729_v0 }
  0x3e   : > { %424 = vst [vmem:[#allocation3 + $0x128] sm:$0xff] %v7729_v0 }
  0x3f   : > { %425 = vst [vmem:[#allocation3 + $0x130] sm:$0xff] %v7729_v0 }
  0x40   : > { %426 = vst [vmem:[#allocation3 + $0x138] sm:$0xff] %v7729_v0 }
  0x41   : > { %427 = vst [vmem:[#allocation3 + $0x140] sm:$0xff] %v7729_v0 }
  0x42   : > { %428 = vst [vmem:[#allocation3 + $0x148] sm:$0xff] %v7729_v0 }
  0x43   : > { %429 = vst [vmem:[#allocation3 + $0x150] sm:$0xff] %v7729_v0 }
  0x44   : > { %430 = vst [vmem:[#allocation3 + $0x158] sm:$0xff] %v7729_v0 }
  0x45   : > { %431 = vst [vmem:[#allocation3 + $0x160] sm:$0xff] %v7729_v0 }
  0x46   : > { %432 = vst [vmem:[#allocation3 + $0x168] sm:$0xff] %v7729_v0 }
  0x47   : > { %433 = vst [vmem:[#allocation3 + $0x170] sm:$0xff] %v7729_v0 }
  0x48   : > { %434 = vst [vmem:[#allocation3 + $0x178] sm:$0xff] %v7729_v0 }
  0x49   : > { %435 = vst [vmem:[#allocation3 + $0x180] sm:$0xff] %v7729_v0 }
  0x4a   : > { %436 = vst [vmem:[#allocation3 + $0x188] sm:$0xff] %v7729_v0 }
  0x4b   : > { %437 = vst [vmem:[#allocation3 + $0x190] sm:$0xff] %v7729_v0 }
  0x4c   : > { %438 = vst [vmem:[#allocation3 + $0x198] sm:$0xff] %v7729_v0 }
  0x4d   : > { %439 = vst [vmem:[#allocation3 + $0x1a0] sm:$0xff] %v7729_v0 }
  0x4e   : > { %440 = vst [vmem:[#allocation3 + $0x1a8] sm:$0xff] %v7729_v0 }
  0x4f   : > { %441 = vst [vmem:[#allocation3 + $0x1b0] sm:$0xff] %v7729_v0 }
  0x50   : > { %442 = vst [vmem:[#allocation3 + $0x1b8] sm:$0xff] %v7729_v0 }
  0x51   : > { %443 = vst [vmem:[#allocation3 + $0x1c0] sm:$0xff] %v7729_v0 }
  0x52   : > { %444 = vst [vmem:[#allocation3 + $0x1c8] sm:$0xff] %v7729_v0 }
  0x53   : > { %445 = vst [vmem:[#allocation3 + $0x1d0] sm:$0xff] %v7729_v0 }
  0x54   : > { %446 = vst [vmem:[#allocation3 + $0x1d8] sm:$0xff] %v7729_v0 }
  0x55   : > { %447 = vst [vmem:[#allocation3 + $0x1e0] sm:$0xff] %v7729_v0 }
  0x56   : > { %448 = vst [vmem:[#allocation3 + $0x1e8] sm:$0xff] %v7729_v0 }
  0x57   : > { %449 = vst [vmem:[#allocation3 + $0x1f0] sm:$0xff] %v7729_v0 }
  0x58   : > { %450 = vst [vmem:[#allocation3 + $0x1f8] sm:$0xff] %v7729_v0 }
  0x59   : > { %451 = vst [vmem:[#allocation3 + $0x200] sm:$0xff] %v7729_v0 }
  0x5a   : > { %452 = vst [vmem:[#allocation3 + $0x208] sm:$0xff] %v7729_v0 }
  0x5b   : > { %453 = vst [vmem:[#allocation3 + $0x210] sm:$0xff] %v7729_v0 }
  0x5c   : > { %454 = vst [vmem:[#allocation3 + $0x218] sm:$0xff] %v7729_v0 }
  0x5d   : > { %455 = vst [vmem:[#allocation3 + $0x220] sm:$0xff] %v7729_v0 }
  0x5e   : > { %456 = vst [vmem:[#allocation3 + $0x228] sm:$0xff] %v7729_v0 }
  0x5f   : > { %457 = vst [vmem:[#allocation3 + $0x230] sm:$0xff] %v7729_v0 }
  0x60   : > { %458 = vst [vmem:[#allocation3 + $0x238] sm:$0xff] %v7729_v0 }
  0x61   : > { %459 = vst [vmem:[#allocation3 + $0x240] sm:$0xff] %v7729_v0 }
  0x62   : > { %460 = vst [vmem:[#allocation3 + $0x248] sm:$0xff] %v7729_v0 }
  0x63   : > { %461 = vst [vmem:[#allocation3 + $0x250] sm:$0xff] %v7729_v0 }
  0x64   : > { %462 = vst [vmem:[#allocation3 + $0x258] sm:$0xff] %v7729_v0 }
  0x65   : > { %463 = vst [vmem:[#allocation3 + $0x260] sm:$0xff] %v7729_v0 }
  0x66   : > { %464 = vst [vmem:[#allocation3 + $0x268] sm:$0xff] %v7729_v0 }
  0x67   : > { %465 = vst [vmem:[#allocation3 + $0x270] sm:$0xff] %v7729_v0 }
  0x68   : > { %466 = vst [vmem:[#allocation3 + $0x278] sm:$0xff] %v7729_v0 }
  0x69   : > { %467 = vst [vmem:[#allocation3 + $0x280] sm:$0xff] %v7729_v0 }
  0x6a   : > { %468 = vst [vmem:[#allocation3 + $0x288] sm:$0xff] %v7729_v0 }
  0x6b   : > { %469 = vst [vmem:[#allocation3 + $0x290] sm:$0xff] %v7729_v0 }
  0x6c   : > { %470 = vst [vmem:[#allocation3 + $0x298] sm:$0xff] %v7729_v0 }
  0x6d   : > { %471 = vst [vmem:[#allocation3 + $0x2a0] sm:$0xff] %v7729_v0 }
  0x6e   : > { %472 = vst [vmem:[#allocation3 + $0x2a8] sm:$0xff] %v7729_v0 }
  0x6f   : > { %473 = vst [vmem:[#allocation3 + $0x2b0] sm:$0xff] %v7729_v0 }
  0x70   : > { %474 = vst [vmem:[#allocation3 + $0x2b8] sm:$0xff] %v7729_v0 }
  0x71   : > { %475 = vst [vmem:[#allocation3 + $0x2c0] sm:$0xff] %v7729_v0 }
  0x72   : > { %476 = vst [vmem:[#allocation3 + $0x2c8] sm:$0xff] %v7729_v0 }
  0x73   : > { %477 = vst [vmem:[#allocation3 + $0x2d0] sm:$0xff] %v7729_v0 }
  0x74   : > { %478 = vst [vmem:[#allocation3 + $0x2d8] sm:$0xff] %v7729_v0 }
  0x75   : > { %479 = vst [vmem:[#allocation3 + $0x2e0] sm:$0xff] %v7729_v0 }
  0x76   : > { %480 = vst [vmem:[#allocation3 + $0x2e8] sm:$0xff] %v7729_v0 }
  0x77   : > { %481 = vst [vmem:[#allocation3 + $0x2f0] sm:$0xff] %v7729_v0 }
  0x78   : > { %482 = vst [vmem:[#allocation3 + $0x2f8] sm:$0xff] %v7729_v0 }
  0x79   : > { %483 = vst [vmem:[#allocation3 + $0x300] sm:$0xff] %v7729_v0 }
  0x7a   : > { %484 = vst [vmem:[#allocation3 + $0x308] sm:$0xff] %v7729_v0 }
  0x7b   : > { %485 = vst [vmem:[#allocation3 + $0x310] sm:$0xff] %v7729_v0 }
  0x7c   : > { %486 = vst [vmem:[#allocation3 + $0x318] sm:$0xff] %v7729_v0 }
  0x7d   : > { %487 = vst [vmem:[#allocation3 + $0x320] sm:$0xff] %v7729_v0 }
  0x7e   : > { %488 = vst [vmem:[#allocation3 + $0x328] sm:$0xff] %v7729_v0 }
  0x7f   : > { %489 = vst [vmem:[#allocation3 + $0x330] sm:$0xff] %v7729_v0 }
  0x80   : > { %490 = vst [vmem:[#allocation3 + $0x338] sm:$0xff] %v7729_v0 }
  0x81   : > { %491 = vst [vmem:[#allocation3 + $0x340] sm:$0xff] %v7729_v0 }
  0x82   : > { %492 = vst [vmem:[#allocation3 + $0x348] sm:$0xff] %v7729_v0 }
  0x83   : > { %493 = vst [vmem:[#allocation3 + $0x350] sm:$0xff] %v7729_v0 }
  0x84   : > { %494 = vst [vmem:[#allocation3 + $0x358] sm:$0xff] %v7729_v0 }
  0x85   : > { %495 = vst [vmem:[#allocation3 + $0x360] sm:$0xff] %v7729_v0 }
  0x86   : > { %496 = vst [vmem:[#allocation3 + $0x368] sm:$0xff] %v7729_v0 }
  0x87   : > { %497 = vst [vmem:[#allocation3 + $0x370] sm:$0xff] %v7729_v0 }
  0x88   : > { %498 = vst [vmem:[#allocation3 + $0x378] sm:$0xff] %v7729_v0 }
  0x89   : > { %499 = vst [vmem:[#allocation3 + $0x380] sm:$0xff] %v7729_v0 }
  0x8a   : > { %500 = vst [vmem:[#allocation3 + $0x388] sm:$0xff] %v7729_v0 }
  0x8b   : > { %501 = vst [vmem:[#allocation3 + $0x390] sm:$0xff] %v7729_v0 }
  0x8c   : > { %502 = vst [vmem:[#allocation3 + $0x398] sm:$0xff] %v7729_v0 }
  0x8d   : > { %503 = vst [vmem:[#allocation3 + $0x3a0] sm:$0xff] %v7729_v0 }
  0x8e   : > { %504 = vst [vmem:[#allocation3 + $0x3a8] sm:$0xff] %v7729_v0 }
  0x8f   : > { %505 = vst [vmem:[#allocation3 + $0x3b0] sm:$0xff] %v7729_v0 }
  0x90   : > { %506 = vst [vmem:[#allocation3 + $0x3b8] sm:$0xff] %v7729_v0 }
  0x91   : > { %507 = vst [vmem:[#allocation3 + $0x3c0] sm:$0xff] %v7729_v0 }
  0x92   : > { %508 = vst [vmem:[#allocation3 + $0x3c8] sm:$0xff] %v7729_v0 }
  0x93   : > { %509 = vst [vmem:[#allocation3 + $0x3d0] sm:$0xff] %v7729_v0 }
  0x94   : > { %510 = vst [vmem:[#allocation3 + $0x3d8] sm:$0xff] %v7729_v0 }
  0x95   : > { %511 = vst [vmem:[#allocation3 + $0x3e0] sm:$0xff] %v7729_v0 }
  0x96   : > { %512 = vst [vmem:[#allocation3 + $0x3e8] sm:$0xff] %v7729_v0 }
  0x97   : > { %513 = vst [vmem:[#allocation3 + $0x3f0] sm:$0xff] %v7729_v0 }
  0x98   : > { %514 = vst [vmem:[#allocation3 + $0x3f8] sm:$0xff] %v7729_v0 }
  0x99   : > { %515 = vst [vmem:[#allocation3 + $0x400] sm:$0xff] %v7729_v0 }
  0x9a   : > { %516 = vst [vmem:[#allocation3 + $0x408] sm:$0xff] %v7729_v0 }
  0x9b   : > { %517 = vst [vmem:[#allocation3 + $0x410] sm:$0xff] %v7729_v0 }
  0x9c   : > { %518 = vst [vmem:[#allocation3 + $0x418] sm:$0xff] %v7729_v0 }
  0x9d   : > { %519 = vst [vmem:[#allocation3 + $0x420] sm:$0xff] %v7729_v0 }
  0x9e   : > { %520 = vst [vmem:[#allocation3 + $0x428] sm:$0xff] %v7729_v0 }
  0x9f   : > { %521 = vst [vmem:[#allocation3 + $0x430] sm:$0xff] %v7729_v0 }
  0xa0   : > { %522 = vst [vmem:[#allocation3 + $0x438] sm:$0xff] %v7729_v0 }
  0xa1   : > { %523 = vst [vmem:[#allocation3 + $0x440] sm:$0xff] %v7729_v0 }
  0xa2   : > { %524 = vst [vmem:[#allocation3 + $0x448] sm:$0xff] %v7729_v0 }
  0xa3   : > { %525 = vst [vmem:[#allocation3 + $0x450] sm:$0xff] %v7729_v0 }
  0xa4   : > { %526 = vst [vmem:[#allocation3 + $0x458] sm:$0xff] %v7729_v0 }
  0xa5   : > { %527 = vst [vmem:[#allocation3 + $0x460] sm:$0xff] %v7729_v0 }
  0xa6   : > { %528 = vst [vmem:[#allocation3 + $0x468] sm:$0xff] %v7729_v0 }
  0xa7   : > { %529 = vst [vmem:[#allocation3 + $0x470] sm:$0xff] %v7729_v0 }
  0xa8   : > { %530 = vst [vmem:[#allocation3 + $0x478] sm:$0xff] %v7729_v0 }
  0xa9   : > { %531 = vst [vmem:[#allocation3 + $0x480] sm:$0xff] %v7729_v0 }
  0xaa   : > { %532 = vst [vmem:[#allocation3 + $0x488] sm:$0xff] %v7729_v0 }
  0xab   : > { %533 = vst [vmem:[#allocation3 + $0x490] sm:$0xff] %v7729_v0 }
  0xac   : > { %534 = vst [vmem:[#allocation3 + $0x498] sm:$0xff] %v7729_v0 }
  0xad   : > { %535 = vst [vmem:[#allocation3 + $0x4a0] sm:$0xff] %v7729_v0 }
  0xae   : > { %536 = vst [vmem:[#allocation3 + $0x4a8] sm:$0xff] %v7729_v0 }
  0xaf   : > { %537 = vst [vmem:[#allocation3 + $0x4b0] sm:$0xff] %v7729_v0 }
  0xb0   : > { %538 = vst [vmem:[#allocation3 + $0x4b8] sm:$0xff] %v7729_v0 }
  0xb1   : > { %539 = vst [vmem:[#allocation3 + $0x4c0] sm:$0xff] %v7729_v0 }
  0xb2   : > { %540 = vst [vmem:[#allocation3 + $0x4c8] sm:$0xff] %v7729_v0 }
  0xb3   : > { %541 = vst [vmem:[#allocation3 + $0x4d0] sm:$0xff] %v7729_v0 }
  0xb4   : > { %542 = vst [vmem:[#allocation3 + $0x4d8] sm:$0xff] %v7729_v0 }
  0xb5   : > { %543 = vst [vmem:[#allocation3 + $0x4e0] sm:$0xff] %v7729_v0 }
  0xb6   : > { %544 = vst [vmem:[#allocation3 + $0x4e8] sm:$0xff] %v7729_v0 }
  0xb7   : > { %545 = vst [vmem:[#allocation3 + $0x4f0] sm:$0xff] %v7729_v0 }
  0xb8   : > { %546 = vst [vmem:[#allocation3 + $0x4f8] sm:$0xff] %v7729_v0 }
  0xb9   : > { %547 = vst [vmem:[#allocation3 + $0x500] sm:$0xff] %v7729_v0 }
  0xba   : > { %548 = vst [vmem:[#allocation3 + $0x508] sm:$0xff] %v7729_v0 }
  0xbb   : > { %549 = vst [vmem:[#allocation3 + $0x510] sm:$0xff] %v7729_v0 }
  0xbc   : > { %550 = vst [vmem:[#allocation3 + $0x518] sm:$0xff] %v7729_v0 }
  0xbd   : > { %551 = vst [vmem:[#allocation3 + $0x520] sm:$0xff] %v7729_v0 }
  0xbe   : > { %552 = vst [vmem:[#allocation3 + $0x528] sm:$0xff] %v7729_v0 }
  0xbf   : > { %553 = vst [vmem:[#allocation3 + $0x530] sm:$0xff] %v7729_v0 }
  0xc0   : > { %554 = vst [vmem:[#allocation3 + $0x538] sm:$0xff] %v7729_v0 }
  0xc1   : > { %555 = vst [vmem:[#allocation3 + $0x540] sm:$0xff] %v7729_v0 }
  0xc2   : > { %556 = vst [vmem:[#allocation3 + $0x548] sm:$0xff] %v7729_v0 }
  0xc3   : > { %557 = vst [vmem:[#allocation3 + $0x550] sm:$0xff] %v7729_v0 }
  0xc4   : > { %558 = vst [vmem:[#allocation3 + $0x558] sm:$0xff] %v7729_v0 }
  0xc5   : > { %559 = vst [vmem:[#allocation3 + $0x560] sm:$0xff] %v7729_v0 }
  0xc6   : > { %560 = vst [vmem:[#allocation3 + $0x568] sm:$0xff] %v7729_v0 }
  0xc7   : > { %561 = vst [vmem:[#allocation3 + $0x570] sm:$0xff] %v7729_v0 }
  0xc8   : > { %562 = vst [vmem:[#allocation3 + $0x578] sm:$0xff] %v7729_v0 }
  0xc9   : > { %563 = vst [vmem:[#allocation3 + $0x580] sm:$0xff] %v7729_v0 }
  0xca   : > { %564 = vst [vmem:[#allocation3 + $0x588] sm:$0xff] %v7729_v0 }
  0xcb   : > { %565 = vst [vmem:[#allocation3 + $0x590] sm:$0xff] %v7729_v0 }
  0xcc   : > { %566 = vst [vmem:[#allocation3 + $0x598] sm:$0xff] %v7729_v0 }
  0xcd   : > { %567 = vst [vmem:[#allocation3 + $0x5a0] sm:$0xff] %v7729_v0 }
  0xce   : > { %568 = vst [vmem:[#allocation3 + $0x5a8] sm:$0xff] %v7729_v0 }
  0xcf   : > { %569 = vst [vmem:[#allocation3 + $0x5b0] sm:$0xff] %v7729_v0 }
  0xd0   : > { %570 = vst [vmem:[#allocation3 + $0x5b8] sm:$0xff] %v7729_v0 }
  0xd1   : > { %571 = vst [vmem:[#allocation3 + $0x5c0] sm:$0xff] %v7729_v0 }
  0xd2   : > { %572 = vst [vmem:[#allocation3 + $0x5c8] sm:$0xff] %v7729_v0 }
  0xd3   : > { %573 = vst [vmem:[#allocation3 + $0x5d0] sm:$0xff] %v7729_v0 }
  0xd4   : > { %574 = vst [vmem:[#allocation3 + $0x5d8] sm:$0xff] %v7729_v0 }
  0xd5   : > { %575 = vst [vmem:[#allocation3 + $0x5e0] sm:$0xff] %v7729_v0 }
  0xd6   : > { %576 = vst [vmem:[#allocation3 + $0x5e8] sm:$0xff] %v7729_v0 }
  0xd7   : > { %577 = vst [vmem:[#allocation3 + $0x5f0] sm:$0xff] %v7729_v0 }
  0xd8   : > { %578 = vst [vmem:[#allocation3 + $0x5f8] sm:$0xff] %v7729_v0 }
  0xd9   : > { %579 = vst [vmem:[#allocation3 + $0x600] sm:$0xff] %v7729_v0 }
  0xda   : > { %580 = vst [vmem:[#allocation3 + $0x608] sm:$0xff] %v7729_v0 }
  0xdb   : > { %581 = vst [vmem:[#allocation3 + $0x610] sm:$0xff] %v7729_v0 }
  0xdc   : > { %582 = vst [vmem:[#allocation3 + $0x618] sm:$0xff] %v7729_v0 }
  0xdd   : > { %583 = vst [vmem:[#allocation3 + $0x620] sm:$0xff] %v7729_v0 }
  0xde   : > { %584 = vst [vmem:[#allocation3 + $0x628] sm:$0xff] %v7729_v0 }
  0xdf   : > { %585 = vst [vmem:[#allocation3 + $0x630] sm:$0xff] %v7729_v0 }
  0xe0   : > { %586 = vst [vmem:[#allocation3 + $0x638] sm:$0xff] %v7729_v0 }
  0xe1   : > { %587 = vst [vmem:[#allocation3 + $0x640] sm:$0xff] %v7729_v0 }
  0xe2   : > { %588 = vst [vmem:[#allocation3 + $0x648] sm:$0xff] %v7729_v0 }
  0xe3   : > { %589 = vst [vmem:[#allocation3 + $0x650] sm:$0xff] %v7729_v0 }
  0xe4   : > { %590 = vst [vmem:[#allocation3 + $0x658] sm:$0xff] %v7729_v0 }
  0xe5   : > { %591 = vst [vmem:[#allocation3 + $0x660] sm:$0xff] %v7729_v0 }
  0xe6   : > { %592 = vst [vmem:[#allocation3 + $0x668] sm:$0xff] %v7729_v0 }
  0xe7   : > { %593 = vst [vmem:[#allocation3 + $0x670] sm:$0xff] %v7729_v0 }
  0xe8   : > { %594 = vst [vmem:[#allocation3 + $0x678] sm:$0xff] %v7729_v0 }
  0xe9   : > { %595 = vst [vmem:[#allocation3 + $0x680] sm:$0xff] %v7729_v0 }
  0xea   : > { %596 = vst [vmem:[#allocation3 + $0x688] sm:$0xff] %v7729_v0 }
  0xeb   : > { %597 = vst [vmem:[#allocation3 + $0x690] sm:$0xff] %v7729_v0 }
  0xec   : > { %598 = vst [vmem:[#allocation3 + $0x698] sm:$0xff] %v7729_v0 }
  0xed   : > { %599 = vst [vmem:[#allocation3 + $0x6a0] sm:$0xff] %v7729_v0 }
  0xee   : > { %600 = vst [vmem:[#allocation3 + $0x6a8] sm:$0xff] %v7729_v0 }
  0xef   : > { %601 = vst [vmem:[#allocation3 + $0x6b0] sm:$0xff] %v7729_v0 }
  0xf0   : > { %602 = vst [vmem:[#allocation3 + $0x6b8] sm:$0xff] %v7729_v0 }
  0xf1   : > { %603 = vst [vmem:[#allocation3 + $0x6c0] sm:$0xff] %v7729_v0 }
  0xf2   : > { %604 = vst [vmem:[#allocation3 + $0x6c8] sm:$0xff] %v7729_v0 }
  0xf3   : > { %605 = vst [vmem:[#allocation3 + $0x6d0] sm:$0xff] %v7729_v0 }
  0xf4   : > { %606 = vst [vmem:[#allocation3 + $0x6d8] sm:$0xff] %v7729_v0 }
  0xf5   : > { %607 = vst [vmem:[#allocation3 + $0x6e0] sm:$0xff] %v7729_v0 }
  0xf6   : > { %608 = vst [vmem:[#allocation3 + $0x6e8] sm:$0xff] %v7729_v0 }
  0xf7   : > { %609 = vst [vmem:[#allocation3 + $0x6f0] sm:$0xff] %v7729_v0 }
  0xf8   : > { %610 = vst [vmem:[#allocation3 + $0x6f8] sm:$0xff] %v7729_v0 }
  0xf9   : > { %611 = vst [vmem:[#allocation3 + $0x700] sm:$0xff] %v7729_v0 }
  0xfa   : > { %612 = vst [vmem:[#allocation3 + $0x708] sm:$0xff] %v7729_v0 }
  0xfb   : > { %613 = vst [vmem:[#allocation3 + $0x710] sm:$0xff] %v7729_v0 }
  0xfc   : > { %614 = vst [vmem:[#allocation3 + $0x718] sm:$0xff] %v7729_v0 }
  0xfd   : > { %615 = vst [vmem:[#allocation3 + $0x720] sm:$0xff] %v7729_v0 }
  0xfe   : > { %616 = vst [vmem:[#allocation3 + $0x728] sm:$0xff] %v7729_v0 }
  0xff   : > { %617 = vst [vmem:[#allocation3 + $0x730] sm:$0xff] %v7729_v0 }
 0x100   : > { %618 = vst [vmem:[#allocation3 + $0x738] sm:$0xff] %v7729_v0 }
 0x101   : > { %619 = vst [vmem:[#allocation3 + $0x740] sm:$0xff] %v7729_v0 }
 0x102   : > { %620 = vst [vmem:[#allocation3 + $0x748] sm:$0xff] %v7729_v0 }
 0x103   : > { %621 = vst [vmem:[#allocation3 + $0x750] sm:$0xff] %v7729_v0 }
 0x104   : > { %622 = vst [vmem:[#allocation3 + $0x758] sm:$0xff] %v7729_v0 }
 0x105   : > { %623 = vst [vmem:[#allocation3 + $0x760] sm:$0xff] %v7729_v0 }
 0x106   : > { %624 = vst [vmem:[#allocation3 + $0x768] sm:$0xff] %v7729_v0 }
 0x107   : > { %625 = vst [vmem:[#allocation3 + $0x770] sm:$0xff] %v7729_v0 }
 0x108   : > { %626 = vst [vmem:[#allocation3 + $0x778] sm:$0xff] %v7729_v0 }
 0x109   : > { %627 = vst [vmem:[#allocation3 + $0x780] sm:$0xff] %v7729_v0 }
 0x10a   : > { %628 = vst [vmem:[#allocation3 + $0x788] sm:$0xff] %v7729_v0 }
 0x10b   : > { %629 = vst [vmem:[#allocation3 + $0x790] sm:$0xff] %v7729_v0 }
 0x10c   : > { %630 = vst [vmem:[#allocation3 + $0x798] sm:$0xff] %v7729_v0 }
 0x10d   : > { %631 = vst [vmem:[#allocation3 + $0x7a0] sm:$0xff] %v7729_v0 }
 0x10e   : > { %632 = vst [vmem:[#allocation3 + $0x7a8] sm:$0xff] %v7729_v0 }
 0x10f   : > { %633 = vst [vmem:[#allocation3 + $0x7b0] sm:$0xff] %v7729_v0 }
 0x110   : > { %634 = vst [vmem:[#allocation3 + $0x7b8] sm:$0xff] %v7729_v0 }
 0x111   : > { %635 = vst [vmem:[#allocation3 + $0x7c0] sm:$0xff] %v7729_v0 }
 0x112   : > { %636 = vst [vmem:[#allocation3 + $0x7c8] sm:$0xff] %v7729_v0 }
 0x113   : > { %637 = vst [vmem:[#allocation3 + $0x7d0] sm:$0xff] %v7729_v0 }
 0x114   : > { %638 = vst [vmem:[#allocation3 + $0x7d8] sm:$0xff] %v7729_v0 }
 0x115   : > { %639 = vst [vmem:[#allocation3 + $0x7e0] sm:$0xff] %v7729_v0 }
 0x116   : > { %640 = vst [vmem:[#allocation3 + $0x7e8] sm:$0xff] %v7729_v0 }
 0x117   : > { %641 = vst [vmem:[#allocation3 + $0x7f0] sm:$0xff] %v7729_v0 }
 0x118   : > { %642 = vst [vmem:[#allocation3 + $0x7f8] sm:$0xff] %v7729_v0 }
 0x119   : > { %643 = vst [vmem:[#allocation3 + $0x800] sm:$0xff] %v7729_v0 }
 0x11a   : > { %644 = vst [vmem:[#allocation3 + $0x808] sm:$0xff] %v7729_v0 }
 0x11b   : > { %645 = vst [vmem:[#allocation3 + $0x810] sm:$0xff] %v7729_v0 }
 0x11c   : > { %646 = vst [vmem:[#allocation3 + $0x818] sm:$0xff] %v7729_v0 }
 0x11d   : > { %647 = vst [vmem:[#allocation3 + $0x820] sm:$0xff] %v7729_v0 }
 0x11e   : > { %648 = vst [vmem:[#allocation4] sm:$0xff] %v7729_v0 }
 0x11f   : > { %649 = vst [vmem:[#allocation4 + $0x8] sm:$0xff] %v7729_v0 }
 0x120   : > { %650 = vst [vmem:[#allocation4 + $0x10] sm:$0xff] %v7729_v0 }
 0x121   : > { %651 = vst [vmem:[#allocation4 + $0x18] sm:$0xff] %v7729_v0 }
 0x122   : > { %652 = vst [vmem:[#allocation4 + $0x20] sm:$0xff] %v7729_v0 }
 0x123   : > { %653 = vst [vmem:[#allocation4 + $0x28] sm:$0xff] %v7729_v0 }
 0x124   : > { %654 = vst [vmem:[#allocation4 + $0x30] sm:$0xff] %v7729_v0 }
 0x125   : > { %655 = vst [vmem:[#allocation4 + $0x38] sm:$0xff] %v7729_v0 }
 0x126   : > { %656 = vst [vmem:[#allocation4 + $0x40] sm:$0xff] %v7729_v0 }
 0x127   : > { %657 = vst [vmem:[#allocation4 + $0x48] sm:$0xff] %v7729_v0 }
 0x128   : > { %658 = vst [vmem:[#allocation4 + $0x50] sm:$0xff] %v7729_v0 }
 0x129   : > { %659 = vst [vmem:[#allocation4 + $0x58] sm:$0xff] %v7729_v0 }
 0x12a   : > { %660 = vst [vmem:[#allocation4 + $0x60] sm:$0xff] %v7729_v0 }
 0x12b   : > { %661 = vst [vmem:[#allocation4 + $0x68] sm:$0xff] %v7729_v0 }
 0x12c   : > { %662 = vst [vmem:[#allocation4 + $0x70] sm:$0xff] %v7729_v0 }
 0x12d   : > { %663 = vst [vmem:[#allocation4 + $0x78] sm:$0xff] %v7729_v0 }
 0x12e   : > { %664 = vst [vmem:[#allocation4 + $0x80] sm:$0xff] %v7729_v0 }
 0x12f   : > { %665 = vst [vmem:[#allocation4 + $0x88] sm:$0xff] %v7729_v0 }
 0x130   : > { %666 = vst [vmem:[#allocation4 + $0x90] sm:$0xff] %v7729_v0 }
 0x131   : > { %667 = vst [vmem:[#allocation4 + $0x98] sm:$0xff] %v7729_v0 }
 0x132   : > { %668 = vst [vmem:[#allocation4 + $0xa0] sm:$0xff] %v7729_v0 }
 0x133   : > { %669 = vst [vmem:[#allocation4 + $0xa8] sm:$0xff] %v7729_v0 }
 0x134   : > { %670 = vst [vmem:[#allocation4 + $0xb0] sm:$0xff] %v7729_v0 }
 0x135   : > { %671 = vst [vmem:[#allocation4 + $0xb8] sm:$0xff] %v7729_v0 }
 0x136   : > { %672 = vst [vmem:[#allocation4 + $0xc0] sm:$0xff] %v7729_v0 }
 0x137   : > { %673 = vst [vmem:[#allocation4 + $0xc8] sm:$0xff] %v7729_v0 }
 0x138   : > { %674 = vst [vmem:[#allocation4 + $0xd0] sm:$0xff] %v7729_v0 }
 0x139   : > { %675 = vst [vmem:[#allocation4 + $0xd8] sm:$0xff] %v7729_v0 }
 0x13a   : > { %676 = vst [vmem:[#allocation4 + $0xe0] sm:$0xff] %v7729_v0 }
 0x13b   : > { %677 = vst [vmem:[#allocation4 + $0xe8] sm:$0xff] %v7729_v0 }
 0x13c   : > { %678 = vst [vmem:[#allocation4 + $0xf0] sm:$0xff] %v7729_v0 }
 0x13d   : > { %679 = vst [vmem:[#allocation4 + $0xf8] sm:$0xff] %v7729_v0 }
 0x13e   : > { %680 = vst [vmem:[#allocation4 + $0x100] sm:$0xff] %v7729_v0 }
 0x13f   : > { %681 = vst [vmem:[#allocation4 + $0x108] sm:$0xff] %v7729_v0 }
 0x140   : > { %682 = vst [vmem:[#allocation4 + $0x110] sm:$0xff] %v7729_v0 }
 0x141   : > { %683 = vst [vmem:[#allocation4 + $0x118] sm:$0xff] %v7729_v0 }
 0x142   : > { %684 = vst [vmem:[#allocation4 + $0x120] sm:$0xff] %v7729_v0 }
 0x143   : > { %685 = vst [vmem:[#allocation4 + $0x128] sm:$0xff] %v7729_v0 }
 0x144   : > { %686 = vst [vmem:[#allocation4 + $0x130] sm:$0xff] %v7729_v0 }
 0x145   : > { %687 = vst [vmem:[#allocation4 + $0x138] sm:$0xff] %v7729_v0 }
 0x146   : > { %688 = vst [vmem:[#allocation4 + $0x140] sm:$0xff] %v7729_v0 }
 0x147   : > { %689 = vst [vmem:[#allocation4 + $0x148] sm:$0xff] %v7729_v0 }
 0x148   : > { %690 = vst [vmem:[#allocation4 + $0x150] sm:$0xff] %v7729_v0 }
 0x149   : > { %691 = vst [vmem:[#allocation4 + $0x158] sm:$0xff] %v7729_v0 }
 0x14a   : > { %692 = vst [vmem:[#allocation4 + $0x160] sm:$0xff] %v7729_v0 }
 0x14b   : > { %693 = vst [vmem:[#allocation4 + $0x168] sm:$0xff] %v7729_v0 }
 0x14c   : > { %694 = vst [vmem:[#allocation4 + $0x170] sm:$0xff] %v7729_v0 }
 0x14d   : > { %695 = vst [vmem:[#allocation4 + $0x178] sm:$0xff] %v7729_v0 }
 0x14e   : > { %696 = vst [vmem:[#allocation4 + $0x180] sm:$0xff] %v7729_v0 }
 0x14f   : > { %697 = vst [vmem:[#allocation4 + $0x188] sm:$0xff] %v7729_v0 }
 0x150   : > { %698 = vst [vmem:[#allocation4 + $0x190] sm:$0xff] %v7729_v0 }
 0x151   : > { %699 = vst [vmem:[#allocation4 + $0x198] sm:$0xff] %v7729_v0 }
 0x152   : > { %700 = vst [vmem:[#allocation4 + $0x1a0] sm:$0xff] %v7729_v0 }
 0x153   : > { %701 = vst [vmem:[#allocation4 + $0x1a8] sm:$0xff] %v7729_v0 }
 0x154   : > { %702 = vst [vmem:[#allocation4 + $0x1b0] sm:$0xff] %v7729_v0 }
 0x155   : > { %703 = vst [vmem:[#allocation4 + $0x1b8] sm:$0xff] %v7729_v0 }
 0x156   : > { %704 = vst [vmem:[#allocation4 + $0x1c0] sm:$0xff] %v7729_v0 }
 0x157   : > { %705 = vst [vmem:[#allocation4 + $0x1c8] sm:$0xff] %v7729_v0 }
 0x158   : > { %706 = vst [vmem:[#allocation4 + $0x1d0] sm:$0xff] %v7729_v0 }
 0x159   : > { %707 = vst [vmem:[#allocation4 + $0x1d8] sm:$0xff] %v7729_v0 }
 0x15a   : > { %708 = vst [vmem:[#allocation4 + $0x1e0] sm:$0xff] %v7729_v0 }
 0x15b   : > { %709 = vst [vmem:[#allocation4 + $0x1e8] sm:$0xff] %v7729_v0 }
 0x15c   : > { %710 = vst [vmem:[#allocation4 + $0x1f0] sm:$0xff] %v7729_v0 }
 0x15d   : > { %711 = vst [vmem:[#allocation4 + $0x1f8] sm:$0xff] %v7729_v0 }
 0x15e   : > { %712 = vst [vmem:[#allocation4 + $0x200] sm:$0xff] %v7729_v0 }
 0x15f   : > { %713 = vst [vmem:[#allocation4 + $0x208] sm:$0xff] %v7729_v0 }
 0x160   : > { %714 = vst [vmem:[#allocation4 + $0x210] sm:$0xff] %v7729_v0 }
 0x161   : > { %715 = vst [vmem:[#allocation4 + $0x218] sm:$0xff] %v7729_v0 }
 0x162   : > { %716 = vst [vmem:[#allocation4 + $0x220] sm:$0xff] %v7729_v0 }
 0x163   : > { %717 = vst [vmem:[#allocation4 + $0x228] sm:$0xff] %v7729_v0 }
 0x164   : > { %718 = vst [vmem:[#allocation4 + $0x230] sm:$0xff] %v7729_v0 }
 0x165   : > { %719 = vst [vmem:[#allocation4 + $0x238] sm:$0xff] %v7729_v0 }
 0x166   : > { %720 = vst [vmem:[#allocation4 + $0x240] sm:$0xff] %v7729_v0 }
 0x167   : > { %721 = vst [vmem:[#allocation4 + $0x248] sm:$0xff] %v7729_v0 }
 0x168   : > { %722 = vst [vmem:[#allocation4 + $0x250] sm:$0xff] %v7729_v0 }
 0x169   : > { %723 = vst [vmem:[#allocation4 + $0x258] sm:$0xff] %v7729_v0 }
 0x16a   : > { %724 = vst [vmem:[#allocation4 + $0x260] sm:$0xff] %v7729_v0 }
 0x16b   : > { %725 = vst [vmem:[#allocation4 + $0x268] sm:$0xff] %v7729_v0 }
 0x16c   : > { %726 = vst [vmem:[#allocation4 + $0x270] sm:$0xff] %v7729_v0 }
 0x16d   : > { %727 = vst [vmem:[#allocation4 + $0x278] sm:$0xff] %v7729_v0 }
 0x16e   : > { %728 = vst [vmem:[#allocation4 + $0x280] sm:$0xff] %v7729_v0 }
 0x16f   : > { %729 = vst [vmem:[#allocation4 + $0x288] sm:$0xff] %v7729_v0 }
 0x170   : > { %730 = vst [vmem:[#allocation4 + $0x290] sm:$0xff] %v7729_v0 }
 0x171   : > { %731 = vst [vmem:[#allocation4 + $0x298] sm:$0xff] %v7729_v0 }
 0x172   : > { %732 = vst [vmem:[#allocation4 + $0x2a0] sm:$0xff] %v7729_v0 }
 0x173   : > { %733 = vst [vmem:[#allocation4 + $0x2a8] sm:$0xff] %v7729_v0 }
 0x174   : > { %734 = vst [vmem:[#allocation4 + $0x2b0] sm:$0xff] %v7729_v0 }
 0x175   : > { %735 = vst [vmem:[#allocation4 + $0x2b8] sm:$0xff] %v7729_v0 }
 0x176   : > { %736 = vst [vmem:[#allocation4 + $0x2c0] sm:$0xff] %v7729_v0 }
 0x177   : > { %737 = vst [vmem:[#allocation4 + $0x2c8] sm:$0xff] %v7729_v0 }
 0x178   : > { %738 = vst [vmem:[#allocation4 + $0x2d0] sm:$0xff] %v7729_v0 }
 0x179   : > { %739 = vst [vmem:[#allocation4 + $0x2d8] sm:$0xff] %v7729_v0 }
 0x17a   : > { %740 = vst [vmem:[#allocation4 + $0x2e0] sm:$0xff] %v7729_v0 }
 0x17b   : > { %741 = vst [vmem:[#allocation4 + $0x2e8] sm:$0xff] %v7729_v0 }
 0x17c   : > { %742 = vst [vmem:[#allocation4 + $0x2f0] sm:$0xff] %v7729_v0 }
 0x17d   : > { %743 = vst [vmem:[#allocation4 + $0x2f8] sm:$0xff] %v7729_v0 }
 0x17e   : > { %744 = vst [vmem:[#allocation4 + $0x300] sm:$0xff] %v7729_v0 }
 0x17f   : > { %745 = vst [vmem:[#allocation4 + $0x308] sm:$0xff] %v7729_v0 }
 0x180   : > { %746 = vst [vmem:[#allocation4 + $0x310] sm:$0xff] %v7729_v0 }
 0x181   : > { %747 = vst [vmem:[#allocation4 + $0x318] sm:$0xff] %v7729_v0 }
 0x182   : > { %748 = vst [vmem:[#allocation4 + $0x320] sm:$0xff] %v7729_v0 }
 0x183   : > { %749 = vst [vmem:[#allocation4 + $0x328] sm:$0xff] %v7729_v0 }
 0x184   : > { %750 = vst [vmem:[#allocation4 + $0x330] sm:$0xff] %v7729_v0 }
 0x185   : > { %751 = vst [vmem:[#allocation4 + $0x338] sm:$0xff] %v7729_v0 }
 0x186   : > { %752 = vst [vmem:[#allocation4 + $0x340] sm:$0xff] %v7729_v0 }
 0x187   : > { %753 = vst [vmem:[#allocation4 + $0x348] sm:$0xff] %v7729_v0 }
 0x188   : > { %754 = vst [vmem:[#allocation4 + $0x350] sm:$0xff] %v7729_v0 }
 0x189   : > { %755 = vst [vmem:[#allocation4 + $0x358] sm:$0xff] %v7729_v0 }
 0x18a   : > { %756 = vst [vmem:[#allocation4 + $0x360] sm:$0xff] %v7729_v0 }
 0x18b   : > { %757 = vst [vmem:[#allocation4 + $0x368] sm:$0xff] %v7729_v0 }
 0x18c   : > { %758 = vst [vmem:[#allocation4 + $0x370] sm:$0xff] %v7729_v0 }
 0x18d   : > { %759 = vst [vmem:[#allocation4 + $0x378] sm:$0xff] %v7729_v0 }
 0x18e   : > { %760 = vst [vmem:[#allocation4 + $0x380] sm:$0xff] %v7729_v0 }
 0x18f   : > { %761 = vst [vmem:[#allocation4 + $0x388] sm:$0xff] %v7729_v0 }
 0x190   : > { %762 = vst [vmem:[#allocation4 + $0x390] sm:$0xff] %v7729_v0 }
 0x191   : > { %763 = vst [vmem:[#allocation4 + $0x398] sm:$0xff] %v7729_v0 }
 0x192   : > { %764 = vst [vmem:[#allocation4 + $0x3a0] sm:$0xff] %v7729_v0 }
 0x193   : > { %765 = vst [vmem:[#allocation4 + $0x3a8] sm:$0xff] %v7729_v0 }
 0x194   : > { %766 = vst [vmem:[#allocation4 + $0x3b0] sm:$0xff] %v7729_v0 }
 0x195   : > { %767 = vst [vmem:[#allocation4 + $0x3b8] sm:$0xff] %v7729_v0 }
 0x196   : > { %768 = vst [vmem:[#allocation4 + $0x3c0] sm:$0xff] %v7729_v0 }
 0x197   : > { %769 = vst [vmem:[#allocation4 + $0x3c8] sm:$0xff] %v7729_v0 }
 0x198   : > { %770 = vst [vmem:[#allocation4 + $0x3d0] sm:$0xff] %v7729_v0 }
 0x199   : > { %771 = vst [vmem:[#allocation4 + $0x3d8] sm:$0xff] %v7729_v0 }
 0x19a   : > { %772 = vst [vmem:[#allocation4 + $0x3e0] sm:$0xff] %v7729_v0 }
 0x19b   : > { %773 = vst [vmem:[#allocation4 + $0x3e8] sm:$0xff] %v7729_v0 }
 0x19c   : > { %774 = vst [vmem:[#allocation4 + $0x3f0] sm:$0xff] %v7729_v0 }
 0x19d   : > { %775 = vst [vmem:[#allocation4 + $0x3f8] sm:$0xff] %v7729_v0 }
 0x19e   : > { %776 = vst [vmem:[#allocation4 + $0x400] sm:$0xff] %v7729_v0 }
 0x19f   : > { %777 = vst [vmem:[#allocation4 + $0x408] sm:$0xff] %v7729_v0 }
 0x1a0   : > { %778 = vst [vmem:[#allocation4 + $0x410] sm:$0xff] %v7729_v0 }
 0x1a1   : > { %779 = vst [vmem:[#allocation4 + $0x418] sm:$0xff] %v7729_v0 }
 0x1a2   : > { %780 = vst [vmem:[#allocation4 + $0x420] sm:$0xff] %v7729_v0 }
 0x1a3   : > { %781 = vst [vmem:[#allocation4 + $0x428] sm:$0xff] %v7729_v0 }
 0x1a4   : > { %782 = vst [vmem:[#allocation4 + $0x430] sm:$0xff] %v7729_v0 }
 0x1a5   : > { %783 = vst [vmem:[#allocation4 + $0x438] sm:$0xff] %v7729_v0 }
 0x1a6   : > { %784 = vst [vmem:[#allocation4 + $0x440] sm:$0xff] %v7729_v0 }
 0x1a7   : > { %785 = vst [vmem:[#allocation4 + $0x448] sm:$0xff] %v7729_v0 }
 0x1a8   : > { %786 = vst [vmem:[#allocation4 + $0x450] sm:$0xff] %v7729_v0 }
 0x1a9   : > { %787 = vst [vmem:[#allocation4 + $0x458] sm:$0xff] %v7729_v0 }
 0x1aa   : > { %788 = vst [vmem:[#allocation4 + $0x460] sm:$0xff] %v7729_v0 }
 0x1ab   : > { %789 = vst [vmem:[#allocation4 + $0x468] sm:$0xff] %v7729_v0 }
 0x1ac   : > { %790 = vst [vmem:[#allocation4 + $0x470] sm:$0xff] %v7729_v0 }
 0x1ad   : > { %791 = vst [vmem:[#allocation4 + $0x478] sm:$0xff] %v7729_v0 }
 0x1ae   : > { %792 = vst [vmem:[#allocation4 + $0x480] sm:$0xff] %v7729_v0 }
 0x1af   : > { %793 = vst [vmem:[#allocation4 + $0x488] sm:$0xff] %v7729_v0 }
 0x1b0   : > { %794 = vst [vmem:[#allocation4 + $0x490] sm:$0xff] %v7729_v0 }
 0x1b1   : > { %795 = vst [vmem:[#allocation4 + $0x498] sm:$0xff] %v7729_v0 }
 0x1b2   : > { %796 = vst [vmem:[#allocation4 + $0x4a0] sm:$0xff] %v7729_v0 }
 0x1b3   : > { %797 = vst [vmem:[#allocation4 + $0x4a8] sm:$0xff] %v7729_v0 }
 0x1b4   : > { %798 = vst [vmem:[#allocation4 + $0x4b0] sm:$0xff] %v7729_v0 }
 0x1b5   : > { %799 = vst [vmem:[#allocation4 + $0x4b8] sm:$0xff] %v7729_v0 }
 0x1b6   : > { %800 = vst [vmem:[#allocation4 + $0x4c0] sm:$0xff] %v7729_v0 }
 0x1b7   : > { %801 = vst [vmem:[#allocation4 + $0x4c8] sm:$0xff] %v7729_v0 }
 0x1b8   : > { %802 = vst [vmem:[#allocation4 + $0x4d0] sm:$0xff] %v7729_v0 }
 0x1b9   : > { %803 = vst [vmem:[#allocation4 + $0x4d8] sm:$0xff] %v7729_v0 }
 0x1ba   : > { %804 = vst [vmem:[#allocation4 + $0x4e0] sm:$0xff] %v7729_v0 }
 0x1bb   : > { %805 = vst [vmem:[#allocation4 + $0x4e8] sm:$0xff] %v7729_v0 }
 0x1bc   : > { %806 = vst [vmem:[#allocation4 + $0x4f0] sm:$0xff] %v7729_v0 }
 0x1bd   : > { %807 = vst [vmem:[#allocation4 + $0x4f8] sm:$0xff] %v7729_v0 }
 0x1be   : > { %808 = vst [vmem:[#allocation4 + $0x500] sm:$0xff] %v7729_v0 }
 0x1bf   : > { %809 = vst [vmem:[#allocation4 + $0x508] sm:$0xff] %v7729_v0 }
 0x1c0   : > { %810 = vst [vmem:[#allocation4 + $0x510] sm:$0xff] %v7729_v0 }
 0x1c1   : > { %811 = vst [vmem:[#allocation4 + $0x518] sm:$0xff] %v7729_v0 }
 0x1c2   : > { %812 = vst [vmem:[#allocation4 + $0x520] sm:$0xff] %v7729_v0 }
 0x1c3 LB: >> { %7426 = vmatpush.msra.mxu2 %v8256_v3  ;;  %7427 = vmatpush.msra.mxu3 %v8256_v3  ;;  %s6267_s24 = sshll.u32 %s7707_s22, 8  ;;  %vm859_vm0 = vcmask 130048   ;;  %v8375_v36 = vperm.slane %v8246_v1, 0  ;;  %s821_s22 = sadd.s32 1, %s7707_s22   ;;  %s7707_s22 = sphi %s8291_s22, %s821_s22  }
 0x1c4   : >> { %970 = vmatpush.msra.mxu0 %v8256_v3  ;;  %7425 = vmatpush.msra.mxu1 %v8256_v3  ;;  %s8306_s25 = scalar_lea.vmem %s7853_s16, %s6267_s24  ;;  %s8381_s30 = scalar_lea.vmem [#allocation2], %s6267_s24 }
 0x1c5   : >> { %7429 = vmatpush.msra.mxu2 %v8251_v2  ;;  %7430 = vmatpush.msra.mxu3 %v8251_v2  ;;  %v840_v4 = vld [vmem:[%s8306_s25 + $0x80] sm:$0xff]  ;;  %v841_v8 = vld [vmem:[%s8306_s25 + $0x88] sm:$0xff]  ;;  %v842_v12 = vld [vmem:[%s8306_s25 + $0x90] sm:$0xff]  ;;  %p818_p11 = scmp.ge.s32.totalorder %s821_s22, 25  }
 0x1c6   : >> { %971 = vmatpush.msra.mxu0 %v8251_v2  ;;  %7428 = vmatpush.msra.mxu1 %v8251_v2  ;;  %v848_v5 = vld [vmem:[%s8306_s25 + $0xc0] sm:$0xff]  ;;  %v849_v9 = vld [vmem:[%s8306_s25 + $0xc8] sm:$0xff]  ;;  %v850_v13 = vld [vmem:[%s8306_s25 + $0xd0] sm:$0xff]  ;;  %s8448_s13 = smov (%p818_p11), 0  }
 0x1c7   : >> { %v824_v6 = vld [vmem:[%s8306_s25] sm:$0xff]  ;;  %6284 = vmatmul.msk.f32.vlgmr.msra.gmra.mxu2 %vm859_vm0, %v840_v4  ;;  %6292 = vmatmul.msk.f32.vlgmr.msra.gmra.mxu3 %vm859_vm0, %v848_v5  ;;  %v825_v10 = vld [vmem:[%s8306_s25 + $0x8] sm:$0xff]  ;;  %v826_v14 = vld [vmem:[%s8306_s25 + $0x10] sm:$0xff] }
 0x1c8   : >> { %v832_v7 = vld [vmem:[%s8306_s25 + $0x40] sm:$0xff]  ;;  %6268 = vmatmul.msk.f32.vlgmr.msra.gmra.mxu0 %vm859_vm0, %v824_v6  ;;  %v833_v11 = vld [vmem:[%s8306_s25 + $0x48] sm:$0xff]  ;;  %v834_v15 = vld [vmem:[%s8306_s25 + $0x50] sm:$0xff] }
 0x1c9   : >> { %6276 = vmatmul.msk.f32.vlgmr.msra.gmra.mxu1 %vm859_vm0, %v832_v7  ;;  %v843_v16 = vld [vmem:[%s8306_s25 + $0x98] sm:$0xff]  ;;  %v844_v20 = vld [vmem:[%s8306_s25 + $0xa0] sm:$0xff]  ;;  %v845_v24 = vld [vmem:[%s8306_s25 + $0xa8] sm:$0xff] }
 0x1ca   : >> { %v851_v17 = vld [vmem:[%s8306_s25 + $0xd8] sm:$0xff]  ;;  %v852_v21 = vld [vmem:[%s8306_s25 + $0xe0] sm:$0xff]  ;;  %v853_v25 = vld [vmem:[%s8306_s25 + $0xe8] sm:$0xff] }
 0x1cb   : >> { %v827_v18 = vld [vmem:[%s8306_s25 + $0x18] sm:$0xff]  ;;  %v828_v22 = vld [vmem:[%s8306_s25 + $0x20] sm:$0xff]  ;;  %v829_v26 = vld [vmem:[%s8306_s25 + $0x28] sm:$0xff] }
 0x1cc   : >> { %v835_v19 = vld [vmem:[%s8306_s25 + $0x58] sm:$0xff]  ;;  %v836_v23 = vld [vmem:[%s8306_s25 + $0x60] sm:$0xff]  ;;  %v837_v27 = vld [vmem:[%s8306_s25 + $0x68] sm:$0xff] }
 0x1cd   : >> { %v846_v28 = vld [vmem:[%s8306_s25 + $0xb0] sm:$0xff]  ;;  %v847_v32 = vld [vmem:[%s8306_s25 + $0xb8] sm:$0xff] }
 0x1ce   : >> { %v854_v29 = vld [vmem:[%s8306_s25 + $0xf0] sm:$0xff]  ;;  %v855_v33 = vld [vmem:[%s8306_s25 + $0xf8] sm:$0xff] }
 0x1cf   : >> { %6285 = vmatmul.msk.f32.gmra.mxu2 %vm859_vm0, %v841_v8  ;;  %6293 = vmatmul.msk.f32.gmra.mxu3 %vm859_vm0, %v849_v9  ;;  %v830_v30 = vld [vmem:[%s8306_s25 + $0x30] sm:$0xff]  ;;  %v831_v34 = vld [vmem:[%s8306_s25 + $0x38] sm:$0xff] }
 0x1d0   : >> { %6269 = vmatmul.msk.f32.gmra.mxu0 %vm859_vm0, %v825_v10  ;;  %v838_v31 = vld [vmem:[%s8306_s25 + $0x70] sm:$0xff]  ;;  %v839_v35 = vld [vmem:[%s8306_s25 + $0x78] sm:$0xff] }
 0x1d1   : >> { %6277 = vmatmul.msk.f32.gmra.mxu1 %vm859_vm0, %v833_v11 }
 0x1d7   : >> { %6286 = vmatmul.msk.f32.gmra.mxu2 %vm859_vm0, %v842_v12  ;;  %6294 = vmatmul.msk.f32.gmra.mxu3 %vm859_vm0, %v850_v13 }
 0x1d8   : >> { %6270 = vmatmul.msk.f32.gmra.mxu0 %vm859_vm0, %v826_v14 }
 0x1d9   : >> { %6278 = vmatmul.msk.f32.gmra.mxu1 %vm859_vm0, %v834_v15 }
 0x1df   : >> { %6287 = vmatmul.msk.f32.gmra.mxu2 %vm859_vm0, %v843_v16  ;;  %6295 = vmatmul.msk.f32.gmra.mxu3 %vm859_vm0, %v851_v17 }
 0x1e0   : >> { %6271 = vmatmul.msk.f32.gmra.mxu0 %vm859_vm0, %v827_v18 }
 0x1e1   : >> { %6279 = vmatmul.msk.f32.gmra.mxu1 %vm859_vm0, %v835_v19 }
 0x1e7   : >> { %6288 = vmatmul.msk.f32.gmra.mxu2 %vm859_vm0, %v844_v20  ;;  %6296 = vmatmul.msk.f32.gmra.mxu3 %vm859_vm0, %v852_v21 }
 0x1e8   : >> { %6272 = vmatmul.msk.f32.gmra.mxu0 %vm859_vm0, %v828_v22 }
 0x1e9   : >> { %6280 = vmatmul.msk.f32.gmra.mxu1 %vm859_vm0, %v836_v23 }
 0x1ef   : >> { %6289 = vmatmul.msk.f32.gmra.mxu2 %vm859_vm0, %v845_v24  ;;  %6297 = vmatmul.msk.f32.gmra.mxu3 %vm859_vm0, %v853_v25 }
 0x1f0   : >> { %6273 = vmatmul.msk.f32.gmra.mxu0 %vm859_vm0, %v829_v26 }
 0x1f1   : >> { %6281 = vmatmul.msk.f32.gmra.mxu1 %vm859_vm0, %v837_v27 }
 0x1f7   : >> { %6290 = vmatmul.msk.f32.gmra.mxu2 %vm859_vm0, %v846_v28  ;;  %6298 = vmatmul.msk.f32.gmra.mxu3 %vm859_vm0, %v854_v29 }
 0x1f8   : >> { %6274 = vmatmul.msk.f32.gmra.mxu0 %vm859_vm0, %v830_v30 }
 0x1f9   : >> { %6282 = vmatmul.msk.f32.gmra.mxu1 %vm859_vm0, %v838_v31 }
 0x1ff   : >> { %6291 = vmatmul.msk.f32.gmra.mxu2 %vm859_vm0, %v847_v32  ;;  %6299 = vmatmul.msk.f32.gmra.mxu3 %vm859_vm0, %v855_v33 }
 0x200   : >> { %6275 = vmatmul.msk.f32.gmra.mxu0 %vm859_vm0, %v831_v34 }
 0x201   : >> { %6283 = vmatmul.msk.f32.gmra.mxu1 %vm859_vm0, %v839_v35 }
 0x245   : >> { %v973_v37 = vpop.f32.mrf.mxu0 }
 0x246   : >> { %v997_v38 = vpop.f32.mrf.mxu1  ;;  %v974_v39 = vadd.f32 %v973_v37, %v8375_v36 }
 0x247   : >> { %v998_v40 = vadd.f32 %v997_v38, %v8375_v36 }
 0x248   : >> { %v1069_v41 = vmax.f32 %v974_v39, 0.0 }
 0x249   : >> { %v1077_v42 = vmax.f32 %v998_v40, 0.0 }
 0x24a   : >> { %1102 = vst [vmem:[%s8381_s30] sm:$0xff] %v1069_v41  ;;  %v1021_v43 = vpop.f32.mrf.mxu2  ;;  %v1045_v44 = vpop.f32.mrf.mxu3 }
 0x24b   : >> { %1110 = vst [vmem:[%s8381_s30 + $0x40] sm:$0xff] %v1077_v42  ;;  %v1022_v45 = vadd.f32 %v1021_v43, %v8375_v36  ;;  %v1046_v46 = vadd.f32 %v1045_v44, %v8375_v36 }
 0x24d   : >> { %v1085_v47 = vmax.f32 %v1022_v45, 0.0  ;;  %v1093_v48 = vmax.f32 %v1046_v46, 0.0  ;;  %v976_v49 = vpop.f32.mrf.mxu0 }
 0x24e   : >> { %v1000_v50 = vpop.f32.mrf.mxu1  ;;  %v977_v51 = vadd.f32 %v976_v49, %v8375_v36 }
 0x24f   : >> { %v1001_v52 = vadd.f32 %v1000_v50, %v8375_v36  ;;  %1118 = vst [vmem:[%s8381_s30 + $0x80] sm:$0xff] %v1085_v47 }
 0x250   : >> { %1126 = vst [vmem:[%s8381_s30 + $0xc0] sm:$0xff] %v1093_v48  ;;  %v1070_v53 = vmax.f32 %v977_v51, 0.0 }
 0x251   : >> { %v1078_v54 = vmax.f32 %v1001_v52, 0.0 }
 0x252   : >> { %1103 = vst [vmem:[%s8381_s30 + $0x8] sm:$0xff] %v1070_v53  ;;  %v1024_v55 = vpop.f32.mrf.mxu2  ;;  %v1048_v56 = vpop.f32.mrf.mxu3 }
 0x253   : >> { %1111 = vst [vmem:[%s8381_s30 + $0x48] sm:$0xff] %v1078_v54  ;;  %v1025_v57 = vadd.f32 %v1024_v55, %v8375_v36  ;;  %v1049_v58 = vadd.f32 %v1048_v56, %v8375_v36 }
 0x255   : >> { %v1086_v59 = vmax.f32 %v1025_v57, 0.0  ;;  %v1094_v60 = vmax.f32 %v1049_v58, 0.0  ;;  %v979_v61 = vpop.f32.mrf.mxu0 }
 0x256   : >> { %v1003_v62 = vpop.f32.mrf.mxu1  ;;  %v980_v63 = vadd.f32 %v979_v61, %v8375_v36 }
 0x257   : >> { %v1004_v0 = vadd.f32 %v1003_v62, %v8375_v36  ;;  %1119 = vst [vmem:[%s8381_s30 + $0x88] sm:$0xff] %v1086_v59 }
 0x258   : >> { %1127 = vst [vmem:[%s8381_s30 + $0xc8] sm:$0xff] %v1094_v60  ;;  %v1071_v4 = vmax.f32 %v980_v63, 0.0 }
 0x259   : >> { %v1079_v5 = vmax.f32 %v1004_v0, 0.0 }
 0x25a   : >> { %1104 = vst [vmem:[%s8381_s30 + $0x10] sm:$0xff] %v1071_v4  ;;  %v1027_v6 = vpop.f32.mrf.mxu2  ;;  %v1051_v7 = vpop.f32.mrf.mxu3 }
 0x25b   : >> { %1112 = vst [vmem:[%s8381_s30 + $0x50] sm:$0xff] %v1079_v5  ;;  %v1028_v8 = vadd.f32 %v1027_v6, %v8375_v36  ;;  %v1052_v9 = vadd.f32 %v1051_v7, %v8375_v36 }
 0x25d   : >> { %v1087_v10 = vmax.f32 %v1028_v8, 0.0  ;;  %v1095_v11 = vmax.f32 %v1052_v9, 0.0  ;;  %v982_v12 = vpop.f32.mrf.mxu0 }
 0x25e   : >> { %v1006_v13 = vpop.f32.mrf.mxu1  ;;  %v983_v14 = vadd.f32 %v982_v12, %v8375_v36 }
 0x25f   : >> { %v1007_v15 = vadd.f32 %v1006_v13, %v8375_v36  ;;  %1120 = vst [vmem:[%s8381_s30 + $0x90] sm:$0xff] %v1087_v10 }
 0x260   : >> { %1128 = vst [vmem:[%s8381_s30 + $0xd0] sm:$0xff] %v1095_v11  ;;  %v1072_v16 = vmax.f32 %v983_v14, 0.0 }
 0x261   : >> { %v1080_v17 = vmax.f32 %v1007_v15, 0.0 }
 0x262   : >> { %1105 = vst [vmem:[%s8381_s30 + $0x18] sm:$0xff] %v1072_v16  ;;  %v1030_v18 = vpop.f32.mrf.mxu2  ;;  %v1054_v19 = vpop.f32.mrf.mxu3 }
 0x263   : >> { %1113 = vst [vmem:[%s8381_s30 + $0x58] sm:$0xff] %v1080_v17  ;;  %v1031_v20 = vadd.f32 %v1030_v18, %v8375_v36  ;;  %v1055_v21 = vadd.f32 %v1054_v19, %v8375_v36 }
 0x265   : >> { %v1088_v22 = vmax.f32 %v1031_v20, 0.0  ;;  %v1096_v23 = vmax.f32 %v1055_v21, 0.0  ;;  %v985_v24 = vpop.f32.mrf.mxu0 }
 0x266   : >> { %v1009_v25 = vpop.f32.mrf.mxu1  ;;  %v986_v26 = vadd.f32 %v985_v24, %v8375_v36 }
 0x267   : >> { %v1010_v27 = vadd.f32 %v1009_v25, %v8375_v36  ;;  %1121 = vst [vmem:[%s8381_s30 + $0x98] sm:$0xff] %v1088_v22 }
 0x268   : >> { %1129 = vst [vmem:[%s8381_s30 + $0xd8] sm:$0xff] %v1096_v23  ;;  %v1073_v28 = vmax.f32 %v986_v26, 0.0 }
 0x269   : >> { %v1081_v29 = vmax.f32 %v1010_v27, 0.0 }
 0x26a   : >> { %1106 = vst [vmem:[%s8381_s30 + $0x20] sm:$0xff] %v1073_v28  ;;  %v1033_v30 = vpop.f32.mrf.mxu2  ;;  %v1057_v31 = vpop.f32.mrf.mxu3 }
 0x26b   : >> { %1114 = vst [vmem:[%s8381_s30 + $0x60] sm:$0xff] %v1081_v29  ;;  %v1034_v32 = vadd.f32 %v1033_v30, %v8375_v36  ;;  %v1058_v33 = vadd.f32 %v1057_v31, %v8375_v36 }
 0x26d   : >> { %v1089_v34 = vmax.f32 %v1034_v32, 0.0  ;;  %v1097_v35 = vmax.f32 %v1058_v33, 0.0  ;;  %v988_v37 = vpop.f32.mrf.mxu0 }
 0x26e   : >> { %v1012_v38 = vpop.f32.mrf.mxu1  ;;  %v989_v39 = vadd.f32 %v988_v37, %v8375_v36 }
 0x26f   : >> { %v1013_v40 = vadd.f32 %v1012_v38, %v8375_v36  ;;  %1122 = vst [vmem:[%s8381_s30 + $0xa0] sm:$0xff] %v1089_v34 }
 0x270   : >> { %1130 = vst [vmem:[%s8381_s30 + $0xe0] sm:$0xff] %v1097_v35  ;;  %v1074_v41 = vmax.f32 %v989_v39, 0.0 }
 0x271   : >> { %v1082_v42 = vmax.f32 %v1013_v40, 0.0 }
 0x272   : >> { %1107 = vst [vmem:[%s8381_s30 + $0x28] sm:$0xff] %v1074_v41  ;;  %v1036_v43 = vpop.f32.mrf.mxu2  ;;  %v1060_v44 = vpop.f32.mrf.mxu3 }
 0x273   : >> { %1115 = vst [vmem:[%s8381_s30 + $0x68] sm:$0xff] %v1082_v42  ;;  %v1037_v45 = vadd.f32 %v1036_v43, %v8375_v36  ;;  %v1061_v46 = vadd.f32 %v1060_v44, %v8375_v36 }
 0x275   : >> { %v1090_v47 = vmax.f32 %v1037_v45, 0.0  ;;  %v1098_v48 = vmax.f32 %v1061_v46, 0.0  ;;  %v991_v49 = vpop.f32.mrf.mxu0 }
 0x276   : >> { %v1015_v50 = vpop.f32.mrf.mxu1  ;;  %v992_v51 = vadd.f32 %v991_v49, %v8375_v36 }
 0x277   : >> { %v1016_v52 = vadd.f32 %v1015_v50, %v8375_v36  ;;  %1123 = vst [vmem:[%s8381_s30 + $0xa8] sm:$0xff] %v1090_v47 }
 0x278   : >> { %1131 = vst [vmem:[%s8381_s30 + $0xe8] sm:$0xff] %v1098_v48  ;;  %v1075_v53 = vmax.f32 %v992_v51, 0.0 }
 0x279   : >> { %v1083_v54 = vmax.f32 %v1016_v52, 0.0 }
 0x27a   : >> { %1108 = vst [vmem:[%s8381_s30 + $0x30] sm:$0xff] %v1075_v53  ;;  %v1039_v55 = vpop.f32.mrf.mxu2  ;;  %v1063_v56 = vpop.f32.mrf.mxu3 }
 0x27b   : >> { %1116 = vst [vmem:[%s8381_s30 + $0x70] sm:$0xff] %v1083_v54  ;;  %v1040_v57 = vadd.f32 %v1039_v55, %v8375_v36  ;;  %v1064_v58 = vadd.f32 %v1063_v56, %v8375_v36 }
 0x27d   : >> { %v1091_v59 = vmax.f32 %v1040_v57, 0.0  ;;  %v1099_v60 = vmax.f32 %v1064_v58, 0.0  ;;  %v994_v61 = vpop.f32.mrf.mxu0 }
 0x27e   : >> { %v1018_v62 = vpop.f32.mrf.mxu1  ;;  %v995_v63 = vadd.f32 %v994_v61, %v8375_v36 }
 0x27f   : >> { %v1019_v0 = vadd.f32 %v1018_v62, %v8375_v36  ;;  %1124 = vst [vmem:[%s8381_s30 + $0xb0] sm:$0xff] %v1091_v59 }
 0x280   : >> { %1132 = vst [vmem:[%s8381_s30 + $0xf0] sm:$0xff] %v1099_v60  ;;  %v1076_v4 = vmax.f32 %v995_v63, 0.0 }
 0x281   : >> { %v1084_v5 = vmax.f32 %v1019_v0, 0.0 }
 0x282   : >> { %1109 = vst [vmem:[%s8381_s30 + $0x38] sm:$0xff] %v1076_v4  ;;  %v1042_v6 = vpop.f32.mrf.mxu2  ;;  %v1066_v7 = vpop.f32.mrf.mxu3 }
 0x283   : >> { %1117 = vst [vmem:[%s8381_s30 + $0x78] sm:$0xff] %v1084_v5  ;;  %v1043_v8 = vadd.f32 %v1042_v6, %v8375_v36  ;;  %v1067_v9 = vadd.f32 %v1066_v7, %v8375_v36 }
 0x284   : > { %820 = sbr.rel (!%p818_p11) target bundleno = 451 (0x1c3), region = 340 }
 0x285   : >> { %v1092_v10 = vmax.f32 %v1043_v8, 0.0  ;;  %v1100_v11 = vmax.f32 %v1067_v9, 0.0 }
 0x287   : >> { %1125 = vst [vmem:[%s8381_s30 + $0xb8] sm:$0xff] %v1092_v10 }
 0x288   : >> { %1133 = vst [vmem:[%s8381_s30 + $0xf8] sm:$0xff] %v1100_v11 }
 0x289 LB: >> { %s1140_s14 = smul.u32 800, %s7711_s13  ;;  %s6408_s16 = sshll.u32 %s7711_s13, 8  ;;  %s7711_s13 = sphi %s8448_s13, %s1139_s13  }
 0x28a   : >> { %s8571_s22 = scalar_lea.vmem [#allocation3], %s6408_s16  ;;  %s1139_s13 = sadd.s32 1, %s7711_s13  }
 0x28b   : >> { %s8454_s24 = scalar_lea.vmem [#allocation2], %s1140_s14  ;;  %p1136_p12 = scmp.ge.s32.totalorder %s1139_s13, 8  }
 0x28c   : > { %s8609_s14 = smov (%p1136_p12), 0  }
 0x28f   : >> { %v1142_v1 = vld [vmem:[%s8454_s24] sm:$0xff]  ;;  %v1143_v3 = vld [vmem:[%s8454_s24 + $0x8] sm:$0xff]  ;;  %v1144_v13 = vld [vmem:[%s8454_s24 + $0x10] sm:$0xff] }
 0x290   : >> { %v6300_v2 = vld [vmem:[%s8454_s24 + $0x1c] sm:$0xff]  ;;  %v6301_v12 = vld [vmem:[%s8454_s24 + $0x24] sm:$0xff]  ;;  %v6302_v14 = vld [vmem:[%s8454_s24 + $0x2c] sm:$0xff] }
 0x291   : >> { %v1152_v36 = vmax.f32 %v1142_v1, %v6300_v2  ;;  %v1153_v15 = vmax.f32 %v1143_v3, %v6301_v12  ;;  %v1154_v16 = vmax.f32 %v1144_v13, %v6302_v14  ;;  %v1145_v17 = vld [vmem:[%s8454_s24 + $0x18] sm:$0xf]  ;;  %v6303_v18 = vld [vmem:[%s8454_s24 + $0x34] sm:$0xf]  ;;  %v6305_v22 = vld [vmem:[%s8454_s24 + $0x40] sm:$0xff] }
 0x292   : >> { %v6304_v19 = vld [vmem:[%s8454_s24 + $0x38] sm:$0xff]  ;;  %v1155_v20 = vmax.f32 %v1145_v17, %v6303_v18  ;;  %v6306_v26 = vld [vmem:[%s8454_s24 + $0x48] sm:$0xff]  ;;  %v6307_v28 = vld [vmem:[%s8454_s24 + $0x50] sm:$0xf] }
 0x293   : >> { %1156 = vst [vmem:[#allocation6] sm:$0xff] %v1152_v36  ;;  %v6308_v21 = vld [vmem:[%s8454_s24 + $0x54] sm:$0xff]  ;;  %v6309_v23 = vld [vmem:[%s8454_s24 + $0x5c] sm:$0xff]  ;;  %v6310_v27 = vld [vmem:[%s8454_s24 + $0x64] sm:$0xff] }
 0x294   : >> { %1157 = vst [vmem:[#allocation6 + $0x8] sm:$0xff] %v1153_v15  ;;  %v1172_v24 = vmax.f32 %v6304_v19, %v6308_v21  ;;  %v1173_v25 = vmax.f32 %v6305_v22, %v6309_v23  ;;  %v1174_v29 = vmax.f32 %v6306_v26, %v6310_v27  ;;  %v6311_v30 = vld [vmem:[%s8454_s24 + $0x6c] sm:$0xf]  ;;  %v6312_v31 = vld [vmem:[%s8454_s24 + $0x70] sm:$0xff]  ;;  %v6313_v34 = vld [vmem:[%s8454_s24 + $0x78] sm:$0xff] }
 0x295   : >> { %1158 = vst [vmem:[#allocation6 + $0x10] sm:$0xff] %v1154_v16  ;;  %v6316_v32 = vld [vmem:[%s8454_s24 + $0x8c] sm:$0xff]  ;;  %v1175_v33 = vmax.f32 %v6307_v28, %v6311_v30  ;;  %v6317_v35 = vld [vmem:[%s8454_s24 + $0x94] sm:$0xff]  ;;  %v6314_v37 = vld [vmem:[%s8454_s24 + $0x80] sm:$0xff] }
 0x296   : >> { %1159 = vst [vmem:[#allocation6 + $0x18] sm:$0xf] %v1155_v20  ;;  %v1192_v38 = vmax.f32 %v6312_v31, %v6316_v32  ;;  %v6318_v39 = vld [vmem:[%s8454_s24 + $0x9c] sm:$0xff]  ;;  %v6315_v40 = vld [vmem:[%s8454_s24 + $0x88] sm:$0xf]  ;;  %v1193_v42 = vmax.f32 %v6313_v34, %v6317_v35  ;;  %v6321_v46 = vld [vmem:[%s8454_s24 + $0xb0] sm:$0xff] }
 0x297   : >> { %1176 = vst [vmem:[#allocation6 + $0x20] sm:$0xff] %v1172_v24  ;;  %v6319_v41 = vld [vmem:[%s8454_s24 + $0xa4] sm:$0xf]  ;;  %v6320_v43 = vld [vmem:[%s8454_s24 + $0xa8] sm:$0xff]  ;;  %v1194_v45 = vmax.f32 %v6314_v37, %v6318_v39  ;;  %v6322_v49 = vld [vmem:[%s8454_s24 + $0xb8] sm:$0xff] }
 0x298   : >> { %1177 = vst [vmem:[#allocation6 + $0x28] sm:$0xff] %v1173_v25  ;;  %v6324_v44 = vld [vmem:[%s8454_s24 + $0xc4] sm:$0xff]  ;;  %v6325_v47 = vld [vmem:[%s8454_s24 + $0xcc] sm:$0xff]  ;;  %v1195_v48 = vmax.f32 %v6315_v40, %v6319_v41  ;;  %v6326_v50 = vld [vmem:[%s8454_s24 + $0xd4] sm:$0xff] }
 0x299   : >> { %1178 = vst [vmem:[#allocation6 + $0x30] sm:$0xff] %v1174_v29  ;;  %v1212_v51 = vmax.f32 %v6320_v43, %v6324_v44  ;;  %v6323_v52 = vld [vmem:[%s8454_s24 + $0xc0] sm:$0xf]  ;;  %v6327_v53 = vld [vmem:[%s8454_s24 + $0xdc] sm:$0xf]  ;;  %v1213_v54 = vmax.f32 %v6321_v46, %v6325_v47  ;;  %v1214_v57 = vmax.f32 %v6322_v49, %v6326_v50  ;;  %v6329_v58 = vld [vmem:[%s8454_s24 + $0xe8] sm:$0xff] }
 0x29a   : >> { %1179 = vst [vmem:[#allocation6 + $0x38] sm:$0xf] %v1175_v33  ;;  %v6328_v55 = vld [vmem:[%s8454_s24 + $0xe0] sm:$0xff]  ;;  %v1215_v60 = vmax.f32 %v6323_v52, %v6327_v53  ;;  %v6330_v61 = vld [vmem:[%s8454_s24 + $0xf0] sm:$0xff]  ;;  %v6331_v0 = vld [vmem:[%s8454_s24 + $0xf8] sm:$0xf] }
 0x29b   : >> { %1196 = vst [vmem:[#allocation6 + $0x40] sm:$0xff] %v1192_v38  ;;  %v6332_v56 = vld [vmem:[%s8454_s24 + $0xfc] sm:$0xff]  ;;  %v6333_v59 = vld [vmem:[%s8454_s24 + $0x104] sm:$0xff]  ;;  %v6334_v62 = vld [vmem:[%s8454_s24 + $0x10c] sm:$0xff] }
 0x29c   : >> { %1197 = vst [vmem:[#allocation6 + $0x48] sm:$0xff] %v1193_v42  ;;  %v1232_v63 = vmax.f32 %v6328_v55, %v6332_v56  ;;  %v6335_v4 = vld [vmem:[%s8454_s24 + $0x114] sm:$0xf]  ;;  %v1233_v5 = vmax.f32 %v6329_v58, %v6333_v59  ;;  %v6336_v6 = vld [vmem:[%s8454_s24 + $0x118] sm:$0xff]  ;;  %v1234_v8 = vmax.f32 %v6330_v61, %v6334_v62  ;;  %v6337_v9 = vld [vmem:[%s8454_s24 + $0x120] sm:$0xff] }
 0x29d   : >> { %1198 = vst [vmem:[#allocation6 + $0x50] sm:$0xff] %v1194_v45  ;;  %v6340_v7 = vld [vmem:[%s8454_s24 + $0x134] sm:$0xff]  ;;  %v6341_v10 = vld [vmem:[%s8454_s24 + $0x13c] sm:$0xff]  ;;  %v1235_v11 = vmax.f32 %v6331_v0, %v6335_v4  ;;  %v6338_v1 = vld [vmem:[%s8454_s24 + $0x128] sm:$0xff] }
 0x29e   : >> { %1199 = vst [vmem:[#allocation6 + $0x58] sm:$0xf] %v1195_v48  ;;  %v6342_v2 = vld [vmem:[%s8454_s24 + $0x144] sm:$0xff]  ;;  %v1252_v3 = vmax.f32 %v6336_v6, %v6340_v7  ;;  %v6339_v36 = vld [vmem:[%s8454_s24 + $0x130] sm:$0xf]  ;;  %v1253_v13 = vmax.f32 %v6337_v9, %v6341_v10  ;;  %v6345_v17 = vld [vmem:[%s8454_s24 + $0x158] sm:$0xff] }
 0x29f   : >> { %1216 = vst [vmem:[#allocation6 + $0x60] sm:$0xff] %v1212_v51  ;;  %v6343_v12 = vld [vmem:[%s8454_s24 + $0x14c] sm:$0xf]  ;;  %v6344_v14 = vld [vmem:[%s8454_s24 + $0x150] sm:$0xff]  ;;  %v1254_v16 = vmax.f32 %v6338_v1, %v6342_v2  ;;  %v6346_v20 = vld [vmem:[%s8454_s24 + $0x160] sm:$0xff] }
 0x2a0   : >> { %1217 = vst [vmem:[#allocation6 + $0x68] sm:$0xff] %v1213_v54  ;;  %v6348_v15 = vld [vmem:[%s8454_s24 + $0x16c] sm:$0xff]  ;;  %v6349_v18 = vld [vmem:[%s8454_s24 + $0x174] sm:$0xff]  ;;  %v1255_v19 = vmax.f32 %v6339_v36, %v6343_v12  ;;  %v6350_v21 = vld [vmem:[%s8454_s24 + $0x17c] sm:$0xff] }
 0x2a1   : >> { %1218 = vst [vmem:[#allocation6 + $0x70] sm:$0xff] %v1214_v57  ;;  %v1272_v22 = vmax.f32 %v6344_v14, %v6348_v15  ;;  %v6347_v23 = vld [vmem:[%s8454_s24 + $0x168] sm:$0xf]  ;;  %v6351_v24 = vld [vmem:[%s8454_s24 + $0x184] sm:$0xf]  ;;  %v1273_v25 = vmax.f32 %v6345_v17, %v6349_v18  ;;  %v1274_v28 = vmax.f32 %v6346_v20, %v6350_v21  ;;  %v6353_v29 = vld [vmem:[%s8454_s24 + $0x190] sm:$0xff] }
 0x2a2   : >> { %1219 = vst [vmem:[#allocation6 + $0x78] sm:$0xf] %v1215_v60  ;;  %v6352_v26 = vld [vmem:[%s8454_s24 + $0x188] sm:$0xff]  ;;  %v1275_v31 = vmax.f32 %v6347_v23, %v6351_v24  ;;  %v6354_v32 = vld [vmem:[%s8454_s24 + $0x198] sm:$0xff]  ;;  %v6355_v35 = vld [vmem:[%s8454_s24 + $0x1a0] sm:$0xf] }
 0x2a3   : >> { %1236 = vst [vmem:[#allocation6 + $0x80] sm:$0xff] %v1232_v63  ;;  %v6356_v27 = vld [vmem:[%s8454_s24 + $0x1a4] sm:$0xff]  ;;  %v6357_v30 = vld [vmem:[%s8454_s24 + $0x1ac] sm:$0xff]  ;;  %v6358_v33 = vld [vmem:[%s8454_s24 + $0x1b4] sm:$0xff] }
 0x2a4   : >> { %1237 = vst [vmem:[#allocation6 + $0x88] sm:$0xff] %v1233_v5  ;;  %v1292_v34 = vmax.f32 %v6352_v26, %v6356_v27  ;;  %v6359_v37 = vld [vmem:[%s8454_s24 + $0x1bc] sm:$0xf]  ;;  %v1293_v38 = vmax.f32 %v6353_v29, %v6357_v30  ;;  %v6360_v39 = vld [vmem:[%s8454_s24 + $0x1c0] sm:$0xff]  ;;  %v1294_v41 = vmax.f32 %v6354_v32, %v6358_v33  ;;  %v6361_v42 = vld [vmem:[%s8454_s24 + $0x1c8] sm:$0xff] }
 0x2a5   : >> { %1238 = vst [vmem:[#allocation6 + $0x90] sm:$0xff] %v1234_v8  ;;  %v6364_v40 = vld [vmem:[%s8454_s24 + $0x1dc] sm:$0xff]  ;;  %v6365_v43 = vld [vmem:[%s8454_s24 + $0x1e4] sm:$0xff]  ;;  %v1295_v44 = vmax.f32 %v6355_v35, %v6359_v37  ;;  %v6362_v45 = vld [vmem:[%s8454_s24 + $0x1d0] sm:$0xff] }
 0x2a6   : >> { %1239 = vst [vmem:[#allocation6 + $0x98] sm:$0xf] %v1235_v11  ;;  %v6366_v46 = vld [vmem:[%s8454_s24 + $0x1ec] sm:$0xff]  ;;  %v1312_v47 = vmax.f32 %v6360_v39, %v6364_v40  ;;  %v6363_v48 = vld [vmem:[%s8454_s24 + $0x1d8] sm:$0xf]  ;;  %v1313_v50 = vmax.f32 %v6361_v42, %v6365_v43  ;;  %v6369_v54 = vld [vmem:[%s8454_s24 + $0x200] sm:$0xff] }
 0x2a7   : >> { %1256 = vst [vmem:[#allocation6 + $0xa0] sm:$0xff] %v1252_v3  ;;  %v6367_v49 = vld [vmem:[%s8454_s24 + $0x1f4] sm:$0xf]  ;;  %v6368_v51 = vld [vmem:[%s8454_s24 + $0x1f8] sm:$0xff]  ;;  %v1314_v53 = vmax.f32 %v6362_v45, %v6366_v46  ;;  %v6370_v57 = vld [vmem:[%s8454_s24 + $0x208] sm:$0xff] }
 0x2a8   : >> { %1257 = vst [vmem:[#allocation6 + $0xa8] sm:$0xff] %v1253_v13  ;;  %v6372_v52 = vld [vmem:[%s8454_s24 + $0x214] sm:$0xff]  ;;  %v6373_v55 = vld [vmem:[%s8454_s24 + $0x21c] sm:$0xff]  ;;  %v1315_v56 = vmax.f32 %v6363_v48, %v6367_v49  ;;  %v6374_v58 = vld [vmem:[%s8454_s24 + $0x224] sm:$0xff] }
 0x2a9   : >> { %1258 = vst [vmem:[#allocation6 + $0xb0] sm:$0xff] %v1254_v16  ;;  %v1332_v59 = vmax.f32 %v6368_v51, %v6372_v52  ;;  %v6371_v60 = vld [vmem:[%s8454_s24 + $0x210] sm:$0xf]  ;;  %v6375_v61 = vld [vmem:[%s8454_s24 + $0x22c] sm:$0xf]  ;;  %v1333_v62 = vmax.f32 %v6369_v54, %v6373_v55  ;;  %v1334_v4 = vmax.f32 %v6370_v57, %v6374_v58  ;;  %v6377_v5 = vld [vmem:[%s8454_s24 + $0x238] sm:$0xff] }
 0x2aa   : >> { %1259 = vst [vmem:[#allocation6 + $0xb8] sm:$0xf] %v1255_v19  ;;  %v6376_v63 = vld [vmem:[%s8454_s24 + $0x230] sm:$0xff]  ;;  %v1335_v7 = vmax.f32 %v6371_v60, %v6375_v61  ;;  %v6378_v8 = vld [vmem:[%s8454_s24 + $0x240] sm:$0xff]  ;;  %v6379_v11 = vld [vmem:[%s8454_s24 + $0x248] sm:$0xf] }
 0x2ab   : >> { %1276 = vst [vmem:[#allocation6 + $0xc0] sm:$0xff] %v1272_v22  ;;  %v6380_v0 = vld [vmem:[%s8454_s24 + $0x24c] sm:$0xff]  ;;  %v6381_v6 = vld [vmem:[%s8454_s24 + $0x254] sm:$0xff]  ;;  %v6382_v9 = vld [vmem:[%s8454_s24 + $0x25c] sm:$0xff] }
 0x2ac   : >> { %1277 = vst [vmem:[#allocation6 + $0xc8] sm:$0xff] %v1273_v25  ;;  %v1352_v10 = vmax.f32 %v6376_v63, %v6380_v0  ;;  %v6383_v1 = vld [vmem:[%s8454_s24 + $0x264] sm:$0xf]  ;;  %v1353_v2 = vmax.f32 %v6377_v5, %v6381_v6  ;;  %v6384_v3 = vld [vmem:[%s8454_s24 + $0x268] sm:$0xff]  ;;  %v1354_v12 = vmax.f32 %v6378_v8, %v6382_v9  ;;  %v6385_v13 = vld [vmem:[%s8454_s24 + $0x270] sm:$0xff] }
 0x2ad   : >> { %1278 = vst [vmem:[#allocation6 + $0xd0] sm:$0xff] %v1274_v28  ;;  %v6388_v36 = vld [vmem:[%s8454_s24 + $0x284] sm:$0xff]  ;;  %v6389_v14 = vld [vmem:[%s8454_s24 + $0x28c] sm:$0xff]  ;;  %v1355_v15 = vmax.f32 %v6379_v11, %v6383_v1  ;;  %v6386_v16 = vld [vmem:[%s8454_s24 + $0x278] sm:$0xff] }
 0x2ae   : >> { %1279 = vst [vmem:[#allocation6 + $0xd8] sm:$0xf] %v1275_v31  ;;  %v6390_v17 = vld [vmem:[%s8454_s24 + $0x294] sm:$0xff]  ;;  %v1372_v18 = vmax.f32 %v6384_v3, %v6388_v36  ;;  %v6387_v19 = vld [vmem:[%s8454_s24 + $0x280] sm:$0xf]  ;;  %v1373_v21 = vmax.f32 %v6385_v13, %v6389_v14  ;;  %v6393_v25 = vld [vmem:[%s8454_s24 + $0x2a8] sm:$0xff] }
 0x2af   : >> { %1296 = vst [vmem:[#allocation6 + $0xe0] sm:$0xff] %v1292_v34  ;;  %v6391_v20 = vld [vmem:[%s8454_s24 + $0x29c] sm:$0xf]  ;;  %v6392_v22 = vld [vmem:[%s8454_s24 + $0x2a0] sm:$0xff]  ;;  %v1374_v24 = vmax.f32 %v6386_v16, %v6390_v17  ;;  %v6394_v28 = vld [vmem:[%s8454_s24 + $0x2b0] sm:$0xff] }
 0x2b0   : >> { %1297 = vst [vmem:[#allocation6 + $0xe8] sm:$0xff] %v1293_v38  ;;  %v6396_v23 = vld [vmem:[%s8454_s24 + $0x2bc] sm:$0xff]  ;;  %v6397_v26 = vld [vmem:[%s8454_s24 + $0x2c4] sm:$0xff]  ;;  %v1375_v27 = vmax.f32 %v6387_v19, %v6391_v20  ;;  %v6398_v29 = vld [vmem:[%s8454_s24 + $0x2cc] sm:$0xff] }
 0x2b1   : >> { %1298 = vst [vmem:[#allocation6 + $0xf0] sm:$0xff] %v1294_v41  ;;  %v1392_v30 = vmax.f32 %v6392_v22, %v6396_v23  ;;  %v6395_v31 = vld [vmem:[%s8454_s24 + $0x2b8] sm:$0xf]  ;;  %v6399_v32 = vld [vmem:[%s8454_s24 + $0x2d4] sm:$0xf]  ;;  %v1393_v34 = vmax.f32 %v6393_v25, %v6397_v26  ;;  %v6401_v37 = vld [vmem:[%s8454_s24 + $0x2e0] sm:$0xff]  ;;  %v1394_v39 = vmax.f32 %v6394_v28, %v6398_v29 }
 0x2b2   : >> { %1299 = vst [vmem:[#allocation6 + $0xf8] sm:$0xf] %v1295_v44  ;;  %v6400_v33 = vld [vmem:[%s8454_s24 + $0x2d8] sm:$0xff]  ;;  %v6402_v40 = vld [vmem:[%s8454_s24 + $0x2e8] sm:$0xff]  ;;  %v6403_v42 = vld [vmem:[%s8454_s24 + $0x2f0] sm:$0xf]  ;;  %v1395_v43 = vmax.f32 %v6395_v31, %v6399_v32 }
 0x2b3   : >> { %1316 = vst [vmem:[#allocation6 + $0x100] sm:$0xff] %v1312_v47  ;;  %v6404_v35 = vld [vmem:[%s8454_s24 + $0x2f4] sm:$0xff]  ;;  %v6405_v38 = vld [vmem:[%s8454_s24 + $0x2fc] sm:$0xff]  ;;  %v6406_v41 = vld [vmem:[%s8454_s24 + $0x304] sm:$0xff] }
 0x2b4   : >> { %1317 = vst [vmem:[#allocation6 + $0x108] sm:$0xff] %v1313_v50  ;;  %v6407_v44 = vld [vmem:[%s8454_s24 + $0x30c] sm:$0xf]  ;;  %v1420_v45 = vld [vmem:[#allocation6] ss:$2 sm:$0xff]  ;;  %v1412_v46 = vmax.f32 %v6400_v33, %v6404_v35  ;;  %v1413_v49 = vmax.f32 %v6401_v37, %v6405_v38  ;;  %v1414_v52 = vmax.f32 %v6402_v40, %v6406_v41 }
 0x2b5   : >> { %1318 = vst [vmem:[#allocation6 + $0x110] sm:$0xff] %v1314_v53  ;;  %v1424_v47 = vld [vmem:[#allocation6 + $0x1] ss:$2 sm:$0xff]  ;;  %v1422_v48 = vld [vmem:[#allocation6 + $0x10] ss:$2 sm:$0x3f]  ;;  %v1415_v55 = vmax.f32 %v6403_v42, %v6407_v44 }
 0x2b6   : >> { %1319 = vst [vmem:[#allocation6 + $0x118] sm:$0xf] %v1315_v56  ;;  %v1426_v50 = vld [vmem:[#allocation6 + $0x11] ss:$2 sm:$0x3f]  ;;  %v1427_v57 = vmax.f32 %v1420_v45, %v1424_v47 }
 0x2b7   : >> { %1336 = vst [vmem:[#allocation6 + $0x120] sm:$0xff] %v1332_v59  ;;  %v1435_v51 = vld [vmem:[#allocation6 + $0x20] ss:$2 sm:$0xff]  ;;  %v1439_v53 = vld [vmem:[#allocation6 + $0x21] ss:$2 sm:$0xff]  ;;  %v1428_v60 = vmax.f32 %v1422_v48, %v1426_v50 }
 0x2b8   : >> { %1337 = vst [vmem:[#allocation6 + $0x128] sm:$0xff] %v1333_v62  ;;  %v1437_v54 = vld [vmem:[#allocation6 + $0x30] ss:$2 sm:$0x3f]  ;;  %v1449_v58 = vld [vmem:[#allocation6 + $0x40] ss:$2 sm:$0xff]  ;;  %v1442_v63 = vmax.f32 %v1435_v51, %v1439_v53 }
 0x2b9   : >> { %1338 = vst [vmem:[#allocation6 + $0x130] sm:$0xff] %v1334_v4  ;;  %v1441_v56 = vld [vmem:[#allocation6 + $0x31] ss:$2 sm:$0x3f]  ;;  %v1453_v61 = vld [vmem:[#allocation6 + $0x41] ss:$2 sm:$0xff] }
 0x2ba   : >> { %1339 = vst [vmem:[#allocation6 + $0x138] sm:$0xf] %v1335_v7  ;;  %v1451_v59 = vld [vmem:[#allocation6 + $0x50] ss:$2 sm:$0x3f]  ;;  %v1443_v6 = vmax.f32 %v1437_v54, %v1441_v56  ;;  %v1456_v9 = vmax.f32 %v1449_v58, %v1453_v61 }
 0x2bb   : >> { %1356 = vst [vmem:[#allocation6 + $0x140] sm:$0xff] %v1352_v10  ;;  %v1455_v62 = vld [vmem:[#allocation6 + $0x51] ss:$2 sm:$0x3f]  ;;  %v1463_v0 = vld [vmem:[#allocation6 + $0x60] ss:$2 sm:$0xff] }
 0x2bc   : >> { %1357 = vst [vmem:[#allocation6 + $0x148] sm:$0xff] %v1353_v2  ;;  %v1465_v4 = vld [vmem:[#allocation6 + $0x70] ss:$2 sm:$0x3f]  ;;  %v1467_v7 = vld [vmem:[#allocation6 + $0x61] ss:$2 sm:$0xff]  ;;  %v1457_v1 = vmax.f32 %v1451_v59, %v1455_v62 }
 0x2bd   : >> { %1358 = vst [vmem:[#allocation6 + $0x150] sm:$0xff] %v1354_v12  ;;  %v1469_v5 = vld [vmem:[#allocation6 + $0x71] ss:$2 sm:$0x3f]  ;;  %v1477_v8 = vld [vmem:[#allocation6 + $0x80] ss:$2 sm:$0xff]  ;;  %v1470_v36 = vmax.f32 %v1463_v0, %v1467_v7 }
 0x2be   : >> { %1359 = vst [vmem:[#allocation6 + $0x158] sm:$0xf] %v1355_v15  ;;  %v1481_v10 = vld [vmem:[#allocation6 + $0x81] ss:$2 sm:$0xff]  ;;  %v1491_v3 = vld [vmem:[#allocation6 + $0xa0] ss:$2 sm:$0xff]  ;;  %v1471_v14 = vmax.f32 %v1465_v4, %v1469_v5 }
 0x2bf   : >> { %1376 = vst [vmem:[#allocation6 + $0x160] sm:$0xff] %v1372_v18  ;;  %v1479_v11 = vld [vmem:[#allocation6 + $0x90] ss:$2 sm:$0x3f]  ;;  %v1495_v12 = vld [vmem:[#allocation6 + $0xa1] ss:$2 sm:$0xff]  ;;  %v1484_v16 = vmax.f32 %v1477_v8, %v1481_v10 }
 0x2c0   : >> { %1377 = vst [vmem:[#allocation6 + $0x168] sm:$0xff] %v1373_v21  ;;  %v1483_v2 = vld [vmem:[#allocation6 + $0x91] ss:$2 sm:$0x3f]  ;;  %v1505_v17 = vld [vmem:[#allocation6 + $0xc0] ss:$2 sm:$0xff]  ;;  %v1498_v23 = vmax.f32 %v1491_v3, %v1495_v12 }
 0x2c1   : >> { %1378 = vst [vmem:[#allocation6 + $0x170] sm:$0xff] %v1374_v24  ;;  %v1493_v13 = vld [vmem:[#allocation6 + $0xb0] ss:$2 sm:$0x3f]  ;;  %v1485_v20 = vmax.f32 %v1479_v11, %v1483_v2  ;;  %v1509_v21 = vld [vmem:[#allocation6 + $0xc1] ss:$2 sm:$0xff] }
 0x2c2   : >> { %1379 = vst [vmem:[#allocation6 + $0x178] sm:$0xf] %v1375_v27  ;;  %v1497_v15 = vld [vmem:[#allocation6 + $0xb1] ss:$2 sm:$0x3f]  ;;  %v1512_v29 = vmax.f32 %v1505_v17, %v1509_v21 }
 0x2c3   : >> { %1396 = vst [vmem:[#allocation6 + $0x180] sm:$0xff] %v1392_v30  ;;  %v1507_v18 = vld [vmem:[#allocation6 + $0xd0] ss:$2 sm:$0x3f]  ;;  %v1519_v22 = vld [vmem:[#allocation6 + $0xe0] ss:$2 sm:$0xff]  ;;  %v1499_v26 = vmax.f32 %v1493_v13, %v1497_v15 }
 0x2c4   : >> { %1397 = vst [vmem:[#allocation6 + $0x188] sm:$0xff] %v1393_v34  ;;  %v1511_v19 = vld [vmem:[#allocation6 + $0xd1] ss:$2 sm:$0x3f]  ;;  %v1523_v24 = vld [vmem:[#allocation6 + $0xe1] ss:$2 sm:$0xff] }
 0x2c5   : >> { %1398 = vst [vmem:[#allocation6 + $0x190] sm:$0xff] %v1394_v39  ;;  %v1521_v25 = vld [vmem:[#allocation6 + $0xf0] ss:$2 sm:$0x3f]  ;;  %v1533_v28 = vld [vmem:[#allocation6 + $0x100] ss:$2 sm:$0xff]  ;;  %v1513_v32 = vmax.f32 %v1507_v18, %v1511_v19  ;;  %v1526_v35 = vmax.f32 %v1519_v22, %v1523_v24 }
 0x2c6   : >> { %1399 = vst [vmem:[#allocation6 + $0x198] sm:$0xf] %v1395_v43  ;;  %v1525_v27 = vld [vmem:[#allocation6 + $0xf1] ss:$2 sm:$0x3f] }
 0x2c7   : >> { %1416 = vst [vmem:[#allocation6 + $0x1a0] sm:$0xff] %v1412_v46  ;;  %v1537_v30 = vld [vmem:[#allocation6 + $0x101] ss:$2 sm:$0xff]  ;;  %v1535_v31 = vld [vmem:[#allocation6 + $0x110] ss:$2 sm:$0x3f]  ;;  %v1527_v39 = vmax.f32 %v1521_v25, %v1525_v27 }
 0x2c8   : >> { %1417 = vst [vmem:[#allocation6 + $0x1a8] sm:$0xff] %v1413_v49  ;;  %v1539_v33 = vld [vmem:[#allocation6 + $0x111] ss:$2 sm:$0x3f]  ;;  %v1547_v34 = vld [vmem:[#allocation6 + $0x120] ss:$2 sm:$0xff]  ;;  %v1540_v41 = vmax.f32 %v1533_v28, %v1537_v30 }
 0x2c9   : >> { %1418 = vst [vmem:[#allocation6 + $0x1b0] sm:$0xff] %v1414_v52  ;;  %v1551_v37 = vld [vmem:[#allocation6 + $0x121] ss:$2 sm:$0xff]  ;;  %v1549_v38 = vld [vmem:[#allocation6 + $0x130] ss:$2 sm:$0x3f]  ;;  %v1541_v45 = vmax.f32 %v1535_v31, %v1539_v33 }
 0x2ca   : >> { %1419 = vst [vmem:[#allocation6 + $0x1b8] sm:$0xf] %v1415_v55  ;;  %v1553_v40 = vld [vmem:[#allocation6 + $0x131] ss:$2 sm:$0x3f]  ;;  %v1554_v48 = vmax.f32 %v1547_v34, %v1551_v37 }
 0x2cb   : >> { %6409 = vst [vmem:[%s8571_s22 + $0x11] sm:$0xff] %v1427_v57  ;;  %v1561_v42 = vld [vmem:[#allocation6 + $0x140] ss:$2 sm:$0xff]  ;;  %v1563_v43 = vld [vmem:[#allocation6 + $0x150] ss:$2 sm:$0x3f]  ;;  %v1555_v51 = vmax.f32 %v1549_v38, %v1553_v40 }
 0x2cc   : >> { %6410 = vst [vmem:[%s8571_s22 + $0x19] sm:$0x3f] %v1428_v60  ;;  %v1567_v44 = vld [vmem:[#allocation6 + $0x151] ss:$2 sm:$0x3f] }
 0x2cd   : >> { %6412 = vst [vmem:[%s8571_s22 + $0x21] sm:$0xff] %v1442_v63  ;;  %v1565_v46 = vld [vmem:[#allocation6 + $0x141] ss:$2 sm:$0xff]  ;;  %v1575_v47 = vld [vmem:[#allocation6 + $0x160] ss:$2 sm:$0xff]  ;;  %v1569_v56 = vmax.f32 %v1563_v43, %v1567_v44 }
 0x2ce   : >> { %6413 = vst [vmem:[%s8571_s22 + $0x29] sm:$0x3f] %v1443_v6  ;;  %v1579_v49 = vld [vmem:[#allocation6 + $0x161] ss:$2 sm:$0xff]  ;;  %v1568_v53 = vmax.f32 %v1561_v42, %v1565_v46  ;;  %v1589_v54 = vld [vmem:[#allocation6 + $0x180] ss:$2 sm:$0xff] }
 0x2cf   : >> { %6415 = vst [vmem:[%s8571_s22 + $0x31] sm:$0xff] %v1456_v9  ;;  %v1577_v50 = vld [vmem:[#allocation6 + $0x170] ss:$2 sm:$0x3f]  ;;  %v1593_v55 = vld [vmem:[#allocation6 + $0x181] ss:$2 sm:$0xff]  ;;  %v1582_v59 = vmax.f32 %v1575_v47, %v1579_v49 }
 0x2d0   : >> { %6416 = vst [vmem:[%s8571_s22 + $0x39] sm:$0x3f] %v1457_v1  ;;  %v1581_v52 = vld [vmem:[#allocation6 + $0x171] ss:$2 sm:$0x3f]  ;;  %v1596_v0 = vmax.f32 %v1589_v54, %v1593_v55 }
 0x2d1   : >> { %6418 = vst [vmem:[%s8571_s22 + $0x41] sm:$0xff] %v1470_v36  ;;  %v1591_v57 = vld [vmem:[#allocation6 + $0x190] ss:$2 sm:$0x3f]  ;;  %v1603_v58 = vld [vmem:[#allocation6 + $0x1a0] ss:$2 sm:$0xff]  ;;  %v1583_v62 = vmax.f32 %v1577_v50, %v1581_v52 }
 0x2d2   : >> { %6419 = vst [vmem:[%s8571_s22 + $0x49] sm:$0x3f] %v1471_v14  ;;  %v1595_v60 = vld [vmem:[#allocation6 + $0x191] ss:$2 sm:$0x3f] }
 0x2d3   : >> { %6421 = vst [vmem:[%s8571_s22 + $0x51] sm:$0xff] %v1484_v16  ;;  %v1607_v61 = vld [vmem:[#allocation6 + $0x1a1] ss:$2 sm:$0xff]  ;;  %v1605_v63 = vld [vmem:[#allocation6 + $0x1b0] ss:$2 sm:$0x3f]  ;;  %v1597_v5 = vmax.f32 %v1591_v57, %v1595_v60 }
 0x2d4   : >> { %6422 = vst [vmem:[%s8571_s22 + $0x59] sm:$0x3f] %v1485_v20  ;;  %v1609_v4 = vld [vmem:[#allocation6 + $0x1b1] ss:$2 sm:$0x3f]  ;;  %v1610_v6 = vmax.f32 %v1603_v58, %v1607_v61 }
 0x2d5   : >> { %6424 = vst [vmem:[%s8571_s22 + $0x61] sm:$0xff] %v1498_v23  ;;  %v1611_v7 = vmax.f32 %v1605_v63, %v1609_v4  ;;  %v8607_v8 = vld [vmem:[%s11287_s4] sm:$0x1] (%p1136_p12) }
 0x2d6   : >> { %6425 = vst [vmem:[%s8571_s22 + $0x69] sm:$0x3f] %v1499_v26 }
 0x2d7   : >> { %6427 = vst [vmem:[%s8571_s22 + $0x71] sm:$0xff] %v1512_v29 }
 0x2d8   : >> { %6428 = vst [vmem:[%s8571_s22 + $0x79] sm:$0x3f] %v1513_v32 }
 0x2d9   : >> { %6430 = vst [vmem:[%s8571_s22 + $0x81] sm:$0xff] %v1526_v35 }
 0x2da   : >> { %6431 = vst [vmem:[%s8571_s22 + $0x89] sm:$0x3f] %v1527_v39 }
 0x2db   : >> { %6433 = vst [vmem:[%s8571_s22 + $0x91] sm:$0xff] %v1540_v41 }
 0x2dc   : >> { %6434 = vst [vmem:[%s8571_s22 + $0x99] sm:$0x3f] %v1541_v45 }
 0x2dd   : >> { %6436 = vst [vmem:[%s8571_s22 + $0xa1] sm:$0xff] %v1554_v48 }
 0x2de   : >> { %6437 = vst [vmem:[%s8571_s22 + $0xa9] sm:$0x3f] %v1555_v51 }
 0x2df   : >> { %6439 = vst [vmem:[%s8571_s22 + $0xb1] sm:$0xff] %v1568_v53 }
 0x2e0   : >> { %6440 = vst [vmem:[%s8571_s22 + $0xb9] sm:$0x3f] %v1569_v56 }
 0x2e1   : >> { %6442 = vst [vmem:[%s8571_s22 + $0xc1] sm:$0xff] %v1582_v59 }
 0x2e2   : >> { %6443 = vst [vmem:[%s8571_s22 + $0xc9] sm:$0x3f] %v1583_v62  ;;  %1138 = sbr.rel (!%p1136_p12) target bundleno = 649 (0x289), region = 351 }
 0x2e3   : >> { %6445 = vst [vmem:[%s8571_s22 + $0xd1] sm:$0xff] %v1596_v0 }
 0x2e4   : >> { %6446 = vst [vmem:[%s8571_s22 + $0xd9] sm:$0x3f] %v1597_v5 }
 0x2e5   : >> { %6448 = vst [vmem:[%s8571_s22 + $0xe1] sm:$0xff] %v1610_v6 }
 0x2e6   : >> { %6449 = vst [vmem:[%s8571_s22 + $0xe9] sm:$0x3f] %v1611_v7 }
 0x2e7 LB: >> { %s11307_s3 = sld [smem:[#allocation15_spill]]  ;;  %s11296_s16 = sshll.u32 %s7715_s14, 8  ;;  %s7715_s14 = sphi %s8609_s14, %s1622_s14  }
 0x2e8   : >> { %s8665_s24 = scalar_lea.vmem [#allocation3], %s11296_s16  ;;  %s11309_s0 = sshll.u32 %s7715_s14, 8 }
 0x2e9   : >> { %s9514_s15 = scalar_lea.vmem [#allocation2], %s11309_s0  ;;  %s1622_s14 = sadd.s32 1, %s7715_s14  }
 0x2ea   : >> { %p1619_p13 = scmp.ge.s32.totalorder %s1622_s14, 8  }
 0x2ed   : >> { %v6499_v9 = vld [vmem:[%s11307_s3 + $0xf8] sm:$0xff]  ;;  %v6498_v10 = vld [vmem:[%s11307_s3 + $0xf0] sm:$0xff]  ;;  %v6497_v11 = vld [vmem:[%s11307_s3 + $0xe8] sm:$0xff] }
 0x2ee   : >> { %7431 = vmatpush.msra.mxu1 %v6499_v9  ;;  %7432 = vmatpush.msra.mxu2 %v6499_v9  ;;  %v6496_v1 = vld [vmem:[%s11307_s3 + $0xe0] sm:$0xff]  ;;  %v6495_v2 = vld [vmem:[%s11307_s3 + $0xd8] sm:$0xff]  ;;  %v6494_v3 = vld [vmem:[%s11307_s3 + $0xd0] sm:$0xff] }
 0x2ef   : >> { %7433 = vmatpush.msra.mxu3 %v6499_v9  ;;  %1724 = vmatpush.msra.mxu0 %v6499_v9  ;;  %v6493_v36 = vld [vmem:[%s11307_s3 + $0xc8] sm:$0xff]  ;;  %v6492_v12 = vld [vmem:[%s11307_s3 + $0xc0] sm:$0xff]  ;;  %v6491_v13 = vld [vmem:[%s11307_s3 + $0xb8] sm:$0xff] }
 0x2f0   : >> { %7434 = vmatpush.msra.mxu1 %v6498_v10  ;;  %7435 = vmatpush.msra.mxu2 %v6498_v10  ;;  %v6490_v14 = vld [vmem:[%s11307_s3 + $0xb0] sm:$0xff]  ;;  %v6489_v15 = vld [vmem:[%s11307_s3 + $0xa8] sm:$0xff]  ;;  %v6488_v16 = vld [vmem:[%s11307_s3 + $0xa0] sm:$0xff] }
 0x2f1   : >> { %7436 = vmatpush.msra.mxu3 %v6498_v10  ;;  %1725 = vmatpush.msra.mxu0 %v6498_v10  ;;  %v6487_v17 = vld [vmem:[%s11307_s3 + $0x98] sm:$0xff]  ;;  %v6486_v18 = vld [vmem:[%s11307_s3 + $0x90] sm:$0xff]  ;;  %v6485_v19 = vld [vmem:[%s11307_s3 + $0x88] sm:$0xff] }
 0x2f2   : >> { %7437 = vmatpush.msra.mxu1 %v6497_v11  ;;  %7438 = vmatpush.msra.mxu2 %v6497_v11  ;;  %v6484_v20 = vld [vmem:[%s11307_s3 + $0x80] sm:$0xff]  ;;  %v6548_v23 = vld [vmem:[%s11307_s3 + $0x178] sm:$0xff]  ;;  %v6547_v27 = vld [vmem:[%s11307_s3 + $0x170] sm:$0xff] }
 0x2f3   : >> { %7439 = vmatpush.msra.mxu3 %v6497_v11  ;;  %1726 = vmatpush.msra.mxu0 %v6497_v11  ;;  %v8668_v21 = vld [vmem:[%s8665_s24 + $0x41] sm:$0xff]  ;;  %v1672_v25 = vld [vmem:[%s11307_s3 + $0x78] sm:$0xff]  ;;  %v1671_v28 = vld [vmem:[%s11307_s3 + $0x70] sm:$0xff] }
 0x2f4   : >> { %7440 = vmatpush.msra.mxu1 %v6496_v1  ;;  %7441 = vmatpush.msra.mxu2 %v6496_v1  ;;  %v8671_v22 = vld [vmem:[%s8665_s24 + $0x81] sm:$0xff]  ;;  %v6597_v26 = vld [vmem:[%s11307_s3 + $0x1f8] sm:$0xff]  ;;  %v6596_v29 = vld [vmem:[%s11307_s3 + $0x1f0] sm:$0xff] }
 0x2f5   : >> { %7442 = vmatpush.msra.mxu3 %v6496_v1  ;;  %1727 = vmatpush.msra.mxu0 %v6496_v1  ;;  %v6476_v24 = vld [vmem:[%s8665_s24 + $0xc1] sm:$0xff]  ;;  %v6646_v34 = vld [vmem:[%s11307_s3 + $0x278] sm:$0xff]  ;;  %v8708_v35 = vld [vmem:[%s8665_s24 + $0x49] sm:$0xff] }
 0x2f6   : >> { %7443 = vmatpush.msra.mxu1 %v6495_v2  ;;  %7444 = vmatpush.msra.mxu2 %v6495_v2  ;;  %v6546_v30 = vld [vmem:[%s11307_s3 + $0x168] sm:$0xff]  ;;  %v6545_v38 = vld [vmem:[%s11307_s3 + $0x160] sm:$0xff]  ;;  %v6645_v41 = vld [vmem:[%s11307_s3 + $0x270] sm:$0xff] }
 0x2f7   : >> { %7445 = vmatpush.msra.mxu3 %v6495_v2  ;;  %1728 = vmatpush.msra.mxu0 %v6495_v2  ;;  %v6452_v31 = vld [vmem:[%s8665_s24 + $0x1] sm:$0xff]  ;;  %v8711_v37 = vld [vmem:[%s8665_s24 + $0x89] sm:$0xff]  ;;  %v6544_v43 = vld [vmem:[%s11307_s3 + $0x158] sm:$0xff] }
 0x2f8   : >> { %7446 = vmatpush.msra.mxu1 %v6494_v3  ;;  %7447 = vmatpush.msra.mxu2 %v6494_v3  ;;  %v1670_v32 = vld [vmem:[%s11307_s3 + $0x68] sm:$0xff]  ;;  %v6594_v39 = vld [vmem:[%s11307_s3 + $0x1e0] sm:$0xff]  ;;  %v6593_v44 = vld [vmem:[%s11307_s3 + $0x1d8] sm:$0xff] }
 0x2f9   : >> { %7448 = vmatpush.msra.mxu3 %v6494_v3  ;;  %1729 = vmatpush.msra.mxu0 %v6494_v3  ;;  %v6595_v33 = vld [vmem:[%s11307_s3 + $0x1e8] sm:$0xff]  ;;  %v1669_v42 = vld [vmem:[%s11307_s3 + $0x60] sm:$0xff]  ;;  %v1668_v46 = vld [vmem:[%s11307_s3 + $0x58] sm:$0xff] }
 0x2fa   : >> { %7449 = vmatpush.msra.mxu1 %v6493_v36  ;;  %7450 = vmatpush.msra.mxu2 %v6493_v36  ;;  %v6477_v40 = vld [vmem:[%s8665_s24 + $0xc9] sm:$0xff]  ;;  %v6643_v50 = vld [vmem:[%s11307_s3 + $0x260] sm:$0xff]  ;;  %v8754_v52 = vld [vmem:[%s8665_s24 + $0x51] sm:$0xff] }
 0x2fb   : >> { %7451 = vmatpush.msra.mxu3 %v6493_v36  ;;  %1730 = vmatpush.msra.mxu0 %v6493_v36  ;;  %v6644_v45 = vld [vmem:[%s11307_s3 + $0x268] sm:$0xff]  ;;  %v6543_v47 = vld [vmem:[%s11307_s3 + $0x150] sm:$0xff]  ;;  %v6642_v57 = vld [vmem:[%s11307_s3 + $0x258] sm:$0xff] }
 0x2fc   : >> { %7452 = vmatpush.msra.mxu1 %v6492_v12  ;;  %7453 = vmatpush.msra.mxu2 %v6492_v12  ;;  %v6453_v48 = vld [vmem:[%s8665_s24 + $0x9] sm:$0xff]  ;;  %v8757_v53 = vld [vmem:[%s8665_s24 + $0x91] sm:$0xff]  ;;  %v6541_v59 = vld [vmem:[%s11307_s3 + $0x140] sm:$0xff] }
 0x2fd   : >> { %7454 = vmatpush.msra.mxu3 %v6492_v12  ;;  %1731 = vmatpush.msra.mxu0 %v6492_v12  ;;  %v6592_v49 = vld [vmem:[%s11307_s3 + $0x1d0] sm:$0xff]  ;;  %v6542_v54 = vld [vmem:[%s11307_s3 + $0x148] sm:$0xff]  ;;  %v6590_v60 = vld [vmem:[%s11307_s3 + $0x1c0] sm:$0xff] }
 0x2fe   : >> { %7455 = vmatpush.msra.mxu1 %v6491_v13  ;;  %7456 = vmatpush.msra.mxu2 %v6491_v13  ;;  %v1667_v51 = vld [vmem:[%s11307_s3 + $0x50] sm:$0xff]  ;;  %v6591_v55 = vld [vmem:[%s11307_s3 + $0x1c8] sm:$0xff]  ;;  %v1665_v62 = vld [vmem:[%s11307_s3 + $0x40] sm:$0xff] }
 0x2ff   : >> { %7457 = vmatpush.msra.mxu3 %v6491_v13  ;;  %1732 = vmatpush.msra.mxu0 %v6491_v13  ;;  %v6478_v56 = vld [vmem:[%s8665_s24 + $0xd1] sm:$0xff]  ;;  %v1666_v58 = vld [vmem:[%s11307_s3 + $0x48] sm:$0xff]  ;;  %v8802_v7 = vld [vmem:[%s8665_s24 + $0x59] sm:$0xff] }
 0x300   : >> { %7458 = vmatpush.msra.mxu1 %v6490_v14  ;;  %7459 = vmatpush.msra.mxu2 %v6490_v14  ;;  %v6641_v61 = vld [vmem:[%s11307_s3 + $0x250] sm:$0xff]  ;;  %v6540_v63 = vld [vmem:[%s11307_s3 + $0x138] sm:$0xff]  ;;  %v6640_v5 = vld [vmem:[%s11307_s3 + $0x248] sm:$0xff] }
 0x301   : >> { %7460 = vmatpush.msra.mxu3 %v6490_v14  ;;  %1733 = vmatpush.msra.mxu0 %v6490_v14  ;;  %v8790_v0 = vld [vmem:[%s8665_s24 + $0x11] sm:$0xff]  ;;  %v8805_v9 = vld [vmem:[%s8665_s24 + $0x99] sm:$0xff]  ;;  %v6538_v36 = vld [vmem:[%s11307_s3 + $0x128] sm:$0xff] }
 0x302   : >> { %7461 = vmatpush.msra.mxu1 %v6489_v15  ;;  %7462 = vmatpush.msra.mxu2 %v6489_v15  ;;  %v6589_v4 = vld [vmem:[%s11307_s3 + $0x1b8] sm:$0xff]  ;;  %v6539_v10 = vld [vmem:[%s11307_s3 + $0x130] sm:$0xff]  ;;  %v6639_v2 = vld [vmem:[%s11307_s3 + $0x240] sm:$0xff] }
 0x303   : >> { %7463 = vmatpush.msra.mxu3 %v6489_v15  ;;  %1734 = vmatpush.msra.mxu0 %v6489_v15  ;;  %v1664_v6 = vld [vmem:[%s11307_s3 + $0x38] sm:$0xff]  ;;  %v6588_v11 = vld [vmem:[%s11307_s3 + $0x1b0] sm:$0xff]  ;;  %v6587_v12 = vld [vmem:[%s11307_s3 + $0x1a8] sm:$0xff] }
 0x304   : >> { %7464 = vmatpush.msra.mxu1 %v6488_v16  ;;  %7465 = vmatpush.msra.mxu2 %v6488_v16  ;;  %v6479_v1 = vld [vmem:[%s8665_s24 + $0xd9] sm:$0xff]  ;;  %v1663_v3 = vld [vmem:[%s11307_s3 + $0x30] sm:$0xff]  ;;  %v1662_v14 = vld [vmem:[%s11307_s3 + $0x28] sm:$0xff] }
 0x305   : >> { %7466 = vmatpush.msra.mxu3 %v6488_v16  ;;  %1735 = vmatpush.msra.mxu0 %v6488_v16  ;;  %v6638_v13 = vld [vmem:[%s11307_s3 + $0x238] sm:$0xff]  ;;  %v6537_v15 = vld [vmem:[%s11307_s3 + $0x120] sm:$0xff] }
 0x306   : >> { %7467 = vmatpush.msra.mxu1 %v6487_v17  ;;  %7468 = vmatpush.msra.mxu2 %v6487_v17  ;;  %v8839_v16 = vld [vmem:[%s8665_s24 + $0x19] sm:$0xff] }
 0x307   : >> { %7469 = vmatpush.msra.mxu3 %v6487_v17  ;;  %1736 = vmatpush.msra.mxu0 %v6487_v17  ;;  %v6586_v17 = vld [vmem:[%s11307_s3 + $0x1a0] sm:$0xff] }
 0x308   : >> { %7470 = vmatpush.msra.mxu1 %v6486_v18  ;;  %7471 = vmatpush.msra.mxu2 %v6486_v18 }
 0x309   : >> { %7472 = vmatpush.msra.mxu3 %v6486_v18  ;;  %1737 = vmatpush.msra.mxu0 %v6486_v18  ;;  %v6637_v18 = vld [vmem:[%s11307_s3 + $0x230] sm:$0xff] }
 0x30a   : >> { %7473 = vmatpush.msra.mxu1 %v6485_v19  ;;  %7474 = vmatpush.msra.mxu2 %v6485_v19 }
 0x30b   : >> { %7475 = vmatpush.msra.mxu3 %v6485_v19  ;;  %1738 = vmatpush.msra.mxu0 %v6485_v19  ;;  %v1661_v19 = vld [vmem:[%s11307_s3 + $0x20] sm:$0xff] }
 0x30c   : >> { %7476 = vmatpush.msra.mxu1 %v6484_v20  ;;  %7477 = vmatpush.msra.mxu2 %v6484_v20 }
 0x30d   : >> { %1764 = vmatmul.f32.vlgmr.msra.gmra.mxu1 %v8668_v21  ;;  %1788 = vmatmul.f32.vlgmr.msra.gmra.mxu2 %v8671_v22 }
 0x30e   : >> { %2001 = vmatpush.msrb.mxu2 %v6548_v23  ;;  %7478 = vmatpush.msra.mxu3 %v6484_v20  ;;  %v8854_v23 = vld [vmem:[%s8665_s24 + $0xa1] sm:$0xff] }
 0x30f   : >> { %1812 = vmatmul.f32.vlgmr.msra.gmra.mxu3 %v6476_v24  ;;  %1837 = vmatpush.msrb.mxu1 %v1672_v25  ;;  %v6536_v24 = vld [vmem:[%s11307_s3 + $0x118] sm:$0xff] }
 0x310   : >> { %2197 = vmatpush.msrb.mxu3 %v6597_v26  ;;  %2002 = vmatpush.msrb.mxu2 %v6547_v27  ;;  %v6585_v25 = vld [vmem:[%s11307_s3 + $0x198] sm:$0xff]  ;;  %v6480_v26 = vld [vmem:[%s8665_s24 + $0xe1] sm:$0xff] }
 0x311   : >> { %1838 = vmatpush.msrb.mxu1 %v1671_v28  ;;  %1739 = vmatpush.msra.mxu0 %v6484_v20  ;;  %v8851_v20 = vld [vmem:[%s8665_s24 + $0x61] sm:$0xff]  ;;  %v1660_v28 = vld [vmem:[%s11307_s3 + $0x18] sm:$0xff] }
 0x312   : >> { %2198 = vmatpush.msrb.mxu3 %v6596_v29  ;;  %2003 = vmatpush.msrb.mxu2 %v6546_v30  ;;  %v6636_v27 = vld [vmem:[%s11307_s3 + $0x228] sm:$0xff]  ;;  %v6535_v29 = vld [vmem:[%s11307_s3 + $0x110] sm:$0xff] }
 0x313   : >> { %1740 = vmatmul.f32.vlgmr.msra.gmra.mxu0 %v6452_v31  ;;  %1839 = vmatpush.msrb.mxu1 %v1670_v32  ;;  %v6584_v30 = vld [vmem:[%s11307_s3 + $0x190] sm:$0xff]  ;;  %v6635_v31 = vld [vmem:[%s11307_s3 + $0x220] sm:$0xff] }
 0x314   : >> { %2199 = vmatpush.msrb.mxu3 %v6595_v33  ;;  %2393 = vmatpush.msrb.mxu0 %v6646_v34  ;;  %v1659_v32 = vld [vmem:[%s11307_s3 + $0x10] sm:$0xff]  ;;  %v6534_v33 = vld [vmem:[%s11307_s3 + $0x108] sm:$0xff] }
 0x315   : >> { %1767 = vmatmul.f32.gmra.mxu1 %v8708_v35  ;;  %1791 = vmatmul.f32.gmra.mxu2 %v8711_v37  ;;  %v8888_v34 = vld [vmem:[%s8665_s24 + $0x21] sm:$0xff] }
 0x316   : >> { %2004 = vmatpush.msrb.mxu2 %v6545_v38  ;;  %2200 = vmatpush.msrb.mxu3 %v6594_v39  ;;  %v6583_v38 = vld [vmem:[%s11307_s3 + $0x188] sm:$0xff]  ;;  %v6634_v39 = vld [vmem:[%s11307_s3 + $0x218] sm:$0xff] }
 0x317   : >> { %1815 = vmatmul.f32.gmra.mxu3 %v6477_v40  ;;  %2394 = vmatpush.msrb.mxu0 %v6645_v41  ;;  %v1658_v40 = vld [vmem:[%s11307_s3 + $0x8] sm:$0xff] }
 0x318   : >> { %1840 = vmatpush.msrb.mxu1 %v1669_v42  ;;  %2005 = vmatpush.msrb.mxu2 %v6544_v43  ;;  %v8900_v41 = vld [vmem:[%s8665_s24 + $0x69] sm:$0xff]  ;;  %v6533_v43 = vld [vmem:[%s11307_s3 + $0x100] sm:$0xff] }
 0x319   : >> { %2201 = vmatpush.msrb.mxu3 %v6593_v44  ;;  %2395 = vmatpush.msrb.mxu0 %v6644_v45  ;;  %v8903_v42 = vld [vmem:[%s8665_s24 + $0xa9] sm:$0xff]  ;;  %v6582_v44 = vld [vmem:[%s11307_s3 + $0x180] sm:$0xff] }
 0x31a   : >> { %1841 = vmatpush.msrb.mxu1 %v1668_v46  ;;  %2006 = vmatpush.msrb.mxu2 %v6543_v47  ;;  %v6481_v45 = vld [vmem:[%s8665_s24 + $0xe9] sm:$0xff]  ;;  %v1657_v47 = vld [vmem:[%s11307_s3] sm:$0xff] }
 0x31b   : >> { %1743 = vmatmul.f32.gmra.mxu0 %v6453_v48  ;;  %2202 = vmatpush.msrb.mxu3 %v6592_v49  ;;  %v6633_v46 = vld [vmem:[%s11307_s3 + $0x210] sm:$0xff]  ;;  %v6744_v48 = vld [vmem:[%s11307_s3 + $0x378] sm:$0xff]  ;;  %v6632_v49 = vld [vmem:[%s11307_s3 + $0x208] sm:$0xff] }
 0x31c   : >> { %2396 = vmatpush.msrb.mxu0 %v6643_v50  ;;  %1842 = vmatpush.msrb.mxu1 %v1667_v51  ;;  %v6793_v50 = vld [vmem:[%s11307_s3 + $0x3f8] sm:$0xff] }
 0x31d   : >> { %1770 = vmatmul.f32.gmra.mxu1 %v8754_v52  ;;  %1794 = vmatmul.f32.gmra.mxu2 %v8757_v53  ;;  %v6695_v51 = vld [vmem:[%s11307_s3 + $0x2f8] sm:$0xff] }
 0x31e   : >> { %2007 = vmatpush.msrb.mxu2 %v6542_v54  ;;  %2203 = vmatpush.msrb.mxu3 %v6591_v55  ;;  %v8934_v54 = vld [vmem:[%s8665_s24 + $0x29] sm:$0xff]  ;;  %v6631_v55 = vld [vmem:[%s11307_s3 + $0x200] sm:$0xff] }
 0x31f   : >> { %1818 = vmatmul.f32.gmra.mxu3 %v6478_v56  ;;  %2397 = vmatpush.msrb.mxu0 %v6642_v57  ;;  %v8940_v56 = vld [vmem:[%s8665_s24 + $0x71] sm:$0xff] }
 0x320   : >> { %1843 = vmatpush.msrb.mxu1 %v1666_v58  ;;  %2008 = vmatpush.msrb.mxu2 %v6541_v59  ;;  %v8943_v57 = vld [vmem:[%s8665_s24 + $0xb1] sm:$0xff] }
 0x321   : >> { %2204 = vmatpush.msrb.mxu3 %v6590_v60  ;;  %2398 = vmatpush.msrb.mxu0 %v6641_v61  ;;  %v6842_v58 = vld [vmem:[%s11307_s3 + $0x478] sm:$0xff]  ;;  %v6743_v60 = vld [vmem:[%s11307_s3 + $0x370] sm:$0xff] }
 0x322   : >> { %1844 = vmatpush.msrb.mxu1 %v1665_v62  ;;  %2009 = vmatpush.msrb.mxu2 %v6540_v63  ;;  %v6482_v59 = vld [vmem:[%s8665_s24 + $0xf1] sm:$0xff] }
 0x323   : >> { %1746 = vmatmul.f32.gmra.mxu0 %v8790_v0  ;;  %2205 = vmatpush.msrb.mxu3 %v6589_v4  ;;  %v6792_v61 = vld [vmem:[%s11307_s3 + $0x3f0] sm:$0xff]  ;;  %v8965_v4 = vld [vmem:[%s8665_s24 + $0x79] sm:$0xff] }
 0x324   : >> { %2399 = vmatpush.msrb.mxu0 %v6640_v5  ;;  %1845 = vmatpush.msrb.mxu1 %v1664_v6  ;;  %v6694_v62 = vld [vmem:[%s11307_s3 + $0x2f0] sm:$0xff]  ;;  %v8968_v5 = vld [vmem:[%s8665_s24 + $0xb9] sm:$0xff] }
 0x325   : >> { %1773 = vmatmul.f32.gmra.mxu1 %v8802_v7  ;;  %1797 = vmatmul.f32.gmra.mxu2 %v8805_v9  ;;  %v8962_v63 = vld [vmem:[%s8665_s24 + $0x31] sm:$0xff]  ;;  %v6483_v6 = vld [vmem:[%s8665_s24 + $0xf9] sm:$0xff] }
 0x326   : >> { %2010 = vmatpush.msrb.mxu2 %v6539_v10  ;;  %2206 = vmatpush.msrb.mxu3 %v6588_v11  ;;  %v6841_v10 = vld [vmem:[%s11307_s3 + $0x470] sm:$0xff]  ;;  %v8978_v11 = vld [vmem:[%s8665_s24 + $0x39] sm:$0xff] }
 0x327   : >> { %1821 = vmatmul.f32.gmra.mxu3 %v6479_v1  ;;  %2400 = vmatpush.msrb.mxu0 %v6639_v2  ;;  %v1625_v1 = vld [vmem:[%s8665_s24] sm:$0xff] }
 0x328   : >> { %1846 = vmatpush.msrb.mxu1 %v1663_v3  ;;  %2011 = vmatpush.msrb.mxu2 %v6538_v36  ;;  %v6501_v2 = vld [vmem:[%s8665_s24 + $0x2] sm:$0xff]  ;;  %v6550_v3 = vld [vmem:[%s8665_s24 + $0x10] sm:$0xff] }
 0x329   : >> { %2207 = vmatpush.msrb.mxu3 %v6587_v12  ;;  %2401 = vmatpush.msrb.mxu0 %v6638_v13  ;;  %v6742_v36 = vld [vmem:[%s11307_s3 + $0x368] sm:$0xff] }
 0x32a   : >> { %1847 = vmatpush.msrb.mxu1 %v1662_v14  ;;  %2012 = vmatpush.msrb.mxu2 %v6537_v15  ;;  %v6791_v12 = vld [vmem:[%s11307_s3 + $0x3e8] sm:$0xff] }
 0x32b   : >> { %1749 = vmatmul.f32.gmra.mxu0 %v8839_v16  ;;  %2208 = vmatpush.msrb.mxu3 %v6586_v17  ;;  %v6693_v13 = vld [vmem:[%s11307_s3 + $0x2e8] sm:$0xff]  ;;  %v6551_v17 = vld [vmem:[%s8665_s24 + $0x18] sm:$0xff] }
 0x32c   : >> { %2402 = vmatpush.msrb.mxu0 %v6637_v18  ;;  %1848 = vmatpush.msrb.mxu1 %v1661_v19  ;;  %v1626_v14 = vld [vmem:[%s8665_s24 + $0x8] sm:$0xff]  ;;  %v6503_v19 = vld [vmem:[%s8665_s24 + $0x12] sm:$0xff] }
 0x32d   : >> { %1776 = vmatmul.f32.gmra.mxu1 %v8851_v20  ;;  %1800 = vmatmul.f32.gmra.mxu2 %v8854_v23  ;;  %v6502_v15 = vld [vmem:[%s8665_s24 + $0xa] sm:$0xff] }
 0x32e   : >> { %2013 = vmatpush.msrb.mxu2 %v6536_v24  ;;  %2209 = vmatpush.msrb.mxu3 %v6585_v25  ;;  %v6840_v18 = vld [vmem:[%s11307_s3 + $0x468] sm:$0xff]  ;;  %v6552_v24 = vld [vmem:[%s8665_s24 + $0x20] sm:$0xff] }
 0x32f   : >> { %1824 = vmatmul.f32.gmra.mxu3 %v6480_v26  ;;  %2403 = vmatpush.msrb.mxu0 %v6636_v27  ;;  %v6790_v25 = vld [vmem:[%s11307_s3 + $0x3e0] sm:$0xff]  ;;  %v6553_v27 = vld [vmem:[%s8665_s24 + $0x28] sm:$0xff] }
 0x330   : >> { %1849 = vmatpush.msrb.mxu1 %v1660_v28  ;;  %2014 = vmatpush.msrb.mxu2 %v6535_v29  ;;  %v6692_v26 = vld [vmem:[%s11307_s3 + $0x2e0] sm:$0xff] }
 0x331   : >> { %2210 = vmatpush.msrb.mxu3 %v6584_v30  ;;  %2404 = vmatpush.msrb.mxu0 %v6635_v31  ;;  %v6839_v28 = vld [vmem:[%s11307_s3 + $0x460] sm:$0xff]  ;;  %v6554_v30 = vld [vmem:[%s8665_s24 + $0x30] sm:$0xff]  ;;  %v6740_v31 = vld [vmem:[%s11307_s3 + $0x358] sm:$0xff] }
 0x332   : >> { %1850 = vmatpush.msrb.mxu1 %v1659_v32  ;;  %2015 = vmatpush.msrb.mxu2 %v6534_v33  ;;  %v6505_v29 = vld [vmem:[%s8665_s24 + $0x22] sm:$0xff]  ;;  %v6789_v32 = vld [vmem:[%s11307_s3 + $0x3d8] sm:$0xff] }
 0x333   : >> { %1752 = vmatmul.f32.gmra.mxu0 %v8888_v34  ;;  %2211 = vmatpush.msrb.mxu3 %v6583_v38  ;;  %v6691_v33 = vld [vmem:[%s11307_s3 + $0x2d8] sm:$0xff] }
 0x334   : >> { %2405 = vmatpush.msrb.mxu0 %v6634_v39  ;;  %1851 = vmatpush.msrb.mxu1 %v1658_v40  ;;  %v6555_v38 = vld [vmem:[%s8665_s24 + $0x38] sm:$0xff] }
 0x335   : >> { %1779 = vmatmul.f32.gmra.mxu1 %v8900_v41  ;;  %1803 = vmatmul.f32.gmra.mxu2 %v8903_v42  ;;  %v6838_v39 = vld [vmem:[%s11307_s3 + $0x458] sm:$0xff] }
 0x336   : >> { %2016 = vmatpush.msrb.mxu2 %v6533_v43  ;;  %2212 = vmatpush.msrb.mxu3 %v6582_v44  ;;  %v6507_v40 = vld [vmem:[%s8665_s24 + $0x32] sm:$0xff]  ;;  %v6556_v43 = vld [vmem:[%s8665_s24 + $0x40] sm:$0xff] }
 0x337   : >> { %1827 = vmatmul.f32.gmra.mxu3 %v6481_v45  ;;  %2406 = vmatpush.msrb.mxu0 %v6633_v46  ;;  %v6739_v44 = vld [vmem:[%s11307_s3 + $0x350] sm:$0xff] }
 0x338   : >> { %1852 = vmatpush.msrb.mxu1 %v1657_v47  ;;  %2785 = vmatpush.msra.mxu2 %v6744_v48  ;;  %v6788_v45 = vld [vmem:[%s11307_s3 + $0x3d0] sm:$0xff]  ;;  %v6508_v47 = vld [vmem:[%s8665_s24 + $0x3a] sm:$0xff]  ;;  %v6557_v48 = vld [vmem:[%s8665_s24 + $0x48] sm:$0xff] }
 0x339   : >> { %2407 = vmatpush.msrb.mxu0 %v6632_v49  ;;  %2981 = vmatpush.msra.mxu3 %v6793_v50  ;;  %v6690_v46 = vld [vmem:[%s11307_s3 + $0x2d0] sm:$0xff] }
 0x33a   : >> { %2589 = vmatpush.msra.mxu1 %v6695_v51  ;;  %2786 = vmatpush.msra.mxu2 %v6743_v60  ;;  %v6837_v49 = vld [vmem:[%s11307_s3 + $0x450] sm:$0xff]  ;;  %v6509_v51 = vld [vmem:[%s8665_s24 + $0x42] sm:$0xff] }
 0x33b   : >> { %1755 = vmatmul.f32.gmra.mxu0 %v8934_v54  ;;  %2982 = vmatpush.msra.mxu3 %v6792_v61 }
 0x33c   : >> { %2408 = vmatpush.msrb.mxu0 %v6631_v55  ;;  %2590 = vmatpush.msra.mxu1 %v6694_v62  ;;  %v6787_v55 = vld [vmem:[%s11307_s3 + $0x3c8] sm:$0xff] }
 0x33d   : >> { %1782 = vmatmul.f32.gmra.mxu1 %v8940_v56  ;;  %1806 = vmatmul.f32.gmra.mxu2 %v8943_v57  ;;  %v6510_v62 = vld [vmem:[%s8665_s24 + $0x4a] sm:$0xff] }
 0x33e   : >> { %3177 = vmatpush.msra.mxu0 %v6842_v58  ;;  %2787 = vmatpush.msra.mxu2 %v6742_v36  ;;  %v6737_v36 = vld [vmem:[%s11307_s3 + $0x340] sm:$0xff] }
 0x33f   : >> { %1830 = vmatmul.f32.gmra.mxu3 %v6482_v59  ;;  %2591 = vmatpush.msra.mxu1 %v6693_v13 }
 0x340   : >> { %3178 = vmatpush.msra.mxu0 %v6841_v10  ;;  %2983 = vmatpush.msra.mxu3 %v6791_v12  ;;  %v6786_v12 = vld [vmem:[%s11307_s3 + $0x3c0] sm:$0xff] }
 0x341   : >> { %2592 = vmatpush.msra.mxu1 %v6692_v26 }
 0x342   : >> { %3179 = vmatpush.msra.mxu0 %v6840_v18  ;;  %2984 = vmatpush.msra.mxu3 %v6790_v25  ;;  %v6512_v18 = vld [vmem:[%s8665_s24 + $0x5a] sm:$0xff] }
 0x343   : >> { %1758 = vmatmul.f32.gmra.mxu0 %v8962_v63  ;;  %2593 = vmatpush.msra.mxu1 %v6691_v33 }
 0x344   : >> { %3180 = vmatpush.msra.mxu0 %v6839_v28  ;;  %2985 = vmatpush.msra.mxu3 %v6789_v32  ;;  %v6736_v28 = vld [vmem:[%s11307_s3 + $0x338] sm:$0xff] }
 0x345   : >> { %1785 = vmatmul.f32.gmra.mxu1 %v8965_v4  ;;  %1809 = vmatmul.f32.gmra.mxu2 %v8968_v5 }
 0x346   : >> { %3181 = vmatpush.msra.mxu0 %v6838_v39  ;;  %2986 = vmatpush.msra.mxu3 %v6788_v45  ;;  %v6834_v39 = vld [vmem:[%s11307_s3 + $0x438] sm:$0xff] }
 0x347   : >> { %1833 = vmatmul.f32.gmra.mxu3 %v6483_v6  ;;  %2594 = vmatpush.msra.mxu1 %v6690_v46  ;;  %v6836_v6 = vld [vmem:[%s11307_s3 + $0x448] sm:$0xff]  ;;  %v6515_v46 = vld [vmem:[%s8665_s24 + $0x72] sm:$0xff] }
 0x348   : >> { %3182 = vmatpush.msra.mxu0 %v6837_v49  ;;  %2987 = vmatpush.msra.mxu3 %v6787_v55  ;;  %v6516_v55 = vld [vmem:[%s8665_s24 + $0x7a] sm:$0xff] }
 0x34a   : >> { %3183 = vmatpush.msra.mxu0 %v6836_v6  ;;  %2988 = vmatpush.msra.mxu3 %v6786_v12  ;;  %v6734_v12 = vld [vmem:[%s11307_s3 + $0x328] sm:$0xff] }
 0x34b   : >> { %1761 = vmatmul.f32.gmra.mxu0 %v8978_v11 }
 0x34d   : >> { %1853 = vmatmul.f32.vlgmr.msrb.gmra.mxu1 %v1625_v1  ;;  %2017 = vmatmul.f32.vlgmr.msrb.gmra.mxu2 %v6501_v2 }
 0x34f   : >> { %2213 = vmatmul.f32.vlgmr.msrb.gmra.mxu3 %v6550_v3 }
 0x353   : >> { %2409 = vmatmul.f32.vlgmr.msrb.gmra.mxu0 %v8790_v0  ;;  %v6741_v0 = vld [vmem:[%s11307_s3 + $0x360] sm:$0xff] }
 0x354   : >> { %2788 = vmatpush.msra.mxu2 %v6741_v0 }
 0x355   : >> { %1856 = vmatmul.f32.gmra.mxu1 %v1626_v14  ;;  %2020 = vmatmul.f32.gmra.mxu2 %v6502_v15 }
 0x356   : >> { %2789 = vmatpush.msra.mxu2 %v6740_v31 }
 0x357   : >> { %2216 = vmatmul.f32.gmra.mxu3 %v6551_v17 }
 0x358   : >> { %2790 = vmatpush.msra.mxu2 %v6739_v44 }
 0x35b   : >> { %2412 = vmatmul.f32.gmra.mxu0 %v8839_v16  ;;  %v6504_v16 = vld [vmem:[%s8665_s24 + $0x1a] sm:$0xff] }
 0x35d   : >> { %1859 = vmatmul.f32.gmra.mxu1 %v6550_v3  ;;  %2023 = vmatmul.f32.gmra.mxu2 %v6503_v19  ;;  %v6511_v3 = vld [vmem:[%s8665_s24 + $0x52] sm:$0xff]  ;;  %v6561_v19 = vld [vmem:[%s8665_s24 + $0x68] sm:$0xff] }
 0x35f   : >> { %2219 = vmatmul.f32.gmra.mxu3 %v6552_v24 }
 0x363   : >> { %2415 = vmatmul.f32.gmra.mxu0 %v8888_v34  ;;  %v6506_v34 = vld [vmem:[%s8665_s24 + $0x2a] sm:$0xff] }
 0x365   : >> { %1862 = vmatmul.f32.gmra.mxu1 %v6551_v17  ;;  %2026 = vmatmul.f32.gmra.mxu2 %v6504_v16 }
 0x367   : >> { %2222 = vmatmul.f32.gmra.mxu3 %v6553_v27 }
 0x36b   : >> { %2418 = vmatmul.f32.gmra.mxu0 %v8934_v54  ;;  %v6558_v54 = vld [vmem:[%s8665_s24 + $0x50] sm:$0xff] }
 0x36d   : >> { %1865 = vmatmul.f32.gmra.mxu1 %v6552_v24  ;;  %2029 = vmatmul.f32.gmra.mxu2 %v6505_v29  ;;  %v6835_v24 = vld [vmem:[%s11307_s3 + $0x440] sm:$0xff]  ;;  %v6785_v29 = vld [vmem:[%s11307_s3 + $0x3b8] sm:$0xff] }
 0x36e   : >> { %3184 = vmatpush.msra.mxu0 %v6835_v24  ;;  %2989 = vmatpush.msra.mxu3 %v6785_v29  ;;  %v6518_v29 = vld [vmem:[%s8665_s24 + $0x8a] sm:$0xff] }
 0x36f   : >> { %2225 = vmatmul.f32.gmra.mxu3 %v6554_v30 }
 0x370   : >> { %3185 = vmatpush.msra.mxu0 %v6834_v39  ;;  %v6832_v39 = vld [vmem:[%s11307_s3 + $0x428] sm:$0xff] }
 0x373   : >> { %2421 = vmatmul.f32.gmra.mxu0 %v8962_v63  ;;  %v6559_v63 = vld [vmem:[%s8665_s24 + $0x58] sm:$0xff] }
 0x375   : >> { %1868 = vmatmul.f32.gmra.mxu1 %v6553_v27  ;;  %2032 = vmatmul.f32.gmra.mxu2 %v6506_v34  ;;  %v6513_v27 = vld [vmem:[%s8665_s24 + $0x62] sm:$0xff]  ;;  %v6514_v34 = vld [vmem:[%s8665_s24 + $0x6a] sm:$0xff] }
 0x377   : >> { %2228 = vmatmul.f32.gmra.mxu3 %v6555_v38 }
 0x37b   : >> { %2424 = vmatmul.f32.gmra.mxu0 %v8978_v11 }
 0x37d   : >> { %1871 = vmatmul.f32.gmra.mxu1 %v6554_v30  ;;  %2035 = vmatmul.f32.gmra.mxu2 %v6507_v40 }
 0x37f   : >> { %2231 = vmatmul.f32.gmra.mxu3 %v6556_v43 }
 0x383   : >> { %2427 = vmatmul.f32.gmra.mxu0 %v8668_v21  ;;  %v6738_v21 = vld [vmem:[%s11307_s3 + $0x348] sm:$0xff] }
 0x384   : >> { %2791 = vmatpush.msra.mxu2 %v6738_v21 }
 0x385   : >> { %1874 = vmatmul.f32.gmra.mxu1 %v6555_v38  ;;  %2038 = vmatmul.f32.gmra.mxu2 %v6508_v47  ;;  %v6563_v38 = vld [vmem:[%s8665_s24 + $0x78] sm:$0xff]  ;;  %v6735_v47 = vld [vmem:[%s11307_s3 + $0x330] sm:$0xff] }
 0x386   : >> { %2792 = vmatpush.msra.mxu2 %v6737_v36  ;;  %v6517_v36 = vld [vmem:[%s8665_s24 + $0x82] sm:$0xff] }
 0x387   : >> { %2234 = vmatmul.f32.gmra.mxu3 %v6557_v48 }
 0x388   : >> { %2793 = vmatpush.msra.mxu2 %v6736_v28 }
 0x38a   : >> { %v9054_v50 = vpop.f32.mrf.mxu1  ;;  %2794 = vmatpush.msra.mxu2 %v6735_v47 }
 0x38b   : >> { %2430 = vmatmul.f32.gmra.mxu0 %v8708_v35  ;;  %v6689_v35 = vld [vmem:[%s11307_s3 + $0x2c8] sm:$0xff] }
 0x38c   : >> { %2595 = vmatpush.msra.mxu1 %v6689_v35  ;;  %v6565_v35 = vld [vmem:[%s8665_s24 + $0x88] sm:$0xff]  ;;  %2795 = vmatpush.msra.mxu2 %v6734_v12 }
 0x38d   : >> { %1877 = vmatmul.f32.gmra.mxu1 %v6556_v43  ;;  %2041 = vmatmul.f32.gmra.mxu2 %v6509_v51 }
 0x38f   : >> { %2237 = vmatmul.f32.gmra.mxu3 %v6558_v54 }
 0x390   : >> { %v9065_v58 = vpop.f32.mrf.mxu2  ;;  %v9067_v59 = vpop.f32.mrf.mxu0 }
 0x392   : >> { %v9072_v60 = vpop.f32.mrf.mxu1  ;;  %v9074_v61 = vpop.f32.mrf.mxu3 }
 0x393   : >> { %2433 = vmatmul.f32.gmra.mxu0 %v8754_v52  ;;  %v6560_v52 = vld [vmem:[%s8665_s24 + $0x60] sm:$0xff] }
 0x395   : >> { %1880 = vmatmul.f32.gmra.mxu1 %v6557_v48  ;;  %2044 = vmatmul.f32.gmra.mxu2 %v6510_v62  ;;  %v6784_v48 = vld [vmem:[%s11307_s3 + $0x3b0] sm:$0xff] }
 0x396   : >> { %2990 = vmatpush.msra.mxu3 %v6784_v48  ;;  %v6833_v62 = vld [vmem:[%s11307_s3 + $0x430] sm:$0xff] }
 0x397   : >> { %2240 = vmatmul.f32.gmra.mxu3 %v6559_v63  ;;  %3186 = vmatpush.msra.mxu0 %v6833_v62  ;;  %v6568_v62 = vld [vmem:[%s8665_s24 + $0xa0] sm:$0xff] }
 0x398   : >> { %v9082_v10 = vpop.f32.mrf.mxu2  ;;  %v9084_v11 = vpop.f32.mrf.mxu0 }
 0x399   : >> { %3187 = vmatpush.msra.mxu0 %v6832_v39 }
 0x39a   : >> { %v9086_v1 = vpop.f32.mrf.mxu1  ;;  %v9088_v2 = vpop.f32.mrf.mxu3 }
 0x39b   : >> { %2436 = vmatmul.f32.gmra.mxu0 %v8802_v7  ;;  %v6688_v7 = vld [vmem:[%s11307_s3 + $0x2c0] sm:$0xff] }
 0x39c   : >> { %2596 = vmatpush.msra.mxu1 %v6688_v7 }
 0x39d   : >> { %1883 = vmatmul.f32.gmra.mxu1 %v6558_v54  ;;  %2047 = vmatmul.f32.gmra.mxu2 %v6511_v3 }
 0x39f   : >> { %2243 = vmatmul.f32.gmra.mxu3 %v6560_v52 }
 0x3a0   : >> { %v9099_v13 = vpop.f32.mrf.mxu2  ;;  %v9101_v14 = vpop.f32.mrf.mxu0 }
 0x3a2   : >> { %v9106_v15 = vpop.f32.mrf.mxu1  ;;  %v9108_v17 = vpop.f32.mrf.mxu3 }
 0x3a3   : >> { %2439 = vmatmul.f32.gmra.mxu0 %v8851_v20  ;;  %v6562_v20 = vld [vmem:[%s8665_s24 + $0x70] sm:$0xff] }
 0x3a5   : >> { %1886 = vmatmul.f32.gmra.mxu1 %v6559_v63  ;;  %2050 = vmatmul.f32.gmra.mxu2 %v6512_v18  ;;  %v6783_v18 = vld [vmem:[%s11307_s3 + $0x3a8] sm:$0xff] }
 0x3a6   : >> { %2991 = vmatpush.msra.mxu3 %v6783_v18 }
 0x3a7   : >> { %2246 = vmatmul.f32.gmra.mxu3 %v6561_v19 }
 0x3a8   : >> { %v9116_v0 = vpop.f32.mrf.mxu2  ;;  %v9118_v25 = vpop.f32.mrf.mxu0 }
 0x3aa   : >> { %v9120_v26 = vpop.f32.mrf.mxu1  ;;  %v9122_v16 = vpop.f32.mrf.mxu3 }
 0x3ab   : >> { %2442 = vmatmul.f32.gmra.mxu0 %v8900_v41  ;;  %v6687_v41 = vld [vmem:[%s11307_s3 + $0x2b8] sm:$0xff] }
 0x3ac   : >> { %2597 = vmatpush.msra.mxu1 %v6687_v41 }
 0x3ad   : >> { %1889 = vmatmul.f32.gmra.mxu1 %v6560_v52  ;;  %2053 = vmatmul.f32.gmra.mxu2 %v6513_v27  ;;  %v6685_v27 = vld [vmem:[%s11307_s3 + $0x2a8] sm:$0xff] }
 0x3af   : >> { %2249 = vmatmul.f32.gmra.mxu3 %v6562_v20 }
 0x3b0   : >> { %v9133_v30 = vpop.f32.mrf.mxu2  ;;  %v9135_v31 = vpop.f32.mrf.mxu0 }
 0x3b2   : >> { %v9140_v32 = vpop.f32.mrf.mxu1  ;;  %v9142_v33 = vpop.f32.mrf.mxu3 }
 0x3b3   : >> { %2445 = vmatmul.f32.gmra.mxu0 %v8940_v56  ;;  %v6564_v56 = vld [vmem:[%s8665_s24 + $0x80] sm:$0xff] }
 0x3b5   : >> { %1892 = vmatmul.f32.gmra.mxu1 %v6561_v19  ;;  %2056 = vmatmul.f32.gmra.mxu2 %v6514_v34 }
 0x3b7   : >> { %2252 = vmatmul.f32.gmra.mxu3 %v6563_v38 }
 0x3b8   : >> { %v9150_v40 = vpop.f32.mrf.mxu2  ;;  %v9152_v43 = vpop.f32.mrf.mxu0 }
 0x3ba   : >> { %v9154_v44 = vpop.f32.mrf.mxu1  ;;  %v9156_v45 = vpop.f32.mrf.mxu3 }
 0x3bb   : >> { %2448 = vmatmul.f32.gmra.mxu0 %v8965_v4  ;;  %v6686_v4 = vld [vmem:[%s11307_s3 + $0x2b0] sm:$0xff] }
 0x3bc   : >> { %2598 = vmatpush.msra.mxu1 %v6686_v4 }
 0x3bd   : >> { %1895 = vmatmul.f32.gmra.mxu1 %v6562_v20  ;;  %2059 = vmatmul.f32.gmra.mxu2 %v6515_v46 }
 0x3be   : >> { %2599 = vmatpush.msra.mxu1 %v6685_v27 }
 0x3bf   : >> { %2255 = vmatmul.f32.gmra.mxu3 %v6564_v56 }
 0x3c0   : >> { %v9167_v49 = vpop.f32.mrf.mxu2  ;;  %v9169_v51 = vpop.f32.mrf.mxu0 }
 0x3c2   : >> { %v9174_v54 = vpop.f32.mrf.mxu1  ;;  %v9176_v21 = vpop.f32.mrf.mxu3 }
 0x3c3   : >> { %2451 = vmatmul.f32.gmra.mxu0 %v8671_v22  ;;  %v6566_v22 = vld [vmem:[%s8665_s24 + $0x90] sm:$0xff] }
 0x3c5   : >> { %1898 = vmatmul.f32.gmra.mxu1 %v6563_v38  ;;  %2062 = vmatmul.f32.gmra.mxu2 %v6516_v55 }
 0x3c7   : >> { %2258 = vmatmul.f32.gmra.mxu3 %v6565_v35 }
 0x3c8   : >> { %v9184_v63 = vpop.f32.mrf.mxu2  ;;  %v9186_v6 = vpop.f32.mrf.mxu0 }
 0x3ca   : >> { %v9188_v3 = vpop.f32.mrf.mxu3  ;;  %v1854_v52 = vpop.f32.mrf.mxu1 }
 0x3cb   : >> { %2454 = vmatmul.f32.gmra.mxu0 %v8711_v37  ;;  %v1855_v7 = vadd.f32 %v1854_v52, %v9067_v59  ;;  %v6567_v59 = vld [vmem:[%s8665_s24 + $0x98] sm:$0xff] }
 0x3cd   : >> { %1901 = vmatmul.f32.gmra.mxu1 %v6564_v56  ;;  %2065 = vmatmul.f32.gmra.mxu2 %v6517_v36  ;;  %v6782_v36 = vld [vmem:[%s11307_s3 + $0x3a0] sm:$0xff] }
 0x3ce   : >> { %2992 = vmatpush.msra.mxu3 %v6782_v36  ;;  %v6522_v36 = vld [vmem:[%s8665_s24 + $0xaa] sm:$0xff] }
 0x3cf   : >> { %2261 = vmatmul.f32.gmra.mxu3 %v6566_v22 }
 0x3d0   : >> { %v2018_v19 = vpop.f32.mrf.mxu2  ;;  %v2410_v24 = vpop.f32.mrf.mxu0 }
 0x3d1   : >> { %v2114_v37 = vadd.f32 %v2018_v19, %v1855_v7 }
 0x3d2   : >> { %v1857_v20 = vpop.f32.mrf.mxu1  ;;  %v2214_v28 = vpop.f32.mrf.mxu3 }
 0x3d3   : >> { %v2310_v41 = vadd.f32 %v2214_v28, %v2114_v37  ;;  %2457 = vmatmul.f32.gmra.mxu0 %v8757_v53  ;;  %v1858_v38 = vadd.f32 %v1857_v20, %v9084_v11  ;;  %v6519_v53 = vld [vmem:[%s8665_s24 + $0x92] sm:$0xff]  ;;  %v6733_v11 = vld [vmem:[%s11307_s3 + $0x320] sm:$0xff] }
 0x3d4   : >> { %2796 = vmatpush.msra.mxu2 %v6733_v11  ;;  %v6831_v28 = vld [vmem:[%s11307_s3 + $0x420] sm:$0xff] }
 0x3d5   : >> { %v9206_v34 = vadd.f32 %v2410_v24, %v2310_v41  ;;  %1904 = vmatmul.f32.gmra.mxu1 %v6565_v35  ;;  %2068 = vmatmul.f32.gmra.mxu2 %v6518_v29  ;;  %v6520_v24 = vld [vmem:[%s8665_s24 + $0x9a] sm:$0xff] }
 0x3d6   : >> { %3188 = vmatpush.msra.mxu0 %v6831_v28 }
 0x3d7   : >> { %2264 = vmatmul.f32.gmra.mxu3 %v6567_v59 }
 0x3d8   : >> { %v2021_v46 = vpop.f32.mrf.mxu2  ;;  %v2413_v56 = vpop.f32.mrf.mxu0 }
 0x3d9   : >> { %v2115_v47 = vadd.f32 %v2021_v46, %v1858_v38 }
 0x3da   : >> { %v1860_v48 = vpop.f32.mrf.mxu1  ;;  %v2217_v4 = vpop.f32.mrf.mxu3 }
 0x3db   : >> { %v2311_v55 = vadd.f32 %v2217_v4, %v2115_v47  ;;  %2460 = vmatmul.f32.gmra.mxu0 %v8805_v9  ;;  %v1861_v52 = vadd.f32 %v1860_v48, %v9101_v14  ;;  %v6569_v14 = vld [vmem:[%s8665_s24 + $0xa8] sm:$0xff]  ;;  %v6570_v47 = vld [vmem:[%s8665_s24 + $0xb0] sm:$0xff]  ;;  %v6781_v4 = vld [vmem:[%s11307_s3 + $0x398] sm:$0xff] }
 0x3dc   : >> { %2993 = vmatpush.msra.mxu3 %v6781_v4  ;;  %v6573_v4 = vld [vmem:[%s8665_s24 + $0xc8] sm:$0xff] }
 0x3dd   : >> { %v9215_v35 = vadd.f32 %v2413_v56, %v2311_v55  ;;  %1907 = vmatmul.f32.gmra.mxu1 %v6566_v22  ;;  %2071 = vmatmul.f32.gmra.mxu2 %v6519_v53  ;;  %v6684_v22 = vld [vmem:[%s11307_s3 + $0x2a0] sm:$0xff] }
 0x3de   : >> { %2600 = vmatpush.msra.mxu1 %v6684_v22  ;;  %v6830_v22 = vld [vmem:[%s11307_s3 + $0x418] sm:$0xff] }
 0x3df   : >> { %2267 = vmatmul.f32.gmra.mxu3 %v6568_v62  ;;  %3189 = vmatpush.msra.mxu0 %v6830_v22  ;;  %v6525_v22 = vld [vmem:[%s8665_s24 + $0xc2] sm:$0xff] }
 0x3e0   : >> { %v2024_v9 = vpop.f32.mrf.mxu2  ;;  %v2416_v12 = vpop.f32.mrf.mxu0 }
 0x3e1   : >> { %v2116_v7 = vadd.f32 %v2024_v9, %v1861_v52 }
 0x3e2   : >> { %v1863_v18 = vpop.f32.mrf.mxu1  ;;  %v2220_v19 = vpop.f32.mrf.mxu3 }
 0x3e3   : >> { %v2312_v37 = vadd.f32 %v2220_v19, %v2116_v7  ;;  %2463 = vmatmul.f32.gmra.mxu0 %v8854_v23  ;;  %v1864_v20 = vadd.f32 %v1863_v18, %v9118_v25  ;;  %v6521_v23 = vld [vmem:[%s8665_s24 + $0xa2] sm:$0xff]  ;;  %v6732_v25 = vld [vmem:[%s11307_s3 + $0x318] sm:$0xff] }
 0x3e4   : >> { %2797 = vmatpush.msra.mxu2 %v6732_v25 }
 0x3e5   : >> { %v9230_v27 = vadd.f32 %v2416_v12, %v2312_v37  ;;  %1910 = vmatmul.f32.gmra.mxu1 %v6567_v59  ;;  %2074 = vmatmul.f32.gmra.mxu2 %v6520_v24 }
 0x3e7   : >> { %2270 = vmatmul.f32.gmra.mxu3 %v6569_v14 }
 0x3e8   : >> { %v2027_v29 = vpop.f32.mrf.mxu2  ;;  %v2419_v41 = vpop.f32.mrf.mxu0 }
 0x3e9   : >> { %v2117_v38 = vadd.f32 %v2027_v29, %v1864_v20  ;;  %v6523_v20 = vld [vmem:[%s8665_s24 + $0xb2] sm:$0xff] }
 0x3ea   : >> { %v1866_v39 = vpop.f32.mrf.mxu1  ;;  %v2223_v46 = vpop.f32.mrf.mxu3 }
 0x3eb   : >> { %v2313_v56 = vadd.f32 %v2223_v46, %v2117_v38  ;;  %2466 = vmatmul.f32.gmra.mxu0 %v8903_v42  ;;  %v1867_v48 = vadd.f32 %v1866_v39, %v9135_v31  ;;  %v6571_v31 = vld [vmem:[%s8665_s24 + $0xb8] sm:$0xff]  ;;  %v6780_v38 = vld [vmem:[%s11307_s3 + $0x390] sm:$0xff]  ;;  %v9273_v46 = vld [vmem:[%s8665_s24 + $0xc1] sm:$0xff] }
 0x3ec   : >> { %2994 = vmatpush.msra.mxu3 %v6780_v38 }
 0x3ed   : >> { %v9239_v59 = vadd.f32 %v2419_v41, %v2313_v56  ;;  %1913 = vmatmul.f32.gmra.mxu1 %v6568_v62  ;;  %2077 = vmatmul.f32.gmra.mxu2 %v6521_v23  ;;  %v6683_v62 = vld [vmem:[%s11307_s3 + $0x298] sm:$0xff]  ;;  %v6682_v56 = vld [vmem:[%s11307_s3 + $0x290] sm:$0xff] }
 0x3ee   : >> { %2601 = vmatpush.msra.mxu1 %v6683_v62 }
 0x3ef   : >> { %2273 = vmatmul.f32.gmra.mxu3 %v6570_v47 }
 0x3f0   : >> { %v2030_v42 = vpop.f32.mrf.mxu2  ;;  %v2422_v53 = vpop.f32.mrf.mxu0  ;;  %2602 = vmatpush.msra.mxu1 %v6682_v56 }
 0x3f1   : >> { %v2118_v55 = vadd.f32 %v2030_v42, %v1867_v48  ;;  %v6524_v48 = vld [vmem:[%s8665_s24 + $0xba] sm:$0xff] }
 0x3f2   : >> { %v1869_v11 = vpop.f32.mrf.mxu1  ;;  %v2226_v52 = vpop.f32.mrf.mxu3 }
 0x3f3   : >> { %v2314_v9 = vadd.f32 %v2226_v52, %v2118_v55  ;;  %2469 = vmatmul.f32.gmra.mxu0 %v8943_v57  ;;  %v1870_v7 = vadd.f32 %v1869_v11, %v9152_v43  ;;  %v6731_v43 = vld [vmem:[%s11307_s3 + $0x310] sm:$0xff] }
 0x3f4   : >> { %2798 = vmatpush.msra.mxu2 %v6731_v43  ;;  %v6829_v55 = vld [vmem:[%s11307_s3 + $0x410] sm:$0xff]  ;;  %v6681_v43 = vld [vmem:[%s11307_s3 + $0x288] sm:$0xff] }
 0x3f5   : >> { %v9254_v12 = vadd.f32 %v2422_v53, %v2314_v9  ;;  %1916 = vmatmul.f32.gmra.mxu1 %v6569_v14  ;;  %2080 = vmatmul.f32.gmra.mxu2 %v6522_v36  ;;  %v6572_v14 = vld [vmem:[%s8665_s24 + $0xc0] sm:$0xff]  ;;  %v9288_v52 = vld [vmem:[%s8665_s24 + $0xc9] sm:$0xff] }
 0x3f6   : >> { %3190 = vmatpush.msra.mxu0 %v6829_v55  ;;  %2603 = vmatpush.msra.mxu1 %v6681_v43  ;;  %v6577_v43 = vld [vmem:[%s8665_s24 + $0xe8] sm:$0xff] }
 0x3f7   : >> { %2276 = vmatmul.f32.gmra.mxu3 %v6571_v31 }
 0x3f8   : >> { %v2033_v18 = vpop.f32.mrf.mxu2  ;;  %v2425_v19 = vpop.f32.mrf.mxu0 }
 0x3f9   : >> { %v2119_v24 = vadd.f32 %v2033_v18, %v1870_v7 }
 0x3fa   : >> { %v1872_v37 = vpop.f32.mrf.mxu1  ;;  %v2229_v57 = vpop.f32.mrf.mxu3 }
 0x3fb   : >> { %v2315_v28 = vadd.f32 %v2229_v57, %v2119_v24  ;;  %2472 = vmatmul.f32.gmra.mxu0 %v8968_v5  ;;  %v1873_v41 = vadd.f32 %v1872_v37, %v9169_v51  ;;  %v6779_v37 = vld [vmem:[%s11307_s3 + $0x388] sm:$0xff] }
 0x3fc   : >> { %2995 = vmatpush.msra.mxu3 %v6779_v37  ;;  %v6680_v37 = vld [vmem:[%s11307_s3 + $0x280] sm:$0xff] }
 0x3fd   : >> { %v9263_v29 = vadd.f32 %v2425_v19, %v2315_v28  ;;  %1919 = vmatmul.f32.gmra.mxu1 %v6570_v47  ;;  %2083 = vmatmul.f32.gmra.mxu2 %v6523_v20  ;;  %v6730_v19 = vld [vmem:[%s11307_s3 + $0x308] sm:$0xff]  ;;  %v9303_v28 = vld [vmem:[%s8665_s24 + $0xd1] sm:$0xff] }
 0x3fe   : >> { %2799 = vmatpush.msra.mxu2 %v6730_v19  ;;  %2604 = vmatpush.msra.mxu1 %v6680_v37 }
 0x3ff   : >> { %2279 = vmatmul.f32.gmra.mxu3 %v6572_v14 }
 0x400   : >> { %v2036_v5 = vpop.f32.mrf.mxu2  ;;  %v2428_v39 = vpop.f32.mrf.mxu0 }
 0x401   : >> { %v2120_v23 = vadd.f32 %v2036_v5, %v1873_v41  ;;  %v6526_v5 = vld [vmem:[%s8665_s24 + $0xca] sm:$0xff] }
 0x402   : >> { %v1875_v47 = vpop.f32.mrf.mxu1  ;;  %v2232_v25 = vpop.f32.mrf.mxu3 }
 0x403   : >> { %v2316_v51 = vadd.f32 %v2232_v25, %v2120_v23  ;;  %2475 = vmatmul.f32.gmra.mxu0 %v9273_v46  ;;  %v1876_v53 = vadd.f32 %v1875_v47, %v9186_v6  ;;  %v6828_v47 = vld [vmem:[%s11307_s3 + $0x408] sm:$0xff] }
 0x404   : >> { %3191 = vmatpush.msra.mxu0 %v6828_v47  ;;  %v9351_v47 = vld [vmem:[%s8665_s24 + $0xe9] sm:$0xff] }
 0x405   : >> { %v9281_v42 = vadd.f32 %v2428_v39, %v2316_v51  ;;  %1922 = vmatmul.f32.gmra.mxu1 %v6571_v31  ;;  %2086 = vmatmul.f32.gmra.mxu2 %v6524_v48  ;;  %v6574_v31 = vld [vmem:[%s8665_s24 + $0xd0] sm:$0xff]  ;;  %v6575_v39 = vld [vmem:[%s8665_s24 + $0xd8] sm:$0xff] }
 0x406   : >> { %v9318_v51 = vld [vmem:[%s8665_s24 + $0xd9] sm:$0xff] }
 0x407   : >> { %2282 = vmatmul.f32.gmra.mxu3 %v6573_v4 }
 0x408   : >> { %v2039_v62 = vpop.f32.mrf.mxu2  ;;  %v2431_v11 = vpop.f32.mrf.mxu0 }
 0x409   : >> { %v2121_v36 = vadd.f32 %v2039_v62, %v1876_v53 }
 0x40a   : >> { %v1878_v9 = vpop.f32.mrf.mxu1  ;;  %v2235_v7 = vpop.f32.mrf.mxu3 }
 0x40b   : >> { %v2317_v18 = vadd.f32 %v2235_v7, %v2121_v36  ;;  %2478 = vmatmul.f32.gmra.mxu0 %v9288_v52  ;;  %v1879_v24 = vadd.f32 %v1878_v9, %v9054_v50  ;;  %v6729_v9 = vld [vmem:[%s11307_s3 + $0x300] sm:$0xff] }
 0x40c   : >> { %2800 = vmatpush.msra.mxu2 %v6729_v9 }
 0x40d   : >> { %v9293_v6 = vadd.f32 %v2431_v11, %v2317_v18  ;;  %1925 = vmatmul.f32.gmra.mxu1 %v6572_v14  ;;  %2089 = vmatmul.f32.gmra.mxu2 %v6525_v22  ;;  %v6527_v11 = vld [vmem:[%s8665_s24 + $0xd2] sm:$0xff]  ;;  %v6778_v22 = vld [vmem:[%s11307_s3 + $0x380] sm:$0xff] }
 0x40e   : >> { %2996 = vmatpush.msra.mxu3 %v6778_v22 }
 0x40f   : >> { %2285 = vmatmul.f32.gmra.mxu3 %v6574_v31 }
 0x410   : >> { %v2042_v57 = vpop.f32.mrf.mxu2  ;;  %v2434_v20 = vpop.f32.mrf.mxu0 }
 0x411   : >> { %v2122_v14 = vadd.f32 %v2042_v57, %v1879_v24  ;;  %v9333_v24 = vld [vmem:[%s8665_s24 + $0xe1] sm:$0xff] }
 0x412   : >> { %v1881_v41 = vpop.f32.mrf.mxu1  ;;  %v2238_v38 = vpop.f32.mrf.mxu3 }
 0x413   : >> { %v2318_v50 = vadd.f32 %v2238_v38, %v2122_v14  ;;  %2481 = vmatmul.f32.gmra.mxu0 %v9303_v28  ;;  %v1882_v56 = vadd.f32 %v1881_v41, %v9072_v60  ;;  %v9339_v14 = vld [vmem:[%s8665_s24 + $0xda] sm:$0xff] }
 0x415   : >> { %v9311_v23 = vadd.f32 %v2434_v20, %v2318_v50  ;;  %1928 = vmatmul.f32.gmra.mxu1 %v6573_v4  ;;  %2092 = vmatmul.f32.gmra.mxu2 %v6526_v5  ;;  %v6576_v4 = vld [vmem:[%s8665_s24 + $0xe0] sm:$0xff] }
 0x416   : >> { %v6827_v5 = vld [vmem:[%s11307_s3 + $0x400] sm:$0xff] }
 0x417   : >> { %2288 = vmatmul.f32.gmra.mxu3 %v6575_v39  ;;  %3192 = vmatpush.msra.mxu0 %v6827_v5 }
 0x418   : >> { %v2045_v25 = vpop.f32.mrf.mxu2  ;;  %v2437_v48 = vpop.f32.mrf.mxu0 }
 0x419   : >> { %v2123_v53 = vadd.f32 %v2045_v25, %v1882_v56 }
 0x41a   : >> { %v1884_v55 = vpop.f32.mrf.mxu1  ;;  %v2241_v62 = vpop.f32.mrf.mxu3 }
 0x41b   : >> { %v2319_v36 = vadd.f32 %v2241_v62, %v2123_v53  ;;  %2484 = vmatmul.f32.gmra.mxu0 %v9318_v51  ;;  %v1885_v7 = vadd.f32 %v1884_v55, %v9086_v1 }
 0x41d   : >> { %v9323_v60 = vadd.f32 %v2437_v48, %v2319_v36  ;;  %1931 = vmatmul.f32.gmra.mxu1 %v6574_v31  ;;  %2095 = vmatmul.f32.gmra.mxu2 %v6527_v11 }
 0x41f   : >> { %2291 = vmatmul.f32.gmra.mxu3 %v6576_v4 }
 0x420   : >> { %v2048_v18 = vpop.f32.mrf.mxu2  ;;  %v2440_v19 = vpop.f32.mrf.mxu0 }
 0x421   : >> { %v2124_v31 = vadd.f32 %v2048_v18, %v1885_v7  ;;  %v9360_v7 = vld [vmem:[%s8665_s24 + $0xf1] sm:$0xff] }
 0x422   : >> { %v1887_v57 = vpop.f32.mrf.mxu1  ;;  %v2244_v20 = vpop.f32.mrf.mxu3 }
 0x423   : >> { %v2320_v1 = vadd.f32 %v2244_v20, %v2124_v31  ;;  %2487 = vmatmul.f32.gmra.mxu0 %v9333_v24  ;;  %v1888_v38 = vadd.f32 %v1887_v57, %v9106_v15  ;;  %v6578_v15 = vld [vmem:[%s8665_s24 + $0xf0] sm:$0xff] }
 0x424   : >> { %v9363_v31 = vld [vmem:[%s8665_s24 + $0xea] sm:$0xff] }
 0x425   : >> { %v9343_v41 = vadd.f32 %v2440_v19, %v2320_v1  ;;  %1934 = vmatmul.f32.gmra.mxu1 %v6575_v39  ;;  %2098 = vmatmul.f32.gmra.mxu2 %v9339_v14  ;;  %v6529_v39 = vld [vmem:[%s8665_s24 + $0xe2] sm:$0xff] }
 0x427   : >> { %2294 = vmatmul.f32.gmra.mxu3 %v6577_v43 }
 0x428   : >> { %v2051_v50 = vpop.f32.mrf.mxu2  ;;  %v2443_v56 = vpop.f32.mrf.mxu0 }
 0x429   : >> { %v2125_v25 = vadd.f32 %v2051_v50, %v1888_v38  ;;  %v9372_v38 = vld [vmem:[%s8665_s24 + $0xf9] sm:$0xff] }
 0x42a   : >> { %v1890_v48 = vpop.f32.mrf.mxu1  ;;  %v2247_v53 = vpop.f32.mrf.mxu3 }
 0x42b   : >> { %v2321_v55 = vadd.f32 %v2247_v53, %v2125_v25  ;;  %2490 = vmatmul.f32.gmra.mxu0 %v9351_v47  ;;  %v1891_v11 = vadd.f32 %v1890_v48, %v9120_v26  ;;  %v9375_v25 = vld [vmem:[%s8665_s24 + $0xf2] sm:$0xff] }
 0x42d   : >> { %v9356_v62 = vadd.f32 %v2443_v56, %v2321_v55  ;;  %1937 = vmatmul.f32.gmra.mxu1 %v6576_v4  ;;  %2101 = vmatmul.f32.gmra.mxu2 %v6529_v39  ;;  %v6579_v4 = vld [vmem:[%s8665_s24 + $0xf8] sm:$0xff] }
 0x42f   : >> { %2297 = vmatmul.f32.gmra.mxu3 %v6578_v15 }
 0x430   : >> { %v2054_v36 = vpop.f32.mrf.mxu2  ;;  %v2446_v9 = vpop.f32.mrf.mxu0 }
 0x431   : >> { %v2126_v22 = vadd.f32 %v2054_v36, %v1891_v11  ;;  %v9384_v11 = vld [vmem:[%s8665_s24 + $0x101] sm:$0xff] }
 0x432   : >> { %v1893_v18 = vpop.f32.mrf.mxu1  ;;  %v2250_v19 = vpop.f32.mrf.mxu3 }
 0x433   : >> { %v2322_v37 = vadd.f32 %v2250_v19, %v2126_v22  ;;  %2493 = vmatmul.f32.gmra.mxu0 %v9360_v7  ;;  %v1894_v26 = vadd.f32 %v1893_v18, %v9140_v32  ;;  %v9387_v18 = vld [vmem:[%s8665_s24 + $0xfa] sm:$0xff] }
 0x435   : >> { %v9367_v57 = vadd.f32 %v2446_v9, %v2322_v37  ;;  %1940 = vmatmul.f32.gmra.mxu1 %v6577_v43  ;;  %2104 = vmatmul.f32.gmra.mxu2 %v9363_v31  ;;  %v6580_v43 = vld [vmem:[%s8665_s24 + $0x100] sm:$0xff] }
 0x437   : >> { %2300 = vmatmul.f32.gmra.mxu3 %v6579_v4 }
 0x438   : >> { %v2057_v20 = vpop.f32.mrf.mxu2  ;;  %v2449_v1 = vpop.f32.mrf.mxu0 }
 0x439   : >> { %v2127_v5 = vadd.f32 %v2057_v20, %v1894_v26 }
 0x43a   : >> { %v1896_v50 = vpop.f32.mrf.mxu1  ;;  %v2253_v56 = vpop.f32.mrf.mxu3 }
 0x43b   : >> { %v2323_v48 = vadd.f32 %v2253_v56, %v2127_v5  ;;  %2496 = vmatmul.f32.gmra.mxu0 %v9372_v38  ;;  %v1897_v32 = vadd.f32 %v1896_v50, %v9154_v44 }
 0x43d   : >> { %v9379_v53 = vadd.f32 %v2449_v1, %v2323_v48  ;;  %1943 = vmatmul.f32.gmra.mxu1 %v6578_v15  ;;  %2107 = vmatmul.f32.gmra.mxu2 %v9375_v25  ;;  %v6581_v15 = vld [vmem:[%s8665_s24 + $0x108] sm:$0xff]  ;;  %v6648_v48 = vld [vmem:[%s8665_s24 + $0x12] sm:$0xff] }
 0x43e   : >> { %v9396_v1 = vld [vmem:[%s8665_s24 + $0x109] sm:$0xff] }
 0x43f   : >> { %2303 = vmatmul.f32.gmra.mxu3 %v6580_v43  ;;  %v6697_v43 = vld [vmem:[%s8665_s24 + $0x20] sm:$0xff] }
 0x440   : >> { %v2060_v39 = vpop.f32.mrf.mxu2  ;;  %v2452_v55 = vpop.f32.mrf.mxu0 }
 0x441   : >> { %v2128_v36 = vadd.f32 %v2060_v39, %v1897_v32 }
 0x442   : >> { %v1899_v9 = vpop.f32.mrf.mxu1  ;;  %v2256_v22 = vpop.f32.mrf.mxu3 }
 0x443   : >> { %v2324_v19 = vadd.f32 %v2256_v22, %v2128_v36  ;;  %2499 = vmatmul.f32.gmra.mxu0 %v9384_v11  ;;  %v1900_v44 = vadd.f32 %v1899_v9, %v9174_v54  ;;  %v6795_v9 = vld [vmem:[%s8665_s24 + $0x22] sm:$0xff] }
 0x445   : >> { %v9391_v37 = vadd.f32 %v2452_v55, %v2324_v19  ;;  %1946 = vmatmul.f32.gmra.mxu1 %v6579_v4  ;;  %2110 = vmatmul.f32.gmra.mxu2 %v9387_v18  ;;  %v6746_v4 = vld [vmem:[%s8665_s24 + $0x21] sm:$0xff] }
 0x447   : >> { %2306 = vmatmul.f32.gmra.mxu3 %v6581_v15 }
 0x448   : >> { %v2063_v26 = vpop.f32.mrf.mxu2  ;;  %v2455_v20 = vpop.f32.mrf.mxu0 }
 0x449   : >> { %v2129_v5 = vadd.f32 %v2063_v26, %v1900_v44  ;;  %v6649_v44 = vld [vmem:[%s8665_s24 + $0x1a] sm:$0xff]  ;;  %v6698_v26 = vld [vmem:[%s8665_s24 + $0x28] sm:$0xff] }
 0x44a   : >> { %v1902_v50 = vpop.f32.mrf.mxu1  ;;  %v2259_v56 = vpop.f32.mrf.mxu3 }
 0x44b   : >> { %v2325_v32 = vadd.f32 %v2259_v56, %v2129_v5  ;;  %2502 = vmatmul.f32.gmra.mxu0 %v9396_v1  ;;  %v1903_v54 = vadd.f32 %v1902_v50, %v9065_v58 }
 0x44d   : >> { %v9402_v39 = vadd.f32 %v2455_v20, %v2325_v32  ;;  %2605 = vmatmul.f32.vlgmr.msra.gmra.mxu1 %v6648_v48  ;;  %2801 = vmatmul.f32.vlgmr.msra.gmra.mxu2 %v6697_v43  ;;  %v6747_v20 = vld [vmem:[%s8665_s24 + $0x29] sm:$0xff] }
 0x44e   : >> { %v6796_v43 = vld [vmem:[%s8665_s24 + $0x2a] sm:$0xff] }
 0x44f   : >> { %2997 = vmatmul.f32.vlgmr.msra.gmra.mxu3 %v6746_v4 }
 0x450   : >> { %v2066_v55 = vpop.f32.mrf.mxu2  ;;  %v2458_v36 = vpop.f32.mrf.mxu0 }
 0x451   : >> { %v2130_v22 = vadd.f32 %v2066_v55, %v1903_v54  ;;  %v6699_v55 = vld [vmem:[%s8665_s24 + $0x30] sm:$0xff] }
 0x452   : >> { %v1905_v19 = vpop.f32.mrf.mxu1  ;;  %v2262_v15 = vpop.f32.mrf.mxu3 }
 0x453   : >> { %v2326_v5 = vadd.f32 %v2262_v15, %v2130_v22  ;;  %3193 = vmatmul.f32.vlgmr.msra.gmra.mxu0 %v6795_v9  ;;  %v1906_v58 = vadd.f32 %v1905_v19, %v9082_v10  ;;  %v6748_v15 = vld [vmem:[%s8665_s24 + $0x31] sm:$0xff] }
 0x455   : >> { %v9409_v56 = vadd.f32 %v2458_v36, %v2326_v5  ;;  %2608 = vmatmul.f32.gmra.mxu1 %v6649_v44  ;;  %2804 = vmatmul.f32.gmra.mxu2 %v6698_v26  ;;  %v6797_v26 = vld [vmem:[%s8665_s24 + $0x32] sm:$0xff] }
 0x457   : >> { %3000 = vmatmul.f32.gmra.mxu3 %v6747_v20 }
 0x458   : >> { %v2069_v50 = vpop.f32.mrf.mxu2  ;;  %v2461_v48 = vpop.f32.mrf.mxu0 }
 0x459   : >> { %v2131_v32 = vadd.f32 %v2069_v50, %v1906_v58  ;;  %v6700_v50 = vld [vmem:[%s8665_s24 + $0x38] sm:$0xff] }
 0x45a   : >> { %v1908_v4 = vpop.f32.mrf.mxu1  ;;  %v2265_v54 = vpop.f32.mrf.mxu3 }
 0x45b   : >> { %v2327_v22 = vadd.f32 %v2265_v54, %v2131_v32  ;;  %3196 = vmatmul.f32.gmra.mxu0 %v6796_v43  ;;  %v1909_v10 = vadd.f32 %v1908_v4, %v9099_v13  ;;  %v6749_v54 = vld [vmem:[%s8665_s24 + $0x39] sm:$0xff] }
 0x45d   : >> { %v9415_v36 = vadd.f32 %v2461_v48, %v2327_v22  ;;  %2611 = vmatmul.f32.gmra.mxu1 %v6795_v9  ;;  %2807 = vmatmul.f32.gmra.mxu2 %v6699_v55  ;;  %v6798_v55 = vld [vmem:[%s8665_s24 + $0x3a] sm:$0xff] }
 0x45f   : >> { %3003 = vmatmul.f32.gmra.mxu3 %v6748_v15 }
 0x460   : >> { %v2072_v19 = vpop.f32.mrf.mxu2  ;;  %v2464_v44 = vpop.f32.mrf.mxu0 }
 0x461   : >> { %v2132_v5 = vadd.f32 %v2072_v19, %v1909_v10  ;;  %v6701_v19 = vld [vmem:[%s8665_s24 + $0x40] sm:$0xff] }
 0x462   : >> { %v1911_v20 = vpop.f32.mrf.mxu1  ;;  %v2268_v58 = vpop.f32.mrf.mxu3 }
 0x463   : >> { %v2328_v32 = vadd.f32 %v2268_v58, %v2132_v5  ;;  %3199 = vmatmul.f32.gmra.mxu0 %v6797_v26  ;;  %v1912_v13 = vadd.f32 %v1911_v20, %v9116_v0  ;;  %v6750_v58 = vld [vmem:[%s8665_s24 + $0x41] sm:$0xff] }
 0x465   : >> { %v9421_v48 = vadd.f32 %v2464_v44, %v2328_v32  ;;  %2614 = vmatmul.f32.gmra.mxu1 %v6796_v43  ;;  %2810 = vmatmul.f32.gmra.mxu2 %v6700_v50  ;;  %v6799_v50 = vld [vmem:[%s8665_s24 + $0x42] sm:$0xff] }
 0x467   : >> { %3006 = vmatmul.f32.gmra.mxu3 %v6749_v54 }
 0x468   : >> { %v2075_v9 = vpop.f32.mrf.mxu2  ;;  %v2467_v4 = vpop.f32.mrf.mxu0 }
 0x469   : >> { %v2133_v22 = vadd.f32 %v2075_v9, %v1912_v13  ;;  %v6702_v9 = vld [vmem:[%s8665_s24 + $0x48] sm:$0xff] }
 0x46a   : >> { %v1914_v15 = vpop.f32.mrf.mxu1  ;;  %v2271_v10 = vpop.f32.mrf.mxu3 }
 0x46b   : >> { %v2329_v5 = vadd.f32 %v2271_v10, %v2133_v22  ;;  %3202 = vmatmul.f32.gmra.mxu0 %v6798_v55  ;;  %v1915_v0 = vadd.f32 %v1914_v15, %v9133_v30  ;;  %v6751_v10 = vld [vmem:[%s8665_s24 + $0x49] sm:$0xff] }
 0x46d   : >> { %v9427_v44 = vadd.f32 %v2467_v4, %v2329_v5  ;;  %2617 = vmatmul.f32.gmra.mxu1 %v6797_v26  ;;  %2813 = vmatmul.f32.gmra.mxu2 %v6701_v19  ;;  %v6800_v19 = vld [vmem:[%s8665_s24 + $0x4a] sm:$0xff] }
 0x46f   : >> { %3009 = vmatmul.f32.gmra.mxu3 %v6750_v58 }
 0x470   : >> { %v2078_v43 = vpop.f32.mrf.mxu2  ;;  %v2470_v20 = vpop.f32.mrf.mxu0 }
 0x471   : >> { %v2134_v32 = vadd.f32 %v2078_v43, %v1915_v0  ;;  %v6703_v43 = vld [vmem:[%s8665_s24 + $0x50] sm:$0xff] }
 0x472   : >> { %v1917_v54 = vpop.f32.mrf.mxu1  ;;  %v2274_v13 = vpop.f32.mrf.mxu3 }
 0x473   : >> { %v2330_v22 = vadd.f32 %v2274_v13, %v2134_v32  ;;  %3205 = vmatmul.f32.gmra.mxu0 %v6799_v50  ;;  %v1918_v30 = vadd.f32 %v1917_v54, %v9150_v40  ;;  %v6752_v13 = vld [vmem:[%s8665_s24 + $0x51] sm:$0xff] }
 0x475   : >> { %v9433_v4 = vadd.f32 %v2470_v20, %v2330_v22  ;;  %2620 = vmatmul.f32.gmra.mxu1 %v6798_v55  ;;  %2816 = vmatmul.f32.gmra.mxu2 %v6702_v9  ;;  %v6801_v9 = vld [vmem:[%s8665_s24 + $0x52] sm:$0xff] }
 0x477   : >> { %3012 = vmatmul.f32.gmra.mxu3 %v6751_v10 }
 0x478   : >> { %v2081_v26 = vpop.f32.mrf.mxu2  ;;  %v2473_v15 = vpop.f32.mrf.mxu0 }
 0x479   : >> { %v2135_v5 = vadd.f32 %v2081_v26, %v1918_v30  ;;  %v6704_v26 = vld [vmem:[%s8665_s24 + $0x58] sm:$0xff] }
 0x47a   : >> { %v1920_v58 = vpop.f32.mrf.mxu1  ;;  %v2277_v0 = vpop.f32.mrf.mxu3 }
 0x47b   : >> { %v2331_v32 = vadd.f32 %v2277_v0, %v2135_v5  ;;  %3208 = vmatmul.f32.gmra.mxu0 %v6800_v19  ;;  %v1921_v40 = vadd.f32 %v1920_v58, %v9167_v49  ;;  %v6753_v0 = vld [vmem:[%s8665_s24 + $0x59] sm:$0xff] }
 0x47d   : >> { %v9439_v20 = vadd.f32 %v2473_v15, %v2331_v32  ;;  %2623 = vmatmul.f32.gmra.mxu1 %v6799_v50  ;;  %2819 = vmatmul.f32.gmra.mxu2 %v6703_v43  ;;  %v6802_v43 = vld [vmem:[%s8665_s24 + $0x5a] sm:$0xff] }
 0x47f   : >> { %3015 = vmatmul.f32.gmra.mxu3 %v6752_v13 }
 0x480   : >> { %v2084_v55 = vpop.f32.mrf.mxu2  ;;  %v2476_v54 = vpop.f32.mrf.mxu0 }
 0x481   : >> { %v2136_v22 = vadd.f32 %v2084_v55, %v1921_v40  ;;  %v6705_v55 = vld [vmem:[%s8665_s24 + $0x60] sm:$0xff] }
 0x482   : >> { %v1923_v10 = vpop.f32.mrf.mxu1  ;;  %v2280_v30 = vpop.f32.mrf.mxu3 }
 0x483   : >> { %v2332_v5 = vadd.f32 %v2280_v30, %v2136_v22  ;;  %3211 = vmatmul.f32.gmra.mxu0 %v6801_v9  ;;  %v1924_v49 = vadd.f32 %v1923_v10, %v9184_v63  ;;  %v6754_v30 = vld [vmem:[%s8665_s24 + $0x61] sm:$0xff] }
 0x485   : >> { %v9445_v15 = vadd.f32 %v2476_v54, %v2332_v5  ;;  %2626 = vmatmul.f32.gmra.mxu1 %v6800_v19  ;;  %2822 = vmatmul.f32.gmra.mxu2 %v6704_v26  ;;  %v6803_v26 = vld [vmem:[%s8665_s24 + $0x62] sm:$0xff] }
 0x487   : >> { %3018 = vmatmul.f32.gmra.mxu3 %v6753_v0 }
 0x488   : >> { %v2087_v50 = vpop.f32.mrf.mxu2  ;;  %v2479_v58 = vpop.f32.mrf.mxu0 }
 0x489   : >> { %v2137_v32 = vadd.f32 %v2087_v50, %v1924_v49  ;;  %v6706_v50 = vld [vmem:[%s8665_s24 + $0x68] sm:$0xff] }
 0x48a   : >> { %v1926_v13 = vpop.f32.mrf.mxu1  ;;  %v2283_v40 = vpop.f32.mrf.mxu3 }
 0x48b   : >> { %v2333_v22 = vadd.f32 %v2283_v40, %v2137_v32  ;;  %3214 = vmatmul.f32.gmra.mxu0 %v6802_v43  ;;  %v1927_v63 = vadd.f32 %v1926_v13, %v9074_v61  ;;  %v6755_v40 = vld [vmem:[%s8665_s24 + $0x69] sm:$0xff] }
 0x48d   : >> { %v9451_v54 = vadd.f32 %v2479_v58, %v2333_v22  ;;  %2629 = vmatmul.f32.gmra.mxu1 %v6801_v9  ;;  %2825 = vmatmul.f32.gmra.mxu2 %v6705_v55  ;;  %v6804_v55 = vld [vmem:[%s8665_s24 + $0x6a] sm:$0xff] }
 0x48f   : >> { %3021 = vmatmul.f32.gmra.mxu3 %v6754_v30 }
 0x490   : >> { %v2090_v19 = vpop.f32.mrf.mxu2  ;;  %v2482_v10 = vpop.f32.mrf.mxu0 }
 0x491   : >> { %v2138_v5 = vadd.f32 %v2090_v19, %v1927_v63  ;;  %v6707_v19 = vld [vmem:[%s8665_s24 + $0x70] sm:$0xff] }
 0x492   : >> { %v1929_v0 = vpop.f32.mrf.mxu1  ;;  %v2286_v49 = vpop.f32.mrf.mxu3 }
 0x493   : >> { %v2334_v32 = vadd.f32 %v2286_v49, %v2138_v5  ;;  %3217 = vmatmul.f32.gmra.mxu0 %v6803_v26  ;;  %v1930_v61 = vadd.f32 %v1929_v0, %v9088_v2  ;;  %v6756_v49 = vld [vmem:[%s8665_s24 + $0x71] sm:$0xff] }
 0x495   : >> { %v9457_v58 = vadd.f32 %v2482_v10, %v2334_v32  ;;  %2632 = vmatmul.f32.gmra.mxu1 %v6802_v43  ;;  %2828 = vmatmul.f32.gmra.mxu2 %v6706_v50  ;;  %v6805_v50 = vld [vmem:[%s8665_s24 + $0x72] sm:$0xff] }
 0x497   : >> { %3024 = vmatmul.f32.gmra.mxu3 %v6755_v40 }
 0x498   : >> { %v2093_v9 = vpop.f32.mrf.mxu2  ;;  %v2485_v13 = vpop.f32.mrf.mxu0 }
 0x499   : >> { %v2139_v22 = vadd.f32 %v2093_v9, %v1930_v61  ;;  %v6708_v9 = vld [vmem:[%s8665_s24 + $0x78] sm:$0xff] }
 0x49a   : >> { %v1932_v30 = vpop.f32.mrf.mxu1  ;;  %v2289_v63 = vpop.f32.mrf.mxu3 }
 0x49b   : >> { %v2335_v5 = vadd.f32 %v2289_v63, %v2139_v22  ;;  %3220 = vmatmul.f32.gmra.mxu0 %v6804_v55  ;;  %v1933_v2 = vadd.f32 %v1932_v30, %v9108_v17  ;;  %v6757_v63 = vld [vmem:[%s8665_s24 + $0x79] sm:$0xff] }
 0x49d   : >> { %v9463_v10 = vadd.f32 %v2485_v13, %v2335_v5  ;;  %2635 = vmatmul.f32.gmra.mxu1 %v6803_v26  ;;  %2831 = vmatmul.f32.gmra.mxu2 %v6707_v19  ;;  %v6806_v19 = vld [vmem:[%s8665_s24 + $0x7a] sm:$0xff] }
 0x49f   : >> { %3027 = vmatmul.f32.gmra.mxu3 %v6756_v49 }
 0x4a0   : >> { %v2096_v43 = vpop.f32.mrf.mxu2  ;;  %v2488_v0 = vpop.f32.mrf.mxu0 }
 0x4a1   : >> { %v2140_v32 = vadd.f32 %v2096_v43, %v1933_v2  ;;  %v6709_v43 = vld [vmem:[%s8665_s24 + $0x80] sm:$0xff] }
 0x4a2   : >> { %v1935_v40 = vpop.f32.mrf.mxu1  ;;  %v2292_v61 = vpop.f32.mrf.mxu3 }
 0x4a3   : >> { %v2336_v22 = vadd.f32 %v2292_v61, %v2140_v32  ;;  %3223 = vmatmul.f32.gmra.mxu0 %v6805_v50  ;;  %v1936_v17 = vadd.f32 %v1935_v40, %v9122_v16  ;;  %v6758_v61 = vld [vmem:[%s8665_s24 + $0x81] sm:$0xff] }
 0x4a5   : >> { %v9469_v13 = vadd.f32 %v2488_v0, %v2336_v22  ;;  %2638 = vmatmul.f32.gmra.mxu1 %v6804_v55  ;;  %2834 = vmatmul.f32.gmra.mxu2 %v6708_v9  ;;  %v6807_v9 = vld [vmem:[%s8665_s24 + $0x82] sm:$0xff] }
 0x4a7   : >> { %3030 = vmatmul.f32.gmra.mxu3 %v6757_v63 }
 0x4a8   : >> { %v2099_v26 = vpop.f32.mrf.mxu2  ;;  %v2491_v30 = vpop.f32.mrf.mxu0 }
 0x4a9   : >> { %v2141_v5 = vadd.f32 %v2099_v26, %v1936_v17  ;;  %v6710_v26 = vld [vmem:[%s8665_s24 + $0x88] sm:$0xff] }
 0x4aa   : >> { %v1938_v49 = vpop.f32.mrf.mxu1  ;;  %v2295_v2 = vpop.f32.mrf.mxu3 }
 0x4ab   : >> { %v2337_v32 = vadd.f32 %v2295_v2, %v2141_v5  ;;  %3226 = vmatmul.f32.gmra.mxu0 %v6806_v19  ;;  %v1939_v16 = vadd.f32 %v1938_v49, %v9142_v33  ;;  %v6759_v2 = vld [vmem:[%s8665_s24 + $0x89] sm:$0xff] }
 0x4ad   : >> { %v9475_v0 = vadd.f32 %v2491_v30, %v2337_v32  ;;  %2641 = vmatmul.f32.gmra.mxu1 %v6805_v50  ;;  %2837 = vmatmul.f32.gmra.mxu2 %v6709_v43  ;;  %v6808_v43 = vld [vmem:[%s8665_s24 + $0x8a] sm:$0xff] }
 0x4af   : >> { %3033 = vmatmul.f32.gmra.mxu3 %v6758_v61 }
 0x4b0   : >> { %v2102_v55 = vpop.f32.mrf.mxu2  ;;  %v2494_v40 = vpop.f32.mrf.mxu0 }
 0x4b1   : >> { %v2142_v22 = vadd.f32 %v2102_v55, %v1939_v16  ;;  %v6711_v55 = vld [vmem:[%s8665_s24 + $0x90] sm:$0xff] }
 0x4b2   : >> { %v1941_v63 = vpop.f32.mrf.mxu1  ;;  %v2298_v17 = vpop.f32.mrf.mxu3 }
 0x4b3   : >> { %v2338_v5 = vadd.f32 %v2298_v17, %v2142_v22  ;;  %3229 = vmatmul.f32.gmra.mxu0 %v6807_v9  ;;  %v1942_v33 = vadd.f32 %v1941_v63, %v9156_v45  ;;  %v6760_v17 = vld [vmem:[%s8665_s24 + $0x91] sm:$0xff] }
 0x4b5   : >> { %v9481_v30 = vadd.f32 %v2494_v40, %v2338_v5  ;;  %2644 = vmatmul.f32.gmra.mxu1 %v6806_v19  ;;  %2840 = vmatmul.f32.gmra.mxu2 %v6710_v26  ;;  %v6809_v26 = vld [vmem:[%s8665_s24 + $0x92] sm:$0xff] }
 0x4b7   : >> { %3036 = vmatmul.f32.gmra.mxu3 %v6759_v2 }
 0x4b8   : >> { %v2105_v50 = vpop.f32.mrf.mxu2  ;;  %v2497_v49 = vpop.f32.mrf.mxu0 }
 0x4b9   : >> { %v2143_v32 = vadd.f32 %v2105_v50, %v1942_v33  ;;  %v6712_v50 = vld [vmem:[%s8665_s24 + $0x98] sm:$0xff] }
 0x4ba   : >> { %v1944_v61 = vpop.f32.mrf.mxu1  ;;  %v2301_v16 = vpop.f32.mrf.mxu3 }
 0x4bb   : >> { %v2339_v22 = vadd.f32 %v2301_v16, %v2143_v32  ;;  %3232 = vmatmul.f32.gmra.mxu0 %v6808_v43  ;;  %v1945_v45 = vadd.f32 %v1944_v61, %v9176_v21  ;;  %v6761_v16 = vld [vmem:[%s8665_s24 + $0x99] sm:$0xff] }
 0x4bd   : >> { %v9487_v40 = vadd.f32 %v2497_v49, %v2339_v22  ;;  %2647 = vmatmul.f32.gmra.mxu1 %v6807_v9  ;;  %2843 = vmatmul.f32.gmra.mxu2 %v6711_v55  ;;  %v6810_v55 = vld [vmem:[%s8665_s24 + $0x9a] sm:$0xff] }
 0x4bf   : >> { %3039 = vmatmul.f32.gmra.mxu3 %v6760_v17 }
 0x4c0   : >> { %v2108_v19 = vpop.f32.mrf.mxu2  ;;  %v2500_v63 = vpop.f32.mrf.mxu0 }
 0x4c1   : >> { %v2144_v5 = vadd.f32 %v2108_v19, %v1945_v45  ;;  %v6713_v19 = vld [vmem:[%s8665_s24 + $0xa0] sm:$0xff] }
 0x4c2   : >> { %v1947_v2 = vpop.f32.mrf.mxu1  ;;  %v2304_v33 = vpop.f32.mrf.mxu3 }
 0x4c3   : >> { %v2340_v32 = vadd.f32 %v2304_v33, %v2144_v5  ;;  %3235 = vmatmul.f32.gmra.mxu0 %v6809_v26  ;;  %v1948_v21 = vadd.f32 %v1947_v2, %v9188_v3  ;;  %v6762_v33 = vld [vmem:[%s8665_s24 + $0xa1] sm:$0xff] }
 0x4c5   : >> { %v9493_v49 = vadd.f32 %v2500_v63, %v2340_v32  ;;  %2650 = vmatmul.f32.gmra.mxu1 %v6808_v43  ;;  %2846 = vmatmul.f32.gmra.mxu2 %v6712_v50  ;;  %v6811_v50 = vld [vmem:[%s8665_s24 + $0xa2] sm:$0xff] }
 0x4c7   : >> { %11308 = vst [vmem:[#allocation10_spill] sm:$0xff] %v9493_v49  ;;  %3042 = vmatmul.f32.gmra.mxu3 %v6761_v16 }
 0x4c8   : >> { %v2111_v9 = vpop.f32.mrf.mxu2  ;;  %v2503_v61 = vpop.f32.mrf.mxu0 }
 0x4c9   : >> { %v2145_v22 = vadd.f32 %v2111_v9, %v1948_v21  ;;  %v6714_v9 = vld [vmem:[%s8665_s24 + $0xa8] sm:$0xff] }
 0x4ca   : >> { %v2307_v17 = vpop.f32.mrf.mxu3  ;;  %v2606_v45 = vpop.f32.mrf.mxu1 }
 0x4cb   : >> { %v2341_v5 = vadd.f32 %v2307_v17, %v2145_v22  ;;  %3238 = vmatmul.f32.gmra.mxu0 %v6810_v55  ;;  %v2702_v3 = vadd.f32 %v2606_v45, %v9206_v34  ;;  %v9505_v22 = vperm.slane %v8607_v8, 0 }
 0x4cd   : >> { %v9499_v63 = vadd.f32 %v2503_v61, %v2341_v5  ;;  %2653 = vmatmul.f32.gmra.mxu1 %v6809_v26  ;;  %2849 = vmatmul.f32.gmra.mxu2 %v6713_v19  ;;  %v6763_v26 = vld [vmem:[%s8665_s24 + $0xa9] sm:$0xff] }
 0x4ce   : >> { %v6812_v5 = vld [vmem:[%s8665_s24 + $0xaa] sm:$0xff] }
 0x4cf   : >> { %3045 = vmatmul.f32.gmra.mxu3 %v6762_v33 }
 0x4d0   : >> { %v2802_v43 = vpop.f32.mrf.mxu2  ;;  %v3194_v2 = vpop.f32.mrf.mxu0 }
 0x4d1   : >> { %v2898_v32 = vadd.f32 %v2802_v43, %v2702_v3 }
 0x4d2   : >> { %v2609_v16 = vpop.f32.mrf.mxu1  ;;  %v2998_v21 = vpop.f32.mrf.mxu3 }
 0x4d3   : >> { %v3094_v49 = vadd.f32 %v2998_v21, %v2898_v32  ;;  %3241 = vmatmul.f32.gmra.mxu0 %v6811_v50  ;;  %v2703_v34 = vadd.f32 %v2609_v16, %v9215_v35  ;;  %v6715_v21 = vld [vmem:[%s8665_s24 + $0xb0] sm:$0xff] }
 0x4d4   : >> { %v6764_v35 = vld [vmem:[%s8665_s24 + $0xb1] sm:$0xff] }
 0x4d5   : >> { %v3290_v61 = vadd.f32 %v3194_v2, %v3094_v49  ;;  %2656 = vmatmul.f32.gmra.mxu1 %v6810_v55  ;;  %2852 = vmatmul.f32.gmra.mxu2 %v6714_v9 }
 0x4d7   : >> { %v3325_v17 = vadd.f32 %v9505_v22, %v3290_v61  ;;  %3048 = vmatmul.f32.gmra.mxu3 %v6763_v26  ;;  %v6813_v61 = vld [vmem:[%s8665_s24 + $0xb2] sm:$0xff] }
 0x4d8   : >> { %v2805_v45 = vpop.f32.mrf.mxu2  ;;  %v3197_v19 = vpop.f32.mrf.mxu0 }
 0x4d9   : >> { %v3357_v33 = vmax.f32 %v3325_v17, 0.0  ;;  %v2899_v3 = vadd.f32 %v2805_v45, %v2703_v34 }
 0x4da   : >> { %v2612_v43 = vpop.f32.mrf.mxu1  ;;  %v3001_v32 = vpop.f32.mrf.mxu3 }
 0x4db   : >> { %3390 = vst [vmem:[%s9514_s15] sm:$0xff] %v3357_v33  ;;  %v3095_v49 = vadd.f32 %v3001_v32, %v2899_v3  ;;  %3244 = vmatmul.f32.gmra.mxu0 %v6812_v5  ;;  %v2704_v2 = vadd.f32 %v2612_v43, %v9230_v27  ;;  %v6716_v3 = vld [vmem:[%s8665_s24 + $0xb8] sm:$0xff] }
 0x4dd   : >> { %v3291_v55 = vadd.f32 %v3197_v19, %v3095_v49  ;;  %2659 = vmatmul.f32.gmra.mxu1 %v6811_v50  ;;  %2855 = vmatmul.f32.gmra.mxu2 %v6715_v21  ;;  %v6765_v50 = vld [vmem:[%s8665_s24 + $0xb9] sm:$0xff] }
 0x4df   : >> { %v3326_v16 = vadd.f32 %v9505_v22, %v3291_v55  ;;  %3051 = vmatmul.f32.gmra.mxu3 %v6764_v35  ;;  %v6814_v35 = vld [vmem:[%s8665_s24 + $0xba] sm:$0xff] }
 0x4e0   : >> { %v2808_v9 = vpop.f32.mrf.mxu2  ;;  %v3200_v26 = vpop.f32.mrf.mxu0 }
 0x4e1   : >> { %v3358_v34 = vmax.f32 %v3326_v16, 0.0  ;;  %v2900_v17 = vadd.f32 %v2808_v9, %v2704_v2 }
 0x4e2   : >> { %v2615_v45 = vpop.f32.mrf.mxu1  ;;  %v3004_v33 = vpop.f32.mrf.mxu3 }
 0x4e3   : >> { %3391 = vst [vmem:[%s9514_s15 + $0x8] sm:$0xff] %v3358_v34  ;;  %v3096_v32 = vadd.f32 %v3004_v33, %v2900_v17  ;;  %3247 = vmatmul.f32.gmra.mxu0 %v6813_v61  ;;  %v2705_v27 = vadd.f32 %v2615_v45, %v9239_v59  ;;  %v6717_v34 = vld [vmem:[%s8665_s24 + $0xc0] sm:$0xff] }
 0x4e5   : >> { %v3292_v19 = vadd.f32 %v3200_v26, %v3096_v32  ;;  %2662 = vmatmul.f32.gmra.mxu1 %v6812_v5  ;;  %2858 = vmatmul.f32.gmra.mxu2 %v6716_v3  ;;  %v6815_v3 = vld [vmem:[%s8665_s24 + $0xc2] sm:$0xff] }
 0x4e7   : >> { %v3327_v43 = vadd.f32 %v9505_v22, %v3292_v19  ;;  %3054 = vmatmul.f32.gmra.mxu3 %v6765_v50 }
 0x4e8   : >> { %v2811_v21 = vpop.f32.mrf.mxu2  ;;  %v3203_v49 = vpop.f32.mrf.mxu0 }
 0x4e9   : >> { %v3359_v55 = vmax.f32 %v3327_v43, 0.0  ;;  %v2901_v2 = vadd.f32 %v2811_v21, %v2705_v27  ;;  %v6718_v43 = vld [vmem:[%s8665_s24 + $0xc8] sm:$0xff] }
 0x4ea   : >> { %v2618_v16 = vpop.f32.mrf.mxu1  ;;  %v3007_v9 = vpop.f32.mrf.mxu3 }
 0x4eb   : >> { %3392 = vst [vmem:[%s9514_s15 + $0x10] sm:$0xff] %v3359_v55  ;;  %v3097_v17 = vadd.f32 %v3007_v9, %v2901_v2  ;;  %3250 = vmatmul.f32.gmra.mxu0 %v6814_v35  ;;  %v2706_v59 = vadd.f32 %v2618_v16, %v9254_v12  ;;  %v6816_v2 = vld [vmem:[%s8665_s24 + $0xca] sm:$0xff] }
 0x4ed   : >> { %v3293_v5 = vadd.f32 %v3203_v49, %v3097_v17  ;;  %2665 = vmatmul.f32.gmra.mxu1 %v6813_v61  ;;  %2861 = vmatmul.f32.gmra.mxu2 %v6717_v34 }
 0x4ef   : >> { %v3328_v26 = vadd.f32 %v9505_v22, %v3293_v5  ;;  %3057 = vmatmul.f32.gmra.mxu3 %v9273_v46  ;;  %v6719_v5 = vld [vmem:[%s8665_s24 + $0xd0] sm:$0xff] }
 0x4f0   : >> { %v2814_v45 = vpop.f32.mrf.mxu2  ;;  %v3206_v33 = vpop.f32.mrf.mxu0 }
 0x4f1   : >> { %v3360_v32 = vmax.f32 %v3328_v26, 0.0  ;;  %v2902_v50 = vadd.f32 %v2814_v45, %v2706_v59 }
 0x4f2   : >> { %v2621_v19 = vpop.f32.mrf.mxu1  ;;  %v3010_v27 = vpop.f32.mrf.mxu3 }
 0x4f3   : >> { %3393 = vst [vmem:[%s9514_s15 + $0x18] sm:$0xff] %v3360_v32  ;;  %v3098_v21 = vadd.f32 %v3010_v27, %v2902_v50  ;;  %3253 = vmatmul.f32.gmra.mxu0 %v6815_v3  ;;  %v2707_v12 = vadd.f32 %v2621_v19, %v9263_v29 }
 0x4f5   : >> { %v3294_v61 = vadd.f32 %v3206_v33, %v3098_v21  ;;  %2668 = vmatmul.f32.gmra.mxu1 %v6814_v35  ;;  %2864 = vmatmul.f32.gmra.mxu2 %v6718_v43  ;;  %v6817_v33 = vld [vmem:[%s8665_s24 + $0xd2] sm:$0xff] }
 0x4f6   : >> { %v6720_v43 = vld [vmem:[%s8665_s24 + $0xd8] sm:$0xff] }
 0x4f7   : >> { %v3329_v46 = vadd.f32 %v9505_v22, %v3294_v61  ;;  %3060 = vmatmul.f32.gmra.mxu3 %v9288_v52 }
 0x4f8   : >> { %v2817_v49 = vpop.f32.mrf.mxu2  ;;  %v3209_v55 = vpop.f32.mrf.mxu0 }
 0x4f9   : >> { %v3361_v16 = vmax.f32 %v3329_v46, 0.0  ;;  %v2903_v9 = vadd.f32 %v2817_v49, %v2707_v12 }
 0x4fa   : >> { %v2624_v34 = vpop.f32.mrf.mxu1  ;;  %v3013_v17 = vpop.f32.mrf.mxu3 }
 0x4fb   : >> { %3394 = vst [vmem:[%s9514_s15 + $0x20] sm:$0xff] %v3361_v16  ;;  %v3099_v59 = vadd.f32 %v3013_v17, %v2903_v9  ;;  %3256 = vmatmul.f32.gmra.mxu0 %v6816_v2  ;;  %v2708_v29 = vadd.f32 %v2624_v34, %v9281_v42  ;;  %v6721_v9 = vld [vmem:[%s8665_s24 + $0xe0] sm:$0xff] }
 0x4fd   : >> { %v3295_v35 = vadd.f32 %v3209_v55, %v3099_v59  ;;  %2671 = vmatmul.f32.gmra.mxu1 %v6815_v3  ;;  %2867 = vmatmul.f32.gmra.mxu2 %v6719_v5  ;;  %v6819_v59 = vld [vmem:[%s8665_s24 + $0xe2] sm:$0xff] }
 0x4ff   : >> { %v3330_v52 = vadd.f32 %v9505_v22, %v3295_v35  ;;  %3063 = vmatmul.f32.gmra.mxu3 %v9303_v28 }
 0x500   : >> { %v2820_v26 = vpop.f32.mrf.mxu2  ;;  %v3212_v45 = vpop.f32.mrf.mxu0 }
 0x501   : >> { %v3362_v32 = vmax.f32 %v3330_v52, 0.0  ;;  %v2904_v50 = vadd.f32 %v2820_v26, %v2708_v29 }
 0x502   : >> { %v2627_v19 = vpop.f32.mrf.mxu1  ;;  %v3016_v27 = vpop.f32.mrf.mxu3 }
 0x503   : >> { %3395 = vst [vmem:[%s9514_s15 + $0x28] sm:$0xff] %v3362_v32  ;;  %v3100_v21 = vadd.f32 %v3016_v27, %v2904_v50  ;;  %3259 = vmatmul.f32.gmra.mxu0 %v6817_v33  ;;  %v2709_v42 = vadd.f32 %v2627_v19, %v9293_v6  ;;  %v6722_v32 = vld [vmem:[%s8665_s24 + $0xe8] sm:$0xff] }
 0x505   : >> { %v3296_v3 = vadd.f32 %v3212_v45, %v3100_v21  ;;  %2674 = vmatmul.f32.gmra.mxu1 %v6816_v2  ;;  %2870 = vmatmul.f32.gmra.mxu2 %v6720_v43  ;;  %v6673_v45 = vld [vmem:[%s8665_s24 + $0xda] sm:$0xff] }
 0x507   : >> { %v3331_v28 = vadd.f32 %v9505_v22, %v3296_v3  ;;  %3066 = vmatmul.f32.gmra.mxu3 %v9318_v51 }
 0x508   : >> { %v2823_v61 = vpop.f32.mrf.mxu2  ;;  %v3215_v12 = vpop.f32.mrf.mxu0 }
 0x509   : >> { %v3363_v46 = vmax.f32 %v3331_v28, 0.0  ;;  %v2905_v49 = vadd.f32 %v2823_v61, %v2709_v42  ;;  %v6723_v42 = vld [vmem:[%s8665_s24 + $0xf0] sm:$0xff] }
 0x50a   : >> { %v2630_v55 = vpop.f32.mrf.mxu1  ;;  %v3019_v16 = vpop.f32.mrf.mxu3 }
 0x50b   : >> { %3396 = vst [vmem:[%s9514_s15 + $0x30] sm:$0xff] %v3363_v46  ;;  %v3101_v34 = vadd.f32 %v3019_v16, %v2905_v49  ;;  %3262 = vmatmul.f32.gmra.mxu0 %v9339_v14  ;;  %v2710_v51 = vadd.f32 %v2630_v55, %v9311_v23 }
 0x50d   : >> { %v3297_v6 = vadd.f32 %v3215_v12, %v3101_v34  ;;  %2677 = vmatmul.f32.gmra.mxu1 %v6817_v33  ;;  %2873 = vmatmul.f32.gmra.mxu2 %v6721_v9  ;;  %v6675_v34 = vld [vmem:[%s8665_s24 + $0xea] sm:$0xff] }
 0x50f   : >> { %v3332_v2 = vadd.f32 %v9505_v22, %v3297_v6  ;;  %3069 = vmatmul.f32.gmra.mxu3 %v9333_v24  ;;  %v6724_v6 = vld [vmem:[%s8665_s24 + $0xf8] sm:$0xff] }
 0x510   : >> { %v2826_v17 = vpop.f32.mrf.mxu2  ;;  %v3218_v5 = vpop.f32.mrf.mxu0 }
 0x511   : >> { %v3364_v35 = vmax.f32 %v3332_v2, 0.0  ;;  %v2906_v29 = vadd.f32 %v2826_v17, %v2710_v51 }
 0x512   : >> { %v2633_v52 = vpop.f32.mrf.mxu1  ;;  %v3022_v26 = vpop.f32.mrf.mxu3 }
 0x513   : >> { %3397 = vst [vmem:[%s9514_s15 + $0x38] sm:$0xff] %v3364_v35  ;;  %v3102_v14 = vadd.f32 %v3022_v26, %v2906_v29  ;;  %3265 = vmatmul.f32.gmra.mxu0 %v6819_v59  ;;  %v2711_v23 = vadd.f32 %v2633_v52, %v9323_v60  ;;  %v6676_v52 = vld [vmem:[%s8665_s24 + $0xf2] sm:$0xff]  ;;  %v6725_v26 = vld [vmem:[%s8665_s24 + $0x100] sm:$0xff] }
 0x515   : >> { %v3298_v33 = vadd.f32 %v3218_v5, %v3102_v14  ;;  %2680 = vmatmul.f32.gmra.mxu1 %v6673_v45  ;;  %2876 = vmatmul.f32.gmra.mxu2 %v6722_v32 }
 0x517   : >> { %v3333_v24 = vadd.f32 %v9505_v22, %v3298_v33  ;;  %3072 = vmatmul.f32.gmra.mxu3 %v9351_v47  ;;  %v6823_v33 = vld [vmem:[%s8665_s24 + $0x102] sm:$0xff] }
 0x518   : >> { %v2829_v50 = vpop.f32.mrf.mxu2  ;;  %v3221_v19 = vpop.f32.mrf.mxu0 }
 0x519   : >> { %v3365_v27 = vmax.f32 %v3333_v24, 0.0  ;;  %v2907_v43 = vadd.f32 %v2829_v50, %v2711_v23 }
 0x51a   : >> { %v2636_v21 = vpop.f32.mrf.mxu1  ;;  %v3025_v3 = vpop.f32.mrf.mxu3 }
 0x51b   : >> { %3398 = vst [vmem:[%s9514_s15 + $0x40] sm:$0xff] %v3365_v27  ;;  %v3103_v28 = vadd.f32 %v3025_v3, %v2907_v43  ;;  %3268 = vmatmul.f32.gmra.mxu0 %v9363_v31  ;;  %v2712_v60 = vadd.f32 %v2636_v21, %v9343_v41  ;;  %v6677_v27 = vld [vmem:[%s8665_s24 + $0xfa] sm:$0xff] }
 0x51d   : >> { %v3299_v61 = vadd.f32 %v3221_v19, %v3103_v28  ;;  %2683 = vmatmul.f32.gmra.mxu1 %v6819_v59  ;;  %2879 = vmatmul.f32.gmra.mxu2 %v6723_v42  ;;  %v6824_v28 = vld [vmem:[%s8665_s24 + $0x10a] sm:$0xff] }
 0x51f   : >> { %v3334_v47 = vadd.f32 %v9505_v22, %v3299_v61  ;;  %3075 = vmatmul.f32.gmra.mxu3 %v9360_v7 }
 0x520   : >> { %v2832_v12 = vpop.f32.mrf.mxu2  ;;  %v3224_v46 = vpop.f32.mrf.mxu0 }
 0x521   : >> { %v3366_v49 = vmax.f32 %v3334_v47, 0.0  ;;  %v2908_v55 = vadd.f32 %v2832_v12, %v2712_v60 }
 0x522   : >> { %v2639_v16 = vpop.f32.mrf.mxu1  ;;  %v3028_v9 = vpop.f32.mrf.mxu3 }
 0x523   : >> { %3399 = vst [vmem:[%s9514_s15 + $0x48] sm:$0xff] %v3366_v49  ;;  %v3104_v31 = vadd.f32 %v3028_v9, %v2908_v55  ;;  %3271 = vmatmul.f32.gmra.mxu0 %v9375_v25  ;;  %v2713_v7 = vadd.f32 %v2639_v16, %v9356_v62  ;;  %v6776_v55 = vld [vmem:[%s8665_s24 + $0x111] sm:$0xff] }
 0x525   : >> { %v3300_v41 = vadd.f32 %v3224_v46, %v3104_v31  ;;  %2686 = vmatmul.f32.gmra.mxu1 %v6675_v34  ;;  %2882 = vmatmul.f32.gmra.mxu2 %v6724_v6  ;;  %v6727_v46 = vld [vmem:[%s8665_s24 + $0x110] sm:$0xff] }
 0x526   : >> { %v6825_v6 = vld [vmem:[%s8665_s24 + $0x112] sm:$0xff] }
 0x527   : >> { %v3335_v51 = vadd.f32 %v9505_v22, %v3300_v41  ;;  %3078 = vmatmul.f32.gmra.mxu3 %v9372_v38 }
 0x528   : >> { %v2835_v2 = vpop.f32.mrf.mxu2  ;;  %v3227_v17 = vpop.f32.mrf.mxu0 }
 0x529   : >> { %v3367_v5 = vmax.f32 %v3335_v51, 0.0  ;;  %v2909_v59 = vadd.f32 %v2835_v2, %v2713_v7  ;;  %v6728_v2 = vld [vmem:[%s8665_s24 + $0x118] sm:$0xff] }
 0x52a   : >> { %v2642_v35 = vpop.f32.mrf.mxu1  ;;  %v3031_v29 = vpop.f32.mrf.mxu3 }
 0x52b   : >> { %3400 = vst [vmem:[%s9514_s15 + $0x50] sm:$0xff] %v3367_v5  ;;  %v3105_v25 = vadd.f32 %v3031_v29, %v2909_v59  ;;  %3274 = vmatmul.f32.gmra.mxu0 %v9387_v18  ;;  %v2714_v38 = vadd.f32 %v2642_v35, %v9367_v57  ;;  %v6726_v18 = vld [vmem:[%s8665_s24 + $0x108] sm:$0xff]  ;;  %v6777_v5 = vld [vmem:[%s8665_s24 + $0x119] sm:$0xff] }
 0x52d   : >> { %v3301_v62 = vadd.f32 %v3227_v17, %v3105_v25  ;;  %2689 = vmatmul.f32.gmra.mxu1 %v6676_v52  ;;  %2885 = vmatmul.f32.gmra.mxu2 %v6725_v26  ;;  %v6826_v26 = vld [vmem:[%s8665_s24 + $0x11a] sm:$0xff]  ;;  %s9657_s24 = smov (%p1619_p13), 0  }
 0x52f   : >> { %v3336_v45 = vadd.f32 %v9505_v22, %v3301_v62  ;;  %3081 = vmatmul.f32.gmra.mxu3 %v9384_v11 }
 0x530   : >> { %v2838_v32 = vpop.f32.mrf.mxu2  ;;  %v3230_v14 = vpop.f32.mrf.mxu0 }
 0x531   : >> { %v3368_v23 = vmax.f32 %v3336_v45, 0.0  ;;  %v2910_v24 = vadd.f32 %v2838_v32, %v2714_v38 }
 0x532   : >> { %v2645_v50 = vpop.f32.mrf.mxu1  ;;  %v3034_v19 = vpop.f32.mrf.mxu3 }
 0x533   : >> { %3401 = vst [vmem:[%s9514_s15 + $0x58] sm:$0xff] %v3368_v23  ;;  %v3106_v43 = vadd.f32 %v3034_v19, %v2910_v24  ;;  %3277 = vmatmul.f32.gmra.mxu0 %v6823_v33  ;;  %v2715_v11 = vadd.f32 %v2645_v50, %v9379_v53 }
 0x535   : >> { %v3302_v57 = vadd.f32 %v3230_v14, %v3106_v43  ;;  %2692 = vmatmul.f32.gmra.mxu1 %v6677_v27  ;;  %2888 = vmatmul.f32.gmra.mxu2 %v6726_v18 }
 0x537   : >> { %v3337_v21 = vadd.f32 %v9505_v22, %v3302_v57  ;;  %3084 = vmatmul.f32.gmra.mxu3 %v9396_v1 }
 0x538   : >> { %v2841_v3 = vpop.f32.mrf.mxu2  ;;  %v3233_v42 = vpop.f32.mrf.mxu0 }
 0x539   : >> { %v3369_v61 = vmax.f32 %v3337_v21, 0.0  ;;  %v2911_v60 = vadd.f32 %v2841_v3, %v2715_v11 }
 0x53a   : >> { %v2648_v47 = vpop.f32.mrf.mxu1  ;;  %v3037_v12 = vpop.f32.mrf.mxu3 }
 0x53b   : >> { %3402 = vst [vmem:[%s9514_s15 + $0x60] sm:$0xff] %v3369_v61  ;;  %v3107_v49 = vadd.f32 %v3037_v12, %v2911_v60  ;;  %3280 = vmatmul.f32.gmra.mxu0 %v6824_v28  ;;  %v2716_v1 = vadd.f32 %v2648_v47, %v9391_v37 }
 0x53d   : >> { %v3303_v53 = vadd.f32 %v3233_v42, %v3107_v49  ;;  %2695 = vmatmul.f32.gmra.mxu1 %v6823_v33  ;;  %2891 = vmatmul.f32.gmra.mxu2 %v6727_v46 }
 0x53f   : >> { %v3338_v16 = vadd.f32 %v9505_v22, %v3303_v53  ;;  %3087 = vmatmul.f32.gmra.mxu3 %v6776_v55 }
 0x540   : >> { %v2844_v9 = vpop.f32.mrf.mxu2  ;;  %v3236_v34 = vpop.f32.mrf.mxu0 }
 0x541   : >> { %v3370_v31 = vmax.f32 %v3338_v16, 0.0  ;;  %v2912_v41 = vadd.f32 %v2844_v9, %v2716_v1 }
 0x542   : >> { %v2651_v7 = vpop.f32.mrf.mxu1  ;;  %v3040_v51 = vpop.f32.mrf.mxu3 }
 0x543   : >> { %3403 = vst [vmem:[%s9514_s15 + $0x68] sm:$0xff] %v3370_v31  ;;  %v3108_v17 = vadd.f32 %v3040_v51, %v2912_v41  ;;  %3283 = vmatmul.f32.gmra.mxu0 %v6825_v6  ;;  %v2717_v37 = vadd.f32 %v2651_v7, %v9402_v39 }
 0x545   : >> { %v3304_v59 = vadd.f32 %v3236_v34, %v3108_v17  ;;  %2698 = vmatmul.f32.gmra.mxu1 %v6824_v28  ;;  %2894 = vmatmul.f32.gmra.mxu2 %v6728_v2 }
 0x547   : >> { %v3339_v35 = vadd.f32 %v9505_v22, %v3304_v59  ;;  %3090 = vmatmul.f32.gmra.mxu3 %v6777_v5 }
 0x548   : >> { %v2847_v29 = vpop.f32.mrf.mxu2  ;;  %v3239_v52 = vpop.f32.mrf.mxu0 }
 0x549   : >> { %v3371_v25 = vmax.f32 %v3339_v35, 0.0  ;;  %v2913_v62 = vadd.f32 %v2847_v29, %v2717_v37 }
 0x54a   : >> { %v2654_v38 = vpop.f32.mrf.mxu1  ;;  %v3043_v45 = vpop.f32.mrf.mxu3 }
 0x54b   : >> { %3404 = vst [vmem:[%s9514_s15 + $0x70] sm:$0xff] %v3371_v25  ;;  %v3109_v32 = vadd.f32 %v3043_v45, %v2913_v62  ;;  %3286 = vmatmul.f32.gmra.mxu0 %v6826_v26  ;;  %v2718_v33 = vadd.f32 %v2654_v38, %v9409_v56 }
 0x54d   : >> { %v3305_v14 = vadd.f32 %v3239_v52, %v3109_v32 }
 0x54f   : >> { %v3340_v23 = vadd.f32 %v9505_v22, %v3305_v14 }
 0x550   : >> { %v2850_v39 = vpop.f32.mrf.mxu2  ;;  %v3242_v24 = vpop.f32.mrf.mxu0 }
 0x551   : >> { %v3372_v50 = vmax.f32 %v3340_v23, 0.0  ;;  %v2914_v19 = vadd.f32 %v2850_v39, %v2718_v33 }
 0x552   : >> { %v2657_v27 = vpop.f32.mrf.mxu1  ;;  %v3046_v18 = vpop.f32.mrf.mxu3 }
 0x553   : >> { %3405 = vst [vmem:[%s9514_s15 + $0x78] sm:$0xff] %v3372_v50  ;;  %v3110_v43 = vadd.f32 %v3046_v18, %v2914_v19  ;;  %v2719_v11 = vadd.f32 %v2657_v27, %v9415_v36 }
 0x555   : >> { %v3306_v57 = vadd.f32 %v3242_v24, %v3110_v43 }
 0x557   : >> { %v3341_v21 = vadd.f32 %v9505_v22, %v3306_v57 }
 0x558   : >> { %v2853_v3 = vpop.f32.mrf.mxu2  ;;  %v3245_v42 = vpop.f32.mrf.mxu0 }
 0x559   : >> { %v3373_v56 = vmax.f32 %v3341_v21, 0.0  ;;  %v2915_v28 = vadd.f32 %v2853_v3, %v2719_v11 }
 0x55a   : >> { %v2660_v61 = vpop.f32.mrf.mxu1  ;;  %v3049_v60 = vpop.f32.mrf.mxu3 }
 0x55b   : >> { %3406 = vst [vmem:[%s9514_s15 + $0x80] sm:$0xff] %v3373_v56  ;;  %v3111_v47 = vadd.f32 %v3049_v60, %v2915_v28  ;;  %v2720_v46 = vadd.f32 %v2660_v61, %v9421_v48 }
 0x55d   : >> { %v3307_v12 = vadd.f32 %v3245_v42, %v3111_v47 }
 0x55f   : >> { %v3342_v49 = vadd.f32 %v9505_v22, %v3307_v12 }
 0x560   : >> { %v2856_v55 = vpop.f32.mrf.mxu2  ;;  %v3248_v53 = vpop.f32.mrf.mxu0 }
 0x561   : >> { %v3374_v36 = vmax.f32 %v3342_v49, 0.0  ;;  %v2916_v1 = vadd.f32 %v2856_v55, %v2720_v46 }
 0x562   : >> { %v2663_v16 = vpop.f32.mrf.mxu1  ;;  %v3052_v9 = vpop.f32.mrf.mxu3 }
 0x563   : >> { %3407 = vst [vmem:[%s9514_s15 + $0x88] sm:$0xff] %v3374_v36  ;;  %v3112_v34 = vadd.f32 %v3052_v9, %v2916_v1  ;;  %v2721_v31 = vadd.f32 %v2663_v16, %v9427_v44 }
 0x565   : >> { %v3308_v6 = vadd.f32 %v3248_v53, %v3112_v34 }
 0x567   : >> { %v3343_v41 = vadd.f32 %v9505_v22, %v3308_v6 }
 0x568   : >> { %v2859_v7 = vpop.f32.mrf.mxu2  ;;  %v3251_v51 = vpop.f32.mrf.mxu0 }
 0x569   : >> { %v3375_v48 = vmax.f32 %v3343_v41, 0.0  ;;  %v2917_v2 = vadd.f32 %v2859_v7, %v2721_v31 }
 0x56a   : >> { %v2666_v17 = vpop.f32.mrf.mxu1  ;;  %v3055_v5 = vpop.f32.mrf.mxu3 }
 0x56b   : >> { %3408 = vst [vmem:[%s9514_s15 + $0x90] sm:$0xff] %v3375_v48  ;;  %v3113_v59 = vadd.f32 %v3055_v5, %v2917_v2  ;;  %v2722_v35 = vadd.f32 %v2666_v17, %v9433_v4 }
 0x56d   : >> { %v3309_v37 = vadd.f32 %v3251_v51, %v3113_v59 }
 0x56f   : >> { %v3344_v29 = vadd.f32 %v9505_v22, %v3309_v37 }
 0x570   : >> { %v2862_v52 = vpop.f32.mrf.mxu2  ;;  %v3254_v26 = vpop.f32.mrf.mxu0 }
 0x571   : >> { %v3376_v44 = vmax.f32 %v3344_v29, 0.0  ;;  %v2918_v25 = vadd.f32 %v2862_v52, %v2722_v35 }
 0x572   : >> { %v2669_v62 = vpop.f32.mrf.mxu1  ;;  %v3058_v38 = vpop.f32.mrf.mxu3 }
 0x573   : >> { %3409 = vst [vmem:[%s9514_s15 + $0x98] sm:$0xff] %v3376_v44  ;;  %v3114_v45 = vadd.f32 %v3058_v38, %v2918_v25  ;;  %v2723_v14 = vadd.f32 %v2669_v62, %v9439_v20 }
 0x575   : >> { %v3310_v32 = vadd.f32 %v3254_v26, %v3114_v45 }
 0x577   : >> { %v3345_v33 = vadd.f32 %v9505_v22, %v3310_v32 }
 0x578   : >> { %v2865_v23 = vpop.f32.mrf.mxu2  ;;  %v3257_v39 = vpop.f32.mrf.mxu0 }
 0x579   : >> { %v3377_v4 = vmax.f32 %v3345_v33, 0.0  ;;  %v2919_v24 = vadd.f32 %v2865_v23, %v2723_v14 }
 0x57a   : >> { %v2672_v50 = vpop.f32.mrf.mxu1  ;;  %v3061_v19 = vpop.f32.mrf.mxu3 }
 0x57b   : >> { %3410 = vst [vmem:[%s9514_s15 + $0xa0] sm:$0xff] %v3377_v4  ;;  %v3115_v27 = vadd.f32 %v3061_v19, %v2919_v24  ;;  %v2724_v43 = vadd.f32 %v2672_v50, %v9445_v15 }
 0x57d   : >> { %v3311_v18 = vadd.f32 %v3257_v39, %v3115_v27 }
 0x57f   : >> { %v3346_v57 = vadd.f32 %v9505_v22, %v3311_v18 }
 0x580   : >> { %v2868_v11 = vpop.f32.mrf.mxu2  ;;  %v3260_v21 = vpop.f32.mrf.mxu0 }
 0x581   : >> { %v3378_v20 = vmax.f32 %v3346_v57, 0.0  ;;  %v2920_v3 = vadd.f32 %v2868_v11, %v2724_v43 }
 0x582   : >> { %v2675_v42 = vpop.f32.mrf.mxu1  ;;  %v3064_v56 = vpop.f32.mrf.mxu3 }
 0x583   : >> { %3411 = vst [vmem:[%s9514_s15 + $0xa8] sm:$0xff] %v3378_v20  ;;  %v3116_v28 = vadd.f32 %v3064_v56, %v2920_v3  ;;  %v2725_v60 = vadd.f32 %v2675_v42, %v9451_v54 }
 0x585   : >> { %v3312_v61 = vadd.f32 %v3260_v21, %v3116_v28 }
 0x587   : >> { %v3347_v47 = vadd.f32 %v9505_v22, %v3312_v61 }
 0x588   : >> { %v2871_v12 = vpop.f32.mrf.mxu2  ;;  %v3263_v46 = vpop.f32.mrf.mxu0 }
 0x589   : >> { %v3379_v15 = vmax.f32 %v3347_v47, 0.0  ;;  %v2921_v49 = vadd.f32 %v2871_v12, %v2725_v60 }
 0x58a   : >> { %v2678_v55 = vpop.f32.mrf.mxu1  ;;  %v3067_v53 = vpop.f32.mrf.mxu3 }
 0x58b   : >> { %3412 = vst [vmem:[%s9514_s15 + $0xb0] sm:$0xff] %v3379_v15  ;;  %v3117_v36 = vadd.f32 %v3067_v53, %v2921_v49  ;;  %v2726_v16 = vadd.f32 %v2678_v55, %v9457_v58 }
 0x58d   : >> { %v3313_v1 = vadd.f32 %v3263_v46, %v3117_v36 }
 0x58f   : >> { %v3348_v9 = vadd.f32 %v9505_v22, %v3313_v1 }
 0x590   : >> { %v2874_v34 = vpop.f32.mrf.mxu2  ;;  %v3266_v6 = vpop.f32.mrf.mxu0 }
 0x591   : >> { %v3380_v54 = vmax.f32 %v3348_v9, 0.0  ;;  %v2922_v31 = vadd.f32 %v2874_v34, %v2726_v16  ;;  %v11310_v16 = vld [vmem:[#allocation10_spill] sm:$0xff] }
 0x592   : >> { %v2681_v41 = vpop.f32.mrf.mxu1  ;;  %v3070_v7 = vpop.f32.mrf.mxu3 }
 0x593   : >> { %3413 = vst [vmem:[%s9514_s15 + $0xb8] sm:$0xff] %v3380_v54  ;;  %v3118_v51 = vadd.f32 %v3070_v7, %v2922_v31  ;;  %v2727_v2 = vadd.f32 %v2681_v41, %v9463_v10 }
 0x595   : >> { %v3314_v48 = vadd.f32 %v3266_v6, %v3118_v51 }
 0x597   : >> { %v3349_v17 = vadd.f32 %v9505_v22, %v3314_v48 }
 0x598   : >> { %v2877_v5 = vpop.f32.mrf.mxu2  ;;  %v3269_v59 = vpop.f32.mrf.mxu0 }
 0x599   : >> { %v3381_v58 = vmax.f32 %v3349_v17, 0.0  ;;  %v2923_v37 = vadd.f32 %v2877_v5, %v2727_v2 }
 0x59a   : >> { %v2684_v35 = vpop.f32.mrf.mxu1  ;;  %v3073_v29 = vpop.f32.mrf.mxu3 }
 0x59b   : >> { %3414 = vst [vmem:[%s9514_s15 + $0xc0] sm:$0xff] %v3381_v58  ;;  %v3119_v52 = vadd.f32 %v3073_v29, %v2923_v37  ;;  %v2728_v44 = vadd.f32 %v2684_v35, %v9469_v13 }
 0x59d   : >> { %v3315_v26 = vadd.f32 %v3269_v59, %v3119_v52 }
 0x59f   : >> { %v3350_v25 = vadd.f32 %v9505_v22, %v3315_v26 }
 0x5a0   : >> { %v2880_v62 = vpop.f32.mrf.mxu2  ;;  %v3272_v38 = vpop.f32.mrf.mxu0 }
 0x5a1   : >> { %v3382_v10 = vmax.f32 %v3350_v25, 0.0  ;;  %v2924_v45 = vadd.f32 %v2880_v62, %v2728_v44 }
 0x5a2   : >> { %v2687_v32 = vpop.f32.mrf.mxu1  ;;  %v3076_v14 = vpop.f32.mrf.mxu3 }
 0x5a3   : >> { %3415 = vst [vmem:[%s9514_s15 + $0xc8] sm:$0xff] %v3382_v10  ;;  %v3120_v33 = vadd.f32 %v3076_v14, %v2924_v45  ;;  %v2729_v39 = vadd.f32 %v2687_v32, %v9475_v0 }
 0x5a5   : >> { %v3316_v23 = vadd.f32 %v3272_v38, %v3120_v33 }
 0x5a7   : >> { %v3351_v4 = vadd.f32 %v9505_v22, %v3316_v23 }
 0x5a8   : >> { %v2883_v24 = vpop.f32.mrf.mxu2  ;;  %v3275_v50 = vpop.f32.mrf.mxu0 }
 0x5a9   : >> { %v3383_v13 = vmax.f32 %v3351_v4, 0.0  ;;  %v2925_v19 = vadd.f32 %v2883_v24, %v2729_v39 }
 0x5aa   : >> { %v2690_v27 = vpop.f32.mrf.mxu1  ;;  %v3079_v18 = vpop.f32.mrf.mxu3 }
 0x5ab   : >> { %3416 = vst [vmem:[%s9514_s15 + $0xd0] sm:$0xff] %v3383_v13  ;;  %v3121_v43 = vadd.f32 %v3079_v18, %v2925_v19  ;;  %v2730_v11 = vadd.f32 %v2690_v27, %v9481_v30 }
 0x5ad   : >> { %v3317_v57 = vadd.f32 %v3275_v50, %v3121_v43 }
 0x5af   : >> { %v3352_v21 = vadd.f32 %v9505_v22, %v3317_v57 }
 0x5b0   : >> { %v2886_v20 = vpop.f32.mrf.mxu2  ;;  %v3278_v3 = vpop.f32.mrf.mxu0 }
 0x5b1   : >> { %v3384_v0 = vmax.f32 %v3352_v21, 0.0  ;;  %v2926_v42 = vadd.f32 %v2886_v20, %v2730_v11 }
 0x5b2   : >> { %v2693_v56 = vpop.f32.mrf.mxu1  ;;  %v3082_v28 = vpop.f32.mrf.mxu3 }
 0x5b3   : >> { %3417 = vst [vmem:[%s9514_s15 + $0xd8] sm:$0xff] %v3384_v0  ;;  %v3122_v61 = vadd.f32 %v3082_v28, %v2926_v42  ;;  %v2731_v47 = vadd.f32 %v2693_v56, %v9487_v40 }
 0x5b5   : >> { %v3318_v60 = vadd.f32 %v3278_v3, %v3122_v61 }
 0x5b7   : >> { %v3353_v12 = vadd.f32 %v9505_v22, %v3318_v60 }
 0x5b8   : >> { %v2889_v46 = vpop.f32.mrf.mxu2  ;;  %v3281_v15 = vpop.f32.mrf.mxu0 }
 0x5b9   : >> { %v3385_v30 = vmax.f32 %v3353_v12, 0.0  ;;  %v2927_v49 = vadd.f32 %v2889_v46, %v2731_v47 }
 0x5ba   : >> { %v2696_v55 = vpop.f32.mrf.mxu1  ;;  %v3085_v53 = vpop.f32.mrf.mxu3 }
 0x5bb   : >> { %3418 = vst [vmem:[%s9514_s15 + $0xe0] sm:$0xff] %v3385_v30  ;;  %v3123_v36 = vadd.f32 %v3085_v53, %v2927_v49  ;;  %v2732_v9 = vadd.f32 %v2696_v55, %v11310_v16 }
 0x5bd   : >> { %v3319_v1 = vadd.f32 %v3281_v15, %v3123_v36 }
 0x5bf   : >> { %v3354_v34 = vadd.f32 %v9505_v22, %v3319_v1 }
 0x5c0   : >> { %v2892_v6 = vpop.f32.mrf.mxu2  ;;  %v3284_v54 = vpop.f32.mrf.mxu0 }
 0x5c1   : >> { %v3386_v40 = vmax.f32 %v3354_v34, 0.0  ;;  %v2928_v31 = vadd.f32 %v2892_v6, %v2732_v9 }
 0x5c2   : >> { %v3088_v41 = vpop.f32.mrf.mxu3  ;;  %v2699_v51 = vpop.f32.mrf.mxu1 }
 0x5c3   : >> { %3419 = vst [vmem:[%s9514_s15 + $0xe8] sm:$0xff] %v3386_v40  ;;  %v3124_v7 = vadd.f32 %v3088_v41, %v2928_v31  ;;  %v2733_v2 = vadd.f32 %v2699_v51, %v9499_v63 }
 0x5c5   : >> { %v3320_v48 = vadd.f32 %v3284_v54, %v3124_v7 }
 0x5c7   : >> { %v3355_v17 = vadd.f32 %v9505_v22, %v3320_v48 }
 0x5c8   : >> { %v2895_v5 = vpop.f32.mrf.mxu2  ;;  %v3287_v35 = vpop.f32.mrf.mxu0 }
 0x5c9   : >> { %v3387_v59 = vmax.f32 %v3355_v17, 0.0  ;;  %v2929_v58 = vadd.f32 %v2895_v5, %v2733_v2 }
 0x5ca   : >> { %v3091_v37 = vpop.f32.mrf.mxu3 }
 0x5cb   : >> { %3420 = vst [vmem:[%s9514_s15 + $0xf0] sm:$0xff] %v3387_v59  ;;  %v3125_v29 = vadd.f32 %v3091_v37, %v2929_v58 }
 0x5cd   : >> { %v3321_v52 = vadd.f32 %v3287_v35, %v3125_v29 }
 0x5cf   : >> { %v3356_v26 = vadd.f32 %v9505_v22, %v3321_v52  ;;  %1621 = sbr.rel (!%p1619_p13) target bundleno = 743 (0x2e7), region = 362 }
 0x5d1   : >> { %v3388_v44 = vmax.f32 %v3356_v26, 0.0 }
 0x5d3   : >> { %3421 = vst [vmem:[%s9514_s15 + $0xf8] sm:$0xff] %v3388_v44 }
 0x5d4 LB: >> { %s6843_s13 = sshll.u32 %s7719_s24, 8  ;;  %s6128_s14 = smul.u32 160, %s7719_s24  ;;  %s7719_s24 = sphi %s9657_s24, %s3427_s24  }
 0x5d5   : >> { %s9663_s25 = scalar_lea.vmem [#allocation2], %s6843_s13  ;;  %s3427_s24 = sadd.s32 1, %s7719_s24  }
 0x5d6   : >> { %s6129_s30 = scalar_lea.vmem [#allocation4], %s6128_s14  ;;  %p3424_p0 = scmp.ge.s32.totalorder %s3427_s24, 8  }
 0x5d7   : > { %v9700_v44 = vld [vmem:[%s11289_s6] sm:$0x1] (%p3424_p0)  ;;  %s9702_s22 = smov (%p3424_p0), 0  }
 0x5da   : >> { %v3430_v8 = vld [vmem:[%s9663_s25] sm:$0xff]  ;;  %v6845_v63 = vld [vmem:[%s9663_s25 + $0x10] sm:$0xff]  ;;  %v3431_v22 = vld [vmem:[%s9663_s25 + $0x8] sm:$0x3f] }
 0x5db   : >> { %v3436_v25 = vmax.f32 %v3430_v8, %v6845_v63  ;;  %v6846_v62 = vld [vmem:[%s9663_s25 + $0x18] sm:$0x3f]  ;;  %v6848_v38 = vld [vmem:[%s9663_s25 + $0x20] sm:$0xff]  ;;  %v6851_v10 = vld [vmem:[%s9663_s25 + $0x30] sm:$0xff] }
 0x5dc   : >> { %v3437_v45 = vmax.f32 %v3431_v22, %v6846_v62  ;;  %v3448_v32 = vmax.f32 %v6848_v38, %v6851_v10  ;;  %v6849_v14 = vld [vmem:[%s9663_s25 + $0x28] sm:$0x3f]  ;;  %v6852_v33 = vld [vmem:[%s9663_s25 + $0x38] sm:$0x3f]  ;;  %v6854_v23 = vld [vmem:[%s9663_s25 + $0x40] sm:$0xff] }
 0x5dd   : >> { %3438 = vst [vmem:[#allocation6] sm:$0xff] %v3436_v25  ;;  %v3449_v39 = vmax.f32 %v6849_v14, %v6852_v33  ;;  %v6857_v4 = vld [vmem:[%s9663_s25 + $0x50] sm:$0xff]  ;;  %v6855_v24 = vld [vmem:[%s9663_s25 + $0x48] sm:$0x3f]  ;;  %v6858_v50 = vld [vmem:[%s9663_s25 + $0x58] sm:$0x3f] }
 0x5de   : >> { %3439 = vst [vmem:[#allocation6 + $0x8] sm:$0x3f] %v3437_v45  ;;  %v3460_v13 = vmax.f32 %v6854_v23, %v6857_v4  ;;  %v3461_v19 = vmax.f32 %v6855_v24, %v6858_v50  ;;  %v6860_v27 = vld [vmem:[%s9663_s25 + $0x60] sm:$0xff]  ;;  %v6863_v18 = vld [vmem:[%s9663_s25 + $0x70] sm:$0xff]  ;;  %v6861_v43 = vld [vmem:[%s9663_s25 + $0x68] sm:$0x3f] }
 0x5df   : >> { %3450 = vst [vmem:[#allocation6 + $0x10] sm:$0xff] %v3448_v32  ;;  %v3472_v57 = vmax.f32 %v6860_v27, %v6863_v18  ;;  %v6864_v11 = vld [vmem:[%s9663_s25 + $0x78] sm:$0x3f]  ;;  %v6866_v21 = vld [vmem:[%s9663_s25 + $0x80] sm:$0xff]  ;;  %v6869_v20 = vld [vmem:[%s9663_s25 + $0x90] sm:$0xff] }
 0x5e0   : >> { %3451 = vst [vmem:[#allocation6 + $0x18] sm:$0x3f] %v3449_v39  ;;  %v3473_v3 = vmax.f32 %v6861_v43, %v6864_v11  ;;  %v6867_v0 = vld [vmem:[%s9663_s25 + $0x88] sm:$0x3f]  ;;  %v6870_v42 = vld [vmem:[%s9663_s25 + $0x98] sm:$0x3f]  ;;  %v3484_v56 = vmax.f32 %v6866_v21, %v6869_v20 }
 0x5e1   : >> { %3462 = vst [vmem:[#allocation6 + $0x20] sm:$0xff] %v3460_v13  ;;  %v6872_v28 = vld [vmem:[%s9663_s25 + $0xa0] sm:$0xff]  ;;  %v6875_v61 = vld [vmem:[%s9663_s25 + $0xb0] sm:$0xff]  ;;  %v6873_v60 = vld [vmem:[%s9663_s25 + $0xa8] sm:$0x3f]  ;;  %v3485_v47 = vmax.f32 %v6867_v0, %v6870_v42 }
 0x5e2   : >> { %3463 = vst [vmem:[#allocation6 + $0x28] sm:$0x3f] %v3461_v19  ;;  %v6876_v12 = vld [vmem:[%s9663_s25 + $0xb8] sm:$0x3f]  ;;  %v6878_v46 = vld [vmem:[%s9663_s25 + $0xc0] sm:$0xff]  ;;  %v6881_v15 = vld [vmem:[%s9663_s25 + $0xd0] sm:$0xff]  ;;  %v3496_v30 = vmax.f32 %v6872_v28, %v6875_v61 }
 0x5e3   : >> { %3474 = vst [vmem:[#allocation6 + $0x30] sm:$0xff] %v3472_v57  ;;  %v6879_v49 = vld [vmem:[%s9663_s25 + $0xc8] sm:$0x3f]  ;;  %v6882_v55 = vld [vmem:[%s9663_s25 + $0xd8] sm:$0x3f]  ;;  %v3497_v53 = vmax.f32 %v6873_v60, %v6876_v12  ;;  %v3508_v36 = vmax.f32 %v6878_v46, %v6881_v15 }
 0x5e4   : >> { %3475 = vst [vmem:[#allocation6 + $0x38] sm:$0x3f] %v3473_v3  ;;  %v3509_v16 = vmax.f32 %v6879_v49, %v6882_v55 }
 0x5e5   : >> { %3486 = vst [vmem:[#allocation6 + $0x40] sm:$0xff] %v3484_v56  ;;  %v3512_v1 = vld [vmem:[#allocation6] ss:$2 sm:$0x7f] }
 0x5e6   : >> { %3487 = vst [vmem:[#allocation6 + $0x48] sm:$0x3f] %v3485_v47  ;;  %v3514_v9 = vld [vmem:[#allocation6 + $0x1] ss:$2 sm:$0x7f] }
 0x5e7   : >> { %3498 = vst [vmem:[#allocation6 + $0x50] sm:$0xff] %v3496_v30  ;;  %v3515_v34 = vmax.f32 %v3512_v1, %v3514_v9  ;;  %v3521_v6 = vld [vmem:[#allocation6 + $0x10] ss:$2 sm:$0x7f] }
 0x5e8   : >> { %3499 = vst [vmem:[#allocation6 + $0x58] sm:$0x3f] %v3497_v53  ;;  %v3523_v54 = vld [vmem:[#allocation6 + $0x11] ss:$2 sm:$0x7f] }
 0x5e9   : >> { %3510 = vst [vmem:[#allocation6 + $0x60] sm:$0xff] %v3508_v36  ;;  %v3524_v40 = vmax.f32 %v3521_v6, %v3523_v54  ;;  %v3529_v31 = vld [vmem:[#allocation6 + $0x20] ss:$2 sm:$0x7f] }
 0x5ea   : >> { %3511 = vst [vmem:[#allocation6 + $0x68] sm:$0x3f] %v3509_v16  ;;  %v3531_v41 = vld [vmem:[#allocation6 + $0x21] ss:$2 sm:$0x7f] }
 0x5eb   : >> { %6883 = vst [vmem:[%s6129_s30 + $0x11] sm:$0x7f] %v3515_v34  ;;  %v3532_v7 = vmax.f32 %v3529_v31, %v3531_v41  ;;  %v3537_v51 = vld [vmem:[#allocation6 + $0x30] ss:$2 sm:$0x7f] }
 0x5ec   : >> { %6884 = vst [vmem:[%s6129_s30 + $0x21] sm:$0x7f] %v3524_v40  ;;  %v3539_v48 = vld [vmem:[#allocation6 + $0x31] ss:$2 sm:$0x7f] }
 0x5ed   : >> { %6885 = vst [vmem:[%s6129_s30 + $0x31] sm:$0x7f] %v3532_v7  ;;  %v3540_v2 = vmax.f32 %v3537_v51, %v3539_v48  ;;  %v3545_v17 = vld [vmem:[#allocation6 + $0x40] ss:$2 sm:$0x7f] }
 0x5ee   : >> { %v3547_v5 = vld [vmem:[#allocation6 + $0x41] ss:$2 sm:$0x7f] }
 0x5ef   : >> { %6886 = vst [vmem:[%s6129_s30 + $0x41] sm:$0x7f] %v3540_v2  ;;  %v3548_v59 = vmax.f32 %v3545_v17, %v3547_v5  ;;  %v3553_v58 = vld [vmem:[#allocation6 + $0x50] ss:$2 sm:$0x7f] }
 0x5f0   : >> { %v3555_v37 = vld [vmem:[#allocation6 + $0x51] ss:$2 sm:$0x7f] }
 0x5f1   : >> { %6887 = vst [vmem:[%s6129_s30 + $0x51] sm:$0x7f] %v3548_v59  ;;  %v3556_v35 = vmax.f32 %v3553_v58, %v3555_v37  ;;  %v3561_v29 = vld [vmem:[#allocation6 + $0x60] ss:$2 sm:$0x7f]  ;;  %3426 = sbr.rel (!%p3424_p0) target bundleno = 1492 (0x5d4), region = 373 }
 0x5f2   : >> { %v3563_v52 = vld [vmem:[#allocation6 + $0x61] ss:$2 sm:$0x7f] }
 0x5f3   : >> { %6888 = vst [vmem:[%s6129_s30 + $0x61] sm:$0x7f] %v3556_v35  ;;  %v3564_v26 = vmax.f32 %v3561_v29, %v3563_v52 }
 0x5f5   : >> { %6889 = vst [vmem:[%s6129_s30 + $0x71] sm:$0x7f] %v3564_v26 }
 0x5f6 LB: >> { %v6939_v8 = vld [vmem:[%s11288_s5 + $0xf8] sm:$0xff]  ;;  %v6938_v63 = vld [vmem:[%s11288_s5 + $0xf0] sm:$0xff]  ;;  %v6937_v22 = vld [vmem:[%s11288_s5 + $0xe8] sm:$0xff]  ;;  %s11297_s16 = sshll.u32 %s7723_s22, 8  ;;  %s7723_s22 = sphi %s9702_s22, %s3574_s22  }
 0x5f7   : >> { %7479 = vmatpush.msra.mxu1 %v6939_v8  ;;  %7480 = vmatpush.msra.mxu2 %v6939_v8  ;;  %v6936_v25 = vld [vmem:[%s11288_s5 + $0xe0] sm:$0xff]  ;;  %v6935_v62 = vld [vmem:[%s11288_s5 + $0xd8] sm:$0xff]  ;;  %v6934_v38 = vld [vmem:[%s11288_s5 + $0xd0] sm:$0xff]  ;;  %s9758_s30 = scalar_lea.vmem [#allocation4], %s11297_s16  ;;  %s11312_s16 = sshll.u32 %s7723_s22, 8 }
 0x5f8   : >> { %7481 = vmatpush.msra.mxu3 %v6939_v8  ;;  %3676 = vmatpush.msra.mxu0 %v6939_v8  ;;  %v6933_v10 = vld [vmem:[%s11288_s5 + $0xc8] sm:$0xff]  ;;  %v6932_v45 = vld [vmem:[%s11288_s5 + $0xc0] sm:$0xff]  ;;  %v6931_v32 = vld [vmem:[%s11288_s5 + $0xb8] sm:$0xff]  ;;  %s10607_s0 = scalar_lea.vmem [#allocation2], %s11312_s16  ;;  %s3574_s22 = sadd.s32 1, %s7723_s22  }
 0x5f9   : >> { %7482 = vmatpush.msra.mxu1 %v6938_v63  ;;  %7483 = vmatpush.msra.mxu2 %v6938_v63  ;;  %v6930_v14 = vld [vmem:[%s11288_s5 + $0xb0] sm:$0xff]  ;;  %v6929_v33 = vld [vmem:[%s11288_s5 + $0xa8] sm:$0xff]  ;;  %v6928_v23 = vld [vmem:[%s11288_s5 + $0xa0] sm:$0xff]  ;;  %p3571_p1 = scmp.ge.s32.totalorder %s3574_s22, 5  }
 0x5fa   : >> { %7484 = vmatpush.msra.mxu3 %v6938_v63  ;;  %3677 = vmatpush.msra.mxu0 %v6938_v63  ;;  %v6927_v39 = vld [vmem:[%s11288_s5 + $0x98] sm:$0xff]  ;;  %v6926_v4 = vld [vmem:[%s11288_s5 + $0x90] sm:$0xff]  ;;  %v6925_v24 = vld [vmem:[%s11288_s5 + $0x88] sm:$0xff] }
 0x5fb   : >> { %7485 = vmatpush.msra.mxu1 %v6937_v22  ;;  %7486 = vmatpush.msra.mxu2 %v6937_v22  ;;  %v6924_v50 = vld [vmem:[%s11288_s5 + $0x80] sm:$0xff]  ;;  %v6988_v27 = vld [vmem:[%s11288_s5 + $0x178] sm:$0xff]  ;;  %v6987_v11 = vld [vmem:[%s11288_s5 + $0x170] sm:$0xff] }
 0x5fc   : >> { %7487 = vmatpush.msra.mxu3 %v6937_v22  ;;  %3678 = vmatpush.msra.mxu0 %v6937_v22  ;;  %v9761_v13 = vld [vmem:[%s9758_s30 + $0x41] sm:$0xff]  ;;  %v3624_v43 = vld [vmem:[%s11288_s5 + $0x78] sm:$0xff]  ;;  %v3623_v21 = vld [vmem:[%s11288_s5 + $0x70] sm:$0xff] }
 0x5fd   : >> { %7488 = vmatpush.msra.mxu1 %v6936_v25  ;;  %7489 = vmatpush.msra.mxu2 %v6936_v25  ;;  %v9764_v19 = vld [vmem:[%s9758_s30 + $0x81] sm:$0xff]  ;;  %v7037_v57 = vld [vmem:[%s11288_s5 + $0x1f8] sm:$0xff]  ;;  %v7036_v20 = vld [vmem:[%s11288_s5 + $0x1f0] sm:$0xff] }
 0x5fe   : >> { %7490 = vmatpush.msra.mxu3 %v6936_v25  ;;  %3679 = vmatpush.msra.mxu0 %v6936_v25  ;;  %v6916_v18 = vld [vmem:[%s9758_s30 + $0xc1] sm:$0xff]  ;;  %v7086_v28 = vld [vmem:[%s11288_s5 + $0x278] sm:$0xff]  ;;  %v9801_v61 = vld [vmem:[%s9758_s30 + $0x49] sm:$0xff] }
 0x5ff   : >> { %7491 = vmatpush.msra.mxu1 %v6935_v62  ;;  %7492 = vmatpush.msra.mxu2 %v6935_v62  ;;  %v6986_v3 = vld [vmem:[%s11288_s5 + $0x168] sm:$0xff]  ;;  %v6985_v47 = vld [vmem:[%s11288_s5 + $0x160] sm:$0xff]  ;;  %v7085_v15 = vld [vmem:[%s11288_s5 + $0x270] sm:$0xff] }
 0x600   : >> { %7493 = vmatpush.msra.mxu3 %v6935_v62  ;;  %3680 = vmatpush.msra.mxu0 %v6935_v62  ;;  %v6892_v0 = vld [vmem:[%s9758_s30 + $0x1] sm:$0xff]  ;;  %v9804_v60 = vld [vmem:[%s9758_s30 + $0x89] sm:$0xff]  ;;  %v6984_v49 = vld [vmem:[%s11288_s5 + $0x158] sm:$0xff] }
 0x601   : >> { %7494 = vmatpush.msra.mxu1 %v6934_v38  ;;  %7495 = vmatpush.msra.mxu2 %v6934_v38  ;;  %v3622_v42 = vld [vmem:[%s11288_s5 + $0x68] sm:$0xff]  ;;  %v7034_v12 = vld [vmem:[%s11288_s5 + $0x1e0] sm:$0xff]  ;;  %v7033_v55 = vld [vmem:[%s11288_s5 + $0x1d8] sm:$0xff] }
 0x602   : >> { %7496 = vmatpush.msra.mxu3 %v6934_v38  ;;  %3681 = vmatpush.msra.mxu0 %v6934_v38  ;;  %v7035_v56 = vld [vmem:[%s11288_s5 + $0x1e8] sm:$0xff]  ;;  %v3621_v30 = vld [vmem:[%s11288_s5 + $0x60] sm:$0xff]  ;;  %v3620_v36 = vld [vmem:[%s11288_s5 + $0x58] sm:$0xff] }
 0x603   : >> { %7497 = vmatpush.msra.mxu1 %v6933_v10  ;;  %7498 = vmatpush.msra.mxu2 %v6933_v10  ;;  %v6917_v46 = vld [vmem:[%s9758_s30 + $0xc9] sm:$0xff]  ;;  %v7083_v34 = vld [vmem:[%s11288_s5 + $0x260] sm:$0xff]  ;;  %v9847_v54 = vld [vmem:[%s9758_s30 + $0x51] sm:$0xff] }
 0x604   : >> { %7499 = vmatpush.msra.mxu3 %v6933_v10  ;;  %3682 = vmatpush.msra.mxu0 %v6933_v10  ;;  %v7084_v53 = vld [vmem:[%s11288_s5 + $0x268] sm:$0xff]  ;;  %v6983_v1 = vld [vmem:[%s11288_s5 + $0x150] sm:$0xff]  ;;  %v7082_v51 = vld [vmem:[%s11288_s5 + $0x258] sm:$0xff] }
 0x605   : >> { %7500 = vmatpush.msra.mxu1 %v6932_v45  ;;  %7501 = vmatpush.msra.mxu2 %v6932_v45  ;;  %v6893_v16 = vld [vmem:[%s9758_s30 + $0x9] sm:$0xff]  ;;  %v9850_v40 = vld [vmem:[%s9758_s30 + $0x91] sm:$0xff]  ;;  %v6981_v2 = vld [vmem:[%s11288_s5 + $0x140] sm:$0xff] }
 0x606   : >> { %7502 = vmatpush.msra.mxu3 %v6932_v45  ;;  %3683 = vmatpush.msra.mxu0 %v6932_v45  ;;  %v7032_v9 = vld [vmem:[%s11288_s5 + $0x1d0] sm:$0xff]  ;;  %v6982_v31 = vld [vmem:[%s11288_s5 + $0x148] sm:$0xff]  ;;  %v7030_v17 = vld [vmem:[%s11288_s5 + $0x1c0] sm:$0xff] }
 0x607   : >> { %7503 = vmatpush.msra.mxu1 %v6931_v32  ;;  %7504 = vmatpush.msra.mxu2 %v6931_v32  ;;  %v3619_v6 = vld [vmem:[%s11288_s5 + $0x50] sm:$0xff]  ;;  %v7031_v41 = vld [vmem:[%s11288_s5 + $0x1c8] sm:$0xff]  ;;  %v3617_v59 = vld [vmem:[%s11288_s5 + $0x40] sm:$0xff] }
 0x608   : >> { %7505 = vmatpush.msra.mxu3 %v6931_v32  ;;  %3684 = vmatpush.msra.mxu0 %v6931_v32  ;;  %v6918_v7 = vld [vmem:[%s9758_s30 + $0xd1] sm:$0xff]  ;;  %v3618_v48 = vld [vmem:[%s11288_s5 + $0x48] sm:$0xff]  ;;  %v9895_v26 = vld [vmem:[%s9758_s30 + $0x59] sm:$0xff] }
 0x609   : >> { %7506 = vmatpush.msra.mxu1 %v6930_v14  ;;  %7507 = vmatpush.msra.mxu2 %v6930_v14  ;;  %v7081_v5 = vld [vmem:[%s11288_s5 + $0x250] sm:$0xff]  ;;  %v6980_v58 = vld [vmem:[%s11288_s5 + $0x138] sm:$0xff]  ;;  %v7080_v29 = vld [vmem:[%s11288_s5 + $0x248] sm:$0xff] }
 0x60a   : >> { %7508 = vmatpush.msra.mxu3 %v6930_v14  ;;  %3685 = vmatpush.msra.mxu0 %v6930_v14  ;;  %v9883_v37 = vld [vmem:[%s9758_s30 + $0x11] sm:$0xff]  ;;  %v9898_v8 = vld [vmem:[%s9758_s30 + $0x99] sm:$0xff]  ;;  %v6978_v10 = vld [vmem:[%s11288_s5 + $0x128] sm:$0xff] }
 0x60b   : >> { %7509 = vmatpush.msra.mxu1 %v6929_v33  ;;  %7510 = vmatpush.msra.mxu2 %v6929_v33  ;;  %v7029_v35 = vld [vmem:[%s11288_s5 + $0x1b8] sm:$0xff]  ;;  %v6979_v63 = vld [vmem:[%s11288_s5 + $0x130] sm:$0xff]  ;;  %v7079_v62 = vld [vmem:[%s11288_s5 + $0x240] sm:$0xff] }
 0x60c   : >> { %7511 = vmatpush.msra.mxu3 %v6929_v33  ;;  %3686 = vmatpush.msra.mxu0 %v6929_v33  ;;  %v3616_v52 = vld [vmem:[%s11288_s5 + $0x38] sm:$0xff]  ;;  %v7028_v22 = vld [vmem:[%s11288_s5 + $0x1b0] sm:$0xff]  ;;  %v7027_v45 = vld [vmem:[%s11288_s5 + $0x1a8] sm:$0xff] }
 0x60d   : >> { %7512 = vmatpush.msra.mxu1 %v6928_v23  ;;  %7513 = vmatpush.msra.mxu2 %v6928_v23  ;;  %v6919_v25 = vld [vmem:[%s9758_s30 + $0xd9] sm:$0xff]  ;;  %v3615_v38 = vld [vmem:[%s11288_s5 + $0x30] sm:$0xff]  ;;  %v3614_v14 = vld [vmem:[%s11288_s5 + $0x28] sm:$0xff] }
 0x60e   : >> { %7514 = vmatpush.msra.mxu3 %v6928_v23  ;;  %3687 = vmatpush.msra.mxu0 %v6928_v23  ;;  %v7078_v32 = vld [vmem:[%s11288_s5 + $0x238] sm:$0xff]  ;;  %v6977_v33 = vld [vmem:[%s11288_s5 + $0x120] sm:$0xff] }
 0x60f   : >> { %7515 = vmatpush.msra.mxu1 %v6927_v39  ;;  %7516 = vmatpush.msra.mxu2 %v6927_v39  ;;  %v9932_v23 = vld [vmem:[%s9758_s30 + $0x19] sm:$0xff] }
 0x610   : >> { %7517 = vmatpush.msra.mxu3 %v6927_v39  ;;  %3688 = vmatpush.msra.mxu0 %v6927_v39  ;;  %v7026_v39 = vld [vmem:[%s11288_s5 + $0x1a0] sm:$0xff] }
 0x611   : >> { %7518 = vmatpush.msra.mxu1 %v6926_v4  ;;  %7519 = vmatpush.msra.mxu2 %v6926_v4 }
 0x612   : >> { %7520 = vmatpush.msra.mxu3 %v6926_v4  ;;  %3689 = vmatpush.msra.mxu0 %v6926_v4  ;;  %v7077_v4 = vld [vmem:[%s11288_s5 + $0x230] sm:$0xff] }
 0x613   : >> { %7521 = vmatpush.msra.mxu1 %v6925_v24  ;;  %7522 = vmatpush.msra.mxu2 %v6925_v24 }
 0x614   : >> { %7523 = vmatpush.msra.mxu3 %v6925_v24  ;;  %3690 = vmatpush.msra.mxu0 %v6925_v24  ;;  %v3613_v24 = vld [vmem:[%s11288_s5 + $0x20] sm:$0xff] }
 0x615   : >> { %7524 = vmatpush.msra.mxu1 %v6924_v50  ;;  %7525 = vmatpush.msra.mxu2 %v6924_v50 }
 0x616   : >> { %3716 = vmatmul.f32.vlgmr.msra.gmra.mxu1 %v9761_v13  ;;  %3740 = vmatmul.f32.vlgmr.msra.gmra.mxu2 %v9764_v19 }
 0x617   : >> { %3953 = vmatpush.msrb.mxu2 %v6988_v27  ;;  %7526 = vmatpush.msra.mxu3 %v6924_v50  ;;  %v9947_v27 = vld [vmem:[%s9758_s30 + $0xa1] sm:$0xff] }
 0x618   : >> { %3764 = vmatmul.f32.vlgmr.msra.gmra.mxu3 %v6916_v18  ;;  %3789 = vmatpush.msrb.mxu1 %v3624_v43  ;;  %v6976_v18 = vld [vmem:[%s11288_s5 + $0x118] sm:$0xff] }
 0x619   : >> { %4149 = vmatpush.msrb.mxu3 %v7037_v57  ;;  %3954 = vmatpush.msrb.mxu2 %v6987_v11  ;;  %v7025_v43 = vld [vmem:[%s11288_s5 + $0x198] sm:$0xff]  ;;  %v6920_v57 = vld [vmem:[%s9758_s30 + $0xe1] sm:$0xff] }
 0x61a   : >> { %3790 = vmatpush.msrb.mxu1 %v3623_v21  ;;  %3691 = vmatpush.msra.mxu0 %v6924_v50  ;;  %v9944_v50 = vld [vmem:[%s9758_s30 + $0x61] sm:$0xff]  ;;  %v3612_v21 = vld [vmem:[%s11288_s5 + $0x18] sm:$0xff] }
 0x61b   : >> { %4150 = vmatpush.msrb.mxu3 %v7036_v20  ;;  %3955 = vmatpush.msrb.mxu2 %v6986_v3  ;;  %v7076_v11 = vld [vmem:[%s11288_s5 + $0x228] sm:$0xff]  ;;  %v6975_v20 = vld [vmem:[%s11288_s5 + $0x110] sm:$0xff] }
 0x61c   : >> { %3692 = vmatmul.f32.vlgmr.msra.gmra.mxu0 %v6892_v0  ;;  %3791 = vmatpush.msrb.mxu1 %v3622_v42  ;;  %v7024_v3 = vld [vmem:[%s11288_s5 + $0x190] sm:$0xff]  ;;  %v7075_v0 = vld [vmem:[%s11288_s5 + $0x220] sm:$0xff] }
 0x61d   : >> { %4151 = vmatpush.msrb.mxu3 %v7035_v56  ;;  %4345 = vmatpush.msrb.mxu0 %v7086_v28  ;;  %v3611_v42 = vld [vmem:[%s11288_s5 + $0x10] sm:$0xff]  ;;  %v6974_v56 = vld [vmem:[%s11288_s5 + $0x108] sm:$0xff] }
 0x61e   : >> { %3719 = vmatmul.f32.gmra.mxu1 %v9801_v61  ;;  %3743 = vmatmul.f32.gmra.mxu2 %v9804_v60  ;;  %v9981_v28 = vld [vmem:[%s9758_s30 + $0x21] sm:$0xff] }
 0x61f   : >> { %3956 = vmatpush.msrb.mxu2 %v6985_v47  ;;  %4152 = vmatpush.msrb.mxu3 %v7034_v12  ;;  %v7023_v47 = vld [vmem:[%s11288_s5 + $0x188] sm:$0xff]  ;;  %v7074_v12 = vld [vmem:[%s11288_s5 + $0x218] sm:$0xff] }
 0x620   : >> { %3767 = vmatmul.f32.gmra.mxu3 %v6917_v46  ;;  %4346 = vmatpush.msrb.mxu0 %v7085_v15  ;;  %v3610_v46 = vld [vmem:[%s11288_s5 + $0x8] sm:$0xff] }
 0x621   : >> { %3792 = vmatpush.msrb.mxu1 %v3621_v30  ;;  %3957 = vmatpush.msrb.mxu2 %v6984_v49  ;;  %v9993_v15 = vld [vmem:[%s9758_s30 + $0x69] sm:$0xff]  ;;  %v6973_v49 = vld [vmem:[%s11288_s5 + $0x100] sm:$0xff] }
 0x622   : >> { %4153 = vmatpush.msrb.mxu3 %v7033_v55  ;;  %4347 = vmatpush.msrb.mxu0 %v7084_v53  ;;  %v9996_v30 = vld [vmem:[%s9758_s30 + $0xa9] sm:$0xff]  ;;  %v7022_v55 = vld [vmem:[%s11288_s5 + $0x180] sm:$0xff] }
 0x623   : >> { %3793 = vmatpush.msrb.mxu1 %v3620_v36  ;;  %3958 = vmatpush.msrb.mxu2 %v6983_v1  ;;  %v6921_v53 = vld [vmem:[%s9758_s30 + $0xe9] sm:$0xff]  ;;  %v3609_v1 = vld [vmem:[%s11288_s5] sm:$0xff] }
 0x624   : >> { %3695 = vmatmul.f32.gmra.mxu0 %v6893_v16  ;;  %4154 = vmatpush.msrb.mxu3 %v7032_v9  ;;  %v7073_v36 = vld [vmem:[%s11288_s5 + $0x210] sm:$0xff]  ;;  %v7184_v16 = vld [vmem:[%s11288_s5 + $0x378] sm:$0xff]  ;;  %v7072_v9 = vld [vmem:[%s11288_s5 + $0x208] sm:$0xff] }
 0x625   : >> { %4348 = vmatpush.msrb.mxu0 %v7083_v34  ;;  %3794 = vmatpush.msrb.mxu1 %v3619_v6  ;;  %v7233_v34 = vld [vmem:[%s11288_s5 + $0x3f8] sm:$0xff] }
 0x626   : >> { %3722 = vmatmul.f32.gmra.mxu1 %v9847_v54  ;;  %3746 = vmatmul.f32.gmra.mxu2 %v9850_v40  ;;  %v7135_v6 = vld [vmem:[%s11288_s5 + $0x2f8] sm:$0xff] }
 0x627   : >> { %3959 = vmatpush.msrb.mxu2 %v6982_v31  ;;  %4155 = vmatpush.msrb.mxu3 %v7031_v41  ;;  %v10027_v31 = vld [vmem:[%s9758_s30 + $0x29] sm:$0xff]  ;;  %v7071_v41 = vld [vmem:[%s11288_s5 + $0x200] sm:$0xff] }
 0x628   : >> { %3770 = vmatmul.f32.gmra.mxu3 %v6918_v7  ;;  %4349 = vmatpush.msrb.mxu0 %v7082_v51  ;;  %v10033_v7 = vld [vmem:[%s9758_s30 + $0x71] sm:$0xff] }
 0x629   : >> { %3795 = vmatpush.msrb.mxu1 %v3618_v48  ;;  %3960 = vmatpush.msrb.mxu2 %v6981_v2  ;;  %v10036_v51 = vld [vmem:[%s9758_s30 + $0xb1] sm:$0xff] }
 0x62a   : >> { %4156 = vmatpush.msrb.mxu3 %v7030_v17  ;;  %4350 = vmatpush.msrb.mxu0 %v7081_v5  ;;  %v7282_v48 = vld [vmem:[%s11288_s5 + $0x478] sm:$0xff]  ;;  %v7183_v17 = vld [vmem:[%s11288_s5 + $0x370] sm:$0xff] }
 0x62b   : >> { %3796 = vmatpush.msrb.mxu1 %v3617_v59  ;;  %3961 = vmatpush.msrb.mxu2 %v6980_v58  ;;  %v6922_v2 = vld [vmem:[%s9758_s30 + $0xf1] sm:$0xff] }
 0x62c   : >> { %3698 = vmatmul.f32.gmra.mxu0 %v9883_v37  ;;  %4157 = vmatpush.msrb.mxu3 %v7029_v35  ;;  %v7232_v5 = vld [vmem:[%s11288_s5 + $0x3f0] sm:$0xff]  ;;  %v10058_v35 = vld [vmem:[%s9758_s30 + $0x79] sm:$0xff] }
 0x62d   : >> { %4351 = vmatpush.msrb.mxu0 %v7080_v29  ;;  %3797 = vmatpush.msrb.mxu1 %v3616_v52  ;;  %v7134_v59 = vld [vmem:[%s11288_s5 + $0x2f0] sm:$0xff]  ;;  %v10061_v29 = vld [vmem:[%s9758_s30 + $0xb9] sm:$0xff] }
 0x62e   : >> { %3725 = vmatmul.f32.gmra.mxu1 %v9895_v26  ;;  %3749 = vmatmul.f32.gmra.mxu2 %v9898_v8  ;;  %v10055_v58 = vld [vmem:[%s9758_s30 + $0x31] sm:$0xff]  ;;  %v6923_v52 = vld [vmem:[%s9758_s30 + $0xf9] sm:$0xff] }
 0x62f   : >> { %3962 = vmatpush.msrb.mxu2 %v6979_v63  ;;  %4158 = vmatpush.msrb.mxu3 %v7028_v22  ;;  %v7281_v63 = vld [vmem:[%s11288_s5 + $0x470] sm:$0xff]  ;;  %v10071_v22 = vld [vmem:[%s9758_s30 + $0x39] sm:$0xff] }
 0x630   : >> { %3773 = vmatmul.f32.gmra.mxu3 %v6919_v25  ;;  %4352 = vmatpush.msrb.mxu0 %v7079_v62  ;;  %v3577_v25 = vld [vmem:[%s9758_s30] sm:$0xff] }
 0x631   : >> { %3798 = vmatpush.msrb.mxu1 %v3615_v38  ;;  %3963 = vmatpush.msrb.mxu2 %v6978_v10  ;;  %v6941_v62 = vld [vmem:[%s9758_s30 + $0x2] sm:$0xff]  ;;  %v6990_v38 = vld [vmem:[%s9758_s30 + $0x10] sm:$0xff] }
 0x632   : >> { %4159 = vmatpush.msrb.mxu3 %v7027_v45  ;;  %4353 = vmatpush.msrb.mxu0 %v7078_v32  ;;  %v7182_v10 = vld [vmem:[%s11288_s5 + $0x368] sm:$0xff] }
 0x633   : >> { %3799 = vmatpush.msrb.mxu1 %v3614_v14  ;;  %3964 = vmatpush.msrb.mxu2 %v6977_v33  ;;  %v7231_v45 = vld [vmem:[%s11288_s5 + $0x3e8] sm:$0xff] }
 0x634   : >> { %3701 = vmatmul.f32.gmra.mxu0 %v9932_v23  ;;  %4160 = vmatpush.msrb.mxu3 %v7026_v39  ;;  %v7133_v32 = vld [vmem:[%s11288_s5 + $0x2e8] sm:$0xff]  ;;  %v6991_v39 = vld [vmem:[%s9758_s30 + $0x18] sm:$0xff] }
 0x635   : >> { %4354 = vmatpush.msrb.mxu0 %v7077_v4  ;;  %3800 = vmatpush.msrb.mxu1 %v3613_v24  ;;  %v3578_v14 = vld [vmem:[%s9758_s30 + $0x8] sm:$0xff]  ;;  %v6943_v24 = vld [vmem:[%s9758_s30 + $0x12] sm:$0xff] }
 0x636   : >> { %3728 = vmatmul.f32.gmra.mxu1 %v9944_v50  ;;  %3752 = vmatmul.f32.gmra.mxu2 %v9947_v27  ;;  %v6942_v33 = vld [vmem:[%s9758_s30 + $0xa] sm:$0xff] }
 0x637   : >> { %3965 = vmatpush.msrb.mxu2 %v6976_v18  ;;  %4161 = vmatpush.msrb.mxu3 %v7025_v43  ;;  %v7280_v4 = vld [vmem:[%s11288_s5 + $0x468] sm:$0xff]  ;;  %v6992_v18 = vld [vmem:[%s9758_s30 + $0x20] sm:$0xff] }
 0x638   : >> { %3776 = vmatmul.f32.gmra.mxu3 %v6920_v57  ;;  %4355 = vmatpush.msrb.mxu0 %v7076_v11  ;;  %v7230_v43 = vld [vmem:[%s11288_s5 + $0x3e0] sm:$0xff]  ;;  %v6993_v11 = vld [vmem:[%s9758_s30 + $0x28] sm:$0xff] }
 0x639   : >> { %3801 = vmatpush.msrb.mxu1 %v3612_v21  ;;  %3966 = vmatpush.msrb.mxu2 %v6975_v20  ;;  %v7132_v57 = vld [vmem:[%s11288_s5 + $0x2e0] sm:$0xff] }
 0x63a   : >> { %4162 = vmatpush.msrb.mxu3 %v7024_v3  ;;  %4356 = vmatpush.msrb.mxu0 %v7075_v0  ;;  %v7279_v21 = vld [vmem:[%s11288_s5 + $0x460] sm:$0xff]  ;;  %v6994_v3 = vld [vmem:[%s9758_s30 + $0x30] sm:$0xff]  ;;  %v7180_v0 = vld [vmem:[%s11288_s5 + $0x358] sm:$0xff] }
 0x63b   : >> { %3802 = vmatpush.msrb.mxu1 %v3611_v42  ;;  %3967 = vmatpush.msrb.mxu2 %v6974_v56  ;;  %v6945_v20 = vld [vmem:[%s9758_s30 + $0x22] sm:$0xff]  ;;  %v7229_v42 = vld [vmem:[%s11288_s5 + $0x3d8] sm:$0xff] }
 0x63c   : >> { %3704 = vmatmul.f32.gmra.mxu0 %v9981_v28  ;;  %4163 = vmatpush.msrb.mxu3 %v7023_v47  ;;  %v7131_v56 = vld [vmem:[%s11288_s5 + $0x2d8] sm:$0xff] }
 0x63d   : >> { %4357 = vmatpush.msrb.mxu0 %v7074_v12  ;;  %3803 = vmatpush.msrb.mxu1 %v3610_v46  ;;  %v6995_v47 = vld [vmem:[%s9758_s30 + $0x38] sm:$0xff] }
 0x63e   : >> { %3731 = vmatmul.f32.gmra.mxu1 %v9993_v15  ;;  %3755 = vmatmul.f32.gmra.mxu2 %v9996_v30  ;;  %v7278_v12 = vld [vmem:[%s11288_s5 + $0x458] sm:$0xff] }
 0x63f   : >> { %3968 = vmatpush.msrb.mxu2 %v6973_v49  ;;  %4164 = vmatpush.msrb.mxu3 %v7022_v55  ;;  %v6947_v46 = vld [vmem:[%s9758_s30 + $0x32] sm:$0xff]  ;;  %v6996_v49 = vld [vmem:[%s9758_s30 + $0x40] sm:$0xff] }
 0x640   : >> { %3779 = vmatmul.f32.gmra.mxu3 %v6921_v53  ;;  %4358 = vmatpush.msrb.mxu0 %v7073_v36  ;;  %v7179_v55 = vld [vmem:[%s11288_s5 + $0x350] sm:$0xff] }
 0x641   : >> { %3804 = vmatpush.msrb.mxu1 %v3609_v1  ;;  %4737 = vmatpush.msra.mxu2 %v7184_v16  ;;  %v7228_v53 = vld [vmem:[%s11288_s5 + $0x3d0] sm:$0xff]  ;;  %v6948_v1 = vld [vmem:[%s9758_s30 + $0x3a] sm:$0xff]  ;;  %v6997_v16 = vld [vmem:[%s9758_s30 + $0x48] sm:$0xff] }
 0x642   : >> { %4359 = vmatpush.msrb.mxu0 %v7072_v9  ;;  %4933 = vmatpush.msra.mxu3 %v7233_v34  ;;  %v7130_v36 = vld [vmem:[%s11288_s5 + $0x2d0] sm:$0xff] }
 0x643   : >> { %4541 = vmatpush.msra.mxu1 %v7135_v6  ;;  %4738 = vmatpush.msra.mxu2 %v7183_v17  ;;  %v7277_v9 = vld [vmem:[%s11288_s5 + $0x450] sm:$0xff]  ;;  %v6949_v6 = vld [vmem:[%s9758_s30 + $0x42] sm:$0xff] }
 0x644   : >> { %3707 = vmatmul.f32.gmra.mxu0 %v10027_v31  ;;  %4934 = vmatpush.msra.mxu3 %v7232_v5 }
 0x645   : >> { %4360 = vmatpush.msrb.mxu0 %v7071_v41  ;;  %4542 = vmatpush.msra.mxu1 %v7134_v59  ;;  %v7227_v41 = vld [vmem:[%s11288_s5 + $0x3c8] sm:$0xff] }
 0x646   : >> { %3734 = vmatmul.f32.gmra.mxu1 %v10033_v7  ;;  %3758 = vmatmul.f32.gmra.mxu2 %v10036_v51  ;;  %v6950_v59 = vld [vmem:[%s9758_s30 + $0x4a] sm:$0xff] }
 0x647   : >> { %5129 = vmatpush.msra.mxu0 %v7282_v48  ;;  %4739 = vmatpush.msra.mxu2 %v7182_v10  ;;  %v7177_v10 = vld [vmem:[%s11288_s5 + $0x340] sm:$0xff] }
 0x648   : >> { %3782 = vmatmul.f32.gmra.mxu3 %v6922_v2  ;;  %4543 = vmatpush.msra.mxu1 %v7133_v32 }
 0x649   : >> { %5130 = vmatpush.msra.mxu0 %v7281_v63  ;;  %4935 = vmatpush.msra.mxu3 %v7231_v45  ;;  %v7226_v45 = vld [vmem:[%s11288_s5 + $0x3c0] sm:$0xff] }
 0x64a   : >> { %4544 = vmatpush.msra.mxu1 %v7132_v57 }
 0x64b   : >> { %5131 = vmatpush.msra.mxu0 %v7280_v4  ;;  %4936 = vmatpush.msra.mxu3 %v7230_v43  ;;  %v6952_v4 = vld [vmem:[%s9758_s30 + $0x5a] sm:$0xff] }
 0x64c   : >> { %3710 = vmatmul.f32.gmra.mxu0 %v10055_v58  ;;  %4545 = vmatpush.msra.mxu1 %v7131_v56 }
 0x64d   : >> { %5132 = vmatpush.msra.mxu0 %v7279_v21  ;;  %4937 = vmatpush.msra.mxu3 %v7229_v42  ;;  %v7176_v21 = vld [vmem:[%s11288_s5 + $0x338] sm:$0xff] }
 0x64e   : >> { %3737 = vmatmul.f32.gmra.mxu1 %v10058_v35  ;;  %3761 = vmatmul.f32.gmra.mxu2 %v10061_v29 }
 0x64f   : >> { %5133 = vmatpush.msra.mxu0 %v7278_v12  ;;  %4938 = vmatpush.msra.mxu3 %v7228_v53  ;;  %v7274_v12 = vld [vmem:[%s11288_s5 + $0x438] sm:$0xff] }
 0x650   : >> { %3785 = vmatmul.f32.gmra.mxu3 %v6923_v52  ;;  %4546 = vmatpush.msra.mxu1 %v7130_v36  ;;  %v7276_v52 = vld [vmem:[%s11288_s5 + $0x448] sm:$0xff]  ;;  %v6955_v36 = vld [vmem:[%s9758_s30 + $0x72] sm:$0xff] }
 0x651   : >> { %5134 = vmatpush.msra.mxu0 %v7277_v9  ;;  %4939 = vmatpush.msra.mxu3 %v7227_v41  ;;  %v6956_v41 = vld [vmem:[%s9758_s30 + $0x7a] sm:$0xff] }
 0x653   : >> { %5135 = vmatpush.msra.mxu0 %v7276_v52  ;;  %4940 = vmatpush.msra.mxu3 %v7226_v45  ;;  %v7174_v45 = vld [vmem:[%s11288_s5 + $0x328] sm:$0xff] }
 0x654   : >> { %3713 = vmatmul.f32.gmra.mxu0 %v10071_v22 }
 0x656   : >> { %3805 = vmatmul.f32.vlgmr.msrb.gmra.mxu1 %v3577_v25  ;;  %3969 = vmatmul.f32.vlgmr.msrb.gmra.mxu2 %v6941_v62 }
 0x658   : >> { %4165 = vmatmul.f32.vlgmr.msrb.gmra.mxu3 %v6990_v38 }
 0x65c   : >> { %4361 = vmatmul.f32.vlgmr.msrb.gmra.mxu0 %v9883_v37  ;;  %v7181_v37 = vld [vmem:[%s11288_s5 + $0x360] sm:$0xff] }
 0x65d   : >> { %4740 = vmatpush.msra.mxu2 %v7181_v37 }
 0x65e   : >> { %3808 = vmatmul.f32.gmra.mxu1 %v3578_v14  ;;  %3972 = vmatmul.f32.gmra.mxu2 %v6942_v33 }
 0x65f   : >> { %4741 = vmatpush.msra.mxu2 %v7180_v0 }
 0x660   : >> { %4168 = vmatmul.f32.gmra.mxu3 %v6991_v39 }
 0x661   : >> { %4742 = vmatpush.msra.mxu2 %v7179_v55 }
 0x664   : >> { %4364 = vmatmul.f32.gmra.mxu0 %v9932_v23  ;;  %v6944_v23 = vld [vmem:[%s9758_s30 + $0x1a] sm:$0xff] }
 0x666   : >> { %3811 = vmatmul.f32.gmra.mxu1 %v6990_v38  ;;  %3975 = vmatmul.f32.gmra.mxu2 %v6943_v24  ;;  %v6951_v38 = vld [vmem:[%s9758_s30 + $0x52] sm:$0xff]  ;;  %v7001_v24 = vld [vmem:[%s9758_s30 + $0x68] sm:$0xff] }
 0x668   : >> { %4171 = vmatmul.f32.gmra.mxu3 %v6992_v18 }
 0x66c   : >> { %4367 = vmatmul.f32.gmra.mxu0 %v9981_v28  ;;  %v6946_v28 = vld [vmem:[%s9758_s30 + $0x2a] sm:$0xff] }
 0x66e   : >> { %3814 = vmatmul.f32.gmra.mxu1 %v6991_v39  ;;  %3978 = vmatmul.f32.gmra.mxu2 %v6944_v23 }
 0x670   : >> { %4174 = vmatmul.f32.gmra.mxu3 %v6993_v11 }
 0x674   : >> { %4370 = vmatmul.f32.gmra.mxu0 %v10027_v31  ;;  %v6998_v31 = vld [vmem:[%s9758_s30 + $0x50] sm:$0xff] }
 0x676   : >> { %3817 = vmatmul.f32.gmra.mxu1 %v6992_v18  ;;  %3981 = vmatmul.f32.gmra.mxu2 %v6945_v20  ;;  %v7275_v18 = vld [vmem:[%s11288_s5 + $0x440] sm:$0xff]  ;;  %v7225_v20 = vld [vmem:[%s11288_s5 + $0x3b8] sm:$0xff] }
 0x677   : >> { %5136 = vmatpush.msra.mxu0 %v7275_v18  ;;  %4941 = vmatpush.msra.mxu3 %v7225_v20  ;;  %v6958_v20 = vld [vmem:[%s9758_s30 + $0x8a] sm:$0xff] }
 0x678   : >> { %4177 = vmatmul.f32.gmra.mxu3 %v6994_v3 }
 0x679   : >> { %5137 = vmatpush.msra.mxu0 %v7274_v12  ;;  %v7272_v12 = vld [vmem:[%s11288_s5 + $0x428] sm:$0xff] }
 0x67c   : >> { %4373 = vmatmul.f32.gmra.mxu0 %v10055_v58  ;;  %v6999_v58 = vld [vmem:[%s9758_s30 + $0x58] sm:$0xff] }
 0x67e   : >> { %3820 = vmatmul.f32.gmra.mxu1 %v6993_v11  ;;  %3984 = vmatmul.f32.gmra.mxu2 %v6946_v28  ;;  %v6953_v11 = vld [vmem:[%s9758_s30 + $0x62] sm:$0xff]  ;;  %v6954_v28 = vld [vmem:[%s9758_s30 + $0x6a] sm:$0xff] }
 0x680   : >> { %4180 = vmatmul.f32.gmra.mxu3 %v6995_v47 }
 0x684   : >> { %4376 = vmatmul.f32.gmra.mxu0 %v10071_v22 }
 0x686   : >> { %3823 = vmatmul.f32.gmra.mxu1 %v6994_v3  ;;  %3987 = vmatmul.f32.gmra.mxu2 %v6947_v46 }
 0x688   : >> { %4183 = vmatmul.f32.gmra.mxu3 %v6996_v49 }
 0x68c   : >> { %4379 = vmatmul.f32.gmra.mxu0 %v9761_v13  ;;  %v7178_v13 = vld [vmem:[%s11288_s5 + $0x348] sm:$0xff] }
 0x68d   : >> { %4743 = vmatpush.msra.mxu2 %v7178_v13 }
 0x68e   : >> { %3826 = vmatmul.f32.gmra.mxu1 %v6995_v47  ;;  %3990 = vmatmul.f32.gmra.mxu2 %v6948_v1  ;;  %v7003_v47 = vld [vmem:[%s9758_s30 + $0x78] sm:$0xff]  ;;  %v7175_v1 = vld [vmem:[%s11288_s5 + $0x330] sm:$0xff] }
 0x68f   : >> { %4744 = vmatpush.msra.mxu2 %v7177_v10  ;;  %v6957_v10 = vld [vmem:[%s9758_s30 + $0x82] sm:$0xff] }
 0x690   : >> { %4186 = vmatmul.f32.gmra.mxu3 %v6997_v16 }
 0x691   : >> { %4745 = vmatpush.msra.mxu2 %v7176_v21 }
 0x693   : >> { %v10147_v34 = vpop.f32.mrf.mxu1  ;;  %4746 = vmatpush.msra.mxu2 %v7175_v1 }
 0x694   : >> { %4382 = vmatmul.f32.gmra.mxu0 %v9801_v61  ;;  %v7129_v61 = vld [vmem:[%s11288_s5 + $0x2c8] sm:$0xff] }
 0x695   : >> { %4547 = vmatpush.msra.mxu1 %v7129_v61  ;;  %v7005_v61 = vld [vmem:[%s9758_s30 + $0x88] sm:$0xff]  ;;  %4747 = vmatpush.msra.mxu2 %v7174_v45 }
 0x696   : >> { %3829 = vmatmul.f32.gmra.mxu1 %v6996_v49  ;;  %3993 = vmatmul.f32.gmra.mxu2 %v6949_v6 }
 0x698   : >> { %4189 = vmatmul.f32.gmra.mxu3 %v6998_v31 }
 0x699   : >> { %v10158_v48 = vpop.f32.mrf.mxu2  ;;  %v10160_v2 = vpop.f32.mrf.mxu0 }
 0x69b   : >> { %v10165_v17 = vpop.f32.mrf.mxu1  ;;  %v10167_v5 = vpop.f32.mrf.mxu3 }
 0x69c   : >> { %4385 = vmatmul.f32.gmra.mxu0 %v9847_v54  ;;  %v7000_v54 = vld [vmem:[%s9758_s30 + $0x60] sm:$0xff] }
 0x69e   : >> { %3832 = vmatmul.f32.gmra.mxu1 %v6997_v16  ;;  %3996 = vmatmul.f32.gmra.mxu2 %v6950_v59  ;;  %v7224_v16 = vld [vmem:[%s11288_s5 + $0x3b0] sm:$0xff] }
 0x69f   : >> { %4942 = vmatpush.msra.mxu3 %v7224_v16  ;;  %v7273_v59 = vld [vmem:[%s11288_s5 + $0x430] sm:$0xff] }
 0x6a0   : >> { %4192 = vmatmul.f32.gmra.mxu3 %v6999_v58  ;;  %5138 = vmatpush.msra.mxu0 %v7273_v59  ;;  %v7008_v59 = vld [vmem:[%s9758_s30 + $0xa0] sm:$0xff] }
 0x6a1   : >> { %v10175_v63 = vpop.f32.mrf.mxu2  ;;  %v10177_v22 = vpop.f32.mrf.mxu0 }
 0x6a2   : >> { %5139 = vmatpush.msra.mxu0 %v7272_v12 }
 0x6a3   : >> { %v10179_v25 = vpop.f32.mrf.mxu1  ;;  %v10181_v62 = vpop.f32.mrf.mxu3 }
 0x6a4   : >> { %4388 = vmatmul.f32.gmra.mxu0 %v9895_v26  ;;  %v7128_v26 = vld [vmem:[%s11288_s5 + $0x2c0] sm:$0xff] }
 0x6a5   : >> { %4548 = vmatpush.msra.mxu1 %v7128_v26 }
 0x6a6   : >> { %3835 = vmatmul.f32.gmra.mxu1 %v6998_v31  ;;  %3999 = vmatmul.f32.gmra.mxu2 %v6951_v38 }
 0x6a8   : >> { %4195 = vmatmul.f32.gmra.mxu3 %v7000_v54 }
 0x6a9   : >> { %v10192_v32 = vpop.f32.mrf.mxu2  ;;  %v10194_v14 = vpop.f32.mrf.mxu0 }
 0x6ab   : >> { %v10199_v33 = vpop.f32.mrf.mxu1  ;;  %v10201_v39 = vpop.f32.mrf.mxu3 }
 0x6ac   : >> { %4391 = vmatmul.f32.gmra.mxu0 %v9944_v50  ;;  %v7002_v50 = vld [vmem:[%s9758_s30 + $0x70] sm:$0xff] }
 0x6ae   : >> { %3838 = vmatmul.f32.gmra.mxu1 %v6999_v58  ;;  %4002 = vmatmul.f32.gmra.mxu2 %v6952_v4  ;;  %v7223_v4 = vld [vmem:[%s11288_s5 + $0x3a8] sm:$0xff] }
 0x6af   : >> { %4943 = vmatpush.msra.mxu3 %v7223_v4 }
 0x6b0   : >> { %4198 = vmatmul.f32.gmra.mxu3 %v7001_v24 }
 0x6b1   : >> { %v10209_v37 = vpop.f32.mrf.mxu2  ;;  %v10211_v43 = vpop.f32.mrf.mxu0 }
 0x6b3   : >> { %v10213_v57 = vpop.f32.mrf.mxu1  ;;  %v10215_v23 = vpop.f32.mrf.mxu3 }
 0x6b4   : >> { %4394 = vmatmul.f32.gmra.mxu0 %v9993_v15  ;;  %v7127_v15 = vld [vmem:[%s11288_s5 + $0x2b8] sm:$0xff] }
 0x6b5   : >> { %4549 = vmatpush.msra.mxu1 %v7127_v15 }
 0x6b6   : >> { %3841 = vmatmul.f32.gmra.mxu1 %v7000_v54  ;;  %4005 = vmatmul.f32.gmra.mxu2 %v6953_v11  ;;  %v7125_v11 = vld [vmem:[%s11288_s5 + $0x2a8] sm:$0xff] }
 0x6b8   : >> { %4201 = vmatmul.f32.gmra.mxu3 %v7002_v50 }
 0x6b9   : >> { %v10226_v3 = vpop.f32.mrf.mxu2  ;;  %v10228_v0 = vpop.f32.mrf.mxu0 }
 0x6bb   : >> { %v10233_v42 = vpop.f32.mrf.mxu1  ;;  %v10235_v56 = vpop.f32.mrf.mxu3 }
 0x6bc   : >> { %4397 = vmatmul.f32.gmra.mxu0 %v10033_v7  ;;  %v7004_v7 = vld [vmem:[%s9758_s30 + $0x80] sm:$0xff] }
 0x6be   : >> { %3844 = vmatmul.f32.gmra.mxu1 %v7001_v24  ;;  %4008 = vmatmul.f32.gmra.mxu2 %v6954_v28 }
 0x6c0   : >> { %4204 = vmatmul.f32.gmra.mxu3 %v7003_v47 }
 0x6c1   : >> { %v10243_v46 = vpop.f32.mrf.mxu2  ;;  %v10245_v49 = vpop.f32.mrf.mxu0 }
 0x6c3   : >> { %v10247_v55 = vpop.f32.mrf.mxu1  ;;  %v10249_v53 = vpop.f32.mrf.mxu3 }
 0x6c4   : >> { %4400 = vmatmul.f32.gmra.mxu0 %v10058_v35  ;;  %v7126_v35 = vld [vmem:[%s11288_s5 + $0x2b0] sm:$0xff] }
 0x6c5   : >> { %4550 = vmatpush.msra.mxu1 %v7126_v35 }
 0x6c6   : >> { %3847 = vmatmul.f32.gmra.mxu1 %v7002_v50  ;;  %4011 = vmatmul.f32.gmra.mxu2 %v6955_v36 }
 0x6c7   : >> { %4551 = vmatpush.msra.mxu1 %v7125_v11 }
 0x6c8   : >> { %4207 = vmatmul.f32.gmra.mxu3 %v7004_v7 }
 0x6c9   : >> { %v10260_v9 = vpop.f32.mrf.mxu2  ;;  %v10262_v6 = vpop.f32.mrf.mxu0 }
 0x6cb   : >> { %v10267_v31 = vpop.f32.mrf.mxu1  ;;  %v10269_v13 = vpop.f32.mrf.mxu3 }
 0x6cc   : >> { %4403 = vmatmul.f32.gmra.mxu0 %v9764_v19  ;;  %v7006_v19 = vld [vmem:[%s9758_s30 + $0x90] sm:$0xff] }
 0x6ce   : >> { %3850 = vmatmul.f32.gmra.mxu1 %v7003_v47  ;;  %4014 = vmatmul.f32.gmra.mxu2 %v6956_v41 }
 0x6d0   : >> { %4210 = vmatmul.f32.gmra.mxu3 %v7005_v61 }
 0x6d1   : >> { %v10277_v58 = vpop.f32.mrf.mxu2  ;;  %v10279_v52 = vpop.f32.mrf.mxu0 }
 0x6d3   : >> { %v10281_v38 = vpop.f32.mrf.mxu3  ;;  %v3806_v54 = vpop.f32.mrf.mxu1 }
 0x6d4   : >> { %4406 = vmatmul.f32.gmra.mxu0 %v9804_v60  ;;  %v3807_v26 = vadd.f32 %v3806_v54, %v10160_v2  ;;  %v7007_v2 = vld [vmem:[%s9758_s30 + $0x98] sm:$0xff] }
 0x6d6   : >> { %3853 = vmatmul.f32.gmra.mxu1 %v7004_v7  ;;  %4017 = vmatmul.f32.gmra.mxu2 %v6957_v10  ;;  %v7222_v10 = vld [vmem:[%s11288_s5 + $0x3a0] sm:$0xff] }
 0x6d7   : >> { %4944 = vmatpush.msra.mxu3 %v7222_v10  ;;  %v6962_v10 = vld [vmem:[%s9758_s30 + $0xaa] sm:$0xff] }
 0x6d8   : >> { %4213 = vmatmul.f32.gmra.mxu3 %v7006_v19 }
 0x6d9   : >> { %v3970_v24 = vpop.f32.mrf.mxu2  ;;  %v4362_v18 = vpop.f32.mrf.mxu0 }
 0x6da   : >> { %v4066_v60 = vadd.f32 %v3970_v24, %v3807_v26 }
 0x6db   : >> { %v3809_v50 = vpop.f32.mrf.mxu1  ;;  %v4166_v21 = vpop.f32.mrf.mxu3 }
 0x6dc   : >> { %v4262_v15 = vadd.f32 %v4166_v21, %v4066_v60  ;;  %4409 = vmatmul.f32.gmra.mxu0 %v9850_v40  ;;  %v3810_v47 = vadd.f32 %v3809_v50, %v10177_v22  ;;  %v6959_v40 = vld [vmem:[%s9758_s30 + $0x92] sm:$0xff]  ;;  %v7173_v22 = vld [vmem:[%s11288_s5 + $0x320] sm:$0xff] }
 0x6dd   : >> { %4748 = vmatpush.msra.mxu2 %v7173_v22  ;;  %v7271_v21 = vld [vmem:[%s11288_s5 + $0x420] sm:$0xff] }
 0x6de   : >> { %v10299_v28 = vadd.f32 %v4362_v18, %v4262_v15  ;;  %3856 = vmatmul.f32.gmra.mxu1 %v7005_v61  ;;  %4020 = vmatmul.f32.gmra.mxu2 %v6958_v20  ;;  %v6960_v18 = vld [vmem:[%s9758_s30 + $0x9a] sm:$0xff] }
 0x6df   : >> { %5140 = vmatpush.msra.mxu0 %v7271_v21 }
 0x6e0   : >> { %4216 = vmatmul.f32.gmra.mxu3 %v7007_v2 }
 0x6e1   : >> { %v3973_v36 = vpop.f32.mrf.mxu2  ;;  %v4365_v7 = vpop.f32.mrf.mxu0 }
 0x6e2   : >> { %v4067_v1 = vadd.f32 %v3973_v36, %v3810_v47 }
 0x6e3   : >> { %v3812_v16 = vpop.f32.mrf.mxu1  ;;  %v4169_v35 = vpop.f32.mrf.mxu3 }
 0x6e4   : >> { %v4263_v41 = vadd.f32 %v4169_v35, %v4067_v1  ;;  %4412 = vmatmul.f32.gmra.mxu0 %v9898_v8  ;;  %v3813_v54 = vadd.f32 %v3812_v16, %v10194_v14  ;;  %v7009_v14 = vld [vmem:[%s9758_s30 + $0xa8] sm:$0xff]  ;;  %v7010_v1 = vld [vmem:[%s9758_s30 + $0xb0] sm:$0xff]  ;;  %v7221_v35 = vld [vmem:[%s11288_s5 + $0x398] sm:$0xff] }
 0x6e5   : >> { %4945 = vmatpush.msra.mxu3 %v7221_v35  ;;  %v7013_v35 = vld [vmem:[%s9758_s30 + $0xc8] sm:$0xff] }
 0x6e6   : >> { %v10308_v61 = vadd.f32 %v4365_v7, %v4263_v41  ;;  %3859 = vmatmul.f32.gmra.mxu1 %v7006_v19  ;;  %4023 = vmatmul.f32.gmra.mxu2 %v6959_v40  ;;  %v7124_v19 = vld [vmem:[%s11288_s5 + $0x2a0] sm:$0xff] }
 0x6e7   : >> { %4552 = vmatpush.msra.mxu1 %v7124_v19  ;;  %v7270_v19 = vld [vmem:[%s11288_s5 + $0x418] sm:$0xff] }
 0x6e8   : >> { %4219 = vmatmul.f32.gmra.mxu3 %v7008_v59  ;;  %5141 = vmatpush.msra.mxu0 %v7270_v19  ;;  %v6965_v19 = vld [vmem:[%s9758_s30 + $0xc2] sm:$0xff] }
 0x6e9   : >> { %v3976_v8 = vpop.f32.mrf.mxu2  ;;  %v4368_v45 = vpop.f32.mrf.mxu0 }
 0x6ea   : >> { %v4068_v26 = vadd.f32 %v3976_v8, %v3813_v54 }
 0x6eb   : >> { %v3815_v4 = vpop.f32.mrf.mxu1  ;;  %v4172_v24 = vpop.f32.mrf.mxu3 }
 0x6ec   : >> { %v4264_v60 = vadd.f32 %v4172_v24, %v4068_v26  ;;  %4415 = vmatmul.f32.gmra.mxu0 %v9947_v27  ;;  %v3816_v50 = vadd.f32 %v3815_v4, %v10211_v43  ;;  %v6961_v27 = vld [vmem:[%s9758_s30 + $0xa2] sm:$0xff]  ;;  %v7172_v43 = vld [vmem:[%s11288_s5 + $0x318] sm:$0xff] }
 0x6ed   : >> { %4749 = vmatpush.msra.mxu2 %v7172_v43 }
 0x6ee   : >> { %v10323_v11 = vadd.f32 %v4368_v45, %v4264_v60  ;;  %3862 = vmatmul.f32.gmra.mxu1 %v7007_v2  ;;  %4026 = vmatmul.f32.gmra.mxu2 %v6960_v18 }
 0x6f0   : >> { %4222 = vmatmul.f32.gmra.mxu3 %v7009_v14 }
 0x6f1   : >> { %v3979_v20 = vpop.f32.mrf.mxu2  ;;  %v4371_v15 = vpop.f32.mrf.mxu0 }
 0x6f2   : >> { %v4069_v47 = vadd.f32 %v3979_v20, %v3816_v50  ;;  %v6963_v50 = vld [vmem:[%s9758_s30 + $0xb2] sm:$0xff] }
 0x6f3   : >> { %v3818_v12 = vpop.f32.mrf.mxu1  ;;  %v4175_v36 = vpop.f32.mrf.mxu3 }
 0x6f4   : >> { %v4265_v7 = vadd.f32 %v4175_v36, %v4069_v47  ;;  %4418 = vmatmul.f32.gmra.mxu0 %v9996_v30  ;;  %v3819_v16 = vadd.f32 %v3818_v12, %v10228_v0  ;;  %v7011_v0 = vld [vmem:[%s9758_s30 + $0xb8] sm:$0xff]  ;;  %v7220_v47 = vld [vmem:[%s11288_s5 + $0x390] sm:$0xff]  ;;  %v10366_v36 = vld [vmem:[%s9758_s30 + $0xc1] sm:$0xff] }
 0x6f5   : >> { %4946 = vmatpush.msra.mxu3 %v7220_v47 }
 0x6f6   : >> { %v10332_v2 = vadd.f32 %v4371_v15, %v4265_v7  ;;  %3865 = vmatmul.f32.gmra.mxu1 %v7008_v59  ;;  %4029 = vmatmul.f32.gmra.mxu2 %v6961_v27  ;;  %v7123_v59 = vld [vmem:[%s11288_s5 + $0x298] sm:$0xff]  ;;  %v7122_v7 = vld [vmem:[%s11288_s5 + $0x290] sm:$0xff] }
 0x6f7   : >> { %4553 = vmatpush.msra.mxu1 %v7123_v59 }
 0x6f8   : >> { %4225 = vmatmul.f32.gmra.mxu3 %v7010_v1 }
 0x6f9   : >> { %v3982_v30 = vpop.f32.mrf.mxu2  ;;  %v4374_v40 = vpop.f32.mrf.mxu0  ;;  %4554 = vmatpush.msra.mxu1 %v7122_v7 }
 0x6fa   : >> { %v4070_v41 = vadd.f32 %v3982_v30, %v3819_v16  ;;  %v6964_v16 = vld [vmem:[%s9758_s30 + $0xba] sm:$0xff] }
 0x6fb   : >> { %v3821_v22 = vpop.f32.mrf.mxu1  ;;  %v4178_v54 = vpop.f32.mrf.mxu3 }
 0x6fc   : >> { %v4266_v8 = vadd.f32 %v4178_v54, %v4070_v41  ;;  %4421 = vmatmul.f32.gmra.mxu0 %v10036_v51  ;;  %v3822_v26 = vadd.f32 %v3821_v22, %v10245_v49  ;;  %v7171_v49 = vld [vmem:[%s11288_s5 + $0x310] sm:$0xff] }
 0x6fd   : >> { %4750 = vmatpush.msra.mxu2 %v7171_v49  ;;  %v7269_v41 = vld [vmem:[%s11288_s5 + $0x410] sm:$0xff]  ;;  %v7121_v49 = vld [vmem:[%s11288_s5 + $0x288] sm:$0xff] }
 0x6fe   : >> { %v10347_v45 = vadd.f32 %v4374_v40, %v4266_v8  ;;  %3868 = vmatmul.f32.gmra.mxu1 %v7009_v14  ;;  %4032 = vmatmul.f32.gmra.mxu2 %v6962_v10  ;;  %v7012_v14 = vld [vmem:[%s9758_s30 + $0xc0] sm:$0xff]  ;;  %v10381_v54 = vld [vmem:[%s9758_s30 + $0xc9] sm:$0xff] }
 0x6ff   : >> { %5142 = vmatpush.msra.mxu0 %v7269_v41  ;;  %4555 = vmatpush.msra.mxu1 %v7121_v49  ;;  %v7017_v49 = vld [vmem:[%s9758_s30 + $0xe8] sm:$0xff] }
 0x700   : >> { %4228 = vmatmul.f32.gmra.mxu3 %v7011_v0 }
 0x701   : >> { %v3985_v4 = vpop.f32.mrf.mxu2  ;;  %v4377_v24 = vpop.f32.mrf.mxu0 }
 0x702   : >> { %v4071_v18 = vadd.f32 %v3985_v4, %v3822_v26 }
 0x703   : >> { %v3824_v60 = vpop.f32.mrf.mxu1  ;;  %v4181_v51 = vpop.f32.mrf.mxu3 }
 0x704   : >> { %v4267_v21 = vadd.f32 %v4181_v51, %v4071_v18  ;;  %4424 = vmatmul.f32.gmra.mxu0 %v10061_v29  ;;  %v3825_v15 = vadd.f32 %v3824_v60, %v10262_v6  ;;  %v7219_v60 = vld [vmem:[%s11288_s5 + $0x388] sm:$0xff] }
 0x705   : >> { %4947 = vmatpush.msra.mxu3 %v7219_v60  ;;  %v7120_v60 = vld [vmem:[%s11288_s5 + $0x280] sm:$0xff] }
 0x706   : >> { %v10356_v20 = vadd.f32 %v4377_v24, %v4267_v21  ;;  %3871 = vmatmul.f32.gmra.mxu1 %v7010_v1  ;;  %4035 = vmatmul.f32.gmra.mxu2 %v6963_v50  ;;  %v7170_v24 = vld [vmem:[%s11288_s5 + $0x308] sm:$0xff]  ;;  %v10396_v21 = vld [vmem:[%s9758_s30 + $0xd1] sm:$0xff] }
 0x707   : >> { %4751 = vmatpush.msra.mxu2 %v7170_v24  ;;  %4556 = vmatpush.msra.mxu1 %v7120_v60 }
 0x708   : >> { %4231 = vmatmul.f32.gmra.mxu3 %v7012_v14 }
 0x709   : >> { %v3988_v29 = vpop.f32.mrf.mxu2  ;;  %v4380_v12 = vpop.f32.mrf.mxu0 }
 0x70a   : >> { %v4072_v27 = vadd.f32 %v3988_v29, %v3825_v15  ;;  %v6966_v29 = vld [vmem:[%s9758_s30 + $0xca] sm:$0xff] }
 0x70b   : >> { %v3827_v1 = vpop.f32.mrf.mxu1  ;;  %v4184_v43 = vpop.f32.mrf.mxu3 }
 0x70c   : >> { %v4268_v6 = vadd.f32 %v4184_v43, %v4072_v27  ;;  %4427 = vmatmul.f32.gmra.mxu0 %v10366_v36  ;;  %v3828_v40 = vadd.f32 %v3827_v1, %v10279_v52  ;;  %v7268_v1 = vld [vmem:[%s11288_s5 + $0x408] sm:$0xff] }
 0x70d   : >> { %5143 = vmatpush.msra.mxu0 %v7268_v1  ;;  %v10444_v1 = vld [vmem:[%s9758_s30 + $0xe9] sm:$0xff] }
 0x70e   : >> { %v10374_v30 = vadd.f32 %v4380_v12, %v4268_v6  ;;  %3874 = vmatmul.f32.gmra.mxu1 %v7011_v0  ;;  %4038 = vmatmul.f32.gmra.mxu2 %v6964_v16  ;;  %v7014_v0 = vld [vmem:[%s9758_s30 + $0xd0] sm:$0xff]  ;;  %v7015_v12 = vld [vmem:[%s9758_s30 + $0xd8] sm:$0xff] }
 0x70f   : >> { %v10411_v6 = vld [vmem:[%s9758_s30 + $0xd9] sm:$0xff] }
 0x710   : >> { %4234 = vmatmul.f32.gmra.mxu3 %v7013_v35 }
 0x711   : >> { %v3991_v59 = vpop.f32.mrf.mxu2  ;;  %v4383_v22 = vpop.f32.mrf.mxu0 }
 0x712   : >> { %v4073_v10 = vadd.f32 %v3991_v59, %v3828_v40 }
 0x713   : >> { %v3830_v8 = vpop.f32.mrf.mxu1  ;;  %v4187_v26 = vpop.f32.mrf.mxu3 }
 0x714   : >> { %v4269_v4 = vadd.f32 %v4187_v26, %v4073_v10  ;;  %4430 = vmatmul.f32.gmra.mxu0 %v10381_v54  ;;  %v3831_v18 = vadd.f32 %v3830_v8, %v10147_v34  ;;  %v7169_v8 = vld [vmem:[%s11288_s5 + $0x300] sm:$0xff] }
 0x715   : >> { %4752 = vmatpush.msra.mxu2 %v7169_v8 }
 0x716   : >> { %v10386_v52 = vadd.f32 %v4383_v22, %v4269_v4  ;;  %3877 = vmatmul.f32.gmra.mxu1 %v7012_v14  ;;  %4041 = vmatmul.f32.gmra.mxu2 %v6965_v19  ;;  %v6967_v22 = vld [vmem:[%s9758_s30 + $0xd2] sm:$0xff]  ;;  %v7218_v19 = vld [vmem:[%s11288_s5 + $0x380] sm:$0xff] }
 0x717   : >> { %4948 = vmatpush.msra.mxu3 %v7218_v19 }
 0x718   : >> { %4237 = vmatmul.f32.gmra.mxu3 %v7014_v0 }
 0x719   : >> { %v3994_v51 = vpop.f32.mrf.mxu2  ;;  %v4386_v50 = vpop.f32.mrf.mxu0 }
 0x71a   : >> { %v4074_v14 = vadd.f32 %v3994_v51, %v3831_v18  ;;  %v10426_v18 = vld [vmem:[%s9758_s30 + $0xe1] sm:$0xff] }
 0x71b   : >> { %v3833_v15 = vpop.f32.mrf.mxu1  ;;  %v4190_v47 = vpop.f32.mrf.mxu3 }
 0x71c   : >> { %v4270_v34 = vadd.f32 %v4190_v47, %v4074_v14  ;;  %4433 = vmatmul.f32.gmra.mxu0 %v10396_v21  ;;  %v3834_v7 = vadd.f32 %v3833_v15, %v10165_v17  ;;  %v10432_v14 = vld [vmem:[%s9758_s30 + $0xda] sm:$0xff] }
 0x71e   : >> { %v10404_v27 = vadd.f32 %v4386_v50, %v4270_v34  ;;  %3880 = vmatmul.f32.gmra.mxu1 %v7013_v35  ;;  %4044 = vmatmul.f32.gmra.mxu2 %v6966_v29  ;;  %v7016_v35 = vld [vmem:[%s9758_s30 + $0xe0] sm:$0xff] }
 0x71f   : >> { %v7267_v29 = vld [vmem:[%s11288_s5 + $0x400] sm:$0xff] }
 0x720   : >> { %4240 = vmatmul.f32.gmra.mxu3 %v7015_v12  ;;  %5144 = vmatpush.msra.mxu0 %v7267_v29 }
 0x721   : >> { %v3997_v43 = vpop.f32.mrf.mxu2  ;;  %v4389_v16 = vpop.f32.mrf.mxu0 }
 0x722   : >> { %v4075_v40 = vadd.f32 %v3997_v43, %v3834_v7 }
 0x723   : >> { %v3836_v41 = vpop.f32.mrf.mxu1  ;;  %v4193_v59 = vpop.f32.mrf.mxu3 }
 0x724   : >> { %v4271_v10 = vadd.f32 %v4193_v59, %v4075_v40  ;;  %4436 = vmatmul.f32.gmra.mxu0 %v10411_v6  ;;  %v3837_v26 = vadd.f32 %v3836_v41, %v10179_v25 }
 0x726   : >> { %v10416_v17 = vadd.f32 %v4389_v16, %v4271_v10  ;;  %3883 = vmatmul.f32.gmra.mxu1 %v7014_v0  ;;  %4047 = vmatmul.f32.gmra.mxu2 %v6967_v22 }
 0x728   : >> { %4243 = vmatmul.f32.gmra.mxu3 %v7016_v35 }
 0x729   : >> { %v4000_v4 = vpop.f32.mrf.mxu2  ;;  %v4392_v24 = vpop.f32.mrf.mxu0 }
 0x72a   : >> { %v4076_v0 = vadd.f32 %v4000_v4, %v3837_v26  ;;  %v10453_v26 = vld [vmem:[%s9758_s30 + $0xf1] sm:$0xff] }
 0x72b   : >> { %v3839_v51 = vpop.f32.mrf.mxu1  ;;  %v4196_v50 = vpop.f32.mrf.mxu3 }
 0x72c   : >> { %v4272_v25 = vadd.f32 %v4196_v50, %v4076_v0  ;;  %4439 = vmatmul.f32.gmra.mxu0 %v10426_v18  ;;  %v3840_v47 = vadd.f32 %v3839_v51, %v10199_v33  ;;  %v7018_v33 = vld [vmem:[%s9758_s30 + $0xf0] sm:$0xff] }
 0x72d   : >> { %v10456_v0 = vld [vmem:[%s9758_s30 + $0xea] sm:$0xff] }
 0x72e   : >> { %v10436_v15 = vadd.f32 %v4392_v24, %v4272_v25  ;;  %3886 = vmatmul.f32.gmra.mxu1 %v7015_v12  ;;  %4050 = vmatmul.f32.gmra.mxu2 %v10432_v14  ;;  %v6969_v12 = vld [vmem:[%s9758_s30 + $0xe2] sm:$0xff] }
 0x730   : >> { %4246 = vmatmul.f32.gmra.mxu3 %v7017_v49 }
 0x731   : >> { %v4003_v34 = vpop.f32.mrf.mxu2  ;;  %v4395_v7 = vpop.f32.mrf.mxu0 }
 0x732   : >> { %v4077_v43 = vadd.f32 %v4003_v34, %v3840_v47  ;;  %v10465_v47 = vld [vmem:[%s9758_s30 + $0xf9] sm:$0xff] }
 0x733   : >> { %v3842_v16 = vpop.f32.mrf.mxu1  ;;  %v4199_v40 = vpop.f32.mrf.mxu3 }
 0x734   : >> { %v4273_v41 = vadd.f32 %v4199_v40, %v4077_v43  ;;  %4442 = vmatmul.f32.gmra.mxu0 %v10444_v1  ;;  %v3843_v22 = vadd.f32 %v3842_v16, %v10213_v57  ;;  %v10468_v43 = vld [vmem:[%s9758_s30 + $0xf2] sm:$0xff] }
 0x736   : >> { %v10449_v59 = vadd.f32 %v4395_v7, %v4273_v41  ;;  %3889 = vmatmul.f32.gmra.mxu1 %v7016_v35  ;;  %4053 = vmatmul.f32.gmra.mxu2 %v6969_v12  ;;  %v7019_v35 = vld [vmem:[%s9758_s30 + $0xf8] sm:$0xff] }
 0x738   : >> { %4249 = vmatmul.f32.gmra.mxu3 %v7018_v33 }
 0x739   : >> { %v4006_v10 = vpop.f32.mrf.mxu2  ;;  %v4398_v8 = vpop.f32.mrf.mxu0 }
 0x73a   : >> { %v4078_v19 = vadd.f32 %v4006_v10, %v3843_v22  ;;  %v10477_v22 = vld [vmem:[%s9758_s30 + $0x101] sm:$0xff] }
 0x73b   : >> { %v3845_v4 = vpop.f32.mrf.mxu1  ;;  %v4202_v24 = vpop.f32.mrf.mxu3 }
 0x73c   : >> { %v4274_v60 = vadd.f32 %v4202_v24, %v4078_v19  ;;  %4445 = vmatmul.f32.gmra.mxu0 %v10453_v26  ;;  %v3846_v57 = vadd.f32 %v3845_v4, %v10233_v42  ;;  %v10480_v4 = vld [vmem:[%s9758_s30 + $0xfa] sm:$0xff] }
 0x73e   : >> { %v10460_v51 = vadd.f32 %v4398_v8, %v4274_v60  ;;  %3892 = vmatmul.f32.gmra.mxu1 %v7017_v49  ;;  %4056 = vmatmul.f32.gmra.mxu2 %v10456_v0  ;;  %v7020_v49 = vld [vmem:[%s9758_s30 + $0x100] sm:$0xff] }
 0x740   : >> { %4252 = vmatmul.f32.gmra.mxu3 %v7019_v35 }
 0x741   : >> { %v4009_v50 = vpop.f32.mrf.mxu2  ;;  %v4401_v25 = vpop.f32.mrf.mxu0 }
 0x742   : >> { %v4079_v29 = vadd.f32 %v4009_v50, %v3846_v57 }
 0x743   : >> { %v3848_v34 = vpop.f32.mrf.mxu1  ;;  %v4205_v7 = vpop.f32.mrf.mxu3 }
 0x744   : >> { %v4275_v16 = vadd.f32 %v4205_v7, %v4079_v29  ;;  %4448 = vmatmul.f32.gmra.mxu0 %v10465_v47  ;;  %v3849_v42 = vadd.f32 %v3848_v34, %v10247_v55 }
 0x746   : >> { %v10472_v40 = vadd.f32 %v4401_v25, %v4275_v16  ;;  %3895 = vmatmul.f32.gmra.mxu1 %v7018_v33  ;;  %4059 = vmatmul.f32.gmra.mxu2 %v10468_v43  ;;  %v7021_v33 = vld [vmem:[%s9758_s30 + $0x108] sm:$0xff]  ;;  %v7088_v16 = vld [vmem:[%s9758_s30 + $0x12] sm:$0xff] }
 0x747   : >> { %v10489_v25 = vld [vmem:[%s9758_s30 + $0x109] sm:$0xff] }
 0x748   : >> { %4255 = vmatmul.f32.gmra.mxu3 %v7020_v49  ;;  %v7137_v49 = vld [vmem:[%s9758_s30 + $0x20] sm:$0xff] }
 0x749   : >> { %v4012_v12 = vpop.f32.mrf.mxu2  ;;  %v4404_v41 = vpop.f32.mrf.mxu0 }
 0x74a   : >> { %v4080_v10 = vadd.f32 %v4012_v12, %v3849_v42 }
 0x74b   : >> { %v3851_v8 = vpop.f32.mrf.mxu1  ;;  %v4208_v19 = vpop.f32.mrf.mxu3 }
 0x74c   : >> { %v4276_v24 = vadd.f32 %v4208_v19, %v4080_v10  ;;  %4451 = vmatmul.f32.gmra.mxu0 %v10477_v22  ;;  %v3852_v55 = vadd.f32 %v3851_v8, %v10267_v31  ;;  %v7235_v8 = vld [vmem:[%s9758_s30 + $0x22] sm:$0xff] }
 0x74e   : >> { %v10484_v60 = vadd.f32 %v4404_v41, %v4276_v24  ;;  %3898 = vmatmul.f32.gmra.mxu1 %v7019_v35  ;;  %4062 = vmatmul.f32.gmra.mxu2 %v10480_v4  ;;  %v7186_v35 = vld [vmem:[%s9758_s30 + $0x21] sm:$0xff] }
 0x750   : >> { %4258 = vmatmul.f32.gmra.mxu3 %v7021_v33 }
 0x751   : >> { %v4015_v57 = vpop.f32.mrf.mxu2  ;;  %v4407_v50 = vpop.f32.mrf.mxu0 }
 0x752   : >> { %v4081_v29 = vadd.f32 %v4015_v57, %v3852_v55  ;;  %v7089_v55 = vld [vmem:[%s9758_s30 + $0x1a] sm:$0xff]  ;;  %v7138_v57 = vld [vmem:[%s9758_s30 + $0x28] sm:$0xff] }
 0x753   : >> { %v3854_v34 = vpop.f32.mrf.mxu1  ;;  %v4211_v7 = vpop.f32.mrf.mxu3 }
 0x754   : >> { %v4277_v42 = vadd.f32 %v4211_v7, %v4081_v29  ;;  %4454 = vmatmul.f32.gmra.mxu0 %v10489_v25  ;;  %v3855_v31 = vadd.f32 %v3854_v34, %v10158_v48 }
 0x756   : >> { %v10495_v12 = vadd.f32 %v4407_v50, %v4277_v42  ;;  %4557 = vmatmul.f32.vlgmr.msra.gmra.mxu1 %v7088_v16  ;;  %4753 = vmatmul.f32.vlgmr.msra.gmra.mxu2 %v7137_v49  ;;  %v7187_v50 = vld [vmem:[%s9758_s30 + $0x29] sm:$0xff] }
 0x757   : >> { %v7236_v49 = vld [vmem:[%s9758_s30 + $0x2a] sm:$0xff] }
 0x758   : >> { %4949 = vmatmul.f32.vlgmr.msra.gmra.mxu3 %v7186_v35 }
 0x759   : >> { %v4018_v41 = vpop.f32.mrf.mxu2  ;;  %v4410_v10 = vpop.f32.mrf.mxu0 }
 0x75a   : >> { %v4082_v19 = vadd.f32 %v4018_v41, %v3855_v31  ;;  %v7139_v41 = vld [vmem:[%s9758_s30 + $0x30] sm:$0xff] }
 0x75b   : >> { %v3857_v24 = vpop.f32.mrf.mxu1  ;;  %v4214_v33 = vpop.f32.mrf.mxu3 }
 0x75c   : >> { %v4278_v29 = vadd.f32 %v4214_v33, %v4082_v19  ;;  %5145 = vmatmul.f32.vlgmr.msra.gmra.mxu0 %v7235_v8  ;;  %v3858_v48 = vadd.f32 %v3857_v24, %v10175_v63  ;;  %v7188_v33 = vld [vmem:[%s9758_s30 + $0x31] sm:$0xff] }
 0x75e   : >> { %v10502_v7 = vadd.f32 %v4410_v10, %v4278_v29  ;;  %4560 = vmatmul.f32.gmra.mxu1 %v7089_v55  ;;  %4756 = vmatmul.f32.gmra.mxu2 %v7138_v57  ;;  %v7237_v57 = vld [vmem:[%s9758_s30 + $0x32] sm:$0xff] }
 0x760   : >> { %4952 = vmatmul.f32.gmra.mxu3 %v7187_v50 }
 0x761   : >> { %v4021_v34 = vpop.f32.mrf.mxu2  ;;  %v4413_v16 = vpop.f32.mrf.mxu0 }
 0x762   : >> { %v4083_v42 = vadd.f32 %v4021_v34, %v3858_v48  ;;  %v7140_v34 = vld [vmem:[%s9758_s30 + $0x38] sm:$0xff] }
 0x763   : >> { %v3860_v35 = vpop.f32.mrf.mxu1  ;;  %v4217_v31 = vpop.f32.mrf.mxu3 }
 0x764   : >> { %v4279_v19 = vadd.f32 %v4217_v31, %v4083_v42  ;;  %5148 = vmatmul.f32.gmra.mxu0 %v7236_v49  ;;  %v3861_v63 = vadd.f32 %v3860_v35, %v10192_v32  ;;  %v7189_v31 = vld [vmem:[%s9758_s30 + $0x39] sm:$0xff] }
 0x766   : >> { %v10508_v10 = vadd.f32 %v4413_v16, %v4279_v19  ;;  %4563 = vmatmul.f32.gmra.mxu1 %v7235_v8  ;;  %4759 = vmatmul.f32.gmra.mxu2 %v7139_v41  ;;  %v7238_v41 = vld [vmem:[%s9758_s30 + $0x3a] sm:$0xff] }
 0x768   : >> { %4955 = vmatmul.f32.gmra.mxu3 %v7188_v33 }
 0x769   : >> { %v4024_v24 = vpop.f32.mrf.mxu2  ;;  %v4416_v55 = vpop.f32.mrf.mxu0 }
 0x76a   : >> { %v4084_v29 = vadd.f32 %v4024_v24, %v3861_v63  ;;  %v7141_v24 = vld [vmem:[%s9758_s30 + $0x40] sm:$0xff] }
 0x76b   : >> { %v3863_v50 = vpop.f32.mrf.mxu1  ;;  %v4220_v48 = vpop.f32.mrf.mxu3 }
 0x76c   : >> { %v4280_v42 = vadd.f32 %v4220_v48, %v4084_v29  ;;  %5151 = vmatmul.f32.gmra.mxu0 %v7237_v57  ;;  %v3864_v32 = vadd.f32 %v3863_v50, %v10209_v37  ;;  %v7190_v48 = vld [vmem:[%s9758_s30 + $0x41] sm:$0xff] }
 0x76e   : >> { %v10514_v16 = vadd.f32 %v4416_v55, %v4280_v42  ;;  %4566 = vmatmul.f32.gmra.mxu1 %v7236_v49  ;;  %4762 = vmatmul.f32.gmra.mxu2 %v7140_v34  ;;  %v7239_v34 = vld [vmem:[%s9758_s30 + $0x42] sm:$0xff] }
 0x770   : >> { %4958 = vmatmul.f32.gmra.mxu3 %v7189_v31 }
 0x771   : >> { %v4027_v8 = vpop.f32.mrf.mxu2  ;;  %v4419_v35 = vpop.f32.mrf.mxu0 }
 0x772   : >> { %v4085_v19 = vadd.f32 %v4027_v8, %v3864_v32  ;;  %v7142_v8 = vld [vmem:[%s9758_s30 + $0x48] sm:$0xff] }
 0x773   : >> { %v3866_v33 = vpop.f32.mrf.mxu1  ;;  %v4223_v63 = vpop.f32.mrf.mxu3 }
 0x774   : >> { %v4281_v29 = vadd.f32 %v4223_v63, %v4085_v19  ;;  %5154 = vmatmul.f32.gmra.mxu0 %v7238_v41  ;;  %v3867_v37 = vadd.f32 %v3866_v33, %v10226_v3  ;;  %v7191_v63 = vld [vmem:[%s9758_s30 + $0x49] sm:$0xff] }
 0x776   : >> { %v10520_v55 = vadd.f32 %v4419_v35, %v4281_v29  ;;  %4569 = vmatmul.f32.gmra.mxu1 %v7237_v57  ;;  %4765 = vmatmul.f32.gmra.mxu2 %v7141_v24  ;;  %v7240_v24 = vld [vmem:[%s9758_s30 + $0x4a] sm:$0xff] }
 0x778   : >> { %4961 = vmatmul.f32.gmra.mxu3 %v7190_v48 }
 0x779   : >> { %v4030_v49 = vpop.f32.mrf.mxu2  ;;  %v4422_v50 = vpop.f32.mrf.mxu0 }
 0x77a   : >> { %v4086_v42 = vadd.f32 %v4030_v49, %v3867_v37  ;;  %v7143_v49 = vld [vmem:[%s9758_s30 + $0x50] sm:$0xff] }
 0x77b   : >> { %v3869_v31 = vpop.f32.mrf.mxu1  ;;  %v4226_v32 = vpop.f32.mrf.mxu3 }
 0x77c   : >> { %v4282_v19 = vadd.f32 %v4226_v32, %v4086_v42  ;;  %5157 = vmatmul.f32.gmra.mxu0 %v7239_v34  ;;  %v3870_v3 = vadd.f32 %v3869_v31, %v10243_v46  ;;  %v7192_v32 = vld [vmem:[%s9758_s30 + $0x51] sm:$0xff] }
 0x77e   : >> { %v10526_v35 = vadd.f32 %v4422_v50, %v4282_v19  ;;  %4572 = vmatmul.f32.gmra.mxu1 %v7238_v41  ;;  %4768 = vmatmul.f32.gmra.mxu2 %v7142_v8  ;;  %v7241_v8 = vld [vmem:[%s9758_s30 + $0x52] sm:$0xff] }
 0x780   : >> { %4964 = vmatmul.f32.gmra.mxu3 %v7191_v63 }
 0x781   : >> { %v4033_v57 = vpop.f32.mrf.mxu2  ;;  %v4425_v33 = vpop.f32.mrf.mxu0 }
 0x782   : >> { %v4087_v29 = vadd.f32 %v4033_v57, %v3870_v3  ;;  %v7144_v57 = vld [vmem:[%s9758_s30 + $0x58] sm:$0xff] }
 0x783   : >> { %v3872_v48 = vpop.f32.mrf.mxu1  ;;  %v4229_v37 = vpop.f32.mrf.mxu3 }
 0x784   : >> { %v4283_v42 = vadd.f32 %v4229_v37, %v4087_v29  ;;  %5160 = vmatmul.f32.gmra.mxu0 %v7240_v24  ;;  %v3873_v46 = vadd.f32 %v3872_v48, %v10260_v9  ;;  %v7193_v37 = vld [vmem:[%s9758_s30 + $0x59] sm:$0xff] }
 0x786   : >> { %v10532_v50 = vadd.f32 %v4425_v33, %v4283_v42  ;;  %4575 = vmatmul.f32.gmra.mxu1 %v7239_v34  ;;  %4771 = vmatmul.f32.gmra.mxu2 %v7143_v49  ;;  %v7242_v49 = vld [vmem:[%s9758_s30 + $0x5a] sm:$0xff] }
 0x788   : >> { %4967 = vmatmul.f32.gmra.mxu3 %v7192_v32 }
 0x789   : >> { %v4036_v41 = vpop.f32.mrf.mxu2  ;;  %v4428_v31 = vpop.f32.mrf.mxu0 }
 0x78a   : >> { %v4088_v19 = vadd.f32 %v4036_v41, %v3873_v46  ;;  %v7145_v41 = vld [vmem:[%s9758_s30 + $0x60] sm:$0xff] }
 0x78b   : >> { %v3875_v63 = vpop.f32.mrf.mxu1  ;;  %v4232_v3 = vpop.f32.mrf.mxu3 }
 0x78c   : >> { %v4284_v29 = vadd.f32 %v4232_v3, %v4088_v19  ;;  %5163 = vmatmul.f32.gmra.mxu0 %v7241_v8  ;;  %v3876_v9 = vadd.f32 %v3875_v63, %v10277_v58  ;;  %v7194_v3 = vld [vmem:[%s9758_s30 + $0x61] sm:$0xff] }
 0x78e   : >> { %v10538_v33 = vadd.f32 %v4428_v31, %v4284_v29  ;;  %4578 = vmatmul.f32.gmra.mxu1 %v7240_v24  ;;  %4774 = vmatmul.f32.gmra.mxu2 %v7144_v57  ;;  %v7243_v57 = vld [vmem:[%s9758_s30 + $0x62] sm:$0xff] }
 0x790   : >> { %4970 = vmatmul.f32.gmra.mxu3 %v7193_v37 }
 0x791   : >> { %v4039_v34 = vpop.f32.mrf.mxu2  ;;  %v4431_v48 = vpop.f32.mrf.mxu0 }
 0x792   : >> { %v4089_v42 = vadd.f32 %v4039_v34, %v3876_v9  ;;  %v7146_v34 = vld [vmem:[%s9758_s30 + $0x68] sm:$0xff] }
 0x793   : >> { %v3878_v32 = vpop.f32.mrf.mxu1  ;;  %v4235_v46 = vpop.f32.mrf.mxu3 }
 0x794   : >> { %v4285_v19 = vadd.f32 %v4235_v46, %v4089_v42  ;;  %5166 = vmatmul.f32.gmra.mxu0 %v7242_v49  ;;  %v3879_v58 = vadd.f32 %v3878_v32, %v10167_v5  ;;  %v7195_v46 = vld [vmem:[%s9758_s30 + $0x69] sm:$0xff] }
 0x796   : >> { %v10544_v31 = vadd.f32 %v4431_v48, %v4285_v19  ;;  %4581 = vmatmul.f32.gmra.mxu1 %v7241_v8  ;;  %4777 = vmatmul.f32.gmra.mxu2 %v7145_v41  ;;  %v7244_v41 = vld [vmem:[%s9758_s30 + $0x6a] sm:$0xff] }
 0x798   : >> { %4973 = vmatmul.f32.gmra.mxu3 %v7194_v3 }
 0x799   : >> { %v4042_v24 = vpop.f32.mrf.mxu2  ;;  %v4434_v63 = vpop.f32.mrf.mxu0 }
 0x79a   : >> { %v4090_v29 = vadd.f32 %v4042_v24, %v3879_v58  ;;  %v7147_v24 = vld [vmem:[%s9758_s30 + $0x70] sm:$0xff] }
 0x79b   : >> { %v3881_v37 = vpop.f32.mrf.mxu1  ;;  %v4238_v9 = vpop.f32.mrf.mxu3 }
 0x79c   : >> { %v4286_v42 = vadd.f32 %v4238_v9, %v4090_v29  ;;  %5169 = vmatmul.f32.gmra.mxu0 %v7243_v57  ;;  %v3882_v5 = vadd.f32 %v3881_v37, %v10181_v62  ;;  %v7196_v9 = vld [vmem:[%s9758_s30 + $0x71] sm:$0xff] }
 0x79e   : >> { %v10550_v48 = vadd.f32 %v4434_v63, %v4286_v42  ;;  %4584 = vmatmul.f32.gmra.mxu1 %v7242_v49  ;;  %4780 = vmatmul.f32.gmra.mxu2 %v7146_v34  ;;  %v7245_v34 = vld [vmem:[%s9758_s30 + $0x72] sm:$0xff] }
 0x7a0   : >> { %4976 = vmatmul.f32.gmra.mxu3 %v7195_v46 }
 0x7a1   : >> { %v4045_v8 = vpop.f32.mrf.mxu2  ;;  %v4437_v32 = vpop.f32.mrf.mxu0 }
 0x7a2   : >> { %v4091_v19 = vadd.f32 %v4045_v8, %v3882_v5  ;;  %v7148_v8 = vld [vmem:[%s9758_s30 + $0x78] sm:$0xff] }
 0x7a3   : >> { %v3884_v3 = vpop.f32.mrf.mxu1  ;;  %v4241_v58 = vpop.f32.mrf.mxu3 }
 0x7a4   : >> { %v4287_v29 = vadd.f32 %v4241_v58, %v4091_v19  ;;  %5172 = vmatmul.f32.gmra.mxu0 %v7244_v41  ;;  %v3885_v62 = vadd.f32 %v3884_v3, %v10201_v39  ;;  %v7197_v58 = vld [vmem:[%s9758_s30 + $0x79] sm:$0xff] }
 0x7a6   : >> { %v10556_v63 = vadd.f32 %v4437_v32, %v4287_v29  ;;  %4587 = vmatmul.f32.gmra.mxu1 %v7243_v57  ;;  %4783 = vmatmul.f32.gmra.mxu2 %v7147_v24  ;;  %v7246_v24 = vld [vmem:[%s9758_s30 + $0x7a] sm:$0xff] }
 0x7a8   : >> { %4979 = vmatmul.f32.gmra.mxu3 %v7196_v9 }
 0x7a9   : >> { %v4048_v49 = vpop.f32.mrf.mxu2  ;;  %v4440_v37 = vpop.f32.mrf.mxu0 }
 0x7aa   : >> { %v4092_v42 = vadd.f32 %v4048_v49, %v3885_v62  ;;  %v7149_v49 = vld [vmem:[%s9758_s30 + $0x80] sm:$0xff] }
 0x7ab   : >> { %v3887_v46 = vpop.f32.mrf.mxu1  ;;  %v4244_v5 = vpop.f32.mrf.mxu3 }
 0x7ac   : >> { %v4288_v19 = vadd.f32 %v4244_v5, %v4092_v42  ;;  %5175 = vmatmul.f32.gmra.mxu0 %v7245_v34  ;;  %v3888_v39 = vadd.f32 %v3887_v46, %v10215_v23  ;;  %v7198_v5 = vld [vmem:[%s9758_s30 + $0x81] sm:$0xff] }
 0x7ae   : >> { %v10562_v32 = vadd.f32 %v4440_v37, %v4288_v19  ;;  %4590 = vmatmul.f32.gmra.mxu1 %v7244_v41  ;;  %4786 = vmatmul.f32.gmra.mxu2 %v7148_v8  ;;  %v7247_v8 = vld [vmem:[%s9758_s30 + $0x82] sm:$0xff] }
 0x7b0   : >> { %4982 = vmatmul.f32.gmra.mxu3 %v7197_v58 }
 0x7b1   : >> { %v4051_v57 = vpop.f32.mrf.mxu2  ;;  %v4443_v3 = vpop.f32.mrf.mxu0 }
 0x7b2   : >> { %v4093_v29 = vadd.f32 %v4051_v57, %v3888_v39  ;;  %v7150_v57 = vld [vmem:[%s9758_s30 + $0x88] sm:$0xff] }
 0x7b3   : >> { %v3890_v9 = vpop.f32.mrf.mxu1  ;;  %v4247_v62 = vpop.f32.mrf.mxu3 }
 0x7b4   : >> { %v4289_v42 = vadd.f32 %v4247_v62, %v4093_v29  ;;  %5178 = vmatmul.f32.gmra.mxu0 %v7246_v24  ;;  %v3891_v23 = vadd.f32 %v3890_v9, %v10235_v56  ;;  %v7199_v62 = vld [vmem:[%s9758_s30 + $0x89] sm:$0xff] }
 0x7b6   : >> { %v10568_v37 = vadd.f32 %v4443_v3, %v4289_v42  ;;  %4593 = vmatmul.f32.gmra.mxu1 %v7245_v34  ;;  %4789 = vmatmul.f32.gmra.mxu2 %v7149_v49  ;;  %v7248_v49 = vld [vmem:[%s9758_s30 + $0x8a] sm:$0xff] }
 0x7b8   : >> { %4985 = vmatmul.f32.gmra.mxu3 %v7198_v5 }
 0x7b9   : >> { %v4054_v41 = vpop.f32.mrf.mxu2  ;;  %v4446_v46 = vpop.f32.mrf.mxu0 }
 0x7ba   : >> { %v4094_v19 = vadd.f32 %v4054_v41, %v3891_v23  ;;  %v7151_v41 = vld [vmem:[%s9758_s30 + $0x90] sm:$0xff] }
 0x7bb   : >> { %v3893_v58 = vpop.f32.mrf.mxu1  ;;  %v4250_v39 = vpop.f32.mrf.mxu3 }
 0x7bc   : >> { %v4290_v29 = vadd.f32 %v4250_v39, %v4094_v19  ;;  %5181 = vmatmul.f32.gmra.mxu0 %v7247_v8  ;;  %v3894_v56 = vadd.f32 %v3893_v58, %v10249_v53  ;;  %v7200_v39 = vld [vmem:[%s9758_s30 + $0x91] sm:$0xff] }
 0x7be   : >> { %v10574_v3 = vadd.f32 %v4446_v46, %v4290_v29  ;;  %4596 = vmatmul.f32.gmra.mxu1 %v7246_v24  ;;  %4792 = vmatmul.f32.gmra.mxu2 %v7150_v57  ;;  %v7249_v57 = vld [vmem:[%s9758_s30 + $0x92] sm:$0xff] }
 0x7c0   : >> { %4988 = vmatmul.f32.gmra.mxu3 %v7199_v62 }
 0x7c1   : >> { %v4057_v34 = vpop.f32.mrf.mxu2  ;;  %v4449_v9 = vpop.f32.mrf.mxu0 }
 0x7c2   : >> { %v4095_v42 = vadd.f32 %v4057_v34, %v3894_v56  ;;  %v7152_v34 = vld [vmem:[%s9758_s30 + $0x98] sm:$0xff] }
 0x7c3   : >> { %v3896_v5 = vpop.f32.mrf.mxu1  ;;  %v4253_v23 = vpop.f32.mrf.mxu3 }
 0x7c4   : >> { %v4291_v19 = vadd.f32 %v4253_v23, %v4095_v42  ;;  %5184 = vmatmul.f32.gmra.mxu0 %v7248_v49  ;;  %v3897_v53 = vadd.f32 %v3896_v5, %v10269_v13  ;;  %v7201_v23 = vld [vmem:[%s9758_s30 + $0x99] sm:$0xff] }
 0x7c6   : >> { %v10580_v46 = vadd.f32 %v4449_v9, %v4291_v19  ;;  %4599 = vmatmul.f32.gmra.mxu1 %v7247_v8  ;;  %4795 = vmatmul.f32.gmra.mxu2 %v7151_v41  ;;  %v7250_v41 = vld [vmem:[%s9758_s30 + $0x9a] sm:$0xff] }
 0x7c8   : >> { %4991 = vmatmul.f32.gmra.mxu3 %v7200_v39 }
 0x7c9   : >> { %v4060_v24 = vpop.f32.mrf.mxu2  ;;  %v4452_v58 = vpop.f32.mrf.mxu0 }
 0x7ca   : >> { %v4096_v29 = vadd.f32 %v4060_v24, %v3897_v53  ;;  %v7153_v24 = vld [vmem:[%s9758_s30 + $0xa0] sm:$0xff] }
 0x7cb   : >> { %v3899_v62 = vpop.f32.mrf.mxu1  ;;  %v4256_v56 = vpop.f32.mrf.mxu3 }
 0x7cc   : >> { %v4292_v42 = vadd.f32 %v4256_v56, %v4096_v29  ;;  %5187 = vmatmul.f32.gmra.mxu0 %v7249_v57  ;;  %v3900_v13 = vadd.f32 %v3899_v62, %v10281_v38  ;;  %v7202_v56 = vld [vmem:[%s9758_s30 + $0xa1] sm:$0xff] }
 0x7ce   : >> { %v10586_v9 = vadd.f32 %v4452_v58, %v4292_v42  ;;  %4602 = vmatmul.f32.gmra.mxu1 %v7248_v49  ;;  %4798 = vmatmul.f32.gmra.mxu2 %v7152_v34  ;;  %v7251_v34 = vld [vmem:[%s9758_s30 + $0xa2] sm:$0xff] }
 0x7d0   : >> { %11311 = vst [vmem:[#allocation11_spill] sm:$0xff] %v10586_v9  ;;  %4994 = vmatmul.f32.gmra.mxu3 %v7201_v23 }
 0x7d1   : >> { %v4063_v8 = vpop.f32.mrf.mxu2  ;;  %v4455_v5 = vpop.f32.mrf.mxu0 }
 0x7d2   : >> { %v4097_v19 = vadd.f32 %v4063_v8, %v3900_v13  ;;  %v7154_v8 = vld [vmem:[%s9758_s30 + $0xa8] sm:$0xff] }
 0x7d3   : >> { %v4259_v39 = vpop.f32.mrf.mxu3  ;;  %v4558_v53 = vpop.f32.mrf.mxu1 }
 0x7d4   : >> { %v4293_v29 = vadd.f32 %v4259_v39, %v4097_v19  ;;  %5190 = vmatmul.f32.gmra.mxu0 %v7250_v41  ;;  %v4654_v38 = vadd.f32 %v4558_v53, %v10299_v28  ;;  %v10598_v19 = vperm.slane %v9700_v44, 0 }
 0x7d6   : >> { %v10592_v58 = vadd.f32 %v4455_v5, %v4293_v29  ;;  %4605 = vmatmul.f32.gmra.mxu1 %v7249_v57  ;;  %4801 = vmatmul.f32.gmra.mxu2 %v7153_v24  ;;  %v7203_v57 = vld [vmem:[%s9758_s30 + $0xa9] sm:$0xff] }
 0x7d7   : >> { %v7252_v29 = vld [vmem:[%s9758_s30 + $0xaa] sm:$0xff] }
 0x7d8   : >> { %4997 = vmatmul.f32.gmra.mxu3 %v7202_v56 }
 0x7d9   : >> { %v4754_v49 = vpop.f32.mrf.mxu2  ;;  %v5146_v62 = vpop.f32.mrf.mxu0 }
 0x7da   : >> { %v4850_v42 = vadd.f32 %v4754_v49, %v4654_v38 }
 0x7db   : >> { %v4561_v23 = vpop.f32.mrf.mxu1  ;;  %v4950_v13 = vpop.f32.mrf.mxu3 }
 0x7dc   : >> { %v5046_v9 = vadd.f32 %v4950_v13, %v4850_v42  ;;  %5193 = vmatmul.f32.gmra.mxu0 %v7251_v34  ;;  %v4655_v28 = vadd.f32 %v4561_v23, %v10308_v61  ;;  %v7155_v13 = vld [vmem:[%s9758_s30 + $0xb0] sm:$0xff] }
 0x7dd   : >> { %v7204_v61 = vld [vmem:[%s9758_s30 + $0xb1] sm:$0xff] }
 0x7de   : >> { %v5242_v5 = vadd.f32 %v5146_v62, %v5046_v9  ;;  %4608 = vmatmul.f32.gmra.mxu1 %v7250_v41  ;;  %4804 = vmatmul.f32.gmra.mxu2 %v7154_v8 }
 0x7e0   : >> { %v5277_v39 = vadd.f32 %v10598_v19, %v5242_v5  ;;  %5000 = vmatmul.f32.gmra.mxu3 %v7203_v57  ;;  %v7253_v5 = vld [vmem:[%s9758_s30 + $0xb2] sm:$0xff] }
 0x7e1   : >> { %v4757_v53 = vpop.f32.mrf.mxu2  ;;  %v5149_v24 = vpop.f32.mrf.mxu0 }
 0x7e2   : >> { %v5309_v56 = vmax.f32 %v5277_v39, 0.0  ;;  %v4851_v38 = vadd.f32 %v4757_v53, %v4655_v28 }
 0x7e3   : >> { %v4564_v49 = vpop.f32.mrf.mxu1  ;;  %v4953_v42 = vpop.f32.mrf.mxu3 }
 0x7e4   : >> { %5342 = vst [vmem:[%s10607_s0] sm:$0xff] %v5309_v56  ;;  %v5047_v9 = vadd.f32 %v4953_v42, %v4851_v38  ;;  %5196 = vmatmul.f32.gmra.mxu0 %v7252_v29  ;;  %v4656_v62 = vadd.f32 %v4564_v49, %v10323_v11  ;;  %v7156_v38 = vld [vmem:[%s9758_s30 + $0xb8] sm:$0xff] }
 0x7e6   : >> { %v5243_v41 = vadd.f32 %v5149_v24, %v5047_v9  ;;  %4611 = vmatmul.f32.gmra.mxu1 %v7251_v34  ;;  %4807 = vmatmul.f32.gmra.mxu2 %v7155_v13  ;;  %v7205_v34 = vld [vmem:[%s9758_s30 + $0xb9] sm:$0xff] }
 0x7e8   : >> { %v5278_v23 = vadd.f32 %v10598_v19, %v5243_v41  ;;  %5003 = vmatmul.f32.gmra.mxu3 %v7204_v61  ;;  %v7254_v61 = vld [vmem:[%s9758_s30 + $0xba] sm:$0xff] }
 0x7e9   : >> { %v4760_v8 = vpop.f32.mrf.mxu2  ;;  %v5152_v57 = vpop.f32.mrf.mxu0 }
 0x7ea   : >> { %v5310_v28 = vmax.f32 %v5278_v23, 0.0  ;;  %v4852_v39 = vadd.f32 %v4760_v8, %v4656_v62 }
 0x7eb   : >> { %v4567_v53 = vpop.f32.mrf.mxu1  ;;  %v4956_v56 = vpop.f32.mrf.mxu3 }
 0x7ec   : >> { %5343 = vst [vmem:[%s10607_s0 + $0x8] sm:$0xff] %v5310_v28  ;;  %v5048_v42 = vadd.f32 %v4956_v56, %v4852_v39  ;;  %5199 = vmatmul.f32.gmra.mxu0 %v7253_v5  ;;  %v4657_v11 = vadd.f32 %v4567_v53, %v10332_v2  ;;  %v7157_v28 = vld [vmem:[%s9758_s30 + $0xc0] sm:$0xff] }
 0x7ee   : >> { %v5244_v24 = vadd.f32 %v5152_v57, %v5048_v42  ;;  %4614 = vmatmul.f32.gmra.mxu1 %v7252_v29  ;;  %4810 = vmatmul.f32.gmra.mxu2 %v7156_v38  ;;  %v7255_v38 = vld [vmem:[%s9758_s30 + $0xc2] sm:$0xff] }
 0x7f0   : >> { %v5279_v49 = vadd.f32 %v10598_v19, %v5244_v24  ;;  %5006 = vmatmul.f32.gmra.mxu3 %v7205_v34 }
 0x7f1   : >> { %v4763_v13 = vpop.f32.mrf.mxu2  ;;  %v5155_v9 = vpop.f32.mrf.mxu0 }
 0x7f2   : >> { %v5311_v41 = vmax.f32 %v5279_v49, 0.0  ;;  %v4853_v62 = vadd.f32 %v4763_v13, %v4657_v11  ;;  %v7158_v49 = vld [vmem:[%s9758_s30 + $0xc8] sm:$0xff] }
 0x7f3   : >> { %v4570_v23 = vpop.f32.mrf.mxu1  ;;  %v4959_v8 = vpop.f32.mrf.mxu3 }
 0x7f4   : >> { %5344 = vst [vmem:[%s10607_s0 + $0x10] sm:$0xff] %v5311_v41  ;;  %v5049_v39 = vadd.f32 %v4959_v8, %v4853_v62  ;;  %5202 = vmatmul.f32.gmra.mxu0 %v7254_v61  ;;  %v4658_v2 = vadd.f32 %v4570_v23, %v10347_v45  ;;  %v7256_v62 = vld [vmem:[%s9758_s30 + $0xca] sm:$0xff] }
 0x7f6   : >> { %v5245_v29 = vadd.f32 %v5155_v9, %v5049_v39  ;;  %4617 = vmatmul.f32.gmra.mxu1 %v7253_v5  ;;  %4813 = vmatmul.f32.gmra.mxu2 %v7157_v28 }
 0x7f8   : >> { %v5280_v57 = vadd.f32 %v10598_v19, %v5245_v29  ;;  %5009 = vmatmul.f32.gmra.mxu3 %v10366_v36  ;;  %v7159_v29 = vld [vmem:[%s9758_s30 + $0xd0] sm:$0xff] }
 0x7f9   : >> { %v4766_v53 = vpop.f32.mrf.mxu2  ;;  %v5158_v56 = vpop.f32.mrf.mxu0 }
 0x7fa   : >> { %v5312_v42 = vmax.f32 %v5280_v57, 0.0  ;;  %v4854_v34 = vadd.f32 %v4766_v53, %v4658_v2 }
 0x7fb   : >> { %v4573_v24 = vpop.f32.mrf.mxu1  ;;  %v4962_v11 = vpop.f32.mrf.mxu3 }
 0x7fc   : >> { %5345 = vst [vmem:[%s10607_s0 + $0x18] sm:$0xff] %v5312_v42  ;;  %v5050_v13 = vadd.f32 %v4962_v11, %v4854_v34  ;;  %5205 = vmatmul.f32.gmra.mxu0 %v7255_v38  ;;  %v4659_v45 = vadd.f32 %v4573_v24, %v10356_v20 }
 0x7fe   : >> { %v5246_v5 = vadd.f32 %v5158_v56, %v5050_v13  ;;  %4620 = vmatmul.f32.gmra.mxu1 %v7254_v61  ;;  %4816 = vmatmul.f32.gmra.mxu2 %v7158_v49  ;;  %v7257_v56 = vld [vmem:[%s9758_s30 + $0xd2] sm:$0xff] }
 0x7ff   : >> { %v7160_v49 = vld [vmem:[%s9758_s30 + $0xd8] sm:$0xff] }
 0x800   : >> { %v5281_v36 = vadd.f32 %v10598_v19, %v5246_v5  ;;  %5012 = vmatmul.f32.gmra.mxu3 %v10381_v54 }
 0x801   : >> { %v4769_v9 = vpop.f32.mrf.mxu2  ;;  %v5161_v41 = vpop.f32.mrf.mxu0 }
 0x802   : >> { %v5313_v23 = vmax.f32 %v5281_v36, 0.0  ;;  %v4855_v8 = vadd.f32 %v4769_v9, %v4659_v45 }
 0x803   : >> { %v4576_v28 = vpop.f32.mrf.mxu1  ;;  %v4965_v39 = vpop.f32.mrf.mxu3 }
 0x804   : >> { %5346 = vst [vmem:[%s10607_s0 + $0x20] sm:$0xff] %v5313_v23  ;;  %v5051_v2 = vadd.f32 %v4965_v39, %v4855_v8  ;;  %5208 = vmatmul.f32.gmra.mxu0 %v7256_v62  ;;  %v4660_v20 = vadd.f32 %v4576_v28, %v10374_v30  ;;  %v7161_v8 = vld [vmem:[%s9758_s30 + $0xe0] sm:$0xff] }
 0x806   : >> { %v5247_v61 = vadd.f32 %v5161_v41, %v5051_v2  ;;  %4623 = vmatmul.f32.gmra.mxu1 %v7255_v38  ;;  %4819 = vmatmul.f32.gmra.mxu2 %v7159_v29  ;;  %v7259_v2 = vld [vmem:[%s9758_s30 + $0xe2] sm:$0xff] }
 0x808   : >> { %v5282_v54 = vadd.f32 %v10598_v19, %v5247_v61  ;;  %5015 = vmatmul.f32.gmra.mxu3 %v10396_v21 }
 0x809   : >> { %v4772_v57 = vpop.f32.mrf.mxu2  ;;  %v5164_v53 = vpop.f32.mrf.mxu0 }
 0x80a   : >> { %v5314_v42 = vmax.f32 %v5282_v54, 0.0  ;;  %v4856_v34 = vadd.f32 %v4772_v57, %v4660_v20 }
 0x80b   : >> { %v4579_v24 = vpop.f32.mrf.mxu1  ;;  %v4968_v11 = vpop.f32.mrf.mxu3 }
 0x80c   : >> { %5347 = vst [vmem:[%s10607_s0 + $0x28] sm:$0xff] %v5314_v42  ;;  %v5052_v13 = vadd.f32 %v4968_v11, %v4856_v34  ;;  %5211 = vmatmul.f32.gmra.mxu0 %v7257_v56  ;;  %v4661_v30 = vadd.f32 %v4579_v24, %v10386_v52  ;;  %v7162_v42 = vld [vmem:[%s9758_s30 + $0xe8] sm:$0xff] }
 0x80e   : >> { %v5248_v38 = vadd.f32 %v5164_v53, %v5052_v13  ;;  %4626 = vmatmul.f32.gmra.mxu1 %v7256_v62  ;;  %4822 = vmatmul.f32.gmra.mxu2 %v7160_v49  ;;  %v7113_v53 = vld [vmem:[%s9758_s30 + $0xda] sm:$0xff] }
 0x810   : >> { %v5283_v21 = vadd.f32 %v10598_v19, %v5248_v38  ;;  %5018 = vmatmul.f32.gmra.mxu3 %v10411_v6 }
 0x811   : >> { %v4775_v5 = vpop.f32.mrf.mxu2  ;;  %v5167_v45 = vpop.f32.mrf.mxu0 }
 0x812   : >> { %v5315_v36 = vmax.f32 %v5283_v21, 0.0  ;;  %v4857_v9 = vadd.f32 %v4775_v5, %v4661_v30  ;;  %v7163_v30 = vld [vmem:[%s9758_s30 + $0xf0] sm:$0xff] }
 0x813   : >> { %v4582_v41 = vpop.f32.mrf.mxu1  ;;  %v4971_v23 = vpop.f32.mrf.mxu3 }
 0x814   : >> { %5348 = vst [vmem:[%s10607_s0 + $0x30] sm:$0xff] %v5315_v36  ;;  %v5053_v28 = vadd.f32 %v4971_v23, %v4857_v9  ;;  %5214 = vmatmul.f32.gmra.mxu0 %v10432_v14  ;;  %v4662_v6 = vadd.f32 %v4582_v41, %v10404_v27 }
 0x816   : >> { %v5249_v52 = vadd.f32 %v5167_v45, %v5053_v28  ;;  %4629 = vmatmul.f32.gmra.mxu1 %v7257_v56  ;;  %4825 = vmatmul.f32.gmra.mxu2 %v7161_v8  ;;  %v7115_v28 = vld [vmem:[%s9758_s30 + $0xea] sm:$0xff] }
 0x818   : >> { %v5284_v62 = vadd.f32 %v10598_v19, %v5249_v52  ;;  %5021 = vmatmul.f32.gmra.mxu3 %v10426_v18  ;;  %v7164_v52 = vld [vmem:[%s9758_s30 + $0xf8] sm:$0xff] }
 0x819   : >> { %v4778_v39 = vpop.f32.mrf.mxu2  ;;  %v5170_v29 = vpop.f32.mrf.mxu0 }
 0x81a   : >> { %v5316_v61 = vmax.f32 %v5284_v62, 0.0  ;;  %v4858_v20 = vadd.f32 %v4778_v39, %v4662_v6 }
 0x81b   : >> { %v4585_v54 = vpop.f32.mrf.mxu1  ;;  %v4974_v57 = vpop.f32.mrf.mxu3 }
 0x81c   : >> { %5349 = vst [vmem:[%s10607_s0 + $0x38] sm:$0xff] %v5316_v61  ;;  %v5054_v14 = vadd.f32 %v4974_v57, %v4858_v20  ;;  %5217 = vmatmul.f32.gmra.mxu0 %v7259_v2  ;;  %v4663_v27 = vadd.f32 %v4585_v54, %v10416_v17  ;;  %v7116_v54 = vld [vmem:[%s9758_s30 + $0xf2] sm:$0xff]  ;;  %v7165_v57 = vld [vmem:[%s9758_s30 + $0x100] sm:$0xff] }
 0x81e   : >> { %v5250_v56 = vadd.f32 %v5170_v29, %v5054_v14  ;;  %4632 = vmatmul.f32.gmra.mxu1 %v7113_v53  ;;  %4828 = vmatmul.f32.gmra.mxu2 %v7162_v42 }
 0x820   : >> { %v5285_v18 = vadd.f32 %v10598_v19, %v5250_v56  ;;  %5024 = vmatmul.f32.gmra.mxu3 %v10444_v1  ;;  %v7263_v56 = vld [vmem:[%s9758_s30 + $0x102] sm:$0xff] }
 0x821   : >> { %v4781_v34 = vpop.f32.mrf.mxu2  ;;  %v5173_v24 = vpop.f32.mrf.mxu0 }
 0x822   : >> { %v5317_v11 = vmax.f32 %v5285_v18, 0.0  ;;  %v4859_v49 = vadd.f32 %v4781_v34, %v4663_v27 }
 0x823   : >> { %v4588_v13 = vpop.f32.mrf.mxu1  ;;  %v4977_v38 = vpop.f32.mrf.mxu3 }
 0x824   : >> { %5350 = vst [vmem:[%s10607_s0 + $0x40] sm:$0xff] %v5317_v11  ;;  %v5055_v21 = vadd.f32 %v4977_v38, %v4859_v49  ;;  %5220 = vmatmul.f32.gmra.mxu0 %v10456_v0  ;;  %v4664_v17 = vadd.f32 %v4588_v13, %v10436_v15  ;;  %v7117_v11 = vld [vmem:[%s9758_s30 + $0xfa] sm:$0xff] }
 0x826   : >> { %v5251_v5 = vadd.f32 %v5173_v24, %v5055_v21  ;;  %4635 = vmatmul.f32.gmra.mxu1 %v7259_v2  ;;  %4831 = vmatmul.f32.gmra.mxu2 %v7163_v30  ;;  %v7264_v21 = vld [vmem:[%s9758_s30 + $0x10a] sm:$0xff] }
 0x828   : >> { %v5286_v1 = vadd.f32 %v10598_v19, %v5251_v5  ;;  %5027 = vmatmul.f32.gmra.mxu3 %v10453_v26 }
 0x829   : >> { %v4784_v45 = vpop.f32.mrf.mxu2  ;;  %v5176_v36 = vpop.f32.mrf.mxu0 }
 0x82a   : >> { %v5318_v9 = vmax.f32 %v5286_v1, 0.0  ;;  %v4860_v41 = vadd.f32 %v4784_v45, %v4664_v17 }
 0x82b   : >> { %v4591_v23 = vpop.f32.mrf.mxu1  ;;  %v4980_v8 = vpop.f32.mrf.mxu3 }
 0x82c   : >> { %5351 = vst [vmem:[%s10607_s0 + $0x48] sm:$0xff] %v5318_v9  ;;  %v5056_v0 = vadd.f32 %v4980_v8, %v4860_v41  ;;  %5223 = vmatmul.f32.gmra.mxu0 %v10468_v43  ;;  %v4665_v26 = vadd.f32 %v4591_v23, %v10449_v59  ;;  %v7216_v41 = vld [vmem:[%s9758_s30 + $0x111] sm:$0xff] }
 0x82e   : >> { %v5252_v15 = vadd.f32 %v5176_v36, %v5056_v0  ;;  %4638 = vmatmul.f32.gmra.mxu1 %v7115_v28  ;;  %4834 = vmatmul.f32.gmra.mxu2 %v7164_v52  ;;  %v7167_v36 = vld [vmem:[%s9758_s30 + $0x110] sm:$0xff] }
 0x82f   : >> { %v7265_v52 = vld [vmem:[%s9758_s30 + $0x112] sm:$0xff] }
 0x830   : >> { %v5287_v6 = vadd.f32 %v10598_v19, %v5252_v15  ;;  %5030 = vmatmul.f32.gmra.mxu3 %v10465_v47 }
 0x831   : >> { %v4787_v62 = vpop.f32.mrf.mxu2  ;;  %v5179_v39 = vpop.f32.mrf.mxu0 }
 0x832   : >> { %v5319_v29 = vmax.f32 %v5287_v6, 0.0  ;;  %v4861_v2 = vadd.f32 %v4787_v62, %v4665_v26  ;;  %v7168_v62 = vld [vmem:[%s9758_s30 + $0x118] sm:$0xff] }
 0x833   : >> { %v4594_v61 = vpop.f32.mrf.mxu1  ;;  %v4983_v20 = vpop.f32.mrf.mxu3 }
 0x834   : >> { %5352 = vst [vmem:[%s10607_s0 + $0x50] sm:$0xff] %v5319_v29  ;;  %v5057_v43 = vadd.f32 %v4983_v20, %v4861_v2  ;;  %5226 = vmatmul.f32.gmra.mxu0 %v10480_v4  ;;  %v4666_v47 = vadd.f32 %v4594_v61, %v10460_v51  ;;  %v7166_v4 = vld [vmem:[%s9758_s30 + $0x108] sm:$0xff]  ;;  %v7217_v29 = vld [vmem:[%s9758_s30 + $0x119] sm:$0xff] }
 0x836   : >> { %v5253_v59 = vadd.f32 %v5179_v39, %v5057_v43  ;;  %4641 = vmatmul.f32.gmra.mxu1 %v7116_v54  ;;  %4837 = vmatmul.f32.gmra.mxu2 %v7165_v57  ;;  %v7266_v57 = vld [vmem:[%s9758_s30 + $0x11a] sm:$0xff]  ;;  %s10750_s30 = smov (%p3571_p1), 0  }
 0x838   : >> { %v5288_v53 = vadd.f32 %v10598_v19, %v5253_v59  ;;  %5033 = vmatmul.f32.gmra.mxu3 %v10477_v22 }
 0x839   : >> { %v4790_v42 = vpop.f32.mrf.mxu2  ;;  %v5182_v14 = vpop.f32.mrf.mxu0 }
 0x83a   : >> { %v5320_v27 = vmax.f32 %v5288_v53, 0.0  ;;  %v4862_v18 = vadd.f32 %v4790_v42, %v4666_v47 }
 0x83b   : >> { %v4597_v34 = vpop.f32.mrf.mxu1  ;;  %v4986_v24 = vpop.f32.mrf.mxu3 }
 0x83c   : >> { %5353 = vst [vmem:[%s10607_s0 + $0x58] sm:$0xff] %v5320_v27  ;;  %v5058_v49 = vadd.f32 %v4986_v24, %v4862_v18  ;;  %5229 = vmatmul.f32.gmra.mxu0 %v7263_v56  ;;  %v4667_v22 = vadd.f32 %v4597_v34, %v10472_v40 }
 0x83e   : >> { %v5254_v51 = vadd.f32 %v5182_v14, %v5058_v49  ;;  %4644 = vmatmul.f32.gmra.mxu1 %v7117_v11  ;;  %4840 = vmatmul.f32.gmra.mxu2 %v7166_v4 }
 0x840   : >> { %v5289_v13 = vadd.f32 %v10598_v19, %v5254_v51  ;;  %5036 = vmatmul.f32.gmra.mxu3 %v10489_v25 }
 0x841   : >> { %v4793_v38 = vpop.f32.mrf.mxu2  ;;  %v5185_v30 = vpop.f32.mrf.mxu0 }
 0x842   : >> { %v5321_v5 = vmax.f32 %v5289_v13, 0.0  ;;  %v4863_v17 = vadd.f32 %v4793_v38, %v4667_v22 }
 0x843   : >> { %v4600_v1 = vpop.f32.mrf.mxu1  ;;  %v4989_v45 = vpop.f32.mrf.mxu3 }
 0x844   : >> { %5354 = vst [vmem:[%s10607_s0 + $0x60] sm:$0xff] %v5321_v5  ;;  %v5059_v9 = vadd.f32 %v4989_v45, %v4863_v17  ;;  %5232 = vmatmul.f32.gmra.mxu0 %v7264_v21  ;;  %v4668_v25 = vadd.f32 %v4600_v1, %v10484_v60 }
 0x846   : >> { %v5255_v40 = vadd.f32 %v5185_v30, %v5059_v9  ;;  %4647 = vmatmul.f32.gmra.mxu1 %v7263_v56  ;;  %4843 = vmatmul.f32.gmra.mxu2 %v7167_v36 }
 0x848   : >> { %v5290_v23 = vadd.f32 %v10598_v19, %v5255_v40  ;;  %5039 = vmatmul.f32.gmra.mxu3 %v7216_v41 }
 0x849   : >> { %v4796_v8 = vpop.f32.mrf.mxu2  ;;  %v5188_v28 = vpop.f32.mrf.mxu0 }
 0x84a   : >> { %v5322_v0 = vmax.f32 %v5290_v23, 0.0  ;;  %v4864_v15 = vadd.f32 %v4796_v8, %v4668_v25 }
 0x84b   : >> { %v4603_v26 = vpop.f32.mrf.mxu1  ;;  %v4992_v6 = vpop.f32.mrf.mxu3 }
 0x84c   : >> { %5355 = vst [vmem:[%s10607_s0 + $0x68] sm:$0xff] %v5322_v0  ;;  %v5060_v39 = vadd.f32 %v4992_v6, %v4864_v15  ;;  %5235 = vmatmul.f32.gmra.mxu0 %v7265_v52  ;;  %v4669_v60 = vadd.f32 %v4603_v26, %v10495_v12 }
 0x84e   : >> { %v5256_v2 = vadd.f32 %v5188_v28, %v5060_v39  ;;  %4650 = vmatmul.f32.gmra.mxu1 %v7264_v21  ;;  %4846 = vmatmul.f32.gmra.mxu2 %v7168_v62 }
 0x850   : >> { %v5291_v61 = vadd.f32 %v10598_v19, %v5256_v2  ;;  %5042 = vmatmul.f32.gmra.mxu3 %v7217_v29 }
 0x851   : >> { %v4799_v20 = vpop.f32.mrf.mxu2  ;;  %v5191_v54 = vpop.f32.mrf.mxu0 }
 0x852   : >> { %v5323_v43 = vmax.f32 %v5291_v61, 0.0  ;;  %v4865_v59 = vadd.f32 %v4799_v20, %v4669_v60 }
 0x853   : >> { %v4606_v47 = vpop.f32.mrf.mxu1  ;;  %v4995_v53 = vpop.f32.mrf.mxu3 }
 0x854   : >> { %5356 = vst [vmem:[%s10607_s0 + $0x70] sm:$0xff] %v5323_v43  ;;  %v5061_v42 = vadd.f32 %v4995_v53, %v4865_v59  ;;  %5238 = vmatmul.f32.gmra.mxu0 %v7266_v57  ;;  %v4670_v56 = vadd.f32 %v4606_v47, %v10502_v7 }
 0x856   : >> { %v5257_v14 = vadd.f32 %v5191_v54, %v5061_v42 }
 0x858   : >> { %v5292_v27 = vadd.f32 %v10598_v19, %v5257_v14 }
 0x859   : >> { %v4802_v12 = vpop.f32.mrf.mxu2  ;;  %v5194_v18 = vpop.f32.mrf.mxu0 }
 0x85a   : >> { %v5324_v34 = vmax.f32 %v5292_v27, 0.0  ;;  %v4866_v24 = vadd.f32 %v4802_v12, %v4670_v56 }
 0x85b   : >> { %v4609_v11 = vpop.f32.mrf.mxu1  ;;  %v4998_v4 = vpop.f32.mrf.mxu3 }
 0x85c   : >> { %5357 = vst [vmem:[%s10607_s0 + $0x78] sm:$0xff] %v5324_v34  ;;  %v5062_v49 = vadd.f32 %v4998_v4, %v4866_v24  ;;  %v4671_v22 = vadd.f32 %v4609_v11, %v10508_v10 }
 0x85e   : >> { %v5258_v51 = vadd.f32 %v5194_v18, %v5062_v49 }
 0x860   : >> { %v5293_v13 = vadd.f32 %v10598_v19, %v5258_v51 }
 0x861   : >> { %v4805_v38 = vpop.f32.mrf.mxu2  ;;  %v5197_v30 = vpop.f32.mrf.mxu0 }
 0x862   : >> { %v5325_v7 = vmax.f32 %v5293_v13, 0.0  ;;  %v4867_v21 = vadd.f32 %v4805_v38, %v4671_v22 }
 0x863   : >> { %v4612_v5 = vpop.f32.mrf.mxu1  ;;  %v5001_v17 = vpop.f32.mrf.mxu3 }
 0x864   : >> { %5358 = vst [vmem:[%s10607_s0 + $0x80] sm:$0xff] %v5325_v7  ;;  %v5063_v1 = vadd.f32 %v5001_v17, %v4867_v21  ;;  %v4672_v36 = vadd.f32 %v4612_v5, %v10514_v16 }
 0x866   : >> { %v5259_v45 = vadd.f32 %v5197_v30, %v5063_v1 }
 0x868   : >> { %v5294_v9 = vadd.f32 %v10598_v19, %v5259_v45 }
 0x869   : >> { %v4808_v41 = vpop.f32.mrf.mxu2  ;;  %v5200_v40 = vpop.f32.mrf.mxu0 }
 0x86a   : >> { %v5326_v10 = vmax.f32 %v5294_v9, 0.0  ;;  %v4868_v25 = vadd.f32 %v4808_v41, %v4672_v36 }
 0x86b   : >> { %v4615_v23 = vpop.f32.mrf.mxu1  ;;  %v5004_v8 = vpop.f32.mrf.mxu3 }
 0x86c   : >> { %5359 = vst [vmem:[%s10607_s0 + $0x88] sm:$0xff] %v5326_v10  ;;  %v5064_v28 = vadd.f32 %v5004_v8, %v4868_v25  ;;  %v4673_v0 = vadd.f32 %v4615_v23, %v10520_v55 }
 0x86e   : >> { %v5260_v52 = vadd.f32 %v5200_v40, %v5064_v28 }
 0x870   : >> { %v5295_v15 = vadd.f32 %v10598_v19, %v5260_v52 }
 0x871   : >> { %v4811_v26 = vpop.f32.mrf.mxu2  ;;  %v5203_v6 = vpop.f32.mrf.mxu0 }
 0x872   : >> { %v5327_v16 = vmax.f32 %v5295_v15, 0.0  ;;  %v4869_v62 = vadd.f32 %v4811_v26, %v4673_v0 }
 0x873   : >> { %v4618_v39 = vpop.f32.mrf.mxu1  ;;  %v5007_v29 = vpop.f32.mrf.mxu3 }
 0x874   : >> { %5360 = vst [vmem:[%s10607_s0 + $0x90] sm:$0xff] %v5327_v16  ;;  %v5065_v2 = vadd.f32 %v5007_v29, %v4869_v62  ;;  %v4674_v61 = vadd.f32 %v4618_v39, %v10526_v35 }
 0x876   : >> { %v5261_v60 = vadd.f32 %v5203_v6, %v5065_v2 }
 0x878   : >> { %v5296_v20 = vadd.f32 %v10598_v19, %v5261_v60 }
 0x879   : >> { %v4814_v54 = vpop.f32.mrf.mxu2  ;;  %v5206_v57 = vpop.f32.mrf.mxu0 }
 0x87a   : >> { %v5328_v55 = vmax.f32 %v5296_v20, 0.0  ;;  %v4870_v43 = vadd.f32 %v4814_v54, %v4674_v61 }
 0x87b   : >> { %v4621_v59 = vpop.f32.mrf.mxu1  ;;  %v5010_v47 = vpop.f32.mrf.mxu3 }
 0x87c   : >> { %5361 = vst [vmem:[%s10607_s0 + $0x98] sm:$0xff] %v5328_v55  ;;  %v5066_v53 = vadd.f32 %v5010_v47, %v4870_v43  ;;  %v4675_v14 = vadd.f32 %v4621_v59, %v10532_v50 }
 0x87e   : >> { %v5262_v42 = vadd.f32 %v5206_v57, %v5066_v53 }
 0x880   : >> { %v5297_v56 = vadd.f32 %v10598_v19, %v5262_v42 }
 0x881   : >> { %v4817_v27 = vpop.f32.mrf.mxu2  ;;  %v5209_v12 = vpop.f32.mrf.mxu0 }
 0x882   : >> { %v5329_v35 = vmax.f32 %v5297_v56, 0.0  ;;  %v4871_v18 = vadd.f32 %v4817_v27, %v4675_v14 }
 0x883   : >> { %v4624_v34 = vpop.f32.mrf.mxu1  ;;  %v5013_v24 = vpop.f32.mrf.mxu3 }
 0x884   : >> { %5362 = vst [vmem:[%s10607_s0 + $0xa0] sm:$0xff] %v5329_v35  ;;  %v5067_v11 = vadd.f32 %v5013_v24, %v4871_v18  ;;  %v4676_v49 = vadd.f32 %v4624_v34, %v10538_v33 }
 0x886   : >> { %v5263_v4 = vadd.f32 %v5209_v12, %v5067_v11 }
 0x888   : >> { %v5298_v51 = vadd.f32 %v10598_v19, %v5263_v4 }
 0x889   : >> { %v4820_v22 = vpop.f32.mrf.mxu2  ;;  %v5212_v13 = vpop.f32.mrf.mxu0 }
 0x88a   : >> { %v5330_v50 = vmax.f32 %v5298_v51, 0.0  ;;  %v4872_v38 = vadd.f32 %v4820_v22, %v4676_v49 }
 0x88b   : >> { %v4627_v30 = vpop.f32.mrf.mxu1  ;;  %v5016_v7 = vpop.f32.mrf.mxu3 }
 0x88c   : >> { %5363 = vst [vmem:[%s10607_s0 + $0xa8] sm:$0xff] %v5330_v50  ;;  %v5068_v21 = vadd.f32 %v5016_v7, %v4872_v38  ;;  %v4677_v17 = vadd.f32 %v4627_v30, %v10544_v31 }
 0x88e   : >> { %v5264_v5 = vadd.f32 %v5212_v13, %v5068_v21 }
 0x890   : >> { %v5299_v1 = vadd.f32 %v10598_v19, %v5264_v5 }
 0x891   : >> { %v4823_v45 = vpop.f32.mrf.mxu2  ;;  %v5215_v36 = vpop.f32.mrf.mxu0 }
 0x892   : >> { %v5331_v33 = vmax.f32 %v5299_v1, 0.0  ;;  %v4873_v9 = vadd.f32 %v4823_v45, %v4677_v17 }
 0x893   : >> { %v4630_v41 = vpop.f32.mrf.mxu1  ;;  %v5019_v40 = vpop.f32.mrf.mxu3 }
 0x894   : >> { %5364 = vst [vmem:[%s10607_s0 + $0xb0] sm:$0xff] %v5331_v33  ;;  %v5069_v10 = vadd.f32 %v5019_v40, %v4873_v9  ;;  %v4678_v23 = vadd.f32 %v4630_v41, %v10550_v48 }
 0x896   : >> { %v5265_v25 = vadd.f32 %v5215_v36, %v5069_v10 }
 0x898   : >> { %v5300_v8 = vadd.f32 %v10598_v19, %v5265_v25 }
 0x899   : >> { %v4826_v28 = vpop.f32.mrf.mxu2  ;;  %v5218_v52 = vpop.f32.mrf.mxu0 }
 0x89a   : >> { %v5332_v31 = vmax.f32 %v5300_v8, 0.0  ;;  %v4874_v0 = vadd.f32 %v4826_v28, %v4678_v23  ;;  %v11313_v23 = vld [vmem:[#allocation11_spill] sm:$0xff] }
 0x89b   : >> { %v4633_v15 = vpop.f32.mrf.mxu1  ;;  %v5022_v26 = vpop.f32.mrf.mxu3 }
 0x89c   : >> { %5365 = vst [vmem:[%s10607_s0 + $0xb8] sm:$0xff] %v5332_v31  ;;  %v5070_v6 = vadd.f32 %v5022_v26, %v4874_v0  ;;  %v4679_v62 = vadd.f32 %v4633_v15, %v10556_v63 }
 0x89e   : >> { %v5266_v16 = vadd.f32 %v5218_v52, %v5070_v6 }
 0x8a0   : >> { %v5301_v39 = vadd.f32 %v10598_v19, %v5266_v16 }
 0x8a1   : >> { %v4829_v29 = vpop.f32.mrf.mxu2  ;;  %v5221_v2 = vpop.f32.mrf.mxu0 }
 0x8a2   : >> { %v5333_v48 = vmax.f32 %v5301_v39, 0.0  ;;  %v4875_v60 = vadd.f32 %v4829_v29, %v4679_v62 }
 0x8a3   : >> { %v4636_v61 = vpop.f32.mrf.mxu1  ;;  %v5025_v20 = vpop.f32.mrf.mxu3 }
 0x8a4   : >> { %5366 = vst [vmem:[%s10607_s0 + $0xc0] sm:$0xff] %v5333_v48  ;;  %v5071_v54 = vadd.f32 %v5025_v20, %v4875_v60  ;;  %v4680_v55 = vadd.f32 %v4636_v61, %v10562_v32 }
 0x8a6   : >> { %v5267_v57 = vadd.f32 %v5221_v2, %v5071_v54 }
 0x8a8   : >> { %v5302_v43 = vadd.f32 %v10598_v19, %v5267_v57 }
 0x8a9   : >> { %v4832_v59 = vpop.f32.mrf.mxu2  ;;  %v5224_v47 = vpop.f32.mrf.mxu0 }
 0x8aa   : >> { %v5334_v63 = vmax.f32 %v5302_v43, 0.0  ;;  %v4876_v53 = vadd.f32 %v4832_v59, %v4680_v55 }
 0x8ab   : >> { %v4639_v42 = vpop.f32.mrf.mxu1  ;;  %v5028_v14 = vpop.f32.mrf.mxu3 }
 0x8ac   : >> { %5367 = vst [vmem:[%s10607_s0 + $0xc8] sm:$0xff] %v5334_v63  ;;  %v5072_v56 = vadd.f32 %v5028_v14, %v4876_v53  ;;  %v4681_v12 = vadd.f32 %v4639_v42, %v10568_v37 }
 0x8ae   : >> { %v5268_v27 = vadd.f32 %v5224_v47, %v5072_v56 }
 0x8b0   : >> { %v5303_v35 = vadd.f32 %v10598_v19, %v5268_v27 }
 0x8b1   : >> { %v4835_v18 = vpop.f32.mrf.mxu2  ;;  %v5227_v34 = vpop.f32.mrf.mxu0 }
 0x8b2   : >> { %v5335_v32 = vmax.f32 %v5303_v35, 0.0  ;;  %v4877_v24 = vadd.f32 %v4835_v18, %v4681_v12 }
 0x8b3   : >> { %v4642_v11 = vpop.f32.mrf.mxu1  ;;  %v5031_v4 = vpop.f32.mrf.mxu3 }
 0x8b4   : >> { %5368 = vst [vmem:[%s10607_s0 + $0xd0] sm:$0xff] %v5335_v32  ;;  %v5073_v49 = vadd.f32 %v5031_v4, %v4877_v24  ;;  %v4682_v22 = vadd.f32 %v4642_v11, %v10574_v3 }
 0x8b6   : >> { %v5269_v51 = vadd.f32 %v5227_v34, %v5073_v49 }
 0x8b8   : >> { %v5304_v13 = vadd.f32 %v10598_v19, %v5269_v51 }
 0x8b9   : >> { %v4838_v50 = vpop.f32.mrf.mxu2  ;;  %v5230_v38 = vpop.f32.mrf.mxu0 }
 0x8ba   : >> { %v5336_v37 = vmax.f32 %v5304_v13, 0.0  ;;  %v4878_v30 = vadd.f32 %v4838_v50, %v4682_v22 }
 0x8bb   : >> { %v4645_v7 = vpop.f32.mrf.mxu1  ;;  %v5034_v21 = vpop.f32.mrf.mxu3 }
 0x8bc   : >> { %5369 = vst [vmem:[%s10607_s0 + $0xd8] sm:$0xff] %v5336_v37  ;;  %v5074_v5 = vadd.f32 %v5034_v21, %v4878_v30  ;;  %v4683_v1 = vadd.f32 %v4645_v7, %v10580_v46 }
 0x8be   : >> { %v5270_v17 = vadd.f32 %v5230_v38, %v5074_v5 }
 0x8c0   : >> { %v5305_v45 = vadd.f32 %v10598_v19, %v5270_v17 }
 0x8c1   : >> { %v4841_v36 = vpop.f32.mrf.mxu2  ;;  %v5233_v33 = vpop.f32.mrf.mxu0 }
 0x8c2   : >> { %v5337_v3 = vmax.f32 %v5305_v45, 0.0  ;;  %v4879_v9 = vadd.f32 %v4841_v36, %v4683_v1 }
 0x8c3   : >> { %v4648_v41 = vpop.f32.mrf.mxu1  ;;  %v5037_v40 = vpop.f32.mrf.mxu3 }
 0x8c4   : >> { %5370 = vst [vmem:[%s10607_s0 + $0xe0] sm:$0xff] %v5337_v3  ;;  %v5075_v10 = vadd.f32 %v5037_v40, %v4879_v9  ;;  %v4684_v8 = vadd.f32 %v4648_v41, %v11313_v23 }
 0x8c6   : >> { %v5271_v25 = vadd.f32 %v5233_v33, %v5075_v10 }
 0x8c8   : >> { %v5306_v28 = vadd.f32 %v10598_v19, %v5271_v25 }
 0x8c9   : >> { %v4844_v52 = vpop.f32.mrf.mxu2  ;;  %v5236_v31 = vpop.f32.mrf.mxu0 }
 0x8ca   : >> { %v5338_v46 = vmax.f32 %v5306_v28, 0.0  ;;  %v4880_v0 = vadd.f32 %v4844_v52, %v4684_v8 }
 0x8cb   : >> { %v5040_v15 = vpop.f32.mrf.mxu3  ;;  %v4651_v6 = vpop.f32.mrf.mxu1 }
 0x8cc   : >> { %5371 = vst [vmem:[%s10607_s0 + $0xe8] sm:$0xff] %v5338_v46  ;;  %v5076_v26 = vadd.f32 %v5040_v15, %v4880_v0  ;;  %v4685_v62 = vadd.f32 %v4651_v6, %v10592_v58 }
 0x8ce   : >> { %v5272_v16 = vadd.f32 %v5236_v31, %v5076_v26 }
 0x8d0   : >> { %v5307_v39 = vadd.f32 %v10598_v19, %v5272_v16 }
 0x8d1   : >> { %v4847_v29 = vpop.f32.mrf.mxu2  ;;  %v5239_v61 = vpop.f32.mrf.mxu0 }
 0x8d2   : >> { %v5339_v2 = vmax.f32 %v5307_v39, 0.0  ;;  %v4881_v48 = vadd.f32 %v4847_v29, %v4685_v62 }
 0x8d3   : >> { %v5043_v60 = vpop.f32.mrf.mxu3 }
 0x8d4   : >> { %5372 = vst [vmem:[%s10607_s0 + $0xf0] sm:$0xff] %v5339_v2  ;;  %v5077_v20 = vadd.f32 %v5043_v60, %v4881_v48 }
 0x8d6   : >> { %v5273_v54 = vadd.f32 %v5239_v61, %v5077_v20 }
 0x8d8   : >> { %v5308_v57 = vadd.f32 %v10598_v19, %v5273_v54  ;;  %3573 = sbr.rel (!%p3571_p1) target bundleno = 1526 (0x5f6), region = 384 }
 0x8da   : >> { %v5340_v55 = vmax.f32 %v5308_v57, 0.0 }
 0x8dc   : >> { %5373 = vst [vmem:[%s10607_s0 + $0xf8] sm:$0xff] %v5340_v55 }
 0x8dd LB: >> { %s5380_s15 = smul.u32 160, %s7727_s30  ;;  %s7288_s22 = sshll.u32 %s7727_s30, 4  ;;  %s7727_s30 = sphi %s10750_s30, %s5379_s30  }
 0x8de   : >> { %s5409_s25 = scalar_lea.vmem [#allocation5], %s7288_s22  ;;  %s5379_s30 = sadd.s32 1, %s7727_s30  }
 0x8df   : >> { %s5381_s13 = scalar_lea.vmem [#allocation2], %s5380_s15  ;;  %p5376_p2 = scmp.ge.s32.totalorder %s5379_s30, 8  }
 0x8e0   : > { %v7308_v11 = vld [vmem:[%s11290_s7 + $0xf8] sm:$0xff] (%p5376_p2)  ;;  %v7307_v4 = vld [vmem:[%s11290_s7 + $0xf0] sm:$0xff] (%p5376_p2)  ;;  %v7306_v22 = vld [vmem:[%s11290_s7 + $0xe8] sm:$0xff] (%p5376_p2)  ;;  %s7422_s29 = sshll.u32 (%p5376_p2), %s7811_s21, 3  ;;  %s11316_s1 = sand.u32 (%p5376_p2), 1, %s7695_s18  }
 0x8e1   : > { %5475 = vmatpush.msra.mxu0 (%p5376_p2), %v7308_v11  ;;  %v7324_v49 = vld [vmem:[%s11290_s7 + $0x178] sm:$0xff] (%p5376_p2)  ;;  %v7323_v51 = vld [vmem:[%s11290_s7 + $0x170] sm:$0xff] (%p5376_p2)  ;;  %v7322_v38 = vld [vmem:[%s11290_s7 + $0x168] sm:$0xff] (%p5376_p2)  ;;  %s5895_s15 = scalar_lea.hbm (%p5376_p2), %s11294_s11, %s7422_s29  ;;  %s5885_s2 = scalar_lea.sflag (%p5376_p2), [#allocation8], %s11316_s1 }
 0x8e2   : > { %5540 = vmatpush.msra.mxu2 (%p5376_p2), %v7324_v49  ;;  %v7340_v13 = vld [vmem:[%s11290_s7 + $0x1f8] sm:$0xff] (%p5376_p2)  ;;  %v7339_v37 = vld [vmem:[%s11290_s7 + $0x1f0] sm:$0xff] (%p5376_p2)  ;;  %v7305_v30 = vld [vmem:[%s11290_s7 + $0xe0] sm:$0xff] (%p5376_p2)  ;;  %s5899_s24 = sshll.u32 (%p5376_p2), %s5895_s15, 4  ;;  %s7637_s0 = scalar_lea.hbm (%p5376_p2), %s11294_s11, 16  ;;  %s5900_s24 = int_to_ptr.hbm [resolvable:$true] %s5899_s24 }
 0x8e3   : >> { %v5382_v58 = vld [vmem:[%s5381_s13] sm:$0x3f]  ;;  %v7283_v19 = vld [vmem:[%s5381_s13 + $0x10] sm:$0x3f]  ;;  %v5449_v50 = vld [vmem:[%s11290_s7 + $0x78] sm:$0xff] (%p5376_p2)  ;;  %5476 = vmatpush.msra.mxu0 (%p5376_p2), %v7307_v4  ;;  %5586 = vmatpush.msra.mxu3 (%p5376_p2), %v7340_v13  ;;  %s7631_s21 = sshra.s32 (%p5376_p2), %s5900_s24, 4  ;;  %s7632_s21 = int_to_ptr.hbm [resolvable:$true] %s7631_s21 }
 0x8e4   : >> { %v7284_v43 = vld [vmem:[%s5381_s13 + $0x20] sm:$0x3f]  ;;  %v5386_v59 = vmax.f32 %v5382_v58, %v7283_v19  ;;  %v7285_v47 = vld [vmem:[%s5381_s13 + $0x30] sm:$0x3f]  ;;  %5541 = vmatpush.msra.mxu2 (%p5376_p2), %v7323_v51  ;;  %5495 = vmatpush.msra.mxu1 (%p5376_p2), %v5449_v50  ;;  %v7338_v21 = vld [vmem:[%s11290_s7 + $0x1e8] sm:$0xff] (%p5376_p2)  ;;  %s7633_s3 = scalar_lea.hbm (%p5376_p2), %s7632_s21, 8  ;;  %p7638_p8 = scmp.lt.s32.totalorder (%p5376_p2), %s7632_s21, %s11294_s11 }
 0x8e5   : >> { %v7286_v63 = vld [vmem:[%s5381_s13 + $0x40] sm:$0x3f]  ;;  %v7287_v53 = vld [vmem:[%s5381_s13 + $0x50] sm:$0x3f]  ;;  %v5394_v42 = vmax.f32 %v7284_v43, %v7285_v47  ;;  %5477 = vmatpush.msra.mxu0 (%p5376_p2), %v7306_v22  ;;  %5587 = vmatpush.msra.mxu3 (%p5376_p2), %v7339_v37  ;;  %v5447_v17 = vld [vmem:[%s11290_s7 + $0x68] sm:$0xff] (%p5376_p2)  ;;  %p7634_p3 = scmp.ne.s32.totalorder (%p5376_p2), %s7632_s21, %s7633_s3  ;;  %p7639_p9 = scmp.lt.s32.totalorder (%p5376_p2), %s7637_s0, %s7633_s3 }
 0x8e6   : >> { %v5402_v14 = vmax.f32 %v7286_v63, %v7287_v53  ;;  %5387 = vst [vmem:[#allocation6] sm:$0x3f] %v5386_v59  ;;  %v5448_v7 = vld [vmem:[%s11290_s7 + $0x70] sm:$0xff] (%p5376_p2)  ;;  %v7321_v5 = vld [vmem:[%s11290_s7 + $0x160] sm:$0xff] (%p5376_p2)  ;;  %v7304_v1 = vld [vmem:[%s11290_s7 + $0xd8] sm:$0xff] (%p5376_p2)  ;;  %5542 = vmatpush.msra.mxu2 (%p5376_p2), %v7322_v38 }
 0x8e7   : >> { %5395 = vst [vmem:[#allocation6 + $0x8] sm:$0x3f] %v5394_v42  ;;  %5496 = vmatpush.msra.mxu1 (%p5376_p2), %v5448_v7  ;;  %v7337_v45 = vld [vmem:[%s11290_s7 + $0x1e0] sm:$0xff] (%p5376_p2)  ;;  %5478 = vmatpush.msra.mxu0 (%p5376_p2), %v7305_v30  ;;  %v7320_v36 = vld [vmem:[%s11290_s7 + $0x158] sm:$0xff] (%p5376_p2)  ;;  %v7303_v3 = vld [vmem:[%s11290_s7 + $0xd0] sm:$0xff] (%p5376_p2)  ;;  %p7635_p4 = pnand (%p5376_p2), %p7634_p3, %p7828_p5  ;;  %p7640_p10 = por (%p5376_p2), %p7639_p9, %p7638_p8 }
 0x8e8   : >> { %5403 = vst [vmem:[#allocation6 + $0x10] sm:$0x3f] %v5402_v14  ;;  %5588 = vmatpush.msra.mxu3 (%p5376_p2), %v7338_v21  ;;  %v5446_v33 = vld [vmem:[%s11290_s7 + $0x60] sm:$0xff] (%p5376_p2)  ;;  %5543 = vmatpush.msra.mxu2 (%p5376_p2), %v7321_v5  ;;  %v7336_v9 = vld [vmem:[%s11290_s7 + $0x1d8] sm:$0xff] (%p5376_p2)  ;;  %v7319_v41 = vld [vmem:[%s11290_s7 + $0x150] sm:$0xff] (%p5376_p2) }
 0x8e9   : > { %5497 = vmatpush.msra.mxu1 (%p5376_p2), %v5447_v17  ;;  %5479 = vmatpush.msra.mxu0 (%p5376_p2), %v7304_v1  ;;  %v5445_v40 = vld [vmem:[%s11290_s7 + $0x58] sm:$0xff] (%p5376_p2)  ;;  %v7302_v10 = vld [vmem:[%s11290_s7 + $0xc8] sm:$0xff] (%p5376_p2)  ;;  %v7335_v25 = vld [vmem:[%s11290_s7 + $0x1d0] sm:$0xff] (%p5376_p2)  ;;  %p7636_p7 = pneg (%p5376_p2), %p7635_p4 }
 0x8ea   : > { %5589 = vmatpush.msra.mxu3 (%p5376_p2), %v7337_v45  ;;  %5544 = vmatpush.msra.mxu2 (%p5376_p2), %v7320_v36  ;;  %v7318_v23 = vld [vmem:[%s11290_s7 + $0x148] sm:$0xff] (%p5376_p2)  ;;  %v5444_v8 = vld [vmem:[%s11290_s7 + $0x50] sm:$0xff] (%p5376_p2)  ;;  %v7301_v28 = vld [vmem:[%s11290_s7 + $0xc0] sm:$0xff] (%p5376_p2) }
 0x8eb   : > { %5498 = vmatpush.msra.mxu1 (%p5376_p2), %v5446_v33  ;;  %5480 = vmatpush.msra.mxu0 (%p5376_p2), %v7303_v3  ;;  %v7334_v52 = vld [vmem:[%s11290_s7 + $0x1c8] sm:$0xff] (%p5376_p2)  ;;  %v7317_v31 = vld [vmem:[%s11290_s7 + $0x140] sm:$0xff] (%p5376_p2)  ;;  %v7300_v0 = vld [vmem:[%s11290_s7 + $0xb8] sm:$0xff] (%p5376_p2)  ;;  %p7641_p11 = pnand (%p5376_p2), %p7640_p10, %p7636_p7 }
 0x8ec   : > { %5590 = vmatpush.msra.mxu3 (%p5376_p2), %v7336_v9  ;;  %5545 = vmatpush.msra.mxu2 (%p5376_p2), %v7319_v41  ;;  %v5443_v46 = vld [vmem:[%s11290_s7 + $0x48] sm:$0xff] (%p5376_p2)  ;;  %v7333_v15 = vld [vmem:[%s11290_s7 + $0x1c0] sm:$0xff] (%p5376_p2)  ;;  %v7316_v26 = vld [vmem:[%s11290_s7 + $0x138] sm:$0xff] (%p5376_p2) }
 0x8ed   : >> { %v5404_v44 = vld [vmem:[#allocation6] ss:$2 sm:$0x7]  ;;  %v5406_v56 = vld [vmem:[#allocation6 + $0x1] ss:$2 sm:$0x7]  ;;  %5499 = vmatpush.msra.mxu1 (%p5376_p2), %v5445_v40  ;;  %5481 = vmatpush.msra.mxu0 (%p5376_p2), %v7302_v10 }
 0x8ee   : >> { %v5407_v27 = vmax.f32 %v5404_v44, %v5406_v56  ;;  %v5412_v12 = vld [vmem:[#allocation6 + $0x8] ss:$2 sm:$0x7]  ;;  %v5414_v35 = vld [vmem:[#allocation6 + $0x9] ss:$2 sm:$0x7]  ;;  %5591 = vmatpush.msra.mxu3 (%p5376_p2), %v7335_v25  ;;  %5546 = vmatpush.msra.mxu2 (%p5376_p2), %v7318_v23 }
 0x8ef   : >> { %v5415_v18 = vmax.f32 %v5412_v12, %v5414_v35  ;;  %v5420_v34 = vld [vmem:[#allocation6 + $0x10] ss:$2 sm:$0x7]  ;;  %v5422_v32 = vld [vmem:[#allocation6 + $0x11] ss:$2 sm:$0x7]  ;;  %5500 = vmatpush.msra.mxu1 (%p5376_p2), %v5444_v8  ;;  %5482 = vmatpush.msra.mxu0 (%p5376_p2), %v7301_v28 }
 0x8f0   : >> { %5410 = vst [vmem:[%s5409_s25] sm:$0x7] %v5407_v27  ;;  %v5423_v24 = vmax.f32 %v5420_v34, %v5422_v32  ;;  %5378 = sbr.rel (!%p5376_p2) target bundleno = 2269 (0x8dd), region = 395  ;;  %5592 = vmatpush.msra.mxu3 (%p5376_p2), %v7334_v52  ;;  %v5442_v6 = vld [vmem:[%s11290_s7 + $0x40] sm:$0xff] (%p5376_p2)  ;;  %v7299_v16 = vld [vmem:[%s11290_s7 + $0xb0] sm:$0xff] (%p5376_p2)  ;;  %5547 = vmatpush.msra.mxu2 (%p5376_p2), %v7317_v31  ;;  %v7332_v62 = vld [vmem:[%s11290_s7 + $0x1b8] sm:$0xff] (%p5376_p2) }
 0x8f1   : >> { %7290 = vst [vmem:[%s5409_s25 + $0x3] sm:$0x7] %v5415_v18  ;;  %5501 = vmatpush.msra.mxu1 (%p5376_p2), %v5443_v46  ;;  %5483 = vmatpush.msra.mxu0 (%p5376_p2), %v7300_v0  ;;  %v7315_v39 = vld [vmem:[%s11290_s7 + $0x130] sm:$0xff] (%p5376_p2)  ;;  %v5441_v29 = vld [vmem:[%s11290_s7 + $0x38] sm:$0xff] (%p5376_p2)  ;;  %v7298_v2 = vld [vmem:[%s11290_s7 + $0xa8] sm:$0xff] (%p5376_p2) }
 0x8f2   : >> { %7292 = vst [vmem:[%s5409_s25 + $0x6] sm:$0x7] %v5423_v24  ;;  %5593 = vmatpush.msra.mxu3 (%p5376_p2), %v7333_v15  ;;  %5548 = vmatpush.msra.mxu2 (%p5376_p2), %v7316_v26  ;;  %v7331_v48 = vld [vmem:[%s11290_s7 + $0x1b0] sm:$0xff] (%p5376_p2)  ;;  %v7314_v60 = vld [vmem:[%s11290_s7 + $0x128] sm:$0xff] (%p5376_p2)  ;;  %v7297_v20 = vld [vmem:[%s11290_s7 + $0xa0] sm:$0xff] (%p5376_p2)  ;;  %s11314_s25 = scalar_lea.vmem (%p5376_p2), [#allocation7], %s7842_s12 }
 0x8f3   : > { %5502 = vmatpush.msra.mxu1 (%p5376_p2), %v5442_v6  ;;  %5484 = vmatpush.msra.mxu0 (%p5376_p2), %v7299_v16  ;;  %v5440_v61 = vld [vmem:[%s11290_s7 + $0x30] sm:$0xff] (%p5376_p2)  ;;  %v7330_v54 = vld [vmem:[%s11290_s7 + $0x1a8] sm:$0xff] (%p5376_p2)  ;;  %v7313_v57 = vld [vmem:[%s11290_s7 + $0x120] sm:$0xff] (%p5376_p2)  ;;  %s5897_s30 = sshll.u32 (%p5376_p2), %s11314_s25, 4  ;;  %s11315_s14 = smov (%p5376_p2), %s11314_s25  ;;  %s5898_s30 = int_to_ptr.vmem [resolvable:$true] %s5897_s30 }
 0x8f4   : > { %5594 = vmatpush.msra.mxu3 (%p5376_p2), %v7332_v62  ;;  %5549 = vmatpush.msra.mxu2 (%p5376_p2), %v7315_v39  ;;  %v5439_v55 = vld [vmem:[%s11290_s7 + $0x28] sm:$0xff] (%p5376_p2)  ;;  %v7296_v58 = vld [vmem:[%s11290_s7 + $0x98] sm:$0xff] (%p5376_p2)  ;;  %v7329_v19 = vld [vmem:[%s11290_s7 + $0x1a0] sm:$0xff] (%p5376_p2) }
 0x8f5   : > { %5503 = vmatpush.msra.mxu1 %v5441_v29  ;;  %5485 = vmatpush.msra.mxu0 %v7298_v2  ;;  %v7312_v43 = vld [vmem:[%s11290_s7 + $0x118] sm:$0xff]  ;;  %v5438_v59 = vld [vmem:[%s11290_s7 + $0x20] sm:$0xff]  ;;  %v7295_v47 = vld [vmem:[%s11290_s7 + $0x90] sm:$0xff] }
 0x8f6   : > { %5595 = vmatpush.msra.mxu3 %v7331_v48  ;;  %5550 = vmatpush.msra.mxu2 %v7314_v60  ;;  %v7328_v63 = vld [vmem:[%s11290_s7 + $0x198] sm:$0xff]  ;;  %v7311_v53 = vld [vmem:[%s11290_s7 + $0x110] sm:$0xff]  ;;  %v7294_v14 = vld [vmem:[%s11290_s7 + $0x88] sm:$0xff] }
 0x8f7   : > { %5504 = vmatpush.msra.mxu1 %v5440_v61  ;;  %5486 = vmatpush.msra.mxu0 %v7297_v20  ;;  %v5437_v42 = vld [vmem:[%s11290_s7 + $0x18] sm:$0xff]  ;;  %v7327_v44 = vld [vmem:[%s11290_s7 + $0x190] sm:$0xff]  ;;  %v7310_v56 = vld [vmem:[%s11290_s7 + $0x108] sm:$0xff] }
 0x8f8   : > { %5596 = vmatpush.msra.mxu3 %v7330_v54  ;;  %5551 = vmatpush.msra.mxu2 %v7313_v57  ;;  %v5436_v27 = vld [vmem:[%s11290_s7 + $0x10] sm:$0xff]  ;;  %v7293_v12 = vld [vmem:[%s11290_s7 + $0x80] sm:$0xff]  ;;  %v7326_v35 = vld [vmem:[%s11290_s7 + $0x188] sm:$0xff] }
 0x8f9   : > { %5505 = vmatpush.msra.mxu1 %v5439_v55  ;;  %5487 = vmatpush.msra.mxu0 %v7296_v58  ;;  %v7356_v18 = vld [vmem:[%s11290_s7 + $0x278] sm:$0xff]  ;;  %v7309_v34 = vld [vmem:[%s11290_s7 + $0x100] sm:$0xff]  ;;  %v5435_v24 = vld [vmem:[%s11290_s7 + $0x8] sm:$0xff] }
 0x8fa   : > { %5597 = vmatpush.msra.mxu3 %v7329_v19  ;;  %5552 = vmatpush.msra.mxu2 %v7312_v43  ;;  %v7388_v32 = vld [vmem:[%s11290_s7 + $0x378] sm:$0xff]  ;;  %v7355_v11 = vld [vmem:[%s11290_s7 + $0x270] sm:$0xff]  ;;  %v7325_v4 = vld [vmem:[%s11290_s7 + $0x180] sm:$0xff] }
 0x8fb   : > { %5506 = vmatpush.msra.mxu1 %v5438_v59  ;;  %5488 = vmatpush.msra.mxu0 %v7295_v47  ;;  %v7387_v49 = vld [vmem:[%s11290_s7 + $0x370] sm:$0xff]  ;;  %v7404_v51 = vld [vmem:[%s11290_s7 + $0x3f8] sm:$0xff]  ;;  %v7354_v22 = vld [vmem:[%s11290_s7 + $0x268] sm:$0xff] }
 0x8fc   : > { %5598 = vmatpush.msra.mxu3 %v7328_v63  ;;  %5553 = vmatpush.msra.mxu2 %v7311_v53  ;;  %v5434_v13 = vld [vmem:[%s11290_s7] sm:$0xff]  ;;  %v7372_v50 = vld [vmem:[%s11290_s7 + $0x2f8] sm:$0xff]  ;;  %v7386_v38 = vld [vmem:[%s11290_s7 + $0x368] sm:$0xff] }
 0x8fd   : > { %5507 = vmatpush.msra.mxu1 %v5437_v42  ;;  %5489 = vmatpush.msra.mxu0 %v7294_v14  ;;  %v7353_v37 = vld [vmem:[%s11290_s7 + $0x260] sm:$0xff]  ;;  %v7403_v30 = vld [vmem:[%s11290_s7 + $0x3f0] sm:$0xff]  ;;  %v7352_v5 = vld [vmem:[%s11290_s7 + $0x258] sm:$0xff] }
 0x8fe   : > { %5599 = vmatpush.msra.mxu3 %v7327_v44  ;;  %5554 = vmatpush.msra.mxu2 %v7310_v56  ;;  %v7371_v7 = vld [vmem:[%s11290_s7 + $0x2f0] sm:$0xff]  ;;  %v7385_v21 = vld [vmem:[%s11290_s7 + $0x360] sm:$0xff]  ;;  %v7402_v17 = vld [vmem:[%s11290_s7 + $0x3e8] sm:$0xff] }
 0x8ff   : > { %5508 = vmatpush.msra.mxu1 %v5436_v27  ;;  %5490 = vmatpush.msra.mxu0 %v7293_v12  ;;  %v7370_v1 = vld [vmem:[%s11290_s7 + $0x2e8] sm:$0xff]  ;;  %v7384_v45 = vld [vmem:[%s11290_s7 + $0x358] sm:$0xff]  ;;  %v7351_v36 = vld [vmem:[%s11290_s7 + $0x250] sm:$0xff] }
 0x900   : > { %5600 = vmatpush.msra.mxu3 %v7326_v35  ;;  %5555 = vmatpush.msra.mxu2 %v7309_v34  ;;  %v7350_v33 = vld [vmem:[%s11290_s7 + $0x248] sm:$0xff]  ;;  %v7401_v3 = vld [vmem:[%s11290_s7 + $0x3e0] sm:$0xff]  ;;  %v7383_v41 = vld [vmem:[%s11290_s7 + $0x350] sm:$0xff] }
 0x901   : > { %5632 = vmatpush.msrb.mxu0 %v7356_v18  ;;  %5509 = vmatpush.msra.mxu1 %v5435_v24  ;;  %v7369_v9 = vld [vmem:[%s11290_s7 + $0x2e0] sm:$0xff]  ;;  %v7400_v40 = vld [vmem:[%s11290_s7 + $0x3d8] sm:$0xff]  ;;  %v7382_v23 = vld [vmem:[%s11290_s7 + $0x348] sm:$0xff] }
 0x902   : > { %5724 = vmatpush.msrb.mxu2 %v7388_v32  ;;  %5601 = vmatpush.msra.mxu3 %v7325_v4  ;;  %v7349_v10 = vld [vmem:[%s11290_s7 + $0x240] sm:$0xff]  ;;  %v7368_v25 = vld [vmem:[%s11290_s7 + $0x2d8] sm:$0xff]  ;;  %v7399_v8 = vld [vmem:[%s11290_s7 + $0x3d0] sm:$0xff] }
 0x903   : > { %5633 = vmatpush.msrb.mxu0 %v7355_v11  ;;  %5510 = vmatpush.msra.mxu1 %v5434_v13  ;;  %v5516_v28 = vld [vmem:[#allocation5 + $0x2] ss:$16 sm:$0x3]  ;;  %v7348_v31 = vld [vmem:[%s11290_s7 + $0x238] sm:$0xff]  ;;  %v7398_v15 = vld [vmem:[%s11290_s7 + $0x3c8] sm:$0xff] }
 0x904   : > { %5725 = vmatpush.msrb.mxu2 %v7387_v49  ;;  %5770 = vmatpush.msrb.mxu3 %v7404_v51  ;;  %v5517_v52 = vld [vmem:[#allocation5 + $0x2] ss:$16 sm:$0xc]  ;;  %v7366_v26 = vld [vmem:[%s11290_s7 + $0x2c8] sm:$0xff]  ;;  %v7380_v6 = vld [vmem:[%s11290_s7 + $0x338] sm:$0xff] }
 0x905   : > { %5634 = vmatpush.msrb.mxu0 %v7354_v22  ;;  %5678 = vmatpush.msrb.mxu1 %v7372_v50  ;;  %v7367_v46 = vld [vmem:[%s11290_s7 + $0x2d0] sm:$0xff]  ;;  %v7381_v0 = vld [vmem:[%s11290_s7 + $0x340] sm:$0xff]  ;;  %v5518_v29 = vor.u32 %v5517_v52, %v5516_v28  ;;  %v7346_v54 = vld [vmem:[%s11290_s7 + $0x228] sm:$0xff] }
 0x906   : > { %5726 = vmatpush.msrb.mxu2 %v7386_v38  ;;  %5771 = vmatpush.msrb.mxu3 %v7403_v30  ;;  %v5451_v16 = vld [vmem:[#allocation5 + $0x1] ss:$16 sm:$0x3]  ;;  %v5562_v2 = vld [vmem:[#allocation5 + $0x3] ss:$16 sm:$0x3] }
 0x907   : > { %5635 = vmatpush.msrb.mxu0 %v7353_v37  ;;  %5679 = vmatpush.msrb.mxu1 %v7371_v7  ;;  %v5452_v62 = vld [vmem:[#allocation5 + $0x1] ss:$16 sm:$0xc]  ;;  %v5563_v48 = vld [vmem:[#allocation5 + $0x3] ss:$16 sm:$0xc] }
 0x908   : > { %5727 = vmatpush.msrb.mxu2 %v7385_v21  ;;  %5772 = vmatpush.msrb.mxu3 %v7402_v17  ;;  %v7347_v39 = vld [vmem:[%s11290_s7 + $0x230] sm:$0xff]  ;;  %v7397_v60 = vld [vmem:[%s11290_s7 + $0x3c0] sm:$0xff]  ;;  %v7396_v55 = vld [vmem:[%s11290_s7 + $0x3b8] sm:$0xff]  ;;  %v5453_v58 = vor.u32 %v5452_v62, %v5451_v16  ;;  %v5564_v59 = vor.u32 %v5563_v48, %v5562_v2 }
 0x909   : > { %5636 = vmatpush.msrb.mxu0 %v7352_v5  ;;  %5680 = vmatpush.msrb.mxu1 %v7370_v1  ;;  %v7365_v61 = vld [vmem:[%s11290_s7 + $0x2c0] sm:$0xff]  ;;  %v7379_v57 = vld [vmem:[%s11290_s7 + $0x330] sm:$0xff]  ;;  %v7364_v43 = vld [vmem:[%s11290_s7 + $0x2b8] sm:$0xff] }
 0x90a   : > { %5728 = vmatpush.msrb.mxu2 %v7384_v45  ;;  %5773 = vmatpush.msrb.mxu3 %v7401_v3  ;;  %v5519_v20 = vld [vmem:[#allocation5 + $0x2] ss:$16 sm:$0x30]  ;;  %v5454_v19 = vld [vmem:[#allocation5 + $0x1] ss:$16 sm:$0x30] }
 0x90b   : > { %5637 = vmatpush.msrb.mxu0 %v7351_v36  ;;  %5681 = vmatpush.msrb.mxu1 %v7369_v9  ;;  %v5427_v47 = vld [vmem:[#allocation5] ss:$16 sm:$0x3]  ;;  %v7378_v42 = vld [vmem:[%s11290_s7 + $0x328] sm:$0xff]  ;;  %v5520_v44 = vor.u32 %v5519_v20, %v5518_v29  ;;  %v7344_v18 = vld [vmem:[%s11290_s7 + $0x218] sm:$0xff]  ;;  %v5455_v32 = vor.u32 %v5454_v19, %v5453_v58 }
 0x90c   : > { %5729 = vmatpush.msrb.mxu2 %v7383_v41  ;;  %5774 = vmatpush.msrb.mxu3 %v7400_v40  ;;  %v5428_v63 = vld [vmem:[#allocation5] ss:$16 sm:$0xc]  ;;  %v5565_v56 = vld [vmem:[#allocation5 + $0x3] ss:$16 sm:$0x30] }
 0x90d   : > { %5638 = vmatpush.msrb.mxu0 %v7350_v33  ;;  %5682 = vmatpush.msrb.mxu1 %v7368_v25  ;;  %v7345_v53 = vld [vmem:[%s11290_s7 + $0x220] sm:$0xff]  ;;  %v7395_v14 = vld [vmem:[%s11290_s7 + $0x3b0] sm:$0xff]  ;;  %v7394_v34 = vld [vmem:[%s11290_s7 + $0x3a8] sm:$0xff]  ;;  %v5429_v11 = vor.u32 %v5428_v63, %v5427_v47  ;;  %v5566_v49 = vor.u32 %v5565_v56, %v5564_v59 }
 0x90e   : > { %5730 = vmatpush.msrb.mxu2 %v7382_v23  ;;  %5775 = vmatpush.msrb.mxu3 %v7399_v8  ;;  %v7363_v27 = vld [vmem:[%s11290_s7 + $0x2b0] sm:$0xff]  ;;  %v7377_v12 = vld [vmem:[%s11290_s7 + $0x320] sm:$0xff]  ;;  %v7362_v38 = vld [vmem:[%s11290_s7 + $0x2a8] sm:$0xff] }
 0x90f   : > { %5639 = vmatpush.msrb.mxu0 %v7349_v10  ;;  %5683 = vmatpush.msrb.mxu1 %v7367_v46  ;;  %v5521_v35 = vld [vmem:[#allocation5 + $0x2] ss:$16 sm:$0xc0]  ;;  %v5456_v24 = vld [vmem:[#allocation5 + $0x1] ss:$16 sm:$0xc0] }
 0x910   : > { %5731 = vmatpush.msrb.mxu2 %v7381_v0  ;;  %5776 = vmatpush.msrb.mxu3 %v7398_v15  ;;  %v5430_v4 = vld [vmem:[#allocation5] ss:$16 sm:$0x30]  ;;  %v5700_v51 = vld [vmem:[#allocation5 + $0x6] ss:$16 sm:$0x3]  ;;  %v5522_v50 = vor.u32 %v5521_v35, %v5520_v44  ;;  %v5457_v1 = vor.u32 %v5456_v24, %v5455_v32 }
 0x911   : > { %5640 = vmatpush.msrb.mxu0 %v7348_v31  ;;  %5684 = vmatpush.msrb.mxu1 %v7366_v26  ;;  %v5701_v22 = vld [vmem:[#allocation5 + $0x6] ss:$16 sm:$0xc]  ;;  %v7376_v37 = vld [vmem:[%s11290_s7 + $0x318] sm:$0xff]  ;;  %v7342_v17 = vld [vmem:[%s11290_s7 + $0x208] sm:$0xff]  ;;  %v5431_v45 = vor.u32 %v5430_v4, %v5429_v11 }
 0x912   : > { %5732 = vmatpush.msrb.mxu2 %v7380_v6  ;;  %5777 = vmatpush.msrb.mxu3 %v7397_v60  ;;  %v7343_v13 = vld [vmem:[%s11290_s7 + $0x210] sm:$0xff]  ;;  %v7393_v7 = vld [vmem:[%s11290_s7 + $0x3a0] sm:$0xff]  ;;  %v5702_v36 = vor.u32 %v5701_v22, %v5700_v51  ;;  %v7392_v0 = vld [vmem:[%s11290_s7 + $0x398] sm:$0xff] }
 0x913   : > { %5641 = vmatpush.msrb.mxu0 %v7347_v39  ;;  %5685 = vmatpush.msrb.mxu1 %v7365_v61  ;;  %v5567_v30 = vld [vmem:[#allocation5 + $0x3] ss:$16 sm:$0xc0]  ;;  %v5608_v21 = vld [vmem:[#allocation5 + $0x4] ss:$16 sm:$0x3] }
 0x914   : > { %5733 = vmatpush.msrb.mxu2 %v7379_v57  ;;  %5778 = vmatpush.msrb.mxu3 %v7396_v55  ;;  %v5609_v5 = vld [vmem:[#allocation5 + $0x4] ss:$16 sm:$0xc]  ;;  %v5746_v33 = vld [vmem:[#allocation5 + $0x7] ss:$16 sm:$0x3]  ;;  %v5568_v9 = vor.u32 %v5567_v30, %v5566_v49 }
 0x915   : > { %5642 = vmatpush.msrb.mxu0 %v7346_v54  ;;  %5686 = vmatpush.msrb.mxu1 %v7364_v43  ;;  %v5747_v3 = vld [vmem:[#allocation5 + $0x7] ss:$16 sm:$0xc]  ;;  %v5432_v41 = vld [vmem:[#allocation5] ss:$16 sm:$0xc0]  ;;  %v5610_v10 = vor.u32 %v5609_v5, %v5608_v21 }
 0x916   : > { %5734 = vmatpush.msrb.mxu2 %v7378_v42  ;;  %5779 = vmatpush.msrb.mxu3 %v7395_v14  ;;  %v5703_v40 = vld [vmem:[#allocation5 + $0x6] ss:$16 sm:$0x30]  ;;  %v5654_v25 = vld [vmem:[#allocation5 + $0x5] ss:$16 sm:$0x3]  ;;  %v5748_v31 = vor.u32 %v5747_v3, %v5746_v33  ;;  %v5433_v15 = vor.u32 %v5432_v41, %v5431_v45 }
 0x917   : > { %5643 = vmatpush.msrb.mxu0 %v7345_v53  ;;  %5687 = vmatpush.msrb.mxu1 %v7363_v27  ;;  %v5655_v23 = vld [vmem:[#allocation5 + $0x5] ss:$16 sm:$0xc]  ;;  %v5611_v52 = vld [vmem:[#allocation5 + $0x4] ss:$16 sm:$0x30]  ;;  %v5704_v26 = vor.u32 %v5703_v40, %v5702_v36 }
 0x918   : > { %5735 = vmatpush.msrb.mxu2 %v7377_v12  ;;  %5780 = vmatpush.msrb.mxu3 %v7394_v34  ;;  %v7361_v8 = vld [vmem:[%s11290_s7 + $0x2a0] sm:$0xff]  ;;  %v7375_v28 = vld [vmem:[%s11290_s7 + $0x310] sm:$0xff]  ;;  %v7420_v16 = vld [vmem:[%s11290_s7 + $0x478] sm:$0xff]  ;;  %v5656_v39 = vor.u32 %v5655_v23, %v5654_v25  ;;  %v5612_v48 = vor.u32 %v5611_v52, %v5610_v10 }
 0x919   : > { %5644 = vmatpush.msrb.mxu0 %v7344_v18  ;;  %5556 = vmatmul.f32.vlgmr.msra.gmra.mxu2 %v5522_v50  ;;  %v7341_v46 = vld [vmem:[%s11290_s7 + $0x200] sm:$0xff]  ;;  %v7360_v29 = vld [vmem:[%s11290_s7 + $0x298] sm:$0xff]  ;;  %v7374_v2 = vld [vmem:[%s11290_s7 + $0x308] sm:$0xff] }
 0x91a   : > { %5688 = vmatpush.msrb.mxu1 %v7362_v38  ;;  %5736 = vmatpush.msrb.mxu2 %v7376_v37  ;;  %v5749_v6 = vld [vmem:[#allocation5 + $0x7] ss:$16 sm:$0x30]  ;;  %v5705_v62 = vld [vmem:[#allocation5 + $0x6] ss:$16 sm:$0xc0] }
 0x91b   : > { %5645 = vmatpush.msrb.mxu0 %v7343_v13  ;;  %5781 = vmatpush.msrb.mxu3 %v7393_v7  ;;  %v5657_v60 = vld [vmem:[#allocation5 + $0x5] ss:$16 sm:$0x30]  ;;  %v5613_v54 = vld [vmem:[#allocation5 + $0x4] ss:$16 sm:$0xc0]  ;;  %v5750_v57 = vor.u32 %v5749_v6, %v5748_v31  ;;  %v5706_v19 = vor.u32 %v5705_v62, %v5704_v26 }
 0x91c   : > { %5491 = vmatmul.f32.vlgmr.msra.gmra.mxu0 %v5457_v1  ;;  %5602 = vmatmul.f32.vlgmr.msra.gmra.mxu3 %v5568_v9  ;;  %v7391_v61 = vld [vmem:[%s11290_s7 + $0x390] sm:$0xff]  ;;  %v7373_v58 = vld [vmem:[%s11290_s7 + $0x300] sm:$0xff]  ;;  %v7390_v59 = vld [vmem:[%s11290_s7 + $0x388] sm:$0xff]  ;;  %v5658_v63 = vor.u32 %v5657_v60, %v5656_v39  ;;  %v5614_v42 = vor.u32 %v5613_v54, %v5612_v48 }
 0x91d   : > { %5646 = vmatpush.msrb.mxu0 %v7342_v17  ;;  %5689 = vmatpush.msrb.mxu1 %v7361_v8  ;;  %v7419_v20 = vld [vmem:[%s11290_s7 + $0x470] sm:$0xff]  ;;  %v7418_v47 = vld [vmem:[%s11290_s7 + $0x468] sm:$0xff]  ;;  %v7389_v44 = vld [vmem:[%s11290_s7 + $0x380] sm:$0xff] }
 0x91e   : > { %5737 = vmatpush.msrb.mxu2 %v7375_v28  ;;  %5782 = vmatpush.msrb.mxu3 %v7392_v0  ;;  %v7359_v55 = vld [vmem:[%s11290_s7 + $0x290] sm:$0xff]  ;;  %v7358_v53 = vld [vmem:[%s11290_s7 + $0x288] sm:$0xff]  ;;  %v7417_v27 = vld [vmem:[%s11290_s7 + $0x460] sm:$0xff] }
 0x91f   : > { %5647 = vmatpush.msrb.mxu0 %v7341_v46  ;;  %5511 = vmatmul.f32.vlgmr.msra.gmra.mxu1 %v5433_v15  ;;  %v5751_v43 = vld [vmem:[#allocation5 + $0x7] ss:$16 sm:$0xc0]  ;;  %v5659_v14 = vld [vmem:[#allocation5 + $0x5] ss:$16 sm:$0xc0] }
 0x920   : > { %5690 = vmatpush.msrb.mxu1 %v7360_v29  ;;  %5738 = vmatpush.msrb.mxu2 %v7374_v2  ;;  %v5752_v56 = vor.u32 %v5751_v43, %v5750_v57  ;;  %v7357_v12 = vld [vmem:[%s11290_s7 + $0x280] sm:$0xff]  ;;  %v5660_v35 = vor.u32 %v5659_v14, %v5658_v63  ;;  %v7416_v18 = vld [vmem:[%s11290_s7 + $0x458] sm:$0xff]  ;;  %v7415_v34 = vld [vmem:[%s11290_s7 + $0x450] sm:$0xff] }
 0x921   : > { %5816 = vmatpush.msra.mxu0 %v7420_v16  ;;  %5783 = vmatpush.msrb.mxu3 %v7391_v61  ;;  %v7414_v32 = vld [vmem:[%s11290_s7 + $0x448] sm:$0xff]  ;;  %v7413_v24 = vld [vmem:[%s11290_s7 + $0x440] sm:$0xff]  ;;  %v7412_v11 = vld [vmem:[%s11290_s7 + $0x438] sm:$0xff] }
 0x922   : > { %5691 = vmatpush.msrb.mxu1 %v7359_v55  ;;  %5739 = vmatpush.msrb.mxu2 %v7373_v58  ;;  %v7411_v4 = vld [vmem:[%s11290_s7 + $0x430] sm:$0xff]  ;;  %v5792_v49 = vld [vmem:[#allocation5 + $0x8] ss:$16 sm:$0x3]  ;;  %v7409_v13 = vld [vmem:[%s11290_s7 + $0x420] sm:$0xff] }
 0x923   : > { %5817 = vmatpush.msra.mxu0 %v7419_v20  ;;  %5784 = vmatpush.msrb.mxu3 %v7390_v59  ;;  %v5793_v51 = vld [vmem:[#allocation5 + $0x8] ss:$16 sm:$0xc]  ;;  %v7407_v30 = vld [vmem:[%s11290_s7 + $0x410] sm:$0xff]  ;;  %v7405_v17 = vld [vmem:[%s11290_s7 + $0x400] sm:$0xff] }
 0x924   : > { %5740 = vmatmul.f32.vlgmr.msrb.gmra.mxu2 %v5706_v19  ;;  %5692 = vmatpush.msrb.mxu1 %v7358_v53  ;;  %v7410_v22 = vld [vmem:[%s11290_s7 + $0x428] sm:$0xff]  ;;  %v5794_v50 = vor.u32 %v5793_v51, %v5792_v49  ;;  %v7408_v37 = vld [vmem:[%s11290_s7 + $0x418] sm:$0xff]  ;;  %v5857_v36 = vld [vmem:[%s11292_s9 + $0x70] sm:$0xff] }
 0x925   : > { %5818 = vmatpush.msra.mxu0 %v7418_v47  ;;  %5785 = vmatpush.msrb.mxu3 %v7389_v44  ;;  %v5795_v38 = vld [vmem:[#allocation5 + $0x8] ss:$16 sm:$0x30]  ;;  %v5855_v3 = vld [vmem:[%s11292_s9 + $0x60] sm:$0xff]  ;;  %v5853_v41 = vld [vmem:[%s11292_s9 + $0x50] sm:$0xff] }
 0x926   : > { %5648 = vmatmul.f32.vlgmr.msrb.gmra.mxu0 %v5614_v42  ;;  %5786 = vmatmul.f32.vlgmr.msrb.gmra.mxu3 %v5752_v56  ;;  %v5796_v7 = vor.u32 %v5795_v38, %v5794_v50  ;;  %v5797_v21 = vld [vmem:[#allocation5 + $0x8] ss:$16 sm:$0xc0]  ;;  %v5851_v10 = vld [vmem:[%s11292_s9 + $0x40] sm:$0xff]  ;;  %v5849_v23 = vld [vmem:[%s11292_s9 + $0x30] sm:$0xff] }
 0x927   : > { %5819 = vmatpush.msra.mxu0 %v7417_v27  ;;  %5693 = vmatpush.msrb.mxu1 %v7357_v12  ;;  %v7406_v5 = vld [vmem:[%s11290_s7 + $0x408] sm:$0xff]  ;;  %v5858_v45 = vld [vmem:[%s11292_s9 + $0x78] sm:$0xff]  ;;  %v5847_v28 = vld [vmem:[%s11292_s9 + $0x20] sm:$0xff] }
 0x928   : > { %5694 = vmatmul.f32.vlgmr.msrb.gmra.mxu1 %v5660_v35  ;;  %v5798_v1 = vor.u32 %v5797_v21, %v5796_v7  ;;  %v5856_v33 = vld [vmem:[%s11292_s9 + $0x68] sm:$0xff]  ;;  %v5854_v9 = vld [vmem:[%s11292_s9 + $0x58] sm:$0xff]  ;;  %v5845_v31 = vld [vmem:[%s11292_s9 + $0x10] sm:$0xff] }
 0x929   : > { %5820 = vmatpush.msra.mxu0 %v7416_v18  ;;  %5863 = vmatpush.msra.mxu1 %v5858_v45  ;;  %v5852_v40 = vld [vmem:[%s11292_s9 + $0x48] sm:$0xff]  ;;  %v5850_v25 = vld [vmem:[%s11292_s9 + $0x38] sm:$0xff]  ;;  %v5843_v15 = vld [vmem:[%s11292_s9] sm:$0xff] }
 0x92a   : > { %v5848_v8 = vld [vmem:[%s11292_s9 + $0x28] sm:$0xff]  ;;  %v5846_v52 = vld [vmem:[%s11292_s9 + $0x18] sm:$0xff]  ;;  %v7615_v58 = vld [vmem:[%s11291_s8] ss:$0 sm:$0xff] }
 0x92b   : > { %5821 = vmatpush.msra.mxu0 %v7415_v34  ;;  %5864 = vmatpush.msra.mxu1 %v5857_v36  ;;  %v5844_v46 = vld [vmem:[%s11292_s9 + $0x8] sm:$0xff]  ;;  %v7616_v63 = vld [vmem:[%s11293_s10] ss:$0 sm:$0xff] }
 0x92d   : > { %5822 = vmatpush.msra.mxu0 %v7414_v32  ;;  %5865 = vmatpush.msra.mxu1 %v5856_v33 }
 0x92f   : > { %5823 = vmatpush.msra.mxu0 %v7413_v24  ;;  %5866 = vmatpush.msra.mxu1 %v5855_v3 }
 0x931   : > { %5824 = vmatpush.msra.mxu0 %v7412_v11  ;;  %5867 = vmatpush.msra.mxu1 %v5854_v9 }
 0x933   : > { %5825 = vmatpush.msra.mxu0 %v7411_v4  ;;  %5868 = vmatpush.msra.mxu1 %v5853_v41 }
 0x935   : > { %5826 = vmatpush.msra.mxu0 %v7410_v22  ;;  %5869 = vmatpush.msra.mxu1 %v5852_v40 }
 0x937   : > { %5827 = vmatpush.msra.mxu0 %v7409_v13  ;;  %5870 = vmatpush.msra.mxu1 %v5851_v10 }
 0x939   : > { %5828 = vmatpush.msra.mxu0 %v7408_v37  ;;  %5871 = vmatpush.msra.mxu1 %v5850_v25 }
 0x93b   : > { %5829 = vmatpush.msra.mxu0 %v7407_v30  ;;  %5872 = vmatpush.msra.mxu1 %v5849_v23 }
 0x93d   : > { %5830 = vmatpush.msra.mxu0 %v7406_v5  ;;  %5873 = vmatpush.msra.mxu1 %v5848_v8 }
 0x93f   : > { %5831 = vmatpush.msra.mxu0 %v7405_v17  ;;  %5874 = vmatpush.msra.mxu1 %v5847_v28 }
 0x940   : > { %5832 = vmatmul.f32.vlgmr.msra.gmra.mxu0 %v5798_v1 }
 0x941   : > { %5875 = vmatpush.msra.mxu1 %v5846_v52 }
 0x943   : > { %5876 = vmatpush.msra.mxu1 %v5845_v31 }
 0x945   : > { %5877 = vmatpush.msra.mxu1 %v5844_v46 }
 0x947   : > { %5878 = vmatpush.msra.mxu1 %v5843_v15 }
 0x999   : > { %v5492_v26 = vpop.f32.mrf.mxu0 }
 0x99c   : > { %v5512_v0 = vpop.f32.mrf.mxu1  ;;  %v5557_v16 = vpop.f32.mrf.mxu2 }
 0x99d   : > { %v5513_v6 = vadd.f32 %v5512_v0, %v5492_v26 }
 0x99f   : > { %v5560_v62 = vadd.f32 %v5557_v16, %v5513_v6  ;;  %v5603_v39 = vpop.f32.mrf.mxu3 }
 0x9a1   : > { %v5606_v29 = vadd.f32 %v5603_v39, %v5560_v62 }
 0x9a3   : > { %v5649_v2 = vpop.f32.mrf.mxu0 }
 0x9a4   : > { %v5652_v48 = vadd.f32 %v5649_v2, %v5606_v29 }
 0x9a5   : > { %v5695_v60 = vpop.f32.mrf.mxu1 }
 0x9a6   : > { %v5698_v61 = vadd.f32 %v5695_v60, %v5652_v48 }
 0x9a7   : > { %v5741_v20 = vpop.f32.mrf.mxu2 }
 0x9a8   : > { %v5744_v54 = vadd.f32 %v5741_v20, %v5698_v61 }
 0x9a9   : > { %v5787_v57 = vpop.f32.mrf.mxu3 }
 0x9aa   : > { %v5790_v55 = vadd.f32 %v5787_v57, %v5744_v54 }
 0x9bd   : > { %v5833_v19 = vpop.f32.mrf.mxu0 }
 0x9be   : > { %v5836_v43 = vadd.f32 %v5833_v19, %v5790_v55 }
 0x9c0   : > { %v5841_v59 = vadd.f32 %v7615_v58, %v5836_v43 }
 0x9c2   : > { %v5842_v47 = vmax.f32 %v5841_v59, 0.0 }
 0x9c4   : > { %5879 = vmatmul.f32.vlgmr.msra.gmra.mxu1 %v5842_v47 }
 0xa41   : > { %v5880_v53 = vpop.f32.mrf.mxu1 }
 0xa42   : > { %v5881_v42 = vadd.f32 %v7616_v63, %v5880_v53 }
 0xa44   : > { %5883 = vst [vmem:[%s11315_s14] sm:$0xff] %v5881_v42 }
 0xa45   : > { %7644 = shalt.err (!%p7641_p11)
}
 0xa46   : > { %7527 = dma.vmem_to_hbm [thread:$0]  (%p7828_p5), %s5898_s30, 128, %s5900_s24, %s5885_s2  }
 0xa47 PF: > { %p7533_p12 = scmp.ge.s32.totalorder %s7703_s20, 2  ;;  %s5911_s1 = sand.u32 1, %s7691_s17  }
 0xa48   : > { %s5912_s12 = scalar_lea.sflag [#allocation8], %s5911_s1 }
 0xa49   : > { %p7530_p13 = pnand %p7533_p12, %p7832_p6 }
 0xa4b   : > { %p7531_p0 = pneg %p7530_p13 }
 0xa4d   : > { %7686 = dma.done.wait (%p7531_p0), %s5912_s12, 128  }
 0xa4e   : > { %7688 = vsyncadd (%p7531_p0), %s5912_s12, 4294967168  ;;  %p21_p1 = scmp.ge.s32.totalorder %s7815_s23, 4   ;;  %s11317_s17 = smov %s7695_s18 }
 0xa4f   : > { %s11318_s18 = smov %s7699_s19  ;;  %s11319_s19 = smov %s7826_s26 }
 0xa50   : > { %s11320_s20 = smov %s7815_s23  ;;  %23 = sbr.rel (!%p21_p1) target bundleno = 8 (0x8), region = 406 }
 0xa55   :  { %5918 = vsyncpa [#allocation8], 1 }
 0xa56   :  { %5920 = vsyncpa [#allocation8 + $0x1], 1 }

</bundles_post_ra>
